<compile_context>
chip_gen: v5e
topology: v5e:2x2
jax: 0.10.0
libtpu: 0.0.40
codegen_flags: <defaults>
</compile_context>

<pallas_src>
import math
import functools

import jax
import jax.numpy as jnp
from jax import lax
from jax.experimental import pallas as pl
from jax.experimental.pallas import tpu as pltpu


_LN_EPS = 1e-5                       # torch.nn.LayerNorm default
# Matmul-operand dtype only. LN stats / softmax / accumulation / residuals remain f32.
# Set to jnp.float32 to reproduce the reference within 3e-2 max-abs.
MATMUL_DTYPE = jnp.bfloat16


# ---------------------------------------------------------------------------
# In-kernel helpers
# ---------------------------------------------------------------------------

def _layernorm(x, g, b):
    """LayerNorm over the last dim. x: (N, D) f32; g/b: (1, D) f32."""
    mean = jnp.mean(x, axis=-1, keepdims=True)
    var = jnp.mean(jnp.square(x - mean), axis=-1, keepdims=True)
    return (x - mean) * lax.rsqrt(var + _LN_EPS) * g + b


def _mdot(a, b):
    """MXU matmul: operands cast to MATMUL_DTYPE, f32 accumulation."""
    return jnp.dot(a.astype(MATMUL_DTYPE), b.astype(MATMUL_DTYPE),
                   preferred_element_type=jnp.float32)


def _gelu_tanh(g):
    """tanh-approximate GELU (EUP tanh slot instead of the erf VPU polynomial)."""
    c = math.sqrt(2.0 / math.pi)
    return 0.5 * g * (1.0 + jnp.tanh(c * (g + 0.044715 * g * g * g)))


def _multi_head_attention(q, k, v, num_heads, head_dim):
    """q, k, v: (N, inner) f32 — softmax scale already folded into q.
    Returns (N, inner) f32. All heads of one batch element per grid step."""
    outs = []
    for h in range(num_heads):                      # static, small head count
        sl = slice(h * head_dim, (h + 1) * head_dim)
        qh = q[:, sl].astype(MATMUL_DTYPE)
        kh = k[:, sl].astype(MATMUL_DTYPE)
        vh = v[:, sl].astype(MATMUL_DTYPE)
        s = lax.dot_general(qh, kh, (((1,), (1,)), ((), ())),
                            preferred_element_type=jnp.float32)          # (N, N) f32
        s = s - jnp.max(s, axis=-1, keepdims=True)
        p = jnp.exp(s)
        denom = jnp.sum(p, axis=-1, keepdims=True)
        oh = jnp.dot(p.astype(MATMUL_DTYPE), vh,
                     preferred_element_type=jnp.float32)                 # (N, Dh)
        outs.append(oh * pl.reciprocal(denom, approx=True))              # EUP recip
    return jnp.concatenate(outs, axis=-1)                                # (N, inner)


# ---------------------------------------------------------------------------
# Fully fused kernel: one grid step == one batch element, everything in VMEM
# ---------------------------------------------------------------------------

def _fused_block_kernel(x_ref, ctx_ref, ln1_ref, vq_ref, b1_ref,
                        wqkv1_ref, wo1_ref, wq2_ref, wkv2_ref, wo2_ref,
                        w1_ref, w2_ref, o_ref, *, num_heads, head_dim):
    inner = num_heads * head_dim

    xv = x_ref[0].astype(jnp.float32)                # (N, C)
    ctx = ctx_ref[0].astype(jnp.float32)             # (N, 64)

    ln1 = ln1_ref[...]                               # (2, C)
    vq = vq_ref[...]                                 # (8, Q) packed Q-length vectors
    ln1g, ln1b = ln1[0:1], ln1[1:2]
    ln2g, ln2b = vq[0:1], vq[1:2]
    ln3g, ln3b = vq[2:3], vq[3:4]
    bo1, bo2, b2 = vq[4:5], vq[5:6], vq[6:7]
    b1 = b1_ref[...]                                 # (1, 2*mlp)

    # ---- LN1 + lane-concat with context -> the residual stream -------------
    xcat = jnp.concatenate([_layernorm(xv, ln1g, ln1b), ctx], axis=-1)   # (N, Q)

    # ---- attn1: self-attention on LN2(xcat) ---------------------------------
    h = _layernorm(xcat, ln2g, ln2b)
    qkv = _mdot(h, wqkv1_ref[...])                                       # (N, 3*inner)
    attn = _multi_head_attention(qkv[:, :inner], qkv[:, inner:2 * inner],
                                 qkv[:, 2 * inner:], num_heads, head_dim)
    x1 = _mdot(attn, wo1_ref[...]) + bo1 + xcat                          # residual

    # ---- attn2: q from LN2(x1), k/v from raw x1 ------------------------------
    h = _layernorm(x1, ln2g, ln2b)
    q = _mdot(h, wq2_ref[...])                                           # scale folded
    kv = _mdot(x1, wkv2_ref[...])                                        # (N, 2*inner)
    attn = _multi_head_attention(q, kv[:, :inner], kv[:, inner:],
                                 num_heads, head_dim)
    x2 = _mdot(attn, wo2_ref[...]) + bo2 + x1                            # residual

    # ---- GEGLU FFN -----------------------------------------------------------
    h = _layernorm(x2, ln3g, ln3b)
    y = _mdot(h, w1_ref[...]) + b1                                       # (N, 2*mlp)
    half = y.shape[-1] // 2
    ff = y[:, :half] * _gelu_tanh(y[:, half:])
    out = _mdot(ff, w2_ref[...]) + b2 + x2                               # residual

    o_ref[0] = out.astype(o_ref.dtype)


# ---------------------------------------------------------------------------
# One-time parameter prep (hoisted out of the jitted forward)
# ---------------------------------------------------------------------------

def prepare_params(params, *, num_heads, head_dim, matmul_dtype=MATMUL_DTYPE):
    """Fuse / fold / pack weights once. Call OUTSIDE the jitted forward."""
    scale = 1.0 / math.sqrt(head_dim)
    a1, a2 = params['attn1'], params['attn2']

    # Fused projection weights; softmax scale folded into the Q columns (free).
    wqkv1 = jnp.concatenate([a1['wq'] * scale, a1['wk'], a1['wv']],
                            axis=1).astype(matmul_dtype)
    wo1 = a1['wo'].astype(matmul_dtype)
    wq2 = (a2['wq'] * scale).astype(matmul_dtype)
    wkv2 = jnp.concatenate([a2['wk'], a2['wv']], axis=1).astype(matmul_dtype)
    wo2 = a2['wo'].astype(matmul_dtype)
    w1 = params['ff_w1'].astype(matmul_dtype)
    w2 = params['ff_w2'].astype(matmul_dtype)

    # Pack the small vectors: ln1 (C-length), all Q-length vectors, and ff_b1.
    Q = params['ln2_g'].shape[0]
    ln1 = jnp.stack([params['ln1_g'], params['ln1_b']]).astype(jnp.float32)   # (2, C)
    vq = jnp.stack([params['ln2_g'], params['ln2_b'],
                    params['ln3_g'], params['ln3_b'],
                    a1['wo_b'], a2['wo_b'], params['ff_b2'],
                    jnp.zeros((Q,), jnp.float32)]).astype(jnp.float32)        # (8, Q)
    b1 = params['ff_b1'].reshape(1, -1).astype(jnp.float32)                   # (1, 2*mlp)

    return dict(wqkv1=wqkv1, wo1=wo1, wq2=wq2, wkv2=wkv2, wo2=wo2,
                w1=w1, w2=w2, ln1=ln1, vq=vq, b1=b1)


# ---------------------------------------------------------------------------
# Wrapper: BasicTransformerBlock forward == 1 pallas_call
# ---------------------------------------------------------------------------

def basic_transformer_block(prep, x, context, *, num_heads, head_dim):
    B, N, C = x.shape
    Cc = context.shape[-1]
    assert Cc == 64, "BasicTransformerBlock requires a 64-channel context"
    Q = C + Cc
    dt = x.dtype

    def wspec(a):                                   # full-array resident block
        nd = a.ndim
        return pl.BlockSpec(a.shape, lambda i, _nd=nd: (0,) * _nd)

    def bspec(d):                                   # per-batch (1, N, d) block
        return pl.BlockSpec((1, N, d), lambda i: (i, 0, 0))

    kernel = functools.partial(_fused_block_kernel,
                               num_heads=num_heads, head_dim=head_dim)

    return pl.pallas_call(
        kernel,
        out_shape=jax.ShapeDtypeStruct((B, N, Q), dt),
        grid=(B,),
        in_specs=[bspec(C), bspec(Cc),
                  wspec(prep['ln1']), wspec(prep['vq']), wspec(prep['b1']),
                  wspec(prep['wqkv1']), wspec(prep['wo1']),
                  wspec(prep['wq2']), wspec(prep['wkv2']), wspec(prep['wo2']),
                  wspec(prep['w1']), wspec(prep['w2'])],
        out_specs=bspec(Q),
        compiler_params=pltpu.CompilerParams(dimension_semantics=("parallel",)),
    )(x, context, prep['ln1'], prep['vq'], prep['b1'],
      prep['wqkv1'], prep['wo1'], prep['wq2'], prep['wkv2'], prep['wo2'],
      prep['w1'], prep['w2'])


# ---------------------------------------------------------------------------
# Pure-JAX reference (mirrors the PyTorch forward, HIGHEST precision)
# ---------------------------------------------------------------------------

def ref_basic_transformer_block(params, x, context, *, num_heads, head_dim):
    P = lax.Precision.HIGHEST

    def ln(v, g, b):
        v = v.astype(jnp.float32)
        m = v.mean(-1, keepdims=True)
        var = jnp.square(v - m).mean(-1, keepdims=True)
        return (v - m) * lax.rsqrt(var + _LN_EPS) * g + b

    def cross_attention(p, xq, xkv):
        B, Nq, _ = xq.shape
        Nk = xkv.shape[1]
        inner = num_heads * head_dim
        q = jnp.dot(xq, p['wq'], precision=P)
        k = jnp.dot(xkv, p['wk'], precision=P)
        v = jnp.dot(xkv, p['wv'], precision=P)

        def split(t, n):
            return t.reshape(B, n, num_heads, head_dim).transpose(0, 2, 1, 3)

        qh, kh, vh = split(q, Nq), split(k, Nk), split(v, Nk)
        s = jnp.einsum('bhqd,bhkd->bhqk', qh, kh, precision=P) / math.sqrt(head_dim)
        s = s - s.max(-1, keepdims=True)
        pr = jnp.exp(s)
        pr = pr / pr.sum(-1, keepdims=True)
        o = jnp.einsum('bhqk,bhkd->bhqd', pr, vh, precision=P)
        o = o.transpose(0, 2, 1, 3).reshape(B, Nq, inner)
        return jnp.dot(o, p['wo'], precision=P) + p['wo_b']

    xcat = jnp.concatenate([ln(x, params['ln1_g'], params['ln1_b']), context], axis=-1)
    h = ln(xcat, params['ln2_g'], params['ln2_b'])
    x1 = cross_attention(params['attn1'], h, h) + xcat
    h = ln(x1, params['ln2_g'], params['ln2_b'])
    x2 = cross_attention(params['attn2'], h, x1) + x1
    h = ln(x2, params['ln3_g'], params['ln3_b'])
    y = jnp.dot(h, params['ff_w1'], precision=P) + params['ff_b1']
    a, g = jnp.split(y, 2, axis=-1)
    ff = a * (0.5 * g * (1.0 + lax.erf(g * (1.0 / math.sqrt(2.0)))))     # exact GELU
    return jnp.dot(ff, params['ff_w2'], precision=P) + params['ff_b2'] + x2


# ---------------------------------------------------------------------------
# Deterministic synthetic parameters
# ---------------------------------------------------------------------------

def init_params(key, num_channels, num_heads, head_dim):
    C = num_channels
    Q = C + 64
    inner = num_heads * head_dim
    mlp = C * 4
    k_it = iter(jax.random.split(key, 32))

    def dense(shape):
        return jax.random.normal(next(k_it), shape, jnp.float32) / math.sqrt(shape[0])

    def vec(n, base=0.0, scale=0.05):
        return base + scale * jax.random.normal(next(k_it), (n,), jnp.float32)

    def attn():
        return dict(wq=dense((Q, inner)), wk=dense((Q, inner)), wv=dense((Q, inner)),
                    wo=dense((inner, Q)), wo_b=vec(Q))

    return dict(
        ln1_g=vec(C, 1.0), ln1_b=vec(C),
        ln2_g=vec(Q, 1.0), ln2_b=vec(Q),
        ln3_g=vec(Q, 1.0), ln3_b=vec(Q),
        attn1=attn(), attn2=attn(),
        ff_w1=dense((Q, 2 * mlp)), ff_b1=vec(2 * mlp),
        ff_w2=dense((mlp, Q)), ff_b2=vec(Q),
    )


# ---------------------------------------------------------------------------
# Demo
# ---------------------------------------------------------------------------

if __name__ == "__main__":
    B, N, C = 2, 128, 64                 # num_channels=64 -> query_dim = C+64 = 128 (lane-dense)
    NUM_HEADS, HEAD_DIM = 4, 32          # inner_dim = 128 (lane-dense)

    root = jax.random.PRNGKey(0)
    k_x, k_c, k_p = jax.random.split(root, 3)
    x = jax.random.normal(k_x, (B, N, C), jnp.float32)
    context = jax.random.normal(k_c, (B, N, 64), jnp.float32)
    params = init_params(k_p, C, NUM_HEADS, HEAD_DIM)

    # One-time weight fusion / packing (hoisted out of the per-step forward).
    prep = jax.tree_util.tree_map(jax.block_until_ready,
                                  prepare_params(params, num_heads=NUM_HEADS,
                                                 head_dim=HEAD_DIM))

    fwd = jax.jit(functools.partial(basic_transformer_block,
                                    num_heads=NUM_HEADS, head_dim=HEAD_DIM))
    out = jax.block_until_ready(fwd(prep, x, context))
    assert out.shape == (B, N, C + 64) and out.dtype == x.dtype

    ref_fwd = jax.jit(functools.partial(ref_basic_transformer_block,
                                        num_heads=NUM_HEADS, head_dim=HEAD_DIM))
    ref = jax.block_until_ready(ref_fwd(params, x, context))

    err = float(jnp.max(jnp.abs(out - ref)))
    # Tolerance vs the HIGHEST-precision f32 reference:
    #   full-f32 matmul operands meet 3e-2; bf16 operands (f32 accumulation) get a
    #   widened bound to absorb rounding through the 3 residual sub-layers.
    tol = 3e-2 if MATMUL_DTYPE == jnp.float32 else 1e-1
    if not math.isfinite(err) or err > tol:
        raise AssertionError(f"Pallas output mismatch vs JAX reference: max abs err {err}")
    print("KERNEL_OK")
</pallas_src>

<mosaic_0001>
module attributes {stable_mosaic.version = 11 : i64} {
  func.func @_fused_block_kernel(%arg0: i32, %arg1: memref<1x128x64xf32, #tpu.memory_space<vmem>>, %arg2: memref<1x128x64xf32, #tpu.memory_space<vmem>>, %arg3: memref<2x64xf32, #tpu.memory_space<vmem>>, %arg4: memref<8x128xf32, #tpu.memory_space<vmem>>, %arg5: memref<1x512xf32, #tpu.memory_space<vmem>>, %arg6: memref<128x384xbf16, #tpu.memory_space<vmem>>, %arg7: memref<128x128xbf16, #tpu.memory_space<vmem>>, %arg8: memref<128x128xbf16, #tpu.memory_space<vmem>>, %arg9: memref<128x256xbf16, #tpu.memory_space<vmem>>, %arg10: memref<128x128xbf16, #tpu.memory_space<vmem>>, %arg11: memref<128x512xbf16, #tpu.memory_space<vmem>>, %arg12: memref<256x128xbf16, #tpu.memory_space<vmem>>, %arg13: memref<1x128x128xf32, #tpu.memory_space<vmem>>) attributes {dimension_semantics = [#tpu.dimension_semantics<parallel>], iteration_bounds = array<i64: 2>, scalar_prefetch = 0 : i64, scratch_operands = 0 : i64, tpu.core_type = #tpu.core_type<tc>, window_params = [{transform_indices = @transform_0, window_bounds = array<i64: 1, 128, 64>}, {transform_indices = @transform_1, window_bounds = array<i64: 1, 128, 64>}, {pipeline_mode = #tpu.pipeline_mode<synchronous>, transform_indices = @transform_2, window_bounds = array<i64: 2, 64>}, {pipeline_mode = #tpu.pipeline_mode<synchronous>, transform_indices = @transform_3, window_bounds = array<i64: 8, 128>}, {pipeline_mode = #tpu.pipeline_mode<synchronous>, transform_indices = @transform_4, window_bounds = array<i64: 1, 512>}, {pipeline_mode = #tpu.pipeline_mode<synchronous>, transform_indices = @transform_5, window_bounds = array<i64: 128, 384>}, {pipeline_mode = #tpu.pipeline_mode<synchronous>, transform_indices = @transform_6, window_bounds = array<i64: 128, 128>}, {pipeline_mode = #tpu.pipeline_mode<synchronous>, transform_indices = @transform_7, window_bounds = array<i64: 128, 128>}, {pipeline_mode = #tpu.pipeline_mode<synchronous>, transform_indices = @transform_8, window_bounds = array<i64: 128, 256>}, {pipeline_mode = #tpu.pipeline_mode<synchronous>, transform_indices = @transform_9, window_bounds = array<i64: 128, 128>}, {pipeline_mode = #tpu.pipeline_mode<synchronous>, transform_indices = @transform_10, window_bounds = array<i64: 128, 512>}, {pipeline_mode = #tpu.pipeline_mode<synchronous>, transform_indices = @transform_11, window_bounds = array<i64: 256, 128>}, {transform_indices = @transform_12, window_bounds = array<i64: 1, 128, 128>}]} {
    %c0 = arith.constant 0 : index
    %c0_0 = arith.constant 0 : index
    %c0_1 = arith.constant 0 : index
    %0 = vector.load %arg1[%c0, %c0_0, %c0_1] : memref<1x128x64xf32, #tpu.memory_space<vmem>>, vector<1x128x64xf32>
    %1 = vector.shape_cast %0 : vector<1x128x64xf32> to vector<128x64xf32>
    %c0_2 = arith.constant 0 : index
    %c0_3 = arith.constant 0 : index
    %c0_4 = arith.constant 0 : index
    %2 = vector.load %arg2[%c0_2, %c0_3, %c0_4] : memref<1x128x64xf32, #tpu.memory_space<vmem>>, vector<1x128x64xf32>
    %3 = vector.shape_cast %2 : vector<1x128x64xf32> to vector<128x64xf32>
    %c0_5 = arith.constant 0 : index
    %c0_6 = arith.constant 0 : index
    %4 = vector.load %arg3[%c0_5, %c0_6] : memref<2x64xf32, #tpu.memory_space<vmem>>, vector<2x64xf32>
    %c0_7 = arith.constant 0 : index
    %c0_8 = arith.constant 0 : index
    %5 = vector.load %arg4[%c0_7, %c0_8] : memref<8x128xf32, #tpu.memory_space<vmem>>, vector<8x128xf32>
    %6 = vector.extract_strided_slice %4 {offsets = [0, 0], sizes = [1, 64], strides = [1, 1]} : vector<2x64xf32> to vector<1x64xf32>
    %7 = vector.extract_strided_slice %4 {offsets = [1, 0], sizes = [1, 64], strides = [1, 1]} : vector<2x64xf32> to vector<1x64xf32>
    %8 = vector.extract_strided_slice %5 {offsets = [0, 0], sizes = [1, 128], strides = [1, 1]} : vector<8x128xf32> to vector<1x128xf32>
    %9 = vector.extract_strided_slice %5 {offsets = [1, 0], sizes = [1, 128], strides = [1, 1]} : vector<8x128xf32> to vector<1x128xf32>
    %10 = vector.extract_strided_slice %5 {offsets = [2, 0], sizes = [1, 128], strides = [1, 1]} : vector<8x128xf32> to vector<1x128xf32>
    %11 = vector.extract_strided_slice %5 {offsets = [3, 0], sizes = [1, 128], strides = [1, 1]} : vector<8x128xf32> to vector<1x128xf32>
    %12 = vector.extract_strided_slice %5 {offsets = [4, 0], sizes = [1, 128], strides = [1, 1]} : vector<8x128xf32> to vector<1x128xf32>
    %13 = vector.extract_strided_slice %5 {offsets = [5, 0], sizes = [1, 128], strides = [1, 1]} : vector<8x128xf32> to vector<1x128xf32>
    %14 = vector.extract_strided_slice %5 {offsets = [6, 0], sizes = [1, 128], strides = [1, 1]} : vector<8x128xf32> to vector<1x128xf32>
    %c0_9 = arith.constant 0 : index
    %c0_10 = arith.constant 0 : index
    %15 = vector.load %arg5[%c0_9, %c0_10] : memref<1x512xf32, #tpu.memory_space<vmem>>, vector<1x512xf32>
    %cst = arith.constant dense<0.000000e+00> : vector<128xf32>
    %16 = vector.multi_reduction <add>, %1, %cst [1] : vector<128x64xf32> to vector<128xf32>
    %17 = vector.shape_cast %16 : vector<128xf32> to vector<128x1xf32>
    %cst_11 = arith.constant 6.400000e+01 : f32
    %18 = vector.broadcast %cst_11 : f32 to vector<128x1xf32>
    %19 = arith.divf %17, %18 : vector<128x1xf32>
    %20 = vector.broadcast %19 : vector<128x1xf32> to vector<128x64xf32>
    %21 = arith.subf %1, %20 : vector<128x64xf32>
    %22 = arith.mulf %21, %21 : vector<128x64xf32>
    %cst_12 = arith.constant dense<0.000000e+00> : vector<128xf32>
    %23 = vector.multi_reduction <add>, %22, %cst_12 [1] : vector<128x64xf32> to vector<128xf32>
    %24 = vector.shape_cast %23 : vector<128xf32> to vector<128x1xf32>
    %cst_13 = arith.constant 6.400000e+01 : f32
    %25 = vector.broadcast %cst_13 : f32 to vector<128x1xf32>
    %26 = arith.divf %24, %25 : vector<128x1xf32>
    %27 = vector.broadcast %19 : vector<128x1xf32> to vector<128x64xf32>
    %28 = arith.subf %1, %27 : vector<128x64xf32>
    %cst_14 = arith.constant 9.99999974E-6 : f32
    %29 = vector.broadcast %cst_14 : f32 to vector<128x1xf32>
    %30 = arith.addf %26, %29 : vector<128x1xf32>
    %31 = math.rsqrt %30 : vector<128x1xf32>
    %32 = vector.broadcast %31 : vector<128x1xf32> to vector<128x64xf32>
    %33 = arith.mulf %28, %32 : vector<128x64xf32>
    %34 = vector.broadcast %6 : vector<1x64xf32> to vector<128x64xf32>
    %35 = arith.mulf %33, %34 : vector<128x64xf32>
    %36 = vector.broadcast %7 : vector<1x64xf32> to vector<128x64xf32>
    %37 = arith.addf %35, %36 : vector<128x64xf32>
    %38 = tpu.concatenate %37, %3 in 1 : vector<128x64xf32>, vector<128x64xf32> -> vector<128x128xf32>
    %cst_15 = arith.constant dense<0.000000e+00> : vector<128xf32>
    %39 = vector.multi_reduction <add>, %38, %cst_15 [1] : vector<128x128xf32> to vector<128xf32>
    %40 = vector.shape_cast %39 : vector<128xf32> to vector<128x1xf32>
    %cst_16 = arith.constant 1.280000e+02 : f32
    %41 = vector.broadcast %cst_16 : f32 to vector<128x1xf32>
    %42 = arith.divf %40, %41 : vector<128x1xf32>
    %43 = vector.broadcast %42 : vector<128x1xf32> to vector<128x128xf32>
    %44 = arith.subf %38, %43 : vector<128x128xf32>
    %45 = arith.mulf %44, %44 : vector<128x128xf32>
    %cst_17 = arith.constant dense<0.000000e+00> : vector<128xf32>
    %46 = vector.multi_reduction <add>, %45, %cst_17 [1] : vector<128x128xf32> to vector<128xf32>
    %47 = vector.shape_cast %46 : vector<128xf32> to vector<128x1xf32>
    %cst_18 = arith.constant 1.280000e+02 : f32
    %48 = vector.broadcast %cst_18 : f32 to vector<128x1xf32>
    %49 = arith.divf %47, %48 : vector<128x1xf32>
    %50 = vector.broadcast %42 : vector<128x1xf32> to vector<128x128xf32>
    %51 = arith.subf %38, %50 : vector<128x128xf32>
    %cst_19 = arith.constant 9.99999974E-6 : f32
    %52 = vector.broadcast %cst_19 : f32 to vector<128x1xf32>
    %53 = arith.addf %49, %52 : vector<128x1xf32>
    %54 = math.rsqrt %53 : vector<128x1xf32>
    %55 = vector.broadcast %54 : vector<128x1xf32> to vector<128x128xf32>
    %56 = arith.mulf %51, %55 : vector<128x128xf32>
    %57 = vector.broadcast %8 : vector<1x128xf32> to vector<128x128xf32>
    %58 = arith.mulf %56, %57 : vector<128x128xf32>
    %59 = vector.broadcast %9 : vector<1x128xf32> to vector<128x128xf32>
    %60 = arith.addf %58, %59 : vector<128x128xf32>
    %c0_20 = arith.constant 0 : index
    %c0_21 = arith.constant 0 : index
    %61 = vector.load %arg6[%c0_20, %c0_21] : memref<128x384xbf16, #tpu.memory_space<vmem>>, vector<128x384xbf16>
    %62 = arith.truncf %60 : vector<128x128xf32> to vector<128x128xbf16>
    %cst_22 = arith.constant dense<0.000000e+00> : vector<128x384xf32>
    %63 = tpu.matmul %62, %61, %cst_22 {dimension_numbers = #tpu.dot_dimension_numbers<[1], [0], [0], [1], [0, 0, 1, 1], [], []>} : vector<128x128xbf16>, vector<128x384xbf16>, vector<128x384xf32> -> vector<128x384xf32>
    %64 = vector.extract_strided_slice %63 {offsets = [0, 0], sizes = [128, 128], strides = [1, 1]} : vector<128x384xf32> to vector<128x128xf32>
    %65 = vector.extract_strided_slice %63 {offsets = [0, 128], sizes = [128, 128], strides = [1, 1]} : vector<128x384xf32> to vector<128x128xf32>
    %66 = vector.extract_strided_slice %63 {offsets = [0, 256], sizes = [128, 128], strides = [1, 1]} : vector<128x384xf32> to vector<128x128xf32>
    %67 = vector.extract_strided_slice %64 {offsets = [0, 0], sizes = [128, 32], strides = [1, 1]} : vector<128x128xf32> to vector<128x32xf32>
    %68 = arith.truncf %67 : vector<128x32xf32> to vector<128x32xbf16>
    %69 = vector.extract_strided_slice %65 {offsets = [0, 0], sizes = [128, 32], strides = [1, 1]} : vector<128x128xf32> to vector<128x32xf32>
    %70 = arith.truncf %69 : vector<128x32xf32> to vector<128x32xbf16>
    %71 = vector.extract_strided_slice %66 {offsets = [0, 0], sizes = [128, 32], strides = [1, 1]} : vector<128x128xf32> to vector<128x32xf32>
    %72 = arith.truncf %71 : vector<128x32xf32> to vector<128x32xbf16>
    %cst_23 = arith.constant dense<0.000000e+00> : vector<128x128xf32>
    %73 = tpu.matmul %68, %70, %cst_23 {dimension_numbers = #tpu.dot_dimension_numbers<[1], [1], [0], [0], [0, 0, 1, 0], [], []>} : vector<128x32xbf16>, vector<128x32xbf16>, vector<128x128xf32> -> vector<128x128xf32>
    %cst_24 = arith.constant dense<0xFF800000> : vector<128xf32>
    %74 = vector.multi_reduction <maximumf>, %73, %cst_24 [1] : vector<128x128xf32> to vector<128xf32>
    %75 = vector.shape_cast %74 : vector<128xf32> to vector<128x1xf32>
    %76 = vector.broadcast %75 : vector<128x1xf32> to vector<128x128xf32>
    %77 = arith.subf %73, %76 : vector<128x128xf32>
    %78 = math.exp %77 : vector<128x128xf32>
    %cst_25 = arith.constant dense<0.000000e+00> : vector<128xf32>
    %79 = vector.multi_reduction <add>, %78, %cst_25 [1] : vector<128x128xf32> to vector<128xf32>
    %80 = vector.shape_cast %79 : vector<128xf32> to vector<128x1xf32>
    %81 = arith.truncf %78 : vector<128x128xf32> to vector<128x128xbf16>
    %cst_26 = arith.constant dense<0.000000e+00> : vector<128x32xf32>
    %82 = tpu.matmul %81, %72, %cst_26 {dimension_numbers = #tpu.dot_dimension_numbers<[1], [0], [0], [1], [0, 0, 1, 1], [], []>} : vector<128x128xbf16>, vector<128x32xbf16>, vector<128x32xf32> -> vector<128x32xf32>
    %83 = tpu.reciprocal %80 {approx = true} : vector<128x1xf32> -> vector<128x1xf32>
    %84 = vector.broadcast %83 : vector<128x1xf32> to vector<128x32xf32>
    %85 = arith.mulf %82, %84 : vector<128x32xf32>
    %86 = vector.extract_strided_slice %64 {offsets = [0, 32], sizes = [128, 32], strides = [1, 1]} : vector<128x128xf32> to vector<128x32xf32>
    %87 = arith.truncf %86 : vector<128x32xf32> to vector<128x32xbf16>
    %88 = vector.extract_strided_slice %65 {offsets = [0, 32], sizes = [128, 32], strides = [1, 1]} : vector<128x128xf32> to vector<128x32xf32>
    %89 = arith.truncf %88 : vector<128x32xf32> to vector<128x32xbf16>
    %90 = vector.extract_strided_slice %66 {offsets = [0, 32], sizes = [128, 32], strides = [1, 1]} : vector<128x128xf32> to vector<128x32xf32>
    %91 = arith.truncf %90 : vector<128x32xf32> to vector<128x32xbf16>
    %cst_27 = arith.constant dense<0.000000e+00> : vector<128x128xf32>
    %92 = tpu.matmul %87, %89, %cst_27 {dimension_numbers = #tpu.dot_dimension_numbers<[1], [1], [0], [0], [0, 0, 1, 0], [], []>} : vector<128x32xbf16>, vector<128x32xbf16>, vector<128x128xf32> -> vector<128x128xf32>
    %cst_28 = arith.constant dense<0xFF800000> : vector<128xf32>
    %93 = vector.multi_reduction <maximumf>, %92, %cst_28 [1] : vector<128x128xf32> to vector<128xf32>
    %94 = vector.shape_cast %93 : vector<128xf32> to vector<128x1xf32>
    %95 = vector.broadcast %94 : vector<128x1xf32> to vector<128x128xf32>
    %96 = arith.subf %92, %95 : vector<128x128xf32>
    %97 = math.exp %96 : vector<128x128xf32>
    %cst_29 = arith.constant dense<0.000000e+00> : vector<128xf32>
    %98 = vector.multi_reduction <add>, %97, %cst_29 [1] : vector<128x128xf32> to vector<128xf32>
    %99 = vector.shape_cast %98 : vector<128xf32> to vector<128x1xf32>
    %100 = arith.truncf %97 : vector<128x128xf32> to vector<128x128xbf16>
    %cst_30 = arith.constant dense<0.000000e+00> : vector<128x32xf32>
    %101 = tpu.matmul %100, %91, %cst_30 {dimension_numbers = #tpu.dot_dimension_numbers<[1], [0], [0], [1], [0, 0, 1, 1], [], []>} : vector<128x128xbf16>, vector<128x32xbf16>, vector<128x32xf32> -> vector<128x32xf32>
    %102 = tpu.reciprocal %99 {approx = true} : vector<128x1xf32> -> vector<128x1xf32>
    %103 = vector.broadcast %102 : vector<128x1xf32> to vector<128x32xf32>
    %104 = arith.mulf %101, %103 : vector<128x32xf32>
    %105 = vector.extract_strided_slice %64 {offsets = [0, 64], sizes = [128, 32], strides = [1, 1]} : vector<128x128xf32> to vector<128x32xf32>
    %106 = arith.truncf %105 : vector<128x32xf32> to vector<128x32xbf16>
    %107 = vector.extract_strided_slice %65 {offsets = [0, 64], sizes = [128, 32], strides = [1, 1]} : vector<128x128xf32> to vector<128x32xf32>
    %108 = arith.truncf %107 : vector<128x32xf32> to vector<128x32xbf16>
    %109 = vector.extract_strided_slice %66 {offsets = [0, 64], sizes = [128, 32], strides = [1, 1]} : vector<128x128xf32> to vector<128x32xf32>
    %110 = arith.truncf %109 : vector<128x32xf32> to vector<128x32xbf16>
    %cst_31 = arith.constant dense<0.000000e+00> : vector<128x128xf32>
    %111 = tpu.matmul %106, %108, %cst_31 {dimension_numbers = #tpu.dot_dimension_numbers<[1], [1], [0], [0], [0, 0, 1, 0], [], []>} : vector<128x32xbf16>, vector<128x32xbf16>, vector<128x128xf32> -> vector<128x128xf32>
    %cst_32 = arith.constant dense<0xFF800000> : vector<128xf32>
    %112 = vector.multi_reduction <maximumf>, %111, %cst_32 [1] : vector<128x128xf32> to vector<128xf32>
    %113 = vector.shape_cast %112 : vector<128xf32> to vector<128x1xf32>
    %114 = vector.broadcast %113 : vector<128x1xf32> to vector<128x128xf32>
    %115 = arith.subf %111, %114 : vector<128x128xf32>
    %116 = math.exp %115 : vector<128x128xf32>
    %cst_33 = arith.constant dense<0.000000e+00> : vector<128xf32>
    %117 = vector.multi_reduction <add>, %116, %cst_33 [1] : vector<128x128xf32> to vector<128xf32>
    %118 = vector.shape_cast %117 : vector<128xf32> to vector<128x1xf32>
    %119 = arith.truncf %116 : vector<128x128xf32> to vector<128x128xbf16>
    %cst_34 = arith.constant dense<0.000000e+00> : vector<128x32xf32>
    %120 = tpu.matmul %119, %110, %cst_34 {dimension_numbers = #tpu.dot_dimension_numbers<[1], [0], [0], [1], [0, 0, 1, 1], [], []>} : vector<128x128xbf16>, vector<128x32xbf16>, vector<128x32xf32> -> vector<128x32xf32>
    %121 = tpu.reciprocal %118 {approx = true} : vector<128x1xf32> -> vector<128x1xf32>
    %122 = vector.broadcast %121 : vector<128x1xf32> to vector<128x32xf32>
    %123 = arith.mulf %120, %122 : vector<128x32xf32>
    %124 = vector.extract_strided_slice %64 {offsets = [0, 96], sizes = [128, 32], strides = [1, 1]} : vector<128x128xf32> to vector<128x32xf32>
    %125 = arith.truncf %124 : vector<128x32xf32> to vector<128x32xbf16>
    %126 = vector.extract_strided_slice %65 {offsets = [0, 96], sizes = [128, 32], strides = [1, 1]} : vector<128x128xf32> to vector<128x32xf32>
    %127 = arith.truncf %126 : vector<128x32xf32> to vector<128x32xbf16>
    %128 = vector.extract_strided_slice %66 {offsets = [0, 96], sizes = [128, 32], strides = [1, 1]} : vector<128x128xf32> to vector<128x32xf32>
    %129 = arith.truncf %128 : vector<128x32xf32> to vector<128x32xbf16>
    %cst_35 = arith.constant dense<0.000000e+00> : vector<128x128xf32>
    %130 = tpu.matmul %125, %127, %cst_35 {dimension_numbers = #tpu.dot_dimension_numbers<[1], [1], [0], [0], [0, 0, 1, 0], [], []>} : vector<128x32xbf16>, vector<128x32xbf16>, vector<128x128xf32> -> vector<128x128xf32>
    %cst_36 = arith.constant dense<0xFF800000> : vector<128xf32>
    %131 = vector.multi_reduction <maximumf>, %130, %cst_36 [1] : vector<128x128xf32> to vector<128xf32>
    %132 = vector.shape_cast %131 : vector<128xf32> to vector<128x1xf32>
    %133 = vector.broadcast %132 : vector<128x1xf32> to vector<128x128xf32>
    %134 = arith.subf %130, %133 : vector<128x128xf32>
    %135 = math.exp %134 : vector<128x128xf32>
    %cst_37 = arith.constant dense<0.000000e+00> : vector<128xf32>
    %136 = vector.multi_reduction <add>, %135, %cst_37 [1] : vector<128x128xf32> to vector<128xf32>
    %137 = vector.shape_cast %136 : vector<128xf32> to vector<128x1xf32>
    %138 = arith.truncf %135 : vector<128x128xf32> to vector<128x128xbf16>
    %cst_38 = arith.constant dense<0.000000e+00> : vector<128x32xf32>
    %139 = tpu.matmul %138, %129, %cst_38 {dimension_numbers = #tpu.dot_dimension_numbers<[1], [0], [0], [1], [0, 0, 1, 1], [], []>} : vector<128x128xbf16>, vector<128x32xbf16>, vector<128x32xf32> -> vector<128x32xf32>
    %140 = tpu.reciprocal %137 {approx = true} : vector<128x1xf32> -> vector<128x1xf32>
    %141 = vector.broadcast %140 : vector<128x1xf32> to vector<128x32xf32>
    %142 = arith.mulf %139, %141 : vector<128x32xf32>
    %143 = tpu.concatenate %85, %104, %123, %142 in 1 : vector<128x32xf32>, vector<128x32xf32>, vector<128x32xf32>, vector<128x32xf32> -> vector<128x128xf32>
    %c0_39 = arith.constant 0 : index
    %c0_40 = arith.constant 0 : index
    %144 = vector.load %arg7[%c0_39, %c0_40] : memref<128x128xbf16, #tpu.memory_space<vmem>>, vector<128x128xbf16>
    %145 = arith.truncf %143 : vector<128x128xf32> to vector<128x128xbf16>
    %cst_41 = arith.constant dense<0.000000e+00> : vector<128x128xf32>
    %146 = tpu.matmul %145, %144, %cst_41 {dimension_numbers = #tpu.dot_dimension_numbers<[1], [0], [0], [1], [0, 0, 1, 1], [], []>} : vector<128x128xbf16>, vector<128x128xbf16>, vector<128x128xf32> -> vector<128x128xf32>
    %147 = vector.broadcast %12 : vector<1x128xf32> to vector<128x128xf32>
    %148 = arith.addf %146, %147 : vector<128x128xf32>
    %149 = arith.addf %148, %38 : vector<128x128xf32>
    %cst_42 = arith.constant dense<0.000000e+00> : vector<128xf32>
    %150 = vector.multi_reduction <add>, %149, %cst_42 [1] : vector<128x128xf32> to vector<128xf32>
    %151 = vector.shape_cast %150 : vector<128xf32> to vector<128x1xf32>
    %cst_43 = arith.constant 1.280000e+02 : f32
    %152 = vector.broadcast %cst_43 : f32 to vector<128x1xf32>
    %153 = arith.divf %151, %152 : vector<128x1xf32>
    %154 = vector.broadcast %153 : vector<128x1xf32> to vector<128x128xf32>
    %155 = arith.subf %149, %154 : vector<128x128xf32>
    %156 = arith.mulf %155, %155 : vector<128x128xf32>
    %cst_44 = arith.constant dense<0.000000e+00> : vector<128xf32>
    %157 = vector.multi_reduction <add>, %156, %cst_44 [1] : vector<128x128xf32> to vector<128xf32>
    %158 = vector.shape_cast %157 : vector<128xf32> to vector<128x1xf32>
    %cst_45 = arith.constant 1.280000e+02 : f32
    %159 = vector.broadcast %cst_45 : f32 to vector<128x1xf32>
    %160 = arith.divf %158, %159 : vector<128x1xf32>
    %161 = vector.broadcast %153 : vector<128x1xf32> to vector<128x128xf32>
    %162 = arith.subf %149, %161 : vector<128x128xf32>
    %cst_46 = arith.constant 9.99999974E-6 : f32
    %163 = vector.broadcast %cst_46 : f32 to vector<128x1xf32>
    %164 = arith.addf %160, %163 : vector<128x1xf32>
    %165 = math.rsqrt %164 : vector<128x1xf32>
    %166 = vector.broadcast %165 : vector<128x1xf32> to vector<128x128xf32>
    %167 = arith.mulf %162, %166 : vector<128x128xf32>
    %168 = vector.broadcast %8 : vector<1x128xf32> to vector<128x128xf32>
    %169 = arith.mulf %167, %168 : vector<128x128xf32>
    %170 = vector.broadcast %9 : vector<1x128xf32> to vector<128x128xf32>
    %171 = arith.addf %169, %170 : vector<128x128xf32>
    %c0_47 = arith.constant 0 : index
    %c0_48 = arith.constant 0 : index
    %172 = vector.load %arg8[%c0_47, %c0_48] : memref<128x128xbf16, #tpu.memory_space<vmem>>, vector<128x128xbf16>
    %173 = arith.truncf %171 : vector<128x128xf32> to vector<128x128xbf16>
    %cst_49 = arith.constant dense<0.000000e+00> : vector<128x128xf32>
    %174 = tpu.matmul %173, %172, %cst_49 {dimension_numbers = #tpu.dot_dimension_numbers<[1], [0], [0], [1], [0, 0, 1, 1], [], []>} : vector<128x128xbf16>, vector<128x128xbf16>, vector<128x128xf32> -> vector<128x128xf32>
    %c0_50 = arith.constant 0 : index
    %c0_51 = arith.constant 0 : index
    %175 = vector.load %arg9[%c0_50, %c0_51] : memref<128x256xbf16, #tpu.memory_space<vmem>>, vector<128x256xbf16>
    %176 = arith.truncf %149 : vector<128x128xf32> to vector<128x128xbf16>
    %cst_52 = arith.constant dense<0.000000e+00> : vector<128x256xf32>
    %177 = tpu.matmul %176, %175, %cst_52 {dimension_numbers = #tpu.dot_dimension_numbers<[1], [0], [0], [1], [0, 0, 1, 1], [], []>} : vector<128x128xbf16>, vector<128x256xbf16>, vector<128x256xf32> -> vector<128x256xf32>
    %178 = vector.extract_strided_slice %177 {offsets = [0, 0], sizes = [128, 128], strides = [1, 1]} : vector<128x256xf32> to vector<128x128xf32>
    %179 = vector.extract_strided_slice %177 {offsets = [0, 128], sizes = [128, 128], strides = [1, 1]} : vector<128x256xf32> to vector<128x128xf32>
    %180 = vector.extract_strided_slice %174 {offsets = [0, 0], sizes = [128, 32], strides = [1, 1]} : vector<128x128xf32> to vector<128x32xf32>
    %181 = arith.truncf %180 : vector<128x32xf32> to vector<128x32xbf16>
    %182 = vector.extract_strided_slice %178 {offsets = [0, 0], sizes = [128, 32], strides = [1, 1]} : vector<128x128xf32> to vector<128x32xf32>
    %183 = arith.truncf %182 : vector<128x32xf32> to vector<128x32xbf16>
    %184 = vector.extract_strided_slice %179 {offsets = [0, 0], sizes = [128, 32], strides = [1, 1]} : vector<128x128xf32> to vector<128x32xf32>
    %185 = arith.truncf %184 : vector<128x32xf32> to vector<128x32xbf16>
    %cst_53 = arith.constant dense<0.000000e+00> : vector<128x128xf32>
    %186 = tpu.matmul %181, %183, %cst_53 {dimension_numbers = #tpu.dot_dimension_numbers<[1], [1], [0], [0], [0, 0, 1, 0], [], []>} : vector<128x32xbf16>, vector<128x32xbf16>, vector<128x128xf32> -> vector<128x128xf32>
    %cst_54 = arith.constant dense<0xFF800000> : vector<128xf32>
    %187 = vector.multi_reduction <maximumf>, %186, %cst_54 [1] : vector<128x128xf32> to vector<128xf32>
    %188 = vector.shape_cast %187 : vector<128xf32> to vector<128x1xf32>
    %189 = vector.broadcast %188 : vector<128x1xf32> to vector<128x128xf32>
    %190 = arith.subf %186, %189 : vector<128x128xf32>
    %191 = math.exp %190 : vector<128x128xf32>
    %cst_55 = arith.constant dense<0.000000e+00> : vector<128xf32>
    %192 = vector.multi_reduction <add>, %191, %cst_55 [1] : vector<128x128xf32> to vector<128xf32>
    %193 = vector.shape_cast %192 : vector<128xf32> to vector<128x1xf32>
    %194 = arith.truncf %191 : vector<128x128xf32> to vector<128x128xbf16>
    %cst_56 = arith.constant dense<0.000000e+00> : vector<128x32xf32>
    %195 = tpu.matmul %194, %185, %cst_56 {dimension_numbers = #tpu.dot_dimension_numbers<[1], [0], [0], [1], [0, 0, 1, 1], [], []>} : vector<128x128xbf16>, vector<128x32xbf16>, vector<128x32xf32> -> vector<128x32xf32>
    %196 = tpu.reciprocal %193 {approx = true} : vector<128x1xf32> -> vector<128x1xf32>
    %197 = vector.broadcast %196 : vector<128x1xf32> to vector<128x32xf32>
    %198 = arith.mulf %195, %197 : vector<128x32xf32>
    %199 = vector.extract_strided_slice %174 {offsets = [0, 32], sizes = [128, 32], strides = [1, 1]} : vector<128x128xf32> to vector<128x32xf32>
    %200 = arith.truncf %199 : vector<128x32xf32> to vector<128x32xbf16>
    %201 = vector.extract_strided_slice %178 {offsets = [0, 32], sizes = [128, 32], strides = [1, 1]} : vector<128x128xf32> to vector<128x32xf32>
    %202 = arith.truncf %201 : vector<128x32xf32> to vector<128x32xbf16>
    %203 = vector.extract_strided_slice %179 {offsets = [0, 32], sizes = [128, 32], strides = [1, 1]} : vector<128x128xf32> to vector<128x32xf32>
    %204 = arith.truncf %203 : vector<128x32xf32> to vector<128x32xbf16>
    %cst_57 = arith.constant dense<0.000000e+00> : vector<128x128xf32>
    %205 = tpu.matmul %200, %202, %cst_57 {dimension_numbers = #tpu.dot_dimension_numbers<[1], [1], [0], [0], [0, 0, 1, 0], [], []>} : vector<128x32xbf16>, vector<128x32xbf16>, vector<128x128xf32> -> vector<128x128xf32>
    %cst_58 = arith.constant dense<0xFF800000> : vector<128xf32>
    %206 = vector.multi_reduction <maximumf>, %205, %cst_58 [1] : vector<128x128xf32> to vector<128xf32>
    %207 = vector.shape_cast %206 : vector<128xf32> to vector<128x1xf32>
    %208 = vector.broadcast %207 : vector<128x1xf32> to vector<128x128xf32>
    %209 = arith.subf %205, %208 : vector<128x128xf32>
    %210 = math.exp %209 : vector<128x128xf32>
    %cst_59 = arith.constant dense<0.000000e+00> : vector<128xf32>
    %211 = vector.multi_reduction <add>, %210, %cst_59 [1] : vector<128x128xf32> to vector<128xf32>
    %212 = vector.shape_cast %211 : vector<128xf32> to vector<128x1xf32>
    %213 = arith.truncf %210 : vector<128x128xf32> to vector<128x128xbf16>
    %cst_60 = arith.constant dense<0.000000e+00> : vector<128x32xf32>
    %214 = tpu.matmul %213, %204, %cst_60 {dimension_numbers = #tpu.dot_dimension_numbers<[1], [0], [0], [1], [0, 0, 1, 1], [], []>} : vector<128x128xbf16>, vector<128x32xbf16>, vector<128x32xf32> -> vector<128x32xf32>
    %215 = tpu.reciprocal %212 {approx = true} : vector<128x1xf32> -> vector<128x1xf32>
    %216 = vector.broadcast %215 : vector<128x1xf32> to vector<128x32xf32>
    %217 = arith.mulf %214, %216 : vector<128x32xf32>
    %218 = vector.extract_strided_slice %174 {offsets = [0, 64], sizes = [128, 32], strides = [1, 1]} : vector<128x128xf32> to vector<128x32xf32>
    %219 = arith.truncf %218 : vector<128x32xf32> to vector<128x32xbf16>
    %220 = vector.extract_strided_slice %178 {offsets = [0, 64], sizes = [128, 32], strides = [1, 1]} : vector<128x128xf32> to vector<128x32xf32>
    %221 = arith.truncf %220 : vector<128x32xf32> to vector<128x32xbf16>
    %222 = vector.extract_strided_slice %179 {offsets = [0, 64], sizes = [128, 32], strides = [1, 1]} : vector<128x128xf32> to vector<128x32xf32>
    %223 = arith.truncf %222 : vector<128x32xf32> to vector<128x32xbf16>
    %cst_61 = arith.constant dense<0.000000e+00> : vector<128x128xf32>
    %224 = tpu.matmul %219, %221, %cst_61 {dimension_numbers = #tpu.dot_dimension_numbers<[1], [1], [0], [0], [0, 0, 1, 0], [], []>} : vector<128x32xbf16>, vector<128x32xbf16>, vector<128x128xf32> -> vector<128x128xf32>
    %cst_62 = arith.constant dense<0xFF800000> : vector<128xf32>
    %225 = vector.multi_reduction <maximumf>, %224, %cst_62 [1] : vector<128x128xf32> to vector<128xf32>
    %226 = vector.shape_cast %225 : vector<128xf32> to vector<128x1xf32>
    %227 = vector.broadcast %226 : vector<128x1xf32> to vector<128x128xf32>
    %228 = arith.subf %224, %227 : vector<128x128xf32>
    %229 = math.exp %228 : vector<128x128xf32>
    %cst_63 = arith.constant dense<0.000000e+00> : vector<128xf32>
    %230 = vector.multi_reduction <add>, %229, %cst_63 [1] : vector<128x128xf32> to vector<128xf32>
    %231 = vector.shape_cast %230 : vector<128xf32> to vector<128x1xf32>
    %232 = arith.truncf %229 : vector<128x128xf32> to vector<128x128xbf16>
    %cst_64 = arith.constant dense<0.000000e+00> : vector<128x32xf32>
    %233 = tpu.matmul %232, %223, %cst_64 {dimension_numbers = #tpu.dot_dimension_numbers<[1], [0], [0], [1], [0, 0, 1, 1], [], []>} : vector<128x128xbf16>, vector<128x32xbf16>, vector<128x32xf32> -> vector<128x32xf32>
    %234 = tpu.reciprocal %231 {approx = true} : vector<128x1xf32> -> vector<128x1xf32>
    %235 = vector.broadcast %234 : vector<128x1xf32> to vector<128x32xf32>
    %236 = arith.mulf %233, %235 : vector<128x32xf32>
    %237 = vector.extract_strided_slice %174 {offsets = [0, 96], sizes = [128, 32], strides = [1, 1]} : vector<128x128xf32> to vector<128x32xf32>
    %238 = arith.truncf %237 : vector<128x32xf32> to vector<128x32xbf16>
    %239 = vector.extract_strided_slice %178 {offsets = [0, 96], sizes = [128, 32], strides = [1, 1]} : vector<128x128xf32> to vector<128x32xf32>
    %240 = arith.truncf %239 : vector<128x32xf32> to vector<128x32xbf16>
    %241 = vector.extract_strided_slice %179 {offsets = [0, 96], sizes = [128, 32], strides = [1, 1]} : vector<128x128xf32> to vector<128x32xf32>
    %242 = arith.truncf %241 : vector<128x32xf32> to vector<128x32xbf16>
    %cst_65 = arith.constant dense<0.000000e+00> : vector<128x128xf32>
    %243 = tpu.matmul %238, %240, %cst_65 {dimension_numbers = #tpu.dot_dimension_numbers<[1], [1], [0], [0], [0, 0, 1, 0], [], []>} : vector<128x32xbf16>, vector<128x32xbf16>, vector<128x128xf32> -> vector<128x128xf32>
    %cst_66 = arith.constant dense<0xFF800000> : vector<128xf32>
    %244 = vector.multi_reduction <maximumf>, %243, %cst_66 [1] : vector<128x128xf32> to vector<128xf32>
    %245 = vector.shape_cast %244 : vector<128xf32> to vector<128x1xf32>
    %246 = vector.broadcast %245 : vector<128x1xf32> to vector<128x128xf32>
    %247 = arith.subf %243, %246 : vector<128x128xf32>
    %248 = math.exp %247 : vector<128x128xf32>
    %cst_67 = arith.constant dense<0.000000e+00> : vector<128xf32>
    %249 = vector.multi_reduction <add>, %248, %cst_67 [1] : vector<128x128xf32> to vector<128xf32>
    %250 = vector.shape_cast %249 : vector<128xf32> to vector<128x1xf32>
    %251 = arith.truncf %248 : vector<128x128xf32> to vector<128x128xbf16>
    %cst_68 = arith.constant dense<0.000000e+00> : vector<128x32xf32>
    %252 = tpu.matmul %251, %242, %cst_68 {dimension_numbers = #tpu.dot_dimension_numbers<[1], [0], [0], [1], [0, 0, 1, 1], [], []>} : vector<128x128xbf16>, vector<128x32xbf16>, vector<128x32xf32> -> vector<128x32xf32>
    %253 = tpu.reciprocal %250 {approx = true} : vector<128x1xf32> -> vector<128x1xf32>
    %254 = vector.broadcast %253 : vector<128x1xf32> to vector<128x32xf32>
    %255 = arith.mulf %252, %254 : vector<128x32xf32>
    %256 = tpu.concatenate %198, %217, %236, %255 in 1 : vector<128x32xf32>, vector<128x32xf32>, vector<128x32xf32>, vector<128x32xf32> -> vector<128x128xf32>
    %c0_69 = arith.constant 0 : index
    %c0_70 = arith.constant 0 : index
    %257 = vector.load %arg10[%c0_69, %c0_70] : memref<128x128xbf16, #tpu.memory_space<vmem>>, vector<128x128xbf16>
    %258 = arith.truncf %256 : vector<128x128xf32> to vector<128x128xbf16>
    %cst_71 = arith.constant dense<0.000000e+00> : vector<128x128xf32>
    %259 = tpu.matmul %258, %257, %cst_71 {dimension_numbers = #tpu.dot_dimension_numbers<[1], [0], [0], [1], [0, 0, 1, 1], [], []>} : vector<128x128xbf16>, vector<128x128xbf16>, vector<128x128xf32> -> vector<128x128xf32>
    %260 = vector.broadcast %13 : vector<1x128xf32> to vector<128x128xf32>
    %261 = arith.addf %259, %260 : vector<128x128xf32>
    %262 = arith.addf %261, %149 : vector<128x128xf32>
    %cst_72 = arith.constant dense<0.000000e+00> : vector<128xf32>
    %263 = vector.multi_reduction <add>, %262, %cst_72 [1] : vector<128x128xf32> to vector<128xf32>
    %264 = vector.shape_cast %263 : vector<128xf32> to vector<128x1xf32>
    %cst_73 = arith.constant 1.280000e+02 : f32
    %265 = vector.broadcast %cst_73 : f32 to vector<128x1xf32>
    %266 = arith.divf %264, %265 : vector<128x1xf32>
    %267 = vector.broadcast %266 : vector<128x1xf32> to vector<128x128xf32>
    %268 = arith.subf %262, %267 : vector<128x128xf32>
    %269 = arith.mulf %268, %268 : vector<128x128xf32>
    %cst_74 = arith.constant dense<0.000000e+00> : vector<128xf32>
    %270 = vector.multi_reduction <add>, %269, %cst_74 [1] : vector<128x128xf32> to vector<128xf32>
    %271 = vector.shape_cast %270 : vector<128xf32> to vector<128x1xf32>
    %cst_75 = arith.constant 1.280000e+02 : f32
    %272 = vector.broadcast %cst_75 : f32 to vector<128x1xf32>
    %273 = arith.divf %271, %272 : vector<128x1xf32>
    %274 = vector.broadcast %266 : vector<128x1xf32> to vector<128x128xf32>
    %275 = arith.subf %262, %274 : vector<128x128xf32>
    %cst_76 = arith.constant 9.99999974E-6 : f32
    %276 = vector.broadcast %cst_76 : f32 to vector<128x1xf32>
    %277 = arith.addf %273, %276 : vector<128x1xf32>
    %278 = math.rsqrt %277 : vector<128x1xf32>
    %279 = vector.broadcast %278 : vector<128x1xf32> to vector<128x128xf32>
    %280 = arith.mulf %275, %279 : vector<128x128xf32>
    %281 = vector.broadcast %10 : vector<1x128xf32> to vector<128x128xf32>
    %282 = arith.mulf %280, %281 : vector<128x128xf32>
    %283 = vector.broadcast %11 : vector<1x128xf32> to vector<128x128xf32>
    %284 = arith.addf %282, %283 : vector<128x128xf32>
    %c0_77 = arith.constant 0 : index
    %c0_78 = arith.constant 0 : index
    %285 = vector.load %arg11[%c0_77, %c0_78] : memref<128x512xbf16, #tpu.memory_space<vmem>>, vector<128x512xbf16>
    %286 = arith.truncf %284 : vector<128x128xf32> to vector<128x128xbf16>
    %cst_79 = arith.constant dense<0.000000e+00> : vector<128x512xf32>
    %287 = tpu.matmul %286, %285, %cst_79 {dimension_numbers = #tpu.dot_dimension_numbers<[1], [0], [0], [1], [0, 0, 1, 1], [], []>} : vector<128x128xbf16>, vector<128x512xbf16>, vector<128x512xf32> -> vector<128x512xf32>
    %288 = vector.broadcast %15 : vector<1x512xf32> to vector<128x512xf32>
    %289 = arith.addf %287, %288 : vector<128x512xf32>
    %290 = vector.extract_strided_slice %289 {offsets = [0, 0], sizes = [128, 256], strides = [1, 1]} : vector<128x512xf32> to vector<128x256xf32>
    %291 = vector.extract_strided_slice %289 {offsets = [0, 256], sizes = [128, 256], strides = [1, 1]} : vector<128x512xf32> to vector<128x256xf32>
    %cst_80 = arith.constant 5.000000e-01 : f32
    %292 = vector.broadcast %cst_80 : f32 to vector<128x256xf32>
    %293 = arith.mulf %292, %291 : vector<128x256xf32>
    %cst_81 = arith.constant 4.471500e-02 : f32
    %294 = vector.broadcast %cst_81 : f32 to vector<128x256xf32>
    %295 = arith.mulf %294, %291 : vector<128x256xf32>
    %296 = arith.mulf %295, %291 : vector<128x256xf32>
    %297 = arith.mulf %296, %291 : vector<128x256xf32>
    %298 = arith.addf %291, %297 : vector<128x256xf32>
    %cst_82 = arith.constant 0.797884583 : f32
    %299 = vector.broadcast %cst_82 : f32 to vector<128x256xf32>
    %300 = arith.mulf %299, %298 : vector<128x256xf32>
    %301 = math.tanh %300 : vector<128x256xf32>
    %cst_83 = arith.constant 1.000000e+00 : f32
    %302 = vector.broadcast %cst_83 : f32 to vector<128x256xf32>
    %303 = arith.addf %302, %301 : vector<128x256xf32>
    %304 = arith.mulf %293, %303 : vector<128x256xf32>
    %305 = arith.mulf %290, %304 : vector<128x256xf32>
    %c0_84 = arith.constant 0 : index
    %c0_85 = arith.constant 0 : index
    %306 = vector.load %arg12[%c0_84, %c0_85] : memref<256x128xbf16, #tpu.memory_space<vmem>>, vector<256x128xbf16>
    %307 = arith.truncf %305 : vector<128x256xf32> to vector<128x256xbf16>
    %cst_86 = arith.constant dense<0.000000e+00> : vector<128x128xf32>
    %308 = tpu.matmul %307, %306, %cst_86 {dimension_numbers = #tpu.dot_dimension_numbers<[1], [0], [0], [1], [0, 0, 1, 1], [], []>} : vector<128x256xbf16>, vector<256x128xbf16>, vector<128x128xf32> -> vector<128x128xf32>
    %309 = vector.broadcast %14 : vector<1x128xf32> to vector<128x128xf32>
    %310 = arith.addf %308, %309 : vector<128x128xf32>
    %311 = arith.addf %310, %262 : vector<128x128xf32>
    %c0_87 = arith.constant 0 : index
    %c0_88 = arith.constant 0 : index
    %c0_89 = arith.constant 0 : index
    %312 = vector.load %arg13[%c0_87, %c0_88, %c0_89] : memref<1x128x128xf32, #tpu.memory_space<vmem>>, vector<1x128x128xf32>
    %313 = vector.shape_cast %312 : vector<1x128x128xf32> to vector<128x128xf32>
    %314 = vector.shape_cast %311 : vector<128x128xf32> to vector<1x128x128xf32>
    tpu.vector_store %arg13[%c0_87, %c0_88, %c0_89], %314 {strides = array<i32>} : memref<1x128x128xf32, #tpu.memory_space<vmem>>, vector<1x128x128xf32>,
    return
  }
  func.func @transform_0(%arg0: i32) -> (i32, i32, i32) {
    %c0_i32 = arith.constant 0 : i32
    %c0_i32_0 = arith.constant 0 : i32
    %c0_i32_1 = arith.constant 0 : i32
    return %arg0, %c0_i32, %c0_i32_0 : i32, i32, i32
  }
  func.func @transform_1(%arg0: i32) -> (i32, i32, i32) {
    %c0_i32 = arith.constant 0 : i32
    %c0_i32_0 = arith.constant 0 : i32
    %c0_i32_1 = arith.constant 0 : i32
    return %arg0, %c0_i32, %c0_i32_0 : i32, i32, i32
  }
  func.func @transform_2(%arg0: i32) -> (i32, i32) {
    %c0_i32 = arith.constant 0 : i32
    %c0_i32_0 = arith.constant 0 : i32
    %c0_i32_1 = arith.constant 0 : i32
    return %c0_i32, %c0_i32_0 : i32, i32
  }
  func.func @transform_3(%arg0: i32) -> (i32, i32) {
    %c0_i32 = arith.constant 0 : i32
    %c0_i32_0 = arith.constant 0 : i32
    %c0_i32_1 = arith.constant 0 : i32
    return %c0_i32, %c0_i32_0 : i32, i32
  }
  func.func @transform_4(%arg0: i32) -> (i32, i32) {
    %c0_i32 = arith.constant 0 : i32
    %c0_i32_0 = arith.constant 0 : i32
    %c0_i32_1 = arith.constant 0 : i32
    return %c0_i32, %c0_i32_0 : i32, i32
  }
  func.func @transform_5(%arg0: i32) -> (i32, i32) {
    %c0_i32 = arith.constant 0 : i32
    %c0_i32_0 = arith.constant 0 : i32
    %c0_i32_1 = arith.constant 0 : i32
    return %c0_i32, %c0_i32_0 : i32, i32
  }
  func.func @transform_6(%arg0: i32) -> (i32, i32) {
    %c0_i32 = arith.constant 0 : i32
    %c0_i32_0 = arith.constant 0 : i32
    %c0_i32_1 = arith.constant 0 : i32
    return %c0_i32, %c0_i32_0 : i32, i32
  }
  func.func @transform_7(%arg0: i32) -> (i32, i32) {
    %c0_i32 = arith.constant 0 : i32
    %c0_i32_0 = arith.constant 0 : i32
    %c0_i32_1 = arith.constant 0 : i32
    return %c0_i32, %c0_i32_0 : i32, i32
  }
  func.func @transform_8(%arg0: i32) -> (i32, i32) {
    %c0_i32 = arith.constant 0 : i32
    %c0_i32_0 = arith.constant 0 : i32
    %c0_i32_1 = arith.constant 0 : i32
    return %c0_i32, %c0_i32_0 : i32, i32
  }
  func.func @transform_9(%arg0: i32) -> (i32, i32) {
    %c0_i32 = arith.constant 0 : i32
    %c0_i32_0 = arith.constant 0 : i32
    %c0_i32_1 = arith.constant 0 : i32
    return %c0_i32, %c0_i32_0 : i32, i32
  }
  func.func @transform_10(%arg0: i32) -> (i32, i32) {
    %c0_i32 = arith.constant 0 : i32
    %c0_i32_0 = arith.constant 0 : i32
    %c0_i32_1 = arith.constant 0 : i32
    return %c0_i32, %c0_i32_0 : i32, i32
  }
  func.func @transform_11(%arg0: i32) -> (i32, i32) {
    %c0_i32 = arith.constant 0 : i32
    %c0_i32_0 = arith.constant 0 : i32
    %c0_i32_1 = arith.constant 0 : i32
    return %c0_i32, %c0_i32_0 : i32, i32
  }
  func.func @transform_12(%arg0: i32) -> (i32, i32, i32) {
    %c0_i32 = arith.constant 0 : i32
    %c0_i32_0 = arith.constant 0 : i32
    %c0_i32_1 = arith.constant 0 : i32
    return %arg0, %c0_i32, %c0_i32_0 : i32, i32, i32
  }
}

</mosaic_0001>

<bundles_post_ra>
// kernel: basic_transformer_block.1
= control target key start
LH: loop header
LB: loop body
LE: loop exit
PB: predicated region body
PF: predicated region fallthrough
CT: control target
= control target key end

     0   :  { %s14225_s0 = inlined_call_operand.vmem [shape: f32[2,128,64], index: 0, kind: input, shape index: {}]   ;;  %s14226_s1 = inlined_call_operand.vmem [shape: f32[2,128,64], index: 1, kind: input, shape index: {}]   ;;  %s14227_s2 = inlined_call_operand.hbm [shape: f32[2,64], index: 2, kind: input, shape index: {}]   ;;  %s14228_s3 = inlined_call_operand.hbm [shape: f32[8,128], index: 3, kind: input, shape index: {}]   ;;  %s14229_s4 = inlined_call_operand.hbm [shape: f32[1,512], index: 4, kind: input, shape index: {}]   ;;  %s14230_s5 = inlined_call_operand.vmem [shape: bf16[128,384], index: 5, kind: input, shape index: {}]   ;;  %s14231_s6 = inlined_call_operand.vmem [shape: bf16[128,128], index: 6, kind: input, shape index: {}]   ;;  %s14232_s7 = inlined_call_operand.hbm [shape: bf16[128,128], index: 7, kind: input, shape index: {}]   ;;  %s14233_s8 = inlined_call_operand.vmem [shape: bf16[128,256], index: 8, kind: input, shape index: {}]   ;;  %s14234_s9 = inlined_call_operand.hbm [shape: bf16[128,128], index: 9, kind: input, shape index: {}]   ;;  %s14235_s10 = inlined_call_operand.vmem [shape: bf16[128,512], index: 10, kind: input, shape index: {}]   ;;  %s14236_s11 = inlined_call_operand.hbm [shape: bf16[256,128], index: 11, kind: input, shape index: {}]   ;;  %s14237_s12 = inlined_call_operand.hbm [shape: f32[2,128,128], index: 12, kind: output, shape index: {}]  }
   0x1   :  { %14293 = sst [smem:[#allocation55_spill]] %s14227_s2 }
   0x2   :  { %14294 = sst [smem:[#allocation56_spill]] %s14228_s3 }
   0x3   :  { %14295 = sst [smem:[#allocation57_spill]] %s14232_s7 }
   0x4   :  { %17 = vsyncpa [#allocation3], 0 }
   0x5   :  { %18 = vsyncpa [#allocation6], 0 }
   0x6   :  { %19 = vsyncpa [#allocation9], 0 }
   0x7   :  { %20 = vsyncpa [#allocation12], 0 }
   0x8   :  { %21 = vsyncpa [#allocation4], 0 }
   0x9   :  { %23 = vsyncpa [#allocation4 + $0x1], 0  ;;  %s9541_s21 = smov 0   ;;  %s9543_s22 = smov 0  }
   0xa   :  { %s9545_s23 = smov 0   ;;  %s9547_s24 = smov 0  }
   0xb LB: > { %14296 = sst [smem:[#allocation19_spill]] %s9447_s21  ;;  %s9562_s25 = sadd.s32 4294967295, %s9459_s24   ;;  %s9459_s24 = sphi %s9547_s24, %s14470_s24   ;;  %s9455_s23 = sphi %s9545_s23, %s14472_s23   ;;  %s9451_s22 = sphi %s9543_s22, %s14474_s22   ;;  %s9447_s21 = sphi %s9541_s21, %s14473_s21  }
   0xc   : > { %14297 = sst [smem:[#allocation20_spill]] %s9455_s23  ;;  %s7464_s26 = sadd.s32 4294967294, %s9459_s24  }
   0xd   : > { %s9566_s27 = sadd.s32 1, %s9459_s24   ;;  %s298_s28 = sadd.s32 1, %s9455_s23 }
   0xe   : > { %14298 = sst [smem:[#allocation21_spill]] %s9566_s27  ;;  %s295_s29 = ssub.s32 %s9459_s24, %s9566_s27 }
   0xf   : > { %p308_p0 = scmp.ne.s32.totalorder %s9455_s23, %s9451_s22  ;;  %p296_p1 = scmp.eq.s32.totalorder %s295_s29, 0 }
  0x10   : > { %p309_p2 = scmp.eq.s32.totalorder %s9562_s25, 1  ;;  %p314_p3 = scmp.ne.s32.totalorder %s9451_s22, %s9447_s21 }
  0x11   : > { %p315_p4 = scmp.eq.s32.totalorder %s7464_s26, 1  ;;  %p7465_p7 = scmp.ge.s32.totalorder %s9459_s24, 1 }
  0x12   : > { %s9577_s30 = scalar_select %p296_p1, %s9455_s23, %s298_s28  }
  0x13   : > { %p9579_p5 = por %p309_p2, %p308_p0  ;;  %p9583_p6 = por %p315_p4, %p314_p3 }
  0x14   : > { %14299 = sst [smem:[#allocation22_spill]] %s9577_s30  ;;  %p322_p8 = scmp.lt.s32.totalorder %s9459_s24, 3 }
  0x15   : > { %s14301_s14 = scalar_select %p9583_p6, 1, 0 }
  0x16   : > { %p8190_p9 = scmp.eq.s32.totalorder %s9562_s25, 0  ;;  %p9590_p10 = pnand %p7465_p7, %p322_p8 }
  0x17   : > { %14302 = sst [smem:[#allocation23_spill]] %s14301_s14  ;;  %s9461_s19 = smov [#allocation5]  }
  0x18   : > { %s14304_s3 = sld [smem:[#allocation56_spill]]  ;;  %p8167_p11 = pneg %p9590_p10 }
  0x19   : > { %s348_s20 = sshll.u32 %s9461_s19, 4  ;;  %s14305_s7 = sld [smem:[#allocation57_spill]]  ;;  %s349_s20 = int_to_ptr.vmem [resolvable:$true] %s348_s20 }
  0x1a   : > { %p9604_p12 = pnand %p8190_p9, %p8167_p11  ;;  %s9462_s16 = smov [#allocation8]  }
  0x1b   : > { %s377_s17 = sshll.u32 %s9462_s16, 4  ;;  %s9463_s19 = smov 64   ;;  %s378_s17 = int_to_ptr.vmem [resolvable:$true] %s377_s17 }
  0x1c   : > { %s14307_s2 = sld [smem:[#allocation55_spill]]  ;;  %s9465_s23 = smov [#allocation2]  }
  0x1d   : > { %s336_s27 = sshll.u32 %s9465_s23, 4  ;;  %s358_s16 = sshll.u32 %s14229_s4, 4  ;;  %s337_s27 = int_to_ptr.vmem [resolvable:$true] %s336_s27  ;;  %s359_s16 = int_to_ptr.hbm [resolvable:$true] %s358_s16 }
  0x1e   : > { %s346_s18 = sshll.u32 %s14304_s3, 4  ;;  %s9464_s3 = smov 4   ;;  %s347_s18 = int_to_ptr.hbm [resolvable:$true] %s346_s18 }
  0x1f   : > { %s375_s29 = sshll.u32 %s14305_s7, 4  ;;  %s392_s26 = sshll.u32 %s14234_s9, 4  ;;  %s376_s29 = int_to_ptr.hbm [resolvable:$true] %s375_s29  ;;  %s393_s26 = int_to_ptr.hbm [resolvable:$true] %s392_s26 }
  0x20   : > { %8173 = dma.hbm_to_vmem [thread:$0]  (!%p9604_p12), %s347_s18, 128, %s349_s20, [#allocation6]  }
  0x21   : > { %8179 = dma.hbm_to_vmem [thread:$0]  (!%p9604_p12), %s376_s29, 1024, %s378_s17, [#allocation9], %s9463_s19, %s9463_s19, %s9464_s3  }
  0x22   : > { %s334_s7 = sshll.u32 %s14307_s2, 4  ;;  %s9466_s18 = smov [#allocation7]   ;;  %s335_s7 = int_to_ptr.hbm [resolvable:$true] %s334_s7 }
  0x23   : > { %8170 = dma.hbm_to_vmem [thread:$0]  (!%p9604_p12), %s335_s7, 32, %s337_s27, [#allocation3]  }
  0x24   : > { %s360_s20 = sshll.u32 %s9466_s18, 4  ;;  %s409_s2 = sshll.u32 %s14236_s11, 4  ;;  %s361_s20 = int_to_ptr.vmem [resolvable:$true] %s360_s20  ;;  %s410_s2 = int_to_ptr.hbm [resolvable:$true] %s409_s2 }
  0x25   : > { %8176 = dma.hbm_to_vmem [thread:$0]  (!%p9604_p12), %s359_s16, 64, %s361_s20, [#allocation6]  }
  0x26   : > { %s9467_s21 = smov [#allocation10]   ;;  %s9468_s7 = smov [#allocation11]  }
  0x27   : > { %s394_s14 = sshll.u32 %s9467_s21, 4  ;;  %s411_s27 = sshll.u32 %s9468_s7, 4  ;;  %s395_s14 = int_to_ptr.vmem [resolvable:$true] %s394_s14  ;;  %s412_s27 = int_to_ptr.vmem [resolvable:$true] %s411_s27 }
  0x28   : > { %8182 = dma.hbm_to_vmem [thread:$0]  (!%p9604_p12), %s393_s26, 1024, %s395_s14, [#allocation9], %s9463_s19, %s9463_s19, %s9464_s3  }
  0x29   : > { %8185 = dma.hbm_to_vmem [thread:$0]  (!%p9604_p12), %s410_s2, 2048, %s412_s27, [#allocation12], %s9463_s19, %s9463_s19, %s9464_s3  }
  0x2a   : > { %443 = sbr.rel (%p9590_p10) target bundleno = 4590 (0x11ee), region = 68 }
  0x2f   : > { %9426 = dma.done.wait (%p8190_p9), [#allocation3], 32  }
  0x30   : > { %9428 = vsyncadd (%p8190_p9), [#allocation3], 4294967264 }
  0x31   : > { %9430 = dma.done.wait (%p8190_p9), [#allocation6], 192  }
  0x32   : > { %9432 = vsyncadd (%p8190_p9), [#allocation6], 4294967104 }
  0x33   : > { %9434 = dma.done.wait (%p8190_p9), [#allocation9], 2048  }
  0x34   : > { %9436 = vsyncadd (%p8190_p9), [#allocation9], 4294965248 }
  0x35   : > { %9438 = dma.done.wait (%p8190_p9), [#allocation12], 2048  }
  0x36   : > { %9440 = vsyncadd (%p8190_p9), [#allocation12], 4294965248  ;;  %p516_p13 = scmp.lt.s32.totalorder %s9562_s25, 1  ;;  %vm561_vm0 = vcmask 523264   ;;  %s9469_s29 = smov 64   ;;  %v9470_v34 = vmov 64.0  }
  0x37   : > { %8490 = vrcp.f32 %v9470_v34  ;;  %s9472_s17 = smov 96   ;;  %s9473_s26 = smov 32  }
  0x38   : > { %s9652_s2 = scalar_select %p516_p13, %s9562_s25, 1 }
  0x39   : > { %s513_s21 = sand.u32 1, %s9451_s22   ;;  %s8116_s27 = sshll.u32 %s9562_s25, 7 }
  0x3a   : > { %s8002_s3 = sshll.u32 %s9652_s2, 7  ;;  %s7480_s14 = sshll.u32 %s513_s21, 7 }
  0x3b   : > { %s9660_s19 = scalar_lea.vmem %s14225_s0, %s8002_s3  ;;  %s9742_s20 = scalar_lea.vmem %s14226_s1, %s8002_s3 }
  0x3c   : > { %v9663_v0 = vld [vmem:[%s9660_s19 + $0x40] sm:$0xff]  ;;  %v9666_v1 = vld [vmem:[%s9660_s19 + $0x50] sm:$0xff]  ;;  %v9678_v6 = vld [vmem:[%s9660_s19 + $0x48] sm:$0xff]  ;;  %s14135_s7 = scalar_lea.vmem [#allocation13], %s7480_s14  ;;  %s7326_s30 = scalar_lea.hbm %s14237_s12, %s8116_s27 }
  0x3d   : > { %v586_v2 = vsel %vm561_vm0, %v9663_v0, 0.0  ;;  %v592_v3 = vsel %vm561_vm0, %v9666_v1, 0.0  ;;  %v9673_v4 = vld [vmem:[%s9660_s19 + $0x60] sm:$0xff]  ;;  %v9681_v7 = vld [vmem:[%s9660_s19 + $0x58] sm:$0xff]  ;;  %v9684_v8 = vld [vmem:[%s9660_s19 + $0x68] sm:$0xff]  ;;  %v589_v9 = vsel %vm561_vm0, %v9678_v6, 0.0  ;;  %v8491_v35 = vpop.eup %8490 }
  0x3e   : > { %587 = vadd.xlane.f32.xlu0 %v586_v2  ;;  %593 = vadd.xlane.f32.xlu1 %v592_v3  ;;  %v598_v5 = vsel %vm561_vm0, %v9673_v4, 0.0  ;;  %v595_v10 = vsel %vm561_vm0, %v9681_v7, 0.0  ;;  %v601_v11 = vsel %vm561_vm0, %v9684_v8, 0.0  ;;  %v9693_v12 = vld [vmem:[%s9660_s19] sm:$0xff]  ;;  %v9696_v13 = vld [vmem:[%s9660_s19 + $0x8] sm:$0xff]  ;;  %v9699_v14 = vld [vmem:[%s9660_s19 + $0x78] sm:$0xff]  ;;  %vm615_vm1 = vweird.f32 %v8491_v35 }
  0x3f   : > { %599 = vadd.xlane.f32.xlu2 %v598_v5  ;;  %v562_v15 = vsel %vm561_vm0, %v9693_v12, 0.0  ;;  %v565_v16 = vsel %vm561_vm0, %v9696_v13, 0.0  ;;  %v607_v17 = vsel %vm561_vm0, %v9699_v14, 0.0  ;;  %v9708_v18 = vld [vmem:[%s9660_s19 + $0x10] sm:$0xff]  ;;  %v9714_v20 = vld [vmem:[%s9660_s19 + $0x28] sm:$0xff]  ;;  %v9723_v24 = vld [vmem:[%s9660_s19 + $0x18] sm:$0xff] }
  0x40   : > { %v9711_v19 = vld [vmem:[%s9660_s19 + $0x70] sm:$0xff]  ;;  %v568_v21 = vsel %vm561_vm0, %v9708_v18, 0.0  ;;  %v577_v23 = vsel %vm561_vm0, %v9714_v20, 0.0  ;;  %v571_v26 = vsel %vm561_vm0, %v9723_v24, 0.0  ;;  %v9733_v28 = vld [vmem:[%s9660_s19 + $0x20] sm:$0xff]  ;;  %v551_v32 = vld [vmem:[%s9742_s20 + $0x48] sm:$0xff] }
  0x41   : > { %v604_v22 = vsel %vm561_vm0, %v9711_v19, 0.0  ;;  %v9726_v25 = vld [vmem:[%s9660_s19 + $0x30] sm:$0xff]  ;;  %v574_v29 = vsel %vm561_vm0, %v9733_v28, 0.0  ;;  %v550_v30 = vld [vmem:[%s9742_s20 + $0x40] sm:$0xff]  ;;  %v553_v33 = vld [vmem:[%s9742_s20 + $0x58] sm:$0xff]  ;;  %v611_v36 = vmul.f32 64.0, %v8491_v35 }
  0x42   : > { %v580_v27 = vsel %vm561_vm0, %v9726_v25, 0.0  ;;  %v552_v31 = vld [vmem:[%s9742_s20 + $0x50] sm:$0xff]  ;;  %v9753_v38 = vld [vmem:[%s9660_s19 + $0x38] sm:$0xff]  ;;  %s7327_s15 = sshll.u32 %s14135_s7, 4  ;;  %s7315_s25 = scalar_lea.sflag [#allocation4], %s513_s21  ;;  %s7328_s15 = int_to_ptr.vmem [resolvable:$true] %s7327_s15 }
  0x43   : > { %v612_v37 = vsub.f32 1.0, %v611_v36  ;;  %v583_v39 = vsel %vm561_vm0, %v9753_v38, 0.0  ;;  %s9401_s18 = scalar_lea.hbm %s14237_s12, 256 }
  0x45   : > { %v613_v40 = vmul.f32 %v8491_v35, %v612_v37 }
  0x46   : > { %590 = vadd.xlane.f32.xlu0 %v589_v9  ;;  %596 = vadd.xlane.f32.xlu1 %v595_v10 }
  0x47   : > { %602 = vadd.xlane.f32.xlu2 %v601_v11  ;;  %v614_v41 = vadd.f32 %v8491_v35, %v613_v40 }
  0x49   : > { %v9757_v42 = vsel %vm615_vm1, %v8491_v35, %v614_v41 }
  0x4e   : > { %563 = vadd.xlane.f32.xlu0 %v562_v15  ;;  %566 = vadd.xlane.f32.xlu1 %v565_v16 }
  0x4f   : > { %608 = vadd.xlane.f32.xlu2 %v607_v17 }
  0x56   : > { %569 = vadd.xlane.f32.xlu0 %v568_v21  ;;  %605 = vadd.xlane.f32.xlu1 %v604_v22 }
  0x57   : > { %578 = vadd.xlane.f32.xlu2 %v577_v23 }
  0x5e   : > { %572 = vadd.xlane.f32.xlu1 %v571_v26 }
  0x5f   : > { %581 = vadd.xlane.f32.xlu2 %v580_v27 }
  0x66   : > { %575 = vadd.xlane.f32.xlu1 %v574_v29 }
  0x6a   : > { %987 = vrot.lane.b32.xlu0 %v550_v30, %s9469_s29 }
  0x77   : > { %991 = vrot.lane.b32.xlu2 %v552_v31, %s9469_s29 }
  0x7f   : > { %989 = vrot.lane.b32.xlu1 %v551_v32, %s9469_s29  ;;  %993 = vrot.lane.b32.xlu2 %v553_v33, %s9469_s29 }
  0xa9   : > { %584 = vadd.xlane.f32.xlu1 %v583_v39 }
  0xb1   : > { %v588_v43 = vpop.xlane.xlu0 %587  ;;  %v594_v44 = vpop.xlane.xlu1 %593 }
  0xb2   : > { %v625_v45 = vmul.f32 %v9757_v42, %v588_v43  ;;  %v627_v46 = vmul.f32 %v9757_v42, %v594_v44  ;;  %v600_v48 = vpop.xlane.xlu2 %599 }
  0xb3   : > { %v629_v55 = vmul.f32 %v9757_v42, %v600_v48 }
  0xb4   : > { %v9762_v47 = vsub.f32 %v9663_v0, %v625_v45  ;;  %v9765_v49 = vsub.f32 %v9666_v1, %v627_v46 }
  0xb5   : > { %v9779_v59 = vsub.f32 %v9673_v4, %v629_v55  ;;  %v544_v55 = vld [vmem:[%s9742_s20 + $0x10] sm:$0xff] }
  0xb6   : > { %v657_v50 = vmul.f32 %v9762_v47, %v9762_v47  ;;  %v659_v57 = vmul.f32 %v9765_v49, %v9765_v49 }
  0xb7   : > { %v661_v4 = vmul.f32 %v9779_v59, %v9779_v59 }
  0xb8   : > { %v689_v51 = vsel %vm561_vm0, %v657_v50, 0.0  ;;  %v695_v61 = vsel %vm561_vm0, %v659_v57, 0.0  ;;  %v547_v57 = vld [vmem:[%s9742_s20 + $0x28] sm:$0xff] }
  0xb9   : > { %v591_v52 = vpop.xlane.xlu0 %590  ;;  %690 = vadd.xlane.f32.xlu2 %v689_v51  ;;  %v597_v53 = vpop.xlane.xlu1 %596  ;;  %v701_v9 = vsel %vm561_vm0, %v661_v4, 0.0  ;;  %v554_v51 = vld [vmem:[%s9742_s20 + $0x60] sm:$0xff] }
  0xba   : > { %v626_v54 = vmul.f32 %v9757_v42, %v591_v52  ;;  %v628_v56 = vmul.f32 %v9757_v42, %v597_v53  ;;  %v603_v63 = vpop.xlane.xlu2 %602  ;;  %v555_v52 = vld [vmem:[%s9742_s20 + $0x68] sm:$0xff]  ;;  %v542_v53 = vld [vmem:[%s9742_s20] sm:$0xff] }
  0xbb   : > { %v630_v3 = vmul.f32 %v9757_v42, %v603_v63 }
  0xbc   : > { %v9776_v58 = vsub.f32 %v9678_v6, %v626_v54  ;;  %v9782_v60 = vsub.f32 %v9681_v7, %v628_v56  ;;  %v556_v54 = vld [vmem:[%s9742_s20 + $0x70] sm:$0xff]  ;;  %v557_v56 = vld [vmem:[%s9742_s20 + $0x78] sm:$0xff] }
  0xbd   : > { %v9795_v7 = vsub.f32 %v9684_v8, %v630_v3 }
  0xbe   : > { %v658_v62 = vmul.f32 %v9776_v58, %v9776_v58  ;;  %v660_v6 = vmul.f32 %v9782_v60, %v9782_v60 }
  0xbf   : > { %v662_v21 = vmul.f32 %v9795_v7, %v9795_v7 }
  0xc0   : > { %v692_v0 = vsel %vm561_vm0, %v658_v62, 0.0  ;;  %v698_v11 = vsel %vm561_vm0, %v660_v6, 0.0 }
  0xc1   : > { %696 = vadd.xlane.f32.xlu2 %v695_v61  ;;  %693 = vadd.xlane.f32.xlu0 %v692_v0  ;;  %v564_v1 = vpop.xlane.xlu0 %563  ;;  %v567_v2 = vpop.xlane.xlu1 %566  ;;  %v704_v26 = vsel %vm561_vm0, %v662_v21, 0.0  ;;  %v545_v21 = vld [vmem:[%s9742_s20 + $0x18] sm:$0xff] }
  0xc2   : > { %v618_v5 = vmul.f32 %v9757_v42, %v567_v2  ;;  %v617_v23 = vmul.f32 %v9757_v42, %v564_v1  ;;  %v609_v31 = vpop.xlane.xlu2 %608 }
  0xc3   : > { %v632_v34 = vmul.f32 %v9757_v42, %v609_v31 }
  0xc4   : > { %v9799_v10 = vsub.f32 %v9696_v13, %v618_v5  ;;  %v9820_v32 = vsub.f32 %v9693_v12, %v617_v23 }
  0xc5   : > { %v9830_v37 = vsub.f32 %v9699_v14, %v632_v34 }
  0xc6   : > { %v650_v8 = vmul.f32 %v9799_v10, %v9799_v10  ;;  %v649_v36 = vmul.f32 %v9820_v32, %v9820_v32 }
  0xc7   : > { %v664_v14 = vmul.f32 %v9830_v37, %v9830_v37 }
  0xc8   : > { %v668_v29 = vsel %vm561_vm0, %v650_v8, 0.0  ;;  %v665_v40 = vsel %vm561_vm0, %v649_v36, 0.0 }
  0xc9   : > { %702 = vadd.xlane.f32.xlu2 %v701_v9  ;;  %699 = vadd.xlane.f32.xlu0 %v698_v11  ;;  %v570_v15 = vpop.xlane.xlu0 %569  ;;  %v606_v16 = vpop.xlane.xlu1 %605  ;;  %v710_v46 = vsel %vm561_vm0, %v664_v14, 0.0 }
  0xca   : > { %v619_v17 = vmul.f32 %v9757_v42, %v570_v15  ;;  %v631_v22 = vmul.f32 %v9757_v42, %v606_v16  ;;  %v579_v41 = vpop.xlane.xlu2 %578 }
  0xcb   : > { %v622_v43 = vmul.f32 %v9757_v42, %v579_v41 }
  0xcc   : > { %v9810_v13 = vsub.f32 %v9708_v18, %v619_v17  ;;  %v9814_v27 = vsub.f32 %v9711_v19, %v631_v22 }
  0xce   : > { %v651_v30 = vmul.f32 %v9810_v13, %v9810_v13  ;;  %v663_v35 = vmul.f32 %v9814_v27, %v9814_v27 }
  0xd0   : > { %v671_v33 = vsel %vm561_vm0, %v651_v30, 0.0  ;;  %v707_v39 = vsel %vm561_vm0, %v663_v35, 0.0 }
  0xd1   : > { %705 = vadd.xlane.f32.xlu2 %v704_v26  ;;  %669 = vadd.xlane.f32.xlu0 %v668_v29  ;;  %v573_v18 = vpop.xlane.xlu1 %572 }
  0xd2   : > { %672 = vadd.xlane.f32.xlu1 %v671_v33  ;;  %v620_v19 = vmul.f32 %v9757_v42, %v573_v18  ;;  %v9866_v62 = vpop.xlane.xlu2 %581 }
  0xd4   : > { %v9833_v12 = vsub.f32 %v9723_v24, %v620_v19  ;;  %v9843_v24 = vsub.f32 %v9714_v20, %v622_v43  ;;  %v543_v20 = vld [vmem:[%s9742_s20 + $0x8] sm:$0xff] }
  0xd6   : > { %v652_v44 = vmul.f32 %v9833_v12, %v9833_v12  ;;  %v654_v48 = vmul.f32 %v9843_v24, %v9843_v24 }
  0xd8   : > { %v674_v45 = vsel %vm561_vm0, %v652_v44, 0.0  ;;  %v680_v50 = vsel %vm561_vm0, %v654_v48, 0.0 }
  0xd9   : > { %708 = vadd.xlane.f32.xlu0 %v707_v39  ;;  %666 = vadd.xlane.f32.xlu2 %v665_v40  ;;  %v576_v61 = vpop.xlane.xlu1 %575 }
  0xda   : > { %v621_v63 = vmul.f32 %v9757_v42, %v576_v61  ;;  %v9876_v3 = vpop.permute.xlu2 %991 }
  0xdc   : > { %v9870_v0 = vsub.f32 %v9733_v28, %v621_v63  ;;  %v9887_v15 = vpop.permute.xlu0 %987  ;;  %v558_v63 = vld [vmem:[#allocation2] sm:$0x3] }
  0xde   : > { %v653_v2 = vmul.f32 %v9870_v0, %v9870_v0 }
  0xe0   : > { %v677_v4 = vsel %vm561_vm0, %v653_v2, 0.0 }
  0xe1   : > { %675 = vadd.xlane.f32.xlu0 %v674_v45  ;;  %711 = vadd.xlane.f32.xlu2 %v710_v46 }
  0xe2   : > { %v9880_v9 = vpop.permute.xlu2 %993 }
  0xe9   : > { %681 = vadd.xlane.f32.xlu2 %v680_v50 }
  0xeb   : > { %995 = vrot.lane.b32.xlu1 %v554_v51, %s9469_s29 }
  0xf1   : > { %v9872_v1 = vpop.permute.xlu1 %989 }
  0xf3   : > { %973 = vrot.lane.b32.xlu1 %v543_v20, %s9469_s29 }
  0xf5   : > { %997 = vrot.lane.b32.xlu0 %v555_v52, %s9469_s29 }
  0xfd   : > { %971 = vrot.lane.b32.xlu0 %v542_v53, %s9469_s29 }
 0x101   : > { %999 = vrot.lane.b32.xlu2 %v556_v54, %s9469_s29  ;;  %v546_v54 = vld [vmem:[%s9742_s20 + $0x20] sm:$0xff] }
 0x105   : > { %975 = vrot.lane.b32.xlu0 %v544_v55, %s9469_s29 }
 0x109   : > { %1001 = vrot.lane.b32.xlu2 %v557_v56, %s9469_s29 }
 0x10d   : > { %981 = vrot.lane.b32.xlu0 %v547_v57, %s9469_s29 }
 0x11c   : > { %v585_v5 = vpop.xlane.xlu1 %584 }
 0x11d   : > { %678 = vadd.xlane.f32.xlu1 %v677_v4  ;;  %v624_v6 = vmul.f32 %v9757_v42, %v585_v5 }
 0x11f   : > { %v9883_v11 = vsub.f32 %v9753_v38, %v624_v6 }
 0x121   : > { %v656_v28 = vmul.f32 %v9883_v11, %v9883_v11 }
 0x123   : > { %v686_v17 = vsel %vm561_vm0, %v656_v28, 0.0 }
 0x12c   : > { %v691_v16 = vpop.xlane.xlu2 %690 }
 0x12d   : > { %v721_v30 = vmul.f32 %v691_v16, %v9757_v42 }
 0x12f   : > { %v9900_v35 = vadd.f32 1e-05, %v721_v30  ;;  %v9938_v30 = vperm.slane %v558_v63, 1 }
 0x132   : > { %687 = vadd.xlane.f32.xlu2 %v686_v17 }
 0x134   : > { %v697_v22 = vpop.xlane.xlu2 %696  ;;  %v694_v8 = vpop.xlane.xlu0 %693 }
 0x135   : > { %v722_v23 = vmul.f32 %v694_v8, %v9757_v42  ;;  %v723_v39 = vmul.f32 %v697_v22, %v9757_v42  ;;  %v9931_v22 = vperm.slane %v558_v63, 0 }
 0x136   : > { %977 = vrot.lane.b32.xlu1 %v545_v21, %s9469_s29 }
 0x137   : > { %v738_v26 = vadd.f32 1e-05, %v722_v23  ;;  %v9908_v48 = vadd.f32 1e-05, %v723_v39 }
 0x139   : > { %8492 = vrsqrt.f32 %v738_v26  ;;  %vm841_vm3 = vweird.f32 %v738_v26 }
 0x13c   : > { %v703_v38 = vpop.xlane.xlu2 %702  ;;  %v700_v29 = vpop.xlane.xlu0 %699 }
 0x13d   : > { %v725_v31 = vmul.f32 %v703_v38, %v9757_v42  ;;  %v724_v33 = vmul.f32 %v700_v29, %v9757_v42 }
 0x13f   : > { %v9896_v18 = vadd.f32 1e-05, %v725_v31  ;;  %v9898_v34 = vadd.f32 1e-05, %v724_v33  ;;  %v8493_v19 = vpop.eup %8492 }
 0x140   : > { %v836_v36 = vmul.f32 %v8493_v19, %v738_v26  ;;  %vm842_vm2 = vweird.f32 %v8493_v19 }
 0x141   : > { %8494 = vrsqrt.f32 %v9896_v18  ;;  %vm843_vm4 = vmor %vm841_vm3, %vm842_vm2  ;;  %vm861_vm5 = vweird.f32 %v9898_v34  ;;  %vm871_vm8 = vweird.f32 %v9896_v18 }
 0x142   : > { %8496 = vrsqrt.f32 %v9898_v34  ;;  %v837_v40 = vmul.f32 %v8493_v19, %v836_v36 }
 0x143   : > { %8498 = vrsqrt.f32 %v9900_v35 }
 0x144   : > { %v706_v41 = vpop.xlane.xlu2 %705  ;;  %v670_v43 = vpop.xlane.xlu0 %669  ;;  %v838_v44 = vmul.f32 0.5, %v837_v40 }
 0x145   : > { %v726_v14 = vmul.f32 %v706_v41, %v9757_v42  ;;  %v673_v45 = vpop.xlane.xlu1 %672  ;;  %v714_v46 = vmul.f32 %v670_v43, %v9757_v42 }
 0x146   : > { %v715_v50 = vmul.f32 %v673_v45, %v9757_v42  ;;  %v839_v20 = vsub.f32 1.5, %v838_v44 }
 0x147   : > { %v9911_v51 = vpop.eup %8494  ;;  %v9913_v52 = vadd.f32 1e-05, %v726_v14  ;;  %v9915_v53 = vadd.f32 1e-05, %v714_v46  ;;  %v623_v14 = vmul.f32 %v9757_v42, %v9866_v62 }
 0x148   : > { %v8497_v55 = vpop.eup %8496  ;;  %v866_v56 = vmul.f32 %v9911_v51, %v9896_v18  ;;  %v840_v57 = vmul.f32 %v8493_v19, %v839_v20  ;;  %v9924_v4 = vadd.f32 1e-05, %v715_v50  ;;  %vm872_vm9 = vweird.f32 %v9911_v51 }
 0x149   : > { %v856_v61 = vmul.f32 %v8497_v55, %v9898_v34  ;;  %8500 = vrsqrt.f32 %v9913_v52  ;;  %v9927_v5 = vpop.eup %8498  ;;  %vm862_vm6 = vweird.f32 %v8497_v55  ;;  %vm9986_vm10 = vmor %vm871_vm8, %vm872_vm9  ;;  %vm761_vm11 = vweird.f32 %v9915_v53 }
 0x14a   : > { %8502 = vrsqrt.f32 %v9908_v48  ;;  %v867_v2 = vmul.f32 %v9911_v51, %v866_v56  ;;  %979 = vrot.lane.b32.xlu2 %v546_v54, %s9469_s29  ;;  %v844_v6 = vsel %vm843_vm4, %v8493_v19, %v840_v57  ;;  %v826_v38 = vmul.f32 %v9927_v5, %v9900_v35  ;;  %vm9953_vm7 = vmor %vm861_vm5, %vm862_vm6 }
 0x14b   : > { %v857_v28 = vmul.f32 %v8497_v55, %v856_v61  ;;  %8504 = vrsqrt.f32 %v9915_v53  ;;  %v914_v21 = vmul.f32 %v844_v6, %v9776_v58  ;;  %v9979_v6 = vsub.f32 %v9726_v25, %v623_v14 }
 0x14c   : > { %v667_v16 = vpop.xlane.xlu2 %666  ;;  %v709_v17 = vpop.xlane.xlu0 %708  ;;  %v868_v8 = vmul.f32 0.5, %v867_v2  ;;  %8506 = vrsqrt.f32 %v9924_v4  ;;  %v827_v50 = vmul.f32 %v9927_v5, %v826_v38  ;;  %vm881_vm14 = vweird.f32 %v9913_v52 }
 0x14d   : > { %v858_v23 = vmul.f32 0.5, %v857_v28  ;;  %v727_v26 = vmul.f32 %v709_v17, %v9757_v42  ;;  %v931_v29 = vmul.f32 %v9931_v22, %v914_v21  ;;  %v713_v39 = vmul.f32 %v667_v16, %v9757_v42 }
 0x14e   : > { %v869_v43 = vsub.f32 1.5, %v868_v8  ;;  %vm832_vm1 = vweird.f32 %v9927_v5  ;;  %vm831_vm4 = vweird.f32 %v9900_v35  ;;  %vm851_vm8 = vweird.f32 %v9908_v48 }
 0x14f   : > { %v9940_v31 = vpop.eup %8500  ;;  %v859_v33 = vsub.f32 1.5, %v858_v23  ;;  %v9943_v58 = vadd.f32 1e-05, %v727_v26  ;;  %v948_v40 = vadd.f32 %v9938_v30, %v931_v29  ;;  %v9967_v57 = vadd.f32 1e-05, %v713_v39  ;;  %vm10034_vm6 = vmor %vm831_vm4, %vm832_vm1 }
 0x150   : > { %v9945_v19 = vpop.eup %8502  ;;  %v876_v36 = vmul.f32 %v9940_v31, %v9913_v52  ;;  %v870_v2 = vmul.f32 %v9911_v51, %v869_v43  ;;  %v655_v43 = vmul.f32 %v9979_v6, %v9979_v6  ;;  %vm882_vm15 = vweird.f32 %v9940_v31 }
 0x151   : > { %v8505_v41 = vpop.eup %8504  ;;  %v860_v44 = vmul.f32 %v8497_v55, %v859_v33  ;;  %v846_v20 = vmul.f32 %v9945_v19, %v9908_v48  ;;  %8508 = vrsqrt.f32 %v9943_v58  ;;  %v9971_v61 = vsel %vm561_vm0, %v948_v40, %v9872_v1  ;;  %vm10027_vm5 = vmor %vm881_vm14, %vm882_vm15 }
 0x152   : > { %v877_v45 = vmul.f32 %v9940_v31, %v876_v36  ;;  %v756_v46 = vmul.f32 %v8505_v41, %v9915_v53  ;;  %v9965_v56 = vpop.eup %8506  ;;  %14310 = vst [vmem:[#allocation24_spill] sm:$0xff] %v9971_v61  ;;  %1053 = vadd.xlane.f32.xlu0 %v9971_v61  ;;  %v828_v1 = vmul.f32 0.5, %v827_v50  ;;  %vm762_vm12 = vweird.f32 %v8505_v41 }
 0x153   : > { %v864_v54 = vsel %vm9953_vm7, %v8497_v55, %v860_v44  ;;  %v847_v21 = vmul.f32 %v9945_v19, %v846_v20  ;;  %v766_v8 = vmul.f32 %v9965_v56, %v9924_v4  ;;  %8510 = vrsqrt.f32 %v9967_v57  ;;  %vm763_vm13 = vmor %vm761_vm11, %vm762_vm12 }
 0x154   : > { %v757_v62 = vmul.f32 %v8505_v41, %v756_v46  ;;  %v712_v63 = vpop.xlane.xlu2 %711  ;;  %v916_v55 = vmul.f32 %v864_v54, %v9782_v60  ;;  %v878_v28 = vmul.f32 0.5, %v877_v45  ;;  %v874_v26 = vsel %vm9986_vm10, %v9911_v51, %v870_v2 }
 0x155   : > { %v728_v17 = vmul.f32 %v712_v63, %v9757_v42  ;;  %v829_v39 = vsub.f32 1.5, %v828_v1  ;;  %v767_v40 = vmul.f32 %v9965_v56, %v766_v8  ;;  %v848_v44 = vmul.f32 0.5, %v847_v21  ;;  %v10017_v63 = vpop.xlane.xlu0 %675 }
 0x156   : > { %v758_v16 = vmul.f32 0.5, %v757_v62  ;;  %v933_v18 = vmul.f32 %v9931_v22, %v916_v55  ;;  %v879_v38 = vsub.f32 1.5, %v878_v28  ;;  %v917_v50 = vmul.f32 %v874_v26, %v9779_v59 }
 0x157   : > { %v8509_v25 = vpop.eup %8508  ;;  %v9996_v36 = vadd.f32 1e-05, %v728_v17  ;;  %v683_v59 = vsel %vm561_vm0, %v655_v43, 0.0  ;;  %vm891_vm2 = vweird.f32 %v9943_v58  ;;  %v849_v17 = vsub.f32 1.5, %v848_v44 }
 0x158   : > { %v759_v60 = vsub.f32 1.5, %v758_v16  ;;  %v886_v33 = vmul.f32 %v8509_v25, %v9943_v58  ;;  %v950_v53 = vadd.f32 %v9938_v30, %v933_v18  ;;  %v880_v54 = vmul.f32 %v9940_v31, %v879_v38 }
 0x159   : > { %v10009_v20 = vpop.eup %8510  ;;  %8512 = vrsqrt.f32 %v9996_v36  ;;  %vm892_vm3 = vweird.f32 %v8509_v25  ;;  %v934_v16 = vmul.f32 %v9931_v22, %v917_v50  ;;  %vm852_vm9 = vweird.f32 %v9945_v19 }
 0x15a   : > { %v760_v29 = vmul.f32 %v8505_v41, %v759_v60  ;;  %v887_v34 = vmul.f32 %v8509_v25, %v886_v33  ;;  %v10005_v51 = vsel %vm561_vm0, %v950_v53, %v9880_v9  ;;  %v768_v9 = vmul.f32 0.5, %v767_v40  ;;  %vm893_vm7 = vmor %vm891_vm2, %vm892_vm3 }
 0x15b   : > { %14313 = vst [vmem:[#allocation25_spill] sm:$0xff] %v10005_v51  ;;  %1057 = vadd.xlane.f32.xlu0 %v10005_v51  ;;  %v746_v28 = vmul.f32 %v10009_v20, %v9967_v57  ;;  %v884_v35 = vsel %vm10027_vm5, %v9940_v31, %v880_v54  ;;  %v951_v38 = vadd.f32 %v9938_v30, %v934_v16  ;;  %vm772_vm10 = vweird.f32 %v9965_v56  ;;  %vm10074_vm11 = vmor %vm851_vm8, %vm852_vm9 }
 0x15c   : > { %v764_v14 = vsel %vm763_vm13, %v8505_v41, %v760_v29  ;;  %v888_v62 = vmul.f32 0.5, %v887_v34  ;;  %v830_v41 = vmul.f32 %v9927_v5, %v829_v39  ;;  %v769_v21 = vsub.f32 1.5, %v768_v9  ;;  %v10044_v8 = vpop.xlane.xlu2 %681 }
 0x15d   : > { %v996_v45 = vpop.permute.xlu1 %995  ;;  %v906_v46 = vmul.f32 %v764_v14, %v9799_v10  ;;  %v747_v31 = vmul.f32 %v10009_v20, %v746_v28  ;;  %v918_v29 = vmul.f32 %v884_v35, %v9795_v7  ;;  %v850_v33 = vmul.f32 %v9945_v19, %v849_v17 }
 0x15e   : > { %v889_v10 = vsub.f32 1.5, %v888_v62  ;;  %v834_v52 = vsel %vm10034_vm6, %v9927_v5, %v830_v41  ;;  %v770_v40 = vmul.f32 %v9965_v56, %v769_v21  ;;  %vm771_vm12 = vweird.f32 %v9924_v4 }
 0x15f   : > { %v923_v2 = vmul.f32 %v9931_v22, %v906_v46  ;;  %v10046_v18 = vpop.eup %8512  ;;  %v748_v44 = vmul.f32 0.5, %v747_v31  ;;  %v935_v14 = vmul.f32 %v9931_v22, %v918_v29  ;;  %vm773_vm13 = vmor %vm771_vm12, %vm772_vm10  ;;  %v854_v46 = vsel %vm10074_vm11, %v9945_v19, %v850_v33 }
 0x160   : > { %684 = vadd.xlane.f32.xlu1 %v683_v59  ;;  %v890_v1 = vmul.f32 %v8509_v25, %v889_v10  ;;  %v896_v53 = vmul.f32 %v10046_v18, %v9996_v36  ;;  %v774_v48 = vsel %vm773_vm13, %v9965_v56, %v770_v40  ;;  %v915_v10 = vmul.f32 %v854_v46, %v9765_v49 }
 0x161   : > { %v940_v60 = vadd.f32 %v9938_v30, %v923_v2  ;;  %v749_v62 = vsub.f32 1.5, %v748_v44  ;;  %v952_v4 = vadd.f32 %v9938_v30, %v935_v14  ;;  %v907_v59 = vmul.f32 %v774_v48, %v9810_v13 }
 0x162   : > { %v894_v23 = vsel %vm893_vm7, %v8509_v25, %v890_v1  ;;  %v913_v25 = vmul.f32 %v834_v52, %v9762_v47  ;;  %v897_v50 = vmul.f32 %v10046_v18, %v896_v53  ;;  %vm752_vm14 = vweird.f32 %v10009_v20  ;;  %v549_v53 = vld [vmem:[%s9742_s20 + $0x38] sm:$0xff] }
 0x163   : > { %v919_v5 = vmul.f32 %v894_v23, %v9814_v27  ;;  %v10066_v27 = vsel %vm561_vm0, %v951_v38, %v996_v45  ;;  %v750_v55 = vmul.f32 %v10009_v20, %v749_v62  ;;  %v924_v13 = vmul.f32 %v9931_v22, %v907_v59 }
 0x164   : > { %14319 = vst [vmem:[#allocation27_spill] sm:$0xff] %v10066_v27  ;;  %v930_v45 = vmul.f32 %v9931_v22, %v913_v25  ;;  %v1000_v54 = vpop.permute.xlu2 %999  ;;  %v898_v2 = vmul.f32 0.5, %v897_v50  ;;  %v932_v49 = vmul.f32 %v9931_v22, %v915_v10  ;;  %vm751_vm15 = vweird.f32 %v9967_v57 }
 0x165   : > { %v974_v26 = vpop.permute.xlu1 %973  ;;  %v936_v43 = vmul.f32 %v9931_v22, %v919_v5  ;;  %vm753_vm1 = vmor %vm751_vm15, %vm752_vm14  ;;  %v941_v17 = vadd.f32 %v9938_v30, %v924_v13  ;;  %vm901_vm2 = vweird.f32 %v9996_v36  ;;  %vm902_vm3 = vweird.f32 %v10046_v18  ;;  %v548_v5 = vld [vmem:[%s9742_s20 + $0x30] sm:$0xff] }
 0x166   : > { %v10058_v39 = vsel %vm561_vm0, %v940_v60, %v974_v26  ;;  %v947_v9 = vadd.f32 %v9938_v30, %v930_v45  ;;  %v899_v16 = vsub.f32 1.5, %v898_v2  ;;  %v754_v58 = vsel %vm753_vm1, %v10009_v20, %v750_v55  ;;  %vm903_vm4 = vmor %vm901_vm2, %vm902_vm3 }
 0x167   : > { %14318 = vst [vmem:[#allocation26_spill] sm:$0xff] %v10058_v39  ;;  %1037 = vadd.xlane.f32.xlu0 %v10058_v39  ;;  %v998_v7 = vpop.permute.xlu0 %997  ;;  %v953_v34 = vadd.f32 %v9938_v30, %v936_v43  ;;  %v949_v35 = vadd.f32 %v9938_v30, %v932_v49  ;;  %v905_v21 = vmul.f32 %v754_v58, %v9820_v32 }
 0x168   : > { %1059 = vadd.xlane.f32.xlu1 %v10066_v27  ;;  %v10096_v19 = vsel %vm561_vm0, %v952_v4, %v998_v7  ;;  %v10103_v28 = vsel %vm561_vm0, %v947_v9, %v9887_v15  ;;  %v900_v1 = vmul.f32 %v10046_v18, %v899_v16  ;;  %v716_v15 = vmul.f32 %v10017_v63, %v9757_v42 }
 0x169   : > { %v10089_v41 = vsel %vm561_vm0, %v953_v34, %v1000_v54  ;;  %14323 = vst [vmem:[#allocation29_spill] sm:$0xff] %v10096_v19  ;;  %v10124_v20 = vsel %vm561_vm0, %v949_v35, %v9876_v3  ;;  %v922_v63 = vmul.f32 %v9931_v22, %v905_v21  ;;  %v718_v32 = vmul.f32 %v10044_v8, %v9757_v42 }
 0x16a   : > { %14322 = vst [vmem:[#allocation28_spill] sm:$0xff] %v10089_v41  ;;  %v904_v36 = vsel %vm903_vm4, %v10046_v18, %v900_v1  ;;  %v732_v23 = vadd.f32 1e-05, %v716_v15 }
 0x16b   : > { %14324 = vst [vmem:[#allocation30_spill] sm:$0xff] %v10103_v28  ;;  %v920_v60 = vmul.f32 %v904_v36, %v9830_v37  ;;  %v939_v31 = vadd.f32 %v9938_v30, %v922_v63  ;;  %v734_v18 = vadd.f32 1e-05, %v718_v32 }
 0x16c   : > { %14326 = vst [vmem:[#allocation32_spill] sm:$0xff] %v10124_v20  ;;  %8514 = vrsqrt.f32 %v732_v23  ;;  %v1002_v37 = vpop.permute.xlu2 %1001  ;;  %vm781_vm5 = vweird.f32 %v732_v23 }
 0x16d   : > { %v937_v3 = vmul.f32 %v9931_v22, %v920_v60  ;;  %8516 = vrsqrt.f32 %v734_v18  ;;  %vm801_vm8 = vweird.f32 %v734_v18 }
 0x16f   : > { %1063 = vadd.xlane.f32.xlu0 %v10089_v41  ;;  %v972_v56 = vpop.permute.xlu0 %971  ;;  %v954_v29 = vadd.f32 %v9938_v30, %v937_v3 }
 0x170   : > { %1061 = vadd.xlane.f32.xlu1 %v10096_v19  ;;  %v10134_v26 = vsel %vm561_vm0, %v939_v31, %v972_v56 }
 0x171   : > { %14327 = vst [vmem:[#allocation33_spill] sm:$0xff] %v10134_v26  ;;  %v10142_v8 = vsel %vm561_vm0, %v954_v29, %v1002_v37 }
 0x172   : > { %v8515_v38 = vpop.eup %8514  ;;  %14328 = vst [vmem:[#allocation34_spill] sm:$0xff] %v10142_v8 }
 0x173   : > { %1051 = vadd.xlane.f32.xlu2 %v10103_v28  ;;  %v776_v33 = vmul.f32 %v8515_v38, %v732_v23  ;;  %v8517_v40 = vpop.eup %8516  ;;  %vm782_vm6 = vweird.f32 %v8515_v38 }
 0x174   : > { %v796_v43 = vmul.f32 %v8517_v40, %v734_v18  ;;  %vm783_vm7 = vmor %vm781_vm5, %vm782_vm6  ;;  %vm802_vm9 = vweird.f32 %v8517_v40  ;;  %v9471_v18 = vmov 128.0  }
 0x175   : > { %v777_v25 = vmul.f32 %v8515_v38, %v776_v33  ;;  %vm803_vm11 = vmor %vm801_vm8, %vm802_vm9 }
 0x176   : > { %v797_v45 = vmul.f32 %v8517_v40, %v796_v43 }
 0x177   : > { %v976_v57 = vpop.permute.xlu0 %975  ;;  %v778_v7 = vmul.f32 0.5, %v777_v25 }
 0x178   : > { %v10118_v52 = vsel %vm561_vm0, %v941_v17, %v976_v57  ;;  %v798_v48 = vmul.f32 0.5, %v797_v45 }
 0x179   : > { %14325 = vst [vmem:[#allocation31_spill] sm:$0xff] %v10118_v52  ;;  %1039 = vadd.xlane.f32.xlu0 %v10118_v52  ;;  %v779_v34 = vsub.f32 1.5, %v778_v7 }
 0x17a   : > { %v799_v62 = vsub.f32 1.5, %v798_v48 }
 0x17b   : > { %1055 = vadd.xlane.f32.xlu2 %v10124_v20  ;;  %v780_v46 = vmul.f32 %v8515_v38, %v779_v34 }
 0x17c   : > { %v800_v10 = vmul.f32 %v8517_v40, %v799_v62 }
 0x17d   : > { %v784_v54 = vsel %vm783_vm7, %v8515_v38, %v780_v46 }
 0x17e   : > { %v908_v59 = vmul.f32 %v784_v54, %v9833_v12  ;;  %v804_v13 = vsel %vm803_vm11, %v8517_v40, %v800_v10 }
 0x17f   : > { %v910_v12 = vmul.f32 %v804_v13, %v9843_v24  ;;  %v982_v63 = vpop.permute.xlu0 %981 }
 0x180   : > { %v925_v55 = vmul.f32 %v9931_v22, %v908_v59 }
 0x181   : > { %v927_v21 = vmul.f32 %v9931_v22, %v910_v12 }
 0x182   : > { %v942_v17 = vadd.f32 %v9938_v30, %v925_v55 }
 0x183   : > { %1035 = vadd.xlane.f32.xlu2 %v10134_v26  ;;  %v944_v24 = vadd.f32 %v9938_v30, %v927_v21 }
 0x189   : > { %983 = vrot.lane.b32.xlu1 %v548_v5, %s9469_s29 }
 0x18b   : > { %1065 = vadd.xlane.f32.xlu2 %v10142_v8 }
 0x190   : > { %v679_v47 = vpop.xlane.xlu1 %678 }
 0x191   : > { %v717_v44 = vmul.f32 %v679_v47, %v9757_v42  ;;  %985 = vrot.lane.b32.xlu1 %v549_v53, %s9469_s29 }
 0x193   : > { %v733_v14 = vadd.f32 1e-05, %v717_v44 }
 0x195   : > { %8518 = vrsqrt.f32 %v733_v14  ;;  %vm791_vm12 = vweird.f32 %v733_v14 }
 0x196   : > { %8520 = vrcp.f32 %v9471_v18 }
 0x19b   : > { %v8519_v50 = vpop.eup %8518 }
 0x19c   : > { %v786_v4 = vmul.f32 %v8519_v50, %v733_v14  ;;  %vm792_vm10 = vweird.f32 %v8519_v50  ;;  %v8521_v29 = vpop.eup %8520 }
 0x19d   : > { %vm793_vm13 = vmor %vm791_vm12, %vm792_vm10  ;;  %v1068_v33 = vmul.f32 128.0, %v8521_v29  ;;  %vm1072_vm14 = vweird.f32 %v8521_v29 }
 0x19e   : > { %v787_v9 = vmul.f32 %v8519_v50, %v786_v4 }
 0x19f   : > { %v1069_v7 = vsub.f32 1.0, %v1068_v33 }
 0x1a0   : > { %v788_v2 = vmul.f32 0.5, %v787_v9 }
 0x1a1   : > { %v1070_v14 = vmul.f32 %v8521_v29, %v1069_v7 }
 0x1a2   : > { %v789_v56 = vsub.f32 1.5, %v788_v2 }
 0x1a3   : > { %v1071_v48 = vadd.f32 %v8521_v29, %v1070_v14 }
 0x1a4   : > { %v790_v49 = vmul.f32 %v8519_v50, %v789_v56 }
 0x1a5   : > { %v688_v16 = vpop.xlane.xlu2 %687  ;;  %v10171_v62 = vsel %vm1072_vm14, %v8521_v29, %v1071_v48 }
 0x1a6   : > { %v794_v58 = vsel %vm793_vm13, %v8519_v50, %v790_v49  ;;  %v720_v32 = vmul.f32 %v688_v16, %v9757_v42  ;;  %14332 = vst [vmem:[#allocation38_spill] sm:$0xff] %v10171_v62 }
 0x1a7   : > { %v909_v35 = vmul.f32 %v794_v58, %v9870_v0  ;;  %v10166_v0 = vsel %vm561_vm0, %v944_v24, %v982_v63 }
 0x1a8   : > { %v978_v1 = vpop.permute.xlu1 %977  ;;  %14331 = vst [vmem:[#allocation37_spill] sm:$0xff] %v10166_v0  ;;  %v736_v38 = vadd.f32 1e-05, %v720_v32 }
 0x1a9   : > { %v10154_v15 = vsel %vm561_vm0, %v942_v17, %v978_v1  ;;  %v926_v57 = vmul.f32 %v9931_v22, %v909_v35 }
 0x1aa   : > { %14329 = vst [vmem:[#allocation35_spill] sm:$0xff] %v10154_v15  ;;  %1041 = vadd.xlane.f32.xlu2 %v10154_v15  ;;  %vm821_vm3 = vweird.f32 %v736_v38 }
 0x1ab   : > { %v943_v36 = vadd.f32 %v9938_v30, %v926_v57 }
 0x1ad   : > { %v980_v23 = vpop.permute.xlu2 %979 }
 0x1ae   : > { %v10161_v60 = vsel %vm561_vm0, %v943_v36, %v980_v23 }
 0x1af   : > { %14330 = vst [vmem:[#allocation36_spill] sm:$0xff] %v10161_v60  ;;  %1043 = vadd.xlane.f32.xlu0 %v10161_v60 }
 0x1b2   : > { %1045 = vadd.xlane.f32.xlu2 %v10166_v0 }
 0x1c5   : > { %v1054_v44 = vpop.xlane.xlu0 %1053 }
 0x1c6   : > { %v1083_v21 = vmul.f32 %v10171_v62, %v1054_v44 }
 0x1ce   : > { %v1058_v59 = vpop.xlane.xlu0 %1057 }
 0x1d3   : > { %v685_v31 = vpop.xlane.xlu1 %684 }
 0x1d4   : > { %v719_v3 = vmul.f32 %v685_v31, %v9757_v42  ;;  %v10197_v31 = vsub.f32 %v9971_v61, %v1083_v21 }
 0x1d6   : > { %v735_v5 = vadd.f32 1e-05, %v719_v3 }
 0x1d8   : > { %8522 = vrsqrt.f32 %v735_v5  ;;  %vm811_vm1 = vweird.f32 %v735_v5 }
 0x1d9   : > { %8524 = vrsqrt.f32 %v736_v38 }
 0x1da   : > { %v1038_v12 = vpop.xlane.xlu0 %1037 }
 0x1db   : > { %v1060_v46 = vpop.xlane.xlu1 %1059  ;;  %v1075_v63 = vmul.f32 %v10171_v62, %v1038_v12 }
 0x1dc   : > { %v1086_v49 = vmul.f32 %v10171_v62, %v1060_v46 }
 0x1de   : > { %v8523_v37 = vpop.eup %8522  ;;  %v10183_v1 = vsub.f32 %v10066_v27, %v1086_v49 }
 0x1df   : > { %v806_v25 = vmul.f32 %v8523_v37, %v735_v5  ;;  %v8525_v40 = vpop.eup %8524  ;;  %vm812_vm15 = vweird.f32 %v8523_v37 }
 0x1e0   : > { %v816_v43 = vmul.f32 %v8525_v40, %v736_v38  ;;  %vm813_vm2 = vmor %vm811_vm1, %vm812_vm15  ;;  %vm822_vm4 = vweird.f32 %v8525_v40  ;;  %v1118_v23 = vmul.f32 %v10183_v1, %v10183_v1  ;;  %v1085_v38 = vmul.f32 %v10171_v62, %v1058_v59 }
 0x1e1   : > { %v807_v53 = vmul.f32 %v8523_v37, %v806_v25  ;;  %vm823_vm5 = vmor %vm821_vm3, %vm822_vm4 }
 0x1e2   : > { %v817_v45 = vmul.f32 %v8525_v40, %v816_v43  ;;  %v1064_v3 = vpop.xlane.xlu0 %1063 }
 0x1e3   : > { %v808_v47 = vmul.f32 0.5, %v807_v53  ;;  %v1062_v16 = vpop.xlane.xlu1 %1061  ;;  %v1088_v33 = vmul.f32 %v10171_v62, %v1064_v3  ;;  %v10218_v53 = vsub.f32 %v10005_v51, %v1085_v38  ;;  %v7571_v3 = vld [vmem:[%s14230_s5 + $0xa8] sm:$0xf]  ;;  %v8025_v38 = vld [vmem:[%s14230_s5 + $0xac] sm:$0xf] }
 0x1e4   : > { %v818_v50 = vmul.f32 0.5, %v817_v45  ;;  %v1087_v43 = vmul.f32 %v10171_v62, %v1062_v16 }
 0x1e5   : > { %v809_v42 = vsub.f32 1.5, %v808_v47  ;;  %v10221_v7 = vsub.f32 %v10089_v41, %v1088_v33  ;;  %v1117_v14 = vmul.f32 %v10218_v53, %v10218_v53 }
 0x1e6   : > { %v1052_v34 = vpop.xlane.xlu2 %1051  ;;  %v819_v9 = vsub.f32 1.5, %v818_v50 }
 0x1e7   : > { %v810_v54 = vmul.f32 %v8523_v37, %v809_v42  ;;  %v1082_v5 = vmul.f32 %v10171_v62, %v1052_v34  ;;  %v1120_v34 = vmul.f32 %v10221_v7, %v10221_v7  ;;  %v10235_v42 = vsub.f32 %v10096_v19, %v1087_v43  ;;  %v8022_v43 = vld [vmem:[%s14230_s5 + $0x94] sm:$0xf] }
 0x1e8   : > { %v820_v13 = vmul.f32 %v8525_v40, %v819_v9 }
 0x1e9   : > { %v814_v10 = vsel %vm813_vm2, %v8523_v37, %v810_v54  ;;  %v1115_v37 = vmul.f32 %v10197_v31, %v10197_v31  ;;  %v1119_v9 = vmul.f32 %v10235_v42, %v10235_v42 }
 0x1ea   : > { %v911_v55 = vmul.f32 %v814_v10, %v9979_v6  ;;  %v824_v35 = vsel %vm823_vm5, %v8525_v40, %v820_v13  ;;  %v10215_v40 = vsub.f32 %v10103_v28, %v1082_v5 }
 0x1eb   : > { %v912_v6 = vmul.f32 %v824_v35, %v9883_v11  ;;  %v10200_v11 = vsub.f32 %v10058_v39, %v1075_v63 }
 0x1ec   : > { %v928_v17 = vmul.f32 %v9931_v22, %v911_v55  ;;  %v1114_v44 = vmul.f32 %v10215_v40, %v10215_v40  ;;  %v1040_v46 = vpop.xlane.xlu0 %1039 }
 0x1ed   : > { %v929_v32 = vmul.f32 %v9931_v22, %v912_v6  ;;  %v1107_v25 = vmul.f32 %v10200_v11, %v10200_v11  ;;  %v1076_v50 = vmul.f32 %v10171_v62, %v1040_v46 }
 0x1ee   : > { %v1056_v4 = vpop.xlane.xlu2 %1055  ;;  %v945_v57 = vadd.f32 %v9938_v30, %v928_v17 }
 0x1ef   : > { %v1084_v2 = vmul.f32 %v10171_v62, %v1056_v4  ;;  %v946_v18 = vadd.f32 %v9938_v30, %v929_v32  ;;  %v10247_v10 = vsub.f32 %v10118_v52, %v1076_v50 }
 0x1f1   : > { %v10175_v56 = vsub.f32 %v10124_v20, %v1084_v2  ;;  %v1108_v55 = vmul.f32 %v10247_v10, %v10247_v10 }
 0x1f3   : > { %v1116_v58 = vmul.f32 %v10175_v56, %v10175_v56 }
 0x1f5   : > { %1142 = vadd.xlane.f32.xlu0 %v1116_v58 }
 0x1f6   : > { %v1036_v30 = vpop.xlane.xlu2 %1035 }
 0x1f7   : > { %v1074_v47 = vmul.f32 %v10171_v62, %v1036_v30  ;;  %v8023_v30 = vld [vmem:[%s14230_s5 + $0x98] sm:$0xf0] }
 0x1f9   : > { %v10232_v45 = vsub.f32 %v10134_v26, %v1074_v47 }
 0x1fb   : > { %v984_v36 = vpop.permute.xlu1 %983  ;;  %v1106_v4 = vmul.f32 %v10232_v45, %v10232_v45 }
 0x1fc   : > { %v10192_v24 = vsel %vm561_vm0, %v945_v57, %v984_v36 }
 0x1fd   : > { %14333 = vst [vmem:[#allocation39_spill] sm:$0xff] %v10192_v24  ;;  %1047 = vadd.xlane.f32.xlu2 %v10192_v24  ;;  %1146 = vadd.xlane.f32.xlu0 %v1118_v23 }
 0x1fe   : > { %v1066_v48 = vpop.xlane.xlu2 %1065 }
 0x1ff   : > { %v1089_v54 = vmul.f32 %v10171_v62, %v1066_v48 }
 0x201   : > { %v10244_v59 = vsub.f32 %v10142_v8, %v1089_v54  ;;  %v7547_v54 = vld [vmem:[%s14230_s5 + $0x78] sm:$0xf] }
 0x203   : > { %v986_v29 = vpop.permute.xlu1 %985  ;;  %v1121_v2 = vmul.f32 %v10244_v59, %v10244_v59 }
 0x204   : > { %v10209_v22 = vsel %vm561_vm0, %v946_v18, %v986_v29  ;;  %v8026_v18 = vld [vmem:[%s14230_s5 + $0xb0] sm:$0xf0] }
 0x205   : > { %14334 = vst [vmem:[#allocation40_spill] sm:$0xff] %v10209_v22  ;;  %1049 = vadd.xlane.f32.xlu1 %v10209_v22  ;;  %1140 = vadd.xlane.f32.xlu2 %v1115_v37  ;;  %v7572_v29 = vor.u32 %v8026_v18, %v7571_v3  ;;  %v7573_v37 = vld [vmem:[%s14230_s5 + $0xb4] sm:$0xf0]  ;;  %v7537_v3 = vld [vmem:[%s14230_s5 + $0x6c] sm:$0xf0] }
 0x206   : > { %1124 = vadd.xlane.f32.xlu0 %v1107_v25  ;;  %v7576_v33 = vor.u32 %v8025_v38, %v7573_v37  ;;  %v7559_v25 = vld [vmem:[%s14230_s5 + $0x90] sm:$0xf] }
 0x207   : > { %8117 = vmatpush.bf16.msra.mxu2 %v7572_v29  ;;  %1564 = vmatpush.bf16.msra.mxu0 %v7572_v29  ;;  %v7560_v47 = vor.u32 %v8023_v30, %v7559_v25 }
 0x208   : > { %8125 = vmatpush.bf16.msra.mxu3 %v7576_v33  ;;  %1613 = vmatpush.bf16.msra.mxu1 %v7576_v33 }
 0x20b   : > { %8118 = vmatpush.bf16.msra.mxu2 %v7560_v47  ;;  %1565 = vmatpush.bf16.msra.mxu0 %v7560_v47  ;;  %v7523_v47 = vld [vmem:[%s14230_s5 + $0x48] sm:$0xf] }
 0x20d   : > { %1138 = vadd.xlane.f32.xlu1 %v1114_v44  ;;  %1144 = vadd.xlane.f32.xlu2 %v1117_v14  ;;  %v7561_v44 = vld [vmem:[%s14230_s5 + $0x9c] sm:$0xf0] }
 0x20e   : > { %1150 = vadd.xlane.f32.xlu0 %v1120_v34  ;;  %v7564_v46 = vor.u32 %v8022_v43, %v7561_v44  ;;  %v8014_v44 = vld [vmem:[%s14230_s5 + $0x50] sm:$0xf0] }
 0x210   : > { %8126 = vmatpush.bf16.msra.mxu3 %v7564_v46  ;;  %1614 = vmatpush.bf16.msra.mxu1 %v7564_v46  ;;  %v7524_v46 = vor.u32 %v8014_v44, %v7523_v47 }
 0x215   : > { %1122 = vadd.xlane.f32.xlu1 %v1106_v4  ;;  %1148 = vadd.xlane.f32.xlu2 %v1119_v9  ;;  %v8020_v4 = vld [vmem:[%s14230_s5 + $0x80] sm:$0xf0]  ;;  %v8019_v9 = vld [vmem:[%s14230_s5 + $0x7c] sm:$0xf] }
 0x21d   : > { %v1042_v13 = vpop.xlane.xlu2 %1041  ;;  %1152 = vadd.xlane.f32.xlu2 %v1121_v2  ;;  %1126 = vadd.xlane.f32.xlu1 %v1108_v55 }
 0x21e   : > { %v1077_v49 = vmul.f32 %v10171_v62, %v1042_v13  ;;  %v7548_v13 = vor.u32 %v8020_v4, %v7547_v54 }
 0x220   : > { %v10255_v16 = vsub.f32 %v10154_v15, %v1077_v49  ;;  %v7549_v49 = vld [vmem:[%s14230_s5 + $0x84] sm:$0xf0]  ;;  %8119 = vmatpush.bf16.msra.mxu2 %v7548_v13  ;;  %1566 = vmatpush.bf16.msra.mxu0 %v7548_v13 }
 0x222   : > { %v1044_v58 = vpop.xlane.xlu0 %1043  ;;  %v1109_v17 = vmul.f32 %v10255_v16, %v10255_v16 }
 0x223   : > { %v1078_v35 = vmul.f32 %v10171_v62, %v1044_v58 }
 0x224   : > { %1128 = vadd.xlane.f32.xlu0 %v1109_v17  ;;  %v7552_v17 = vor.u32 %v8019_v9, %v7549_v49  ;;  %v7511_v49 = vld [vmem:[%s14230_s5 + $0x30] sm:$0xf] }
 0x225   : > { %v1046_v12 = vpop.xlane.xlu2 %1045  ;;  %v10261_v57 = vsub.f32 %v10161_v60, %v1078_v35 }
 0x226   : > { %v1079_v6 = vmul.f32 %v10171_v62, %v1046_v12  ;;  %8127 = vmatpush.bf16.msra.mxu3 %v7552_v17  ;;  %1615 = vmatpush.bf16.msra.mxu1 %v7552_v17  ;;  %v8010_v17 = vld [vmem:[%s14230_s5 + $0x34] sm:$0xf] }
 0x227   : > { %v1110_v21 = vmul.f32 %v10261_v57, %v10261_v57 }
 0x228   : > { %v10267_v36 = vsub.f32 %v10166_v0, %v1079_v6 }
 0x229   : > { %1130 = vadd.xlane.f32.xlu2 %v1110_v21  ;;  %v7535_v21 = vld [vmem:[%s14230_s5 + $0x60] sm:$0xf] }
 0x22a   : > { %v1111_v23 = vmul.f32 %v10267_v36, %v10267_v36 }
 0x22c   : > { %1132 = vadd.xlane.f32.xlu1 %v1111_v23  ;;  %v8017_v23 = vld [vmem:[%s14230_s5 + $0x68] sm:$0xf0] }
 0x268   : > { %v1143_v63 = vpop.xlane.xlu0 %1142 }
 0x269   : > { %v1164_v32 = vmul.f32 %v1143_v63, %v10171_v62  ;;  %v8016_v63 = vld [vmem:[%s14230_s5 + $0x64] sm:$0xf] }
 0x26a   : > { %v7540_v29 = vor.u32 %v8016_v63, %v7537_v3 }
 0x26b   : > { %v10281_v5 = vadd.f32 1e-05, %v1164_v32  ;;  %v7536_v32 = vor.u32 %v8017_v23, %v7535_v21 }
 0x26c   : > { %8128 = vmatpush.bf16.msra.mxu3 %v7540_v29  ;;  %1616 = vmatpush.bf16.msra.mxu1 %v7540_v29  ;;  %v7499_v29 = vld [vmem:[%s14230_s5 + $0x18] sm:$0xf] }
 0x26d   : > { %8526 = vrsqrt.f32 %v10281_v5  ;;  %8120 = vmatpush.bf16.msra.mxu2 %v7536_v32  ;;  %1567 = vmatpush.bf16.msra.mxu0 %v7536_v32  ;;  %vm1292_vm7 = vweird.f32 %v10281_v5 }
 0x270   : > { %v1048_v14 = vpop.xlane.xlu2 %1047  ;;  %v1147_v34 = vpop.xlane.xlu0 %1146 }
 0x271   : > { %v1080_v48 = vmul.f32 %v10171_v62, %v1048_v14  ;;  %v1166_v50 = vmul.f32 %v1147_v34, %v10171_v62  ;;  %8121 = vmatpush.bf16.msra.mxu2 %v7524_v46  ;;  %1568 = vmatpush.bf16.msra.mxu0 %v7524_v46 }
 0x273   : > { %v10310_v2 = vpop.eup %8526  ;;  %v10313_v55 = vsub.f32 %v10192_v24, %v1080_v48  ;;  %v10320_v35 = vadd.f32 1e-05, %v1166_v50  ;;  %v8013_v48 = vld [vmem:[%s14230_s5 + $0x4c] sm:$0xf]  ;;  %v7525_v50 = vld [vmem:[%s14230_s5 + $0x54] sm:$0xf0] }
 0x274   : > { %v1287_v58 = vmul.f32 %v10310_v2, %v10281_v5  ;;  %v7528_v13 = vor.u32 %v8013_v48, %v7525_v50  ;;  %vm1293_vm6 = vweird.f32 %v10310_v2  ;;  %v8007_v48 = vld [vmem:[%s14230_s5 + $0x1c] sm:$0xf]  ;;  %v7501_v50 = vld [vmem:[%s14230_s5 + $0x24] sm:$0xf0]  ;;  %v7487_v5 = vld [vmem:[%s14230_s5] sm:$0xf] }
 0x275   : > { %v1112_v12 = vmul.f32 %v10313_v55, %v10313_v55  ;;  %8528 = vrsqrt.f32 %v10320_v35  ;;  %vm10412_vm8 = vmor %vm1292_vm7, %vm1293_vm6  ;;  %vm1312_vm6 = vweird.f32 %v10320_v35 }
 0x276   : > { %v1288_v6 = vmul.f32 %v10310_v2, %v1287_v58  ;;  %v8011_v58 = vld [vmem:[%s14230_s5 + $0x38] sm:$0xf0]  ;;  %8129 = vmatpush.bf16.msra.mxu3 %v7528_v13  ;;  %1617 = vmatpush.bf16.msra.mxu1 %v7528_v13 }
 0x277   : > { %1134 = vadd.xlane.f32.xlu0 %v1112_v12  ;;  %v7512_v12 = vor.u32 %v8011_v58, %v7511_v49  ;;  %v8005_v58 = vld [vmem:[%s14230_s5 + $0x8] sm:$0xf0] }
 0x278   : > { %v1050_v18 = vpop.xlane.xlu1 %1049  ;;  %v1141_v38 = vpop.xlane.xlu2 %1140  ;;  %v1289_v37 = vmul.f32 0.5, %v1288_v6  ;;  %v7513_v6 = vld [vmem:[%s14230_s5 + $0x3c] sm:$0xf0] }
 0x279   : > { %v1081_v33 = vmul.f32 %v10171_v62, %v1050_v18  ;;  %v1163_v25 = vmul.f32 %v1141_v38, %v10171_v62  ;;  %v1125_v30 = vpop.xlane.xlu0 %1124  ;;  %v7516_v32 = vor.u32 %v8010_v17, %v7513_v6  ;;  %8122 = vmatpush.bf16.msra.mxu2 %v7512_v12  ;;  %1569 = vmatpush.bf16.msra.mxu0 %v7512_v12 }
 0x27a   : > { %v1155_v43 = vmul.f32 %v1125_v30, %v10171_v62  ;;  %v1290_v4 = vsub.f32 1.5, %v1289_v37  ;;  %v8008_v37 = vld [vmem:[%s14230_s5 + $0x20] sm:$0xf0]  ;;  %v7504_v6 = vor.u32 %v8007_v48, %v7501_v50 }
 0x27b   : > { %v10347_v14 = vadd.f32 1e-05, %v1163_v25  ;;  %v10350_v34 = vsub.f32 %v10209_v22, %v1081_v33  ;;  %v10376_v21 = vpop.eup %8528  ;;  %8130 = vmatpush.bf16.msra.mxu3 %v7516_v32  ;;  %v7500_v47 = vor.u32 %v8008_v37, %v7499_v29  ;;  %1618 = vmatpush.bf16.msra.mxu1 %v7516_v32  ;;  %v559_v32 = vld [vmem:[#allocation5] sm:$0xff] }
 0x27c   : > { %v10358_v54 = vadd.f32 1e-05, %v1155_v43  ;;  %v1291_v38 = vmul.f32 %v10310_v2, %v1290_v4  ;;  %v1307_v25 = vmul.f32 %v10376_v21, %v10320_v35  ;;  %v10438_v50 = vperm.slane %v559_v32, 0 }
 0x27d   : > { %8530 = vrsqrt.f32 %v10347_v14  ;;  %v1113_v9 = vmul.f32 %v10350_v34, %v10350_v34  ;;  %8123 = vmatpush.bf16.msra.mxu2 %v7500_v47  ;;  %1570 = vmatpush.bf16.msra.mxu0 %v7500_v47  ;;  %vm1282_vm10 = vweird.f32 %v10347_v14  ;;  %vm1313_vm2 = vweird.f32 %v10376_v21 }
 0x27e   : > { %8532 = vrsqrt.f32 %v10358_v54  ;;  %v1295_v17 = vsel %vm10412_vm8, %v10310_v2, %v1291_v38  ;;  %v1308_v12 = vmul.f32 %v10376_v21, %v1307_v25  ;;  %v7488_v2 = vor.u32 %v8005_v58, %v7487_v5  ;;  %14337 = vst [vmem:[#allocation41_spill] sm:$0xff] %v10438_v50 }
 0x27f   : > { %1136 = vadd.xlane.f32.xlu2 %v1113_v9  ;;  %8131 = vmatpush.bf16.msra.mxu3 %v7504_v6  ;;  %vm1202_vm12 = vweird.f32 %v10358_v54 }
 0x280   : > { %v1139_v23 = vpop.xlane.xlu1 %1138  ;;  %v1145_v63 = vpop.xlane.xlu2 %1144  ;;  %1619 = vmatpush.bf16.msra.mxu1 %v7504_v6 }
 0x281   : > { %v1162_v3 = vmul.f32 %v1139_v23, %v10171_v62  ;;  %v1165_v18 = vmul.f32 %v1145_v63, %v10171_v62  ;;  %v1151_v9 = vpop.xlane.xlu0 %1150  ;;  %v8004_v23 = vld [vmem:[%s14230_s5 + $0x4] sm:$0xf]  ;;  %v7489_v63 = vld [vmem:[%s14230_s5 + $0xc] sm:$0xf0]  ;;  %8124 = vmatpush.bf16.msra.mxu2 %v7488_v2  ;;  %1571 = vmatpush.bf16.msra.mxu0 %v7488_v2 }
 0x282   : > { %v1168_v29 = vmul.f32 %v1151_v9, %v10171_v62 }
 0x283   : > { %v10388_v33 = vpop.eup %8530  ;;  %v10392_v30 = vadd.f32 1e-05, %v1162_v3  ;;  %v10394_v43 = vadd.f32 1e-05, %v1165_v18 }
 0x284   : > { %v10396_v44 = vpop.eup %8532  ;;  %v1277_v46 = vmul.f32 %v10388_v33, %v10347_v14  ;;  %vm1283_vm9 = vweird.f32 %v10388_v33 }
 0x285   : > { %v1197_v4 = vmul.f32 %v10396_v44, %v10358_v54  ;;  %8534 = vrsqrt.f32 %v10392_v30  ;;  %vm10464_vm11 = vmor %vm1282_vm10, %vm1283_vm9  ;;  %vm1203_vm13 = vweird.f32 %v10396_v44  ;;  %vm1272_vm1 = vweird.f32 %v10392_v30  ;;  %v8027_v54 = vld [vmem:[%s14230_s5 + $0xb8] sm:$0xf0] }
 0x286   : > { %v1278_v49 = vmul.f32 %v10388_v33, %v1277_v46  ;;  %8536 = vrsqrt.f32 %v10394_v43  ;;  %v7492_v46 = vor.u32 %v8004_v23, %v7489_v63  ;;  %v10453_v63 = vadd.f32 1e-05, %v1168_v29  ;;  %vm10528_vm7 = vmor %vm1202_vm12, %vm1203_vm13 }
 0x287   : > { %v1198_v18 = vmul.f32 %v10396_v44, %v1197_v4  ;;  %vm1302_vm4 = vweird.f32 %v10394_v43  ;;  %vm10601_vm12 = vmor %vm1312_vm6, %vm1313_vm2 }
 0x288   : > { %v1279_v3 = vmul.f32 0.5, %v1278_v49  ;;  %v1123_v37 = vpop.xlane.xlu1 %1122  ;;  %v1149_v47 = vpop.xlane.xlu2 %1148  ;;  %v1356_v49 = vmul.f32 %v1295_v17, %v10175_v56  ;;  %8132 = vmatpush.bf16.msra.mxu3 %v7492_v46  ;;  %1620 = vmatpush.bf16.msra.mxu1 %v7492_v46  ;;  %v10460_v17 = vperm.slane %v559_v32, 1 }
 0x289   : > { %v1154_v38 = vmul.f32 %v1123_v37, %v10171_v62  ;;  %v1167_v25 = vmul.f32 %v1149_v47, %v10171_v62  ;;  %v1199_v6 = vmul.f32 0.5, %v1198_v18 }
 0x28a   : > { %v1280_v48 = vsub.f32 1.5, %v1279_v3  ;;  %v1309_v3 = vmul.f32 0.5, %v1308_v12  ;;  %14338 = vst [vmem:[#allocation42_spill] sm:$0xff] %v10460_v17  ;;  %v1373_v29 = vmul.f32 %v10438_v50, %v1356_v49 }
 0x28b   : > { %v10440_v13 = vpop.eup %8534  ;;  %v10443_v4 = vadd.f32 1e-05, %v1154_v38  ;;  %v10445_v9 = vadd.f32 1e-05, %v1167_v25  ;;  %v1200_v32 = vsub.f32 1.5, %v1199_v6 }
 0x28c   : > { %v10448_v5 = vpop.eup %8536  ;;  %v1281_v58 = vmul.f32 %v10388_v33, %v1280_v48  ;;  %v1267_v23 = vmul.f32 %v10440_v13, %v10392_v30  ;;  %v1310_v25 = vsub.f32 1.5, %v1309_v3  ;;  %vm1273_vm14 = vweird.f32 %v10440_v13 }
 0x28d   : > { %v1297_v37 = vmul.f32 %v10448_v5, %v10394_v43  ;;  %8538 = vrsqrt.f32 %v10443_v4  ;;  %vm1303_vm15 = vweird.f32 %v10448_v5  ;;  %vm10496_vm3 = vmor %vm1272_vm1, %vm1273_vm14  ;;  %vm1192_vm9 = vweird.f32 %v10443_v4 }
 0x28e   : > { %v1268_v56 = vmul.f32 %v10440_v13, %v1267_v23  ;;  %8540 = vrsqrt.f32 %v10445_v9  ;;  %v1285_v14 = vsel %vm10464_vm11, %v10388_v33, %v1281_v58  ;;  %vm10516_vm5 = vmor %vm1302_vm4, %vm1303_vm15  ;;  %vm1322_vm13 = vweird.f32 %v10445_v9 }
 0x28f   : > { %v1298_v12 = vmul.f32 %v10448_v5, %v1297_v37  ;;  %8542 = vrsqrt.f32 %v10453_v63  ;;  %v1355_v3 = vmul.f32 %v1285_v14, %v10197_v31  ;;  %v10504_v31 = vadd.f32 %v10460_v17, %v1373_v29 }
 0x290   : > { %v1269_v47 = vmul.f32 0.5, %v1268_v56  ;;  %v1153_v2 = vpop.xlane.xlu2 %1152  ;;  %v1127_v38 = vpop.xlane.xlu1 %1126  ;;  %v1201_v56 = vmul.f32 %v10396_v44, %v1200_v32  ;;  %v10509_v14 = vmul.f32 %v10376_v21, %v1310_v25 }
 0x291   : > { %v1299_v46 = vmul.f32 0.5, %v1298_v12  ;;  %v1169_v48 = vmul.f32 %v1153_v2, %v10171_v62  ;;  %v1156_v23 = vmul.f32 %v1127_v38, %v10171_v62 }
 0x292   : > { %v1270_v37 = vsub.f32 1.5, %v1269_v47 }
 0x293   : > { %v10481_v33 = vpop.eup %8538  ;;  %v1300_v49 = vsub.f32 1.5, %v1299_v46  ;;  %v10483_v58 = vadd.f32 1e-05, %v1169_v48  ;;  %v10485_v6 = vadd.f32 1e-05, %v1156_v23 }
 0x294   : > { %v1271_v18 = vmul.f32 %v10440_v13, %v1270_v37  ;;  %v1187_v12 = vmul.f32 %v10481_v33, %v10443_v4  ;;  %v10493_v47 = vpop.eup %8540  ;;  %v1372_v37 = vmul.f32 %v10438_v50, %v1355_v3  ;;  %vm1193_vm8 = vweird.f32 %v10481_v33  ;;  %v7555_v4 = vld [vmem:[%s14230_s5 + $0x80] sm:$0xf] }
 0x295   : > { %v1301_v38 = vmul.f32 %v10448_v5, %v1300_v49  ;;  %8544 = vrsqrt.f32 %v10483_v58  ;;  %v10506_v30 = vpop.eup %8542  ;;  %v1317_v29 = vmul.f32 %v10493_v47, %v10445_v9  ;;  %v7579_v49 = vld [vmem:[%s14230_s5 + $0xb0] sm:$0xf]  ;;  %vm1194_vm10 = vmor %vm1192_vm9, %vm1193_vm8  ;;  %vm1323_vm11 = vweird.f32 %v10493_v47 }
 0x296   : > { %v1275_v32 = vsel %vm10496_vm3, %v10440_v13, %v1271_v18  ;;  %v1188_v43 = vmul.f32 %v10481_v33, %v1187_v12  ;;  %8546 = vrsqrt.f32 %v10485_v6  ;;  %v1205_v18 = vsel %vm10528_vm7, %v10396_v44, %v1201_v56  ;;  %v8024_v44 = vld [vmem:[%s14230_s5 + $0xa0] sm:$0xf0]  ;;  %vm10614_vm14 = vmor %vm1322_vm13, %vm1323_vm11 }
 0x297   : > { %v1305_v13 = vsel %vm10516_vm5, %v10448_v5, %v1301_v38  ;;  %v1129_v48 = vpop.xlane.xlu0 %1128  ;;  %v1354_v23 = vmul.f32 %v1275_v32, %v10215_v40  ;;  %v1318_v12 = vmul.f32 %v10493_v47, %v1317_v29  ;;  %v1327_v40 = vmul.f32 %v10506_v30, %v10453_v63  ;;  %v7567_v32 = vld [vmem:[%s14230_s5 + $0x98] sm:$0xf] }
 0x298   : > { %v1189_v5 = vmul.f32 0.5, %v1188_v43  ;;  %v1157_v2 = vmul.f32 %v1129_v48, %v10171_v62  ;;  %v1357_v38 = vmul.f32 %v1305_v13, %v10218_v53  ;;  %v7580_v29 = vor.u32 %v8027_v54, %v7579_v49  ;;  %v8021_v49 = vld [vmem:[%s14230_s5 + $0x88] sm:$0xf0] }
 0x299   : > { %v1371_v3 = vmul.f32 %v10438_v50, %v1354_v23  ;;  %v1319_v46 = vmul.f32 0.5, %v1318_v12  ;;  %v1389_v23 = vadd.f32 %v10460_v17, %v1372_v37  ;;  %v1347_v13 = vmul.f32 %v1205_v18, %v10200_v11 }
 0x29a   : > { %v1190_v56 = vsub.f32 1.5, %v1189_v5  ;;  %v10560_v43 = vadd.f32 1e-05, %v1157_v2  ;;  %v1374_v53 = vmul.f32 %v10438_v50, %v1357_v38  ;;  %1662 = vmatpush.bf16.msrb.mxu2 %v7580_v29  ;;  %v7568_v12 = vor.u32 %v8024_v44, %v7567_v32 }
 0x29b   : > { %v10562_v25 = vpop.eup %8544  ;;  %v1388_v48 = vadd.f32 %v10460_v17, %v1371_v3  ;;  %v1320_v41 = vsub.f32 1.5, %v1319_v46  ;;  %v1364_v29 = vmul.f32 %v10438_v50, %v1347_v13  ;;  %vm1212_vm1 = vweird.f32 %v10485_v6 }
 0x29c   : > { %v1191_v8 = vmul.f32 %v10481_v33, %v1190_v56  ;;  %v1131_v5 = vpop.xlane.xlu2 %1130  ;;  %v10570_v2 = vpop.eup %8546  ;;  %8548 = vrsqrt.f32 %v10560_v43  ;;  %v1337_v3 = vmul.f32 %v10562_v25, %v10483_v58  ;;  %v1391_v56 = vadd.f32 %v10460_v17, %v1374_v53  ;;  %v7543_v53 = vld [vmem:[%s14230_s5 + $0x68] sm:$0xf] }
 0x29d   : > { %v1158_v37 = vmul.f32 %v1131_v5, %v10171_v62  ;;  %v10577_v11 = vpack.c.bf16 %v1389_v23, %v1388_v48  ;;  %v1321_v18 = vmul.f32 %v10493_v47, %v1320_v41  ;;  %v1207_v38 = vmul.f32 %v10570_v2, %v10485_v6 }
 0x29e   : > { %v1195_v54 = vsel %vm1194_vm10, %v10481_v33, %v1191_v8  ;;  %1663 = vmatpush.bf16.msrb.mxu2 %v7568_v12  ;;  %v7556_v48 = vor.u32 %v8021_v49, %v7555_v4  ;;  %v10620_v9 = vpack.c.bf16 %v1391_v56, %v10504_v31  ;;  %v1338_v13 = vmul.f32 %v10562_v25, %v1337_v3  ;;  %v8015_v56 = vld [vmem:[%s14230_s5 + $0x58] sm:$0xf0] }
 0x29f   : > { %v10591_v32 = vadd.f32 1e-05, %v1158_v37  ;;  %1641 = vmatmul.bf16.vlgmr.msra.gmra.mxu3 %v10577_v11  ;;  %v1133_v44 = vpop.xlane.xlu1 %1132  ;;  %v1346_v46 = vmul.f32 %v1195_v54, %v10232_v45  ;;  %v1208_v8 = vmul.f32 %v10570_v2, %v1207_v38  ;;  %v1315_v45 = vsel %vm10601_vm12, %v10376_v21, %v10509_v14  ;;  %v8018_v21 = vld [vmem:[%s14230_s5 + $0x70] sm:$0xf0] }
 0x2a0   : > { %v1159_v33 = vmul.f32 %v1133_v44, %v10171_v62  ;;  %v1325_v14 = vsel %vm10614_vm14, %v10493_v47, %v1321_v18  ;;  %v1328_v37 = vmul.f32 %v10506_v30, %v1327_v40  ;;  %1597 = vmatmul.bf16.vlgmr.msra.gmra.mxu2 %v10620_v9  ;;  %v1381_v49 = vadd.f32 %v10460_v17, %v1364_v29  ;;  %v7531_v44 = vld [vmem:[%s14230_s5 + $0x50] sm:$0xf] }
 0x2a1   : > { %8550 = vrsqrt.f32 %v10591_v32  ;;  %v1363_v23 = vmul.f32 %v10438_v50, %v1346_v46  ;;  %v1209_v5 = vmul.f32 0.5, %v1208_v8  ;;  %vm1213_vm15 = vweird.f32 %v10570_v2 }
 0x2a2   : > { %v10633_v12 = vadd.f32 1e-05, %v1159_v33  ;;  %v8549_v31 = vpop.eup %8548  ;;  %1664 = vmatpush.bf16.msrb.mxu2 %v7556_v48  ;;  %v7544_v47 = vor.u32 %v8018_v21, %v7543_v53  ;;  %v1358_v3 = vmul.f32 %v1315_v45, %v10183_v1  ;;  %v1359_v40 = vmul.f32 %v1325_v14, %v10235_v42  ;;  %vm10658_vm2 = vmor %vm1212_vm1, %vm1213_vm15  ;;  %v7519_v53 = vld [vmem:[%s14230_s5 + $0x38] sm:$0xf]  ;;  %v8012_v21 = vld [vmem:[%s14230_s5 + $0x40] sm:$0xf0] }
 0x2a3   : > { %v1380_v4 = vadd.f32 %v10460_v17, %v1363_v23  ;;  %v1210_v54 = vsub.f32 1.5, %v1209_v5  ;;  %v1217_v38 = vmul.f32 %v8549_v31, %v10560_v43  ;;  %v1339_v46 = vmul.f32 0.5, %v1338_v13 }
 0x2a4   : > { %8552 = vrsqrt.f32 %v10633_v12  ;;  %v1329_v33 = vmul.f32 0.5, %v1328_v37  ;;  %v7532_v45 = vor.u32 %v8015_v56, %v7531_v44  ;;  %v1375_v35 = vmul.f32 %v10438_v50, %v1358_v3  ;;  %v7507_v44 = vld [vmem:[%s14230_s5 + $0x20] sm:$0xf] }
 0x2a5   : > { %v10642_v18 = vpack.c.bf16 %v1381_v49, %v1380_v4  ;;  %v1211_v29 = vmul.f32 %v10570_v2, %v1210_v54  ;;  %v1218_v41 = vmul.f32 %v8549_v31, %v1217_v38  ;;  %v1376_v23 = vmul.f32 %v10438_v50, %v1359_v40 }
 0x2a6   : > { %1665 = vmatpush.bf16.msrb.mxu2 %v7544_v47  ;;  %v1340_v14 = vsub.f32 1.5, %v1339_v46  ;;  %vm1223_vm3 = vweird.f32 %v8549_v31  ;;  %v1330_v37 = vsub.f32 1.5, %v1329_v33  ;;  %vm1222_vm4 = vweird.f32 %v10560_v43  ;;  %v8009_v43 = vld [vmem:[%s14230_s5 + $0x28] sm:$0xf0] }
 0x2a7   : > { %v10654_v8 = vpop.eup %8550  ;;  %1572 = vmatmul.bf16.vlgmr.msra.gmra.mxu0 %v10642_v18  ;;  %1621 = vmatmul.bf16.vlgmr.msra.gmra.mxu1 %v10642_v18  ;;  %v1215_v42 = vsel %vm10658_vm2, %v10570_v2, %v1211_v29  ;;  %v1219_v48 = vmul.f32 0.5, %v1218_v41  ;;  %v7520_v47 = vor.u32 %v8012_v21, %v7519_v53  ;;  %vm1224_vm5 = vmor %vm1222_vm4, %vm1223_vm3  ;;  %v1392_v3 = vadd.f32 %v10460_v17, %v1375_v35 }
 0x2a8   : > { %v1227_v6 = vmul.f32 %v10654_v8, %v10591_v32  ;;  %v1348_v4 = vmul.f32 %v1215_v42, %v10247_v10  ;;  %v1393_v40 = vadd.f32 %v10460_v17, %v1376_v23  ;;  %v1341_v10 = vmul.f32 %v10562_v25, %v1340_v14 }
 0x2a9   : > { %v1220_v2 = vsub.f32 1.5, %v1219_v48  ;;  %vm1343_vm6 = vweird.f32 %v10562_v25  ;;  %v1331_v29 = vmul.f32 %v10506_v30, %v1330_v37  ;;  %vm1333_vm7 = vweird.f32 %v10506_v30 }
 0x2aa   : > { %v1228_v13 = vmul.f32 %v10654_v8, %v1227_v6  ;;  %v8553_v5 = vpop.eup %8552  ;;  %1666 = vmatpush.bf16.msrb.mxu2 %v7532_v45  ;;  %v1365_v33 = vmul.f32 %v10438_v50, %v1348_v4  ;;  %vm1342_vm8 = vweird.f32 %v10483_v58  ;;  %v7508_v48 = vor.u32 %v8009_v43, %v7507_v44  ;;  %v8006_v58 = vld [vmem:[%s14230_s5 + $0x10] sm:$0xf0] }
 0x2ab   : > { %v1221_v49 = vmul.f32 %v8549_v31, %v1220_v2  ;;  %v1237_v38 = vmul.f32 %v8553_v5, %v10633_v12  ;;  %vm1332_vm9 = vweird.f32 %v10453_v63  ;;  %vm10698_vm10 = vmor %vm1342_vm8, %vm1343_vm6  ;;  %v10702_v6 = vpack.c.bf16 %v1393_v40, %v1392_v3 }
 0x2ac   : > { %v1229_v54 = vmul.f32 0.5, %v1228_v13  ;;  %vm10713_vm11 = vmor %vm1332_vm9, %vm1333_vm7  ;;  %v1345_v35 = vsel %vm10698_vm10, %v10562_v25, %v1341_v10  ;;  %vm1243_vm12 = vweird.f32 %v8553_v5  ;;  %vm1242_vm13 = vweird.f32 %v10633_v12 }
 0x2ad   : > { %v1225_v56 = vsel %vm1224_vm5, %v8549_v31, %v1221_v49  ;;  %v1238_v46 = vmul.f32 %v8553_v5, %v1237_v38  ;;  %v1335_v53 = vsel %vm10713_vm11, %v10506_v30, %v1331_v29  ;;  %v1382_v21 = vadd.f32 %v10460_v17, %v1365_v33  ;;  %vm1244_vm15 = vmor %vm1242_vm13, %vm1243_vm12 }
 0x2ae   : > { %v1349_v41 = vmul.f32 %v1225_v56, %v10255_v16  ;;  %v1230_v1 = vsub.f32 1.5, %v1229_v54  ;;  %1667 = vmatpush.bf16.msrb.mxu2 %v7520_v47  ;;  %v7495_v16 = vld [vmem:[%s14230_s5 + $0x8] sm:$0xf]  ;;  %vm1233_vm14 = vweird.f32 %v10654_v8  ;;  %v1361_v4 = vmul.f32 %v1345_v35, %v10244_v59 }
 0x2af   : > { %1646 = vmatmul.bf16.gmra.mxu3 %v10620_v9  ;;  %v1239_v42 = vmul.f32 0.5, %v1238_v46  ;;  %v7496_v25 = vor.u32 %v8006_v58, %v7495_v16  ;;  %vm1232_vm1 = vweird.f32 %v10591_v32  ;;  %v1360_v12 = vmul.f32 %v1335_v53, %v10221_v7 }
 0x2b0   : > { %v1366_v45 = vmul.f32 %v10438_v50, %v1349_v41  ;;  %1602 = vmatmul.bf16.gmra.mxu2 %v10702_v6  ;;  %v1231_v2 = vmul.f32 %v10654_v8, %v1230_v1  ;;  %vm1234_vm2 = vmor %vm1232_vm1, %vm1233_vm14  ;;  %v1378_v54 = vmul.f32 %v10438_v50, %v1361_v4  ;;  %vm1735_vm9 = vcmask 261120  }
 0x2b1   : > { %v1240_v23 = vsub.f32 1.5, %v1239_v42  ;;  %v1377_v47 = vmul.f32 %v10438_v50, %v1360_v12  ;;  %vm3344_vm10 = vcmask 785408  }
 0x2b2   : > { %v1383_v14 = vadd.f32 %v10460_v17, %v1366_v45  ;;  %1668 = vmatpush.bf16.msrb.mxu2 %v7508_v48  ;;  %v1235_v49 = vsel %vm1234_vm2, %v10654_v8, %v1231_v2  ;;  %v1395_v59 = vadd.f32 %v10460_v17, %v1378_v54 }
 0x2b3   : > { %v1241_v13 = vmul.f32 %v8553_v5, %v1240_v23  ;;  %v1350_v3 = vmul.f32 %v1235_v49, %v10261_v57 }
 0x2b4   : > { %v1429_v37 = vpack.c.bf16 %v1383_v14, %v1382_v21 }
 0x2b5   : > { %v1245_v30 = vsel %vm1244_vm15, %v8553_v5, %v1241_v13  ;;  %v1394_v5 = vadd.f32 %v10460_v17, %v1377_v47  ;;  %v1367_v7 = vmul.f32 %v10438_v50, %v1350_v3 }
 0x2b6   : > { %1669 = vmatpush.bf16.msrb.mxu2 %v7496_v25  ;;  %v1351_v38 = vmul.f32 %v1245_v30, %v10267_v36 }
 0x2b7   : > { %1577 = vmatmul.bf16.gmra.mxu0 %v1429_v37  ;;  %1626 = vmatmul.bf16.gmra.mxu1 %v1429_v37  ;;  %v10742_v8 = vpack.c.bf16 %v1395_v59, %v1394_v5  ;;  %v1384_v36 = vadd.f32 %v10460_v17, %v1367_v7 }
 0x2b8   : > { %v1368_v32 = vmul.f32 %v10438_v50, %v1351_v38 }
 0x2ba   : > { %v1385_v40 = vadd.f32 %v10460_v17, %v1368_v32 }
 0x2bc   : > { %v1430_v44 = vpack.c.bf16 %v1385_v40, %v1384_v36 }
 0x2bf   : > { %1651 = vmatmul.bf16.gmra.mxu3 %v10702_v6 }
 0x2c0   : > { %1607 = vmatmul.bf16.gmra.mxu2 %v10742_v8 }
 0x2c7   : > { %1582 = vmatmul.bf16.gmra.mxu0 %v1430_v44  ;;  %1631 = vmatmul.bf16.gmra.mxu1 %v1430_v44 }
 0x2cf   : > { %1656 = vmatmul.bf16.gmra.mxu3 %v10742_v8 }
 0x2d0   : > { %1670 = vmatmul.bf16.vlgmr.msrb.gmra.mxu2 %v10642_v18 }
 0x2e0   : > { %1675 = vmatmul.bf16.gmra.mxu2 %v1429_v37 }
 0x2ea   : > { %v1135_v57 = vpop.xlane.xlu0 %1134 }
 0x2eb   : > { %v1160_v43 = vmul.f32 %v1135_v57, %v10171_v62 }
 0x2ed   : > { %v1176_v10 = vadd.f32 1e-05, %v1160_v43 }
 0x2ef   : > { %8554 = vrsqrt.f32 %v1176_v10  ;;  %vm1252_vm4 = vweird.f32 %v1176_v10 }
 0x2f0   : > { %1680 = vmatmul.bf16.gmra.mxu2 %v1430_v44 }
 0x2f2   : > { %v1137_v56 = vpop.xlane.xlu2 %1136 }
 0x2f3   : > { %v1161_v46 = vmul.f32 %v1137_v56, %v10171_v62 }
 0x2f5   : > { %v8555_v29 = vpop.eup %8554  ;;  %v1177_v41 = vadd.f32 1e-05, %v1161_v46 }
 0x2f6   : > { %v1247_v33 = vmul.f32 %v8555_v29, %v1176_v10  ;;  %vm1253_vm3 = vweird.f32 %v8555_v29 }
 0x2f7   : > { %8556 = vrsqrt.f32 %v1177_v41  ;;  %vm1254_vm5 = vmor %vm1252_vm4, %vm1253_vm3  ;;  %vm1262_vm7 = vweird.f32 %v1177_v41 }
 0x2f8   : > { %v1248_v1 = vmul.f32 %v8555_v29, %v1247_v33 }
 0x2fa   : > { %v1249_v42 = vmul.f32 0.5, %v1248_v1 }
 0x2fc   : > { %v1250_v48 = vsub.f32 1.5, %v1249_v42 }
 0x2fd   : > { %v8557_v31 = vpop.eup %8556 }
 0x2fe   : > { %v1251_v45 = vmul.f32 %v8555_v29, %v1250_v48  ;;  %v1257_v18 = vmul.f32 %v8557_v31, %v1177_v41  ;;  %vm1263_vm6 = vweird.f32 %v8557_v31 }
 0x2ff   : > { %vm1264_vm8 = vmor %vm1262_vm7, %vm1263_vm6 }
 0x300   : > { %v1258_v16 = vmul.f32 %v8557_v31, %v1257_v18  ;;  %v1255_v58 = vsel %vm1254_vm5, %v8555_v29, %v1251_v45 }
 0x301   : > { %v1352_v23 = vmul.f32 %v1255_v58, %v10313_v55 }
 0x302   : > { %v1259_v63 = vmul.f32 0.5, %v1258_v16 }
 0x303   : > { %v1369_v2 = vmul.f32 %v10438_v50, %v1352_v23 }
 0x304   : > { %v1260_v35 = vsub.f32 1.5, %v1259_v63 }
 0x305   : > { %v1386_v25 = vadd.f32 %v10460_v17, %v1369_v2 }
 0x306   : > { %v1261_v53 = vmul.f32 %v8557_v31, %v1260_v35 }
 0x308   : > { %v1265_v21 = vsel %vm1264_vm8, %v8557_v31, %v1261_v53 }
 0x309   : > { %v1353_v14 = vmul.f32 %v1265_v21, %v10350_v34 }
 0x30b   : > { %v1370_v13 = vmul.f32 %v10438_v50, %v1353_v14 }
 0x30d   : > { %v1387_v37 = vadd.f32 %v10460_v17, %v1370_v13 }
 0x30f   : > { %v1431_v4 = vpack.c.bf16 %v1387_v37, %v1386_v25 }
 0x311   : > { %1587 = vmatmul.bf16.gmra.mxu0 %v1431_v4  ;;  %1636 = vmatmul.bf16.gmra.mxu1 %v1431_v4 }
 0x312   : > { %1685 = vmatmul.bf16.gmra.mxu2 %v1431_v4 }
 0x321   : > { %1592 = vmatmul.bf16.gmra.mxu0 %v10577_v11 }
 0x322   : > { %1690 = vmatmul.bf16.gmra.mxu2 %v10577_v11  ;;  %v1642_v55 = vpop.f32.mrf.mxu3 }
 0x323   : > { %v1598_v34 = vpop.f32.mrf.mxu2 }
 0x324   : > { %v1573_v30 = vpop.f32.mrf.mxu0  ;;  %v1622_v12 = vpop.f32.mrf.mxu1 }
 0x32a   : > { %v1644_v49 = vpop.f32.mrf.mxu3 }
 0x32b   : > { %v1600_v59 = vpop.f32.mrf.mxu2  ;;  %v1723_v44 = vpack.c.bf16 %v1644_v49, %v1642_v55 }
 0x32c   : > { %v1575_v54 = vpop.f32.mrf.mxu0  ;;  %v1624_v38 = vpop.f32.mrf.mxu1  ;;  %v10776_v36 = vpack.c.bf16 %v1600_v59, %v1598_v34 }
 0x32d   : > { %v10759_v47 = vpack.c.bf16 %v1575_v54, %v1573_v30  ;;  %v10761_v3 = vpack.c.bf16 %v1624_v38, %v1622_v12  ;;  %v1773_v37 = vsel %vm1735_vm9, %v1723_v44, 0 }
 0x32f   : > { %2428 = vrot.lane.b32.xlu0 %v10761_v3, %s9469_s29  ;;  %2066 = vrot.lane.b32.xlu1 %v10761_v3, %s9472_s17 }
 0x330   : > { %2042 = vrot.lane.b32.xlu2 %v10759_v47, %s9472_s17 }
 0x332   : > { %1695 = vmatmul.bf16.gmra.mxu2 %v10620_v9  ;;  %v1647_v11 = vpop.f32.mrf.mxu3 }
 0x333   : > { %v1603_v5 = vpop.f32.mrf.mxu2 }
 0x334   : > { %v1578_v32 = vpop.f32.mrf.mxu0  ;;  %v1627_v40 = vpop.f32.mrf.mxu1 }
 0x337   : > { %2782 = vrot.lane.b32.xlu1 %v10761_v3, %s9473_s26  ;;  %2766 = vrot.lane.b32.xlu0 %v10759_v47, %s9473_s26 }
 0x338   : > { %2412 = vrot.lane.b32.xlu2 %v10759_v47, %s9469_s29 }
 0x33a   : > { %v1649_v7 = vpop.f32.mrf.mxu3 }
 0x33b   : > { %v1605_v57 = vpop.f32.mrf.mxu2  ;;  %v1724_v33 = vpack.c.bf16 %v1649_v7, %v1647_v11 }
 0x33c   : > { %v1580_v9 = vpop.f32.mrf.mxu0  ;;  %v1629_v56 = vpop.f32.mrf.mxu1  ;;  %v10822_v14 = vpack.c.bf16 %v1605_v57, %v1603_v5 }
 0x33d   : > { %v10783_v10 = vpack.c.bf16 %v1580_v9, %v1578_v32  ;;  %v10791_v1 = vpack.c.bf16 %v1629_v56, %v1627_v40  ;;  %v1776_v2 = vsel %vm1735_vm9, %v1724_v33, 0 }
 0x33f   : > { %2422 = vrot.lane.b32.xlu1 %v10776_v36, %s9469_s29  ;;  %2074 = vrot.lane.b32.xlu0 %v1723_v44, %s9472_s17 }
 0x340   : > { %2436 = vrot.lane.b32.xlu2 %v1723_v44, %s9469_s29 }
 0x342   : > { %1700 = vmatmul.bf16.gmra.mxu2 %v10702_v6  ;;  %v1652_v43 = vpop.f32.mrf.mxu3 }
 0x343   : > { %v1608_v46 = vpop.f32.mrf.mxu2 }
 0x344   : > { %v1583_v29 = vpop.f32.mrf.mxu0  ;;  %v1632_v6 = vpop.f32.mrf.mxu1 }
 0x347   : > { %2052 = vrot.lane.b32.xlu0 %v10776_v36, %s9472_s17  ;;  %2414 = vrot.lane.b32.xlu1 %v10783_v10, %s9469_s29 }
 0x348   : > { %2776 = vrot.lane.b32.xlu2 %v10776_v36, %s9473_s26 }
 0x34a   : > { %v1654_v41 = vpop.f32.mrf.mxu3 }
 0x34b   : > { %v1610_v42 = vpop.f32.mrf.mxu2  ;;  %v1725_v23 = vpack.c.bf16 %v1654_v41, %v1652_v43 }
 0x34c   : > { %v1585_v48 = vpop.f32.mrf.mxu0  ;;  %v1634_v18 = vpop.f32.mrf.mxu1  ;;  %v10830_v25 = vpack.c.bf16 %v1610_v42, %v1608_v46 }
 0x34d   : > { %v10798_v45 = vpack.c.bf16 %v1585_v48, %v1583_v29  ;;  %v1779_v21 = vsel %vm1735_vm9, %v1725_v23, 0 }
 0x34f   : > { %2790 = vrot.lane.b32.xlu0 %v1723_v44, %s9473_s26  ;;  %2792 = vrot.lane.b32.xlu1 %v1724_v33, %s9473_s26 }
 0x350   : > { %2784 = vrot.lane.b32.xlu2 %v10791_v1, %s9473_s26 }
 0x352   : > { %1705 = vmatmul.bf16.gmra.mxu2 %v10742_v8  ;;  %v1657_v31 = vpop.f32.mrf.mxu3  ;;  %v1721_v8 = vpack.c.bf16 %v1634_v18, %v1632_v6  ;;  %v1764_v6 = vsel %vm1735_vm9, %v10791_v1, 0 }
 0x353   : > { %v10806_v58 = vpop.f32.mrf.mxu2 }
 0x354   : > { %v1767_v43 = vsel %vm1735_vm9, %v1721_v8, 0 }
 0x357   : > { %2068 = vrot.lane.b32.xlu0 %v10791_v1, %s9472_s17  ;;  %2046 = vrot.lane.b32.xlu1 %v10798_v45, %s9472_s17 }
 0x358   : > { %2768 = vrot.lane.b32.xlu2 %v10783_v10, %s9473_s26 }
 0x35a   : > { %v1659_v16 = vpop.f32.mrf.mxu3 }
 0x35b   : > { %v10808_v63 = vpack.c.bf16 %v1659_v16, %v1657_v31  ;;  %v1673_v53 = vpop.f32.mrf.mxu2 }
 0x35c   : > { %v10875_v29 = vpack.c.bf16 %v1673_v53, %v10806_v58 }
 0x35d   : > { %v1782_v35 = vsel %vm1735_vm9, %v10808_v63, 0 }
 0x35e   : > { %1784 = vmatpush.bf16.xpose.msrb.mxu3 %v1782_v35 }
 0x35f   : > { %2044 = vrot.lane.b32.xlu0 %v10783_v10, %s9472_s17  ;;  %2432 = vrot.lane.b32.xlu1 %v1721_v8, %s9469_s29 }
 0x360   : > { %2076 = vrot.lane.b32.xlu2 %v1724_v33, %s9472_s17 }
 0x363   : > { %v1676_v13 = vpop.f32.mrf.mxu2 }
 0x366   : > { %1785 = vmatpush.bf16.xpose.msrb.mxu3 %v1779_v21 }
 0x367   : > { %2430 = vrot.lane.b32.xlu0 %v10791_v1, %s9469_s29  ;;  %2416 = vrot.lane.b32.xlu1 %v10798_v45, %s9469_s29  ;;  %v1761_v1 = vsel %vm1735_vm9, %v10761_v3, 0 }
 0x368   : > { %2438 = vrot.lane.b32.xlu2 %v1724_v33, %s9469_s29 }
 0x36b   : > { %v1678_v4 = vpop.f32.mrf.mxu2 }
 0x36c   : > { %v10891_v18 = vpack.c.bf16 %v1678_v4, %v1676_v13 }
 0x36e   : > { %1786 = vmatpush.bf16.xpose.msrb.mxu3 %v1776_v2 }
 0x36f   : > { %2424 = vrot.lane.b32.xlu0 %v10822_v14, %s9469_s29  ;;  %2794 = vrot.lane.b32.xlu1 %v1725_v23, %s9473_s26 }
 0x370   : > { %2054 = vrot.lane.b32.xlu2 %v10822_v14, %s9472_s17 }
 0x373   : > { %v1681_v55 = vpop.f32.mrf.mxu2 }
 0x376   : > { %1787 = vmatpush.bf16.xpose.msrb.mxu3 %v1773_v37 }
 0x377   : > { %2778 = vrot.lane.b32.xlu0 %v10822_v14, %s9473_s26  ;;  %2056 = vrot.lane.b32.xlu1 %v10830_v25, %s9472_s17 }
 0x378   : > { %2070 = vrot.lane.b32.xlu2 %v1721_v8, %s9472_s17 }
 0x37b   : > { %v1683_v12 = vpop.f32.mrf.mxu2 }
 0x37c   : > { %v1729_v13 = vpack.c.bf16 %v1683_v12, %v1681_v55 }
 0x37f   : > { %2770 = vrot.lane.b32.xlu0 %v10798_v45, %s9473_s26  ;;  %2780 = vrot.lane.b32.xlu1 %v10830_v25, %s9473_s26 }
 0x380   : > { %2786 = vrot.lane.b32.xlu2 %v1721_v8, %s9473_s26 }
 0x387   : > { %2078 = vrot.lane.b32.xlu0 %v1725_v23, %s9472_s17 }
 0x388   : > { %2426 = vrot.lane.b32.xlu2 %v10830_v25, %s9469_s29 }
 0x38a   : > { %v10846_v30 = vpop.permute.xlu2 %2042 }
 0x38e   : > { %v1588_v34 = vpop.f32.mrf.mxu0  ;;  %v1637_v49 = vpop.f32.mrf.mxu1 }
 0x38f   : > { %2440 = vrot.lane.b32.xlu0 %v1725_v23, %s9469_s29 }
 0x392   : > { %v10849_v54 = vpop.permute.xlu2 %2412 }
 0x395   : > { %v10851_v38 = vpop.f32.mrf.mxu2 }
 0x396   : > { %v1590_v59 = vpop.f32.mrf.mxu0  ;;  %v1639_v11 = vpop.f32.mrf.mxu1 }
 0x397   : > { %v10853_v32 = vpack.c.bf16 %v1590_v59, %v1588_v34  ;;  %v1722_v5 = vpack.c.bf16 %v1639_v11, %v1637_v49 }
 0x399   : > { %2788 = vrot.lane.b32.xlu0 %v1722_v5, %s9473_s26  ;;  %2072 = vrot.lane.b32.xlu1 %v1722_v5, %s9472_s17  ;;  %v1770_v7 = vsel %vm1735_vm9, %v1722_v5, 0 }
 0x39a   : > { %v10858_v40 = vpop.permute.xlu2 %2436  ;;  %2048 = vrot.lane.b32.xlu2 %v10853_v32, %s9472_s17  ;;  %1788 = vmatpush.bf16.xpose.msrb.mxu3 %v1770_v7 }
 0x39d   : > { %v1688_v44 = vpop.f32.mrf.mxu2 }
 0x39e   : > { %v1593_v48 = vpop.f32.mrf.mxu0  ;;  %v1730_v11 = vpack.c.bf16 %v1688_v44, %v10851_v38 }
 0x3a1   : > { %v10862_v57 = vpop.permute.xlu1 %2066  ;;  %2434 = vrot.lane.b32.xlu1 %v1722_v5, %s9469_s29  ;;  %2418 = vrot.lane.b32.xlu0 %v10853_v32, %s9469_s29  ;;  %v10867_v9 = vpop.permute.xlu0 %2428 }
 0x3a2   : > { %v10870_v56 = vpop.permute.xlu2 %2776  ;;  %2796 = vrot.lane.b32.xlu2 %v10808_v63, %s9473_s26  ;;  %1789 = vmatpush.bf16.xpose.msrb.mxu3 %v1767_v43 }
 0x3a5   : > { %v1691_v46 = vpop.f32.mrf.mxu2 }
 0x3a6   : > { %v1595_v35 = vpop.f32.mrf.mxu0 }
 0x3a7   : > { %v10907_v53 = vpack.c.bf16 %v1595_v35, %v1593_v48 }
 0x3a9   : > { %v10877_v41 = vpop.permute.xlu1 %2782  ;;  %2080 = vrot.lane.b32.xlu1 %v10808_v63, %s9472_s17  ;;  %2772 = vrot.lane.b32.xlu0 %v10853_v32, %s9473_s26  ;;  %v10883_v33 = vpop.permute.xlu0 %2766 }
 0x3aa   : > { %v10887_v42 = vpop.permute.xlu2 %2784  ;;  %2661 = vrot.lane.b32.xlu2 %v10875_v29, %s9469_s29  ;;  %1790 = vmatpush.bf16.xpose.msrb.mxu3 %v1764_v6 }
 0x3ad   : > { %v1693_v31 = vpop.f32.mrf.mxu2 }
 0x3ae   : > { %v1731_v49 = vpack.c.bf16 %v1693_v31, %v1691_v46 }
 0x3b1   : > { %2307 = vrot.lane.b32.xlu1 %v10875_v29, %s9472_s17  ;;  %2442 = vrot.lane.b32.xlu0 %v10808_v63, %s9469_s29  ;;  %v10897_v16 = vpop.permute.xlu0 %2074  ;;  %v10905_v8 = vpop.permute.xlu1 %2422 }
 0x3b2   : > { %v10901_v58 = vpop.permute.xlu2 %2768  ;;  %2309 = vrot.lane.b32.xlu2 %v10891_v18, %s9472_s17  ;;  %1791 = vmatpush.bf16.xpose.msrb.mxu3 %v1761_v1 }
 0x3b5   : > { %v1696_v23 = vpop.f32.mrf.mxu2 }
 0x3b9   : > { %3015 = vrot.lane.b32.xlu1 %v10875_v29, %s9473_s26  ;;  %7581 = vmatmul.msk.bf16.vlgmr.msrb.gmra.mxu3 %vm1735_vm9, %v10759_v47  ;;  %v10913_v63 = vpop.permute.xlu0 %2052  ;;  %v10921_v21 = vpop.permute.xlu1 %2414 }
 0x3ba   : > { %v10915_v3 = vpop.permute.xlu2 %2076  ;;  %3017 = vrot.lane.b32.xlu2 %v10891_v18, %s9473_s26  ;;  %2774 = vrot.lane.b32.xlu0 %v10907_v53, %s9473_s26 }
 0x3bd   : > { %v1698_v2 = vpop.f32.mrf.mxu2 }
 0x3be   : > { %v1732_v48 = vpack.c.bf16 %v1698_v2, %v1696_v23 }
 0x3c1   : > { %2050 = vrot.lane.b32.xlu1 %v10907_v53, %s9472_s17  ;;  %v10925_v37 = vpop.permute.xlu0 %2790  ;;  %v10932_v34 = vpop.permute.xlu1 %2792 }
 0x3c2   : > { %2663 = vrot.lane.b32.xlu2 %v10891_v18, %s9469_s29  ;;  %2311 = vrot.lane.b32.xlu0 %v1729_v13, %s9472_s17  ;;  %v10930_v47 = vpop.permute.xlu2 %2438 }
 0x3c5   : > { %v1701_v4 = vpop.f32.mrf.mxu2 }
 0x3c9   : > { %7582 = vmatmul.msk.bf16.gmra.mxu3 %vm1735_vm9, %v10783_v10  ;;  %2420 = vrot.lane.b32.xlu1 %v10907_v53, %s9469_s29  ;;  %v10938_v55 = vpop.permute.xlu0 %2068  ;;  %v10945_v5 = vpop.permute.xlu1 %2046 }
 0x3ca   : > { %2315 = vrot.lane.b32.xlu2 %v1731_v49, %s9472_s17  ;;  %3019 = vrot.lane.b32.xlu0 %v1729_v13, %s9473_s26  ;;  %v10942_v59 = vpop.permute.xlu2 %2054 }
 0x3cd   : > { %v1703_v12 = vpop.f32.mrf.mxu2 }
 0x3ce   : > { %v1733_v31 = vpack.c.bf16 %v1703_v12, %v1701_v4 }
 0x3d1   : > { %3021 = vrot.lane.b32.xlu1 %v1730_v11, %s9473_s26  ;;  %v10948_v7 = vpop.permute.xlu0 %2044  ;;  %v10961_v38 = vpop.permute.xlu1 %2432 }
 0x3d2   : > { %3023 = vrot.lane.b32.xlu2 %v1731_v49, %s9473_s26  ;;  %2665 = vrot.lane.b32.xlu0 %v1729_v13, %s9469_s29  ;;  %v10952_v43 = vpop.permute.xlu2 %2070  ;;  %v2475_v15 = vsel %vm1735_vm9, %v10961_v38, 0 }
 0x3d5   : > { %v1706_v10 = vpop.f32.mrf.mxu2 }
 0x3d9   : > { %7583 = vmatmul.msk.bf16.gmra.mxu3 %vm1735_vm9, %v10798_v45  ;;  %2667 = vrot.lane.b32.xlu1 %v1730_v11, %s9469_s29  ;;  %v10957_v46 = vpop.permute.xlu0 %2430  ;;  %v10970_v35 = vpop.permute.xlu1 %2416 }
 0x3da   : > { %2669 = vrot.lane.b32.xlu2 %v1731_v49, %s9469_s29  ;;  %2313 = vrot.lane.b32.xlu0 %v1730_v11, %s9472_s17  ;;  %v10966_v45 = vpop.permute.xlu2 %2786  ;;  %v2472_v39 = vsel %vm1735_vm9, %v10957_v46, 0  ;;  %v2469_v46 = vsel %vm1735_vm9, %v10867_v9, 0 }
 0x3dd   : > { %v1708_v44 = vpop.f32.mrf.mxu2 }
 0x3de   : > { %v1734_v6 = vpack.c.bf16 %v1708_v44, %v1706_v10 }
 0x3e0   : > { %1953 = vmatpush.bf16.msrb.mxu0 %v1734_v6 }
 0x3e1   : > { %2317 = vrot.lane.b32.xlu1 %v1732_v48, %s9472_s17  ;;  %v10964_v1 = vpop.permute.xlu0 %2424  ;;  %v10981_v4 = vpop.permute.xlu1 %2794 }
 0x3e2   : > { %3025 = vrot.lane.b32.xlu2 %v1732_v48, %s9473_s26  ;;  %3027 = vrot.lane.b32.xlu0 %v1733_v31, %s9473_s26  ;;  %v10979_v2 = vpop.permute.xlu2 %2426 }
 0x3e4   : > { %1954 = vmatpush.bf16.msrb.mxu0 %v1733_v31 }
 0x3e8   : > { %1955 = vmatpush.bf16.msrb.mxu0 %v1732_v48 }
 0x3e9   : > { %7584 = vmatmul.msk.bf16.gmra.mxu3 %vm1735_vm9, %v10853_v32  ;;  %3029 = vrot.lane.b32.xlu1 %v1734_v6, %s9473_s26  ;;  %v10975_v23 = vpop.permute.xlu0 %2778  ;;  %v10989_v10 = vpop.permute.xlu1 %2056 }
 0x3ea   : > { %2671 = vrot.lane.b32.xlu2 %v1732_v48, %s9469_s29  ;;  %2321 = vrot.lane.b32.xlu0 %v1734_v6, %s9472_s17 }
 0x3ec   : > { %1956 = vmatpush.bf16.msrb.mxu0 %v1731_v49 }
 0x3f0   : > { %1957 = vmatpush.bf16.msrb.mxu0 %v1730_v11 }
 0x3f1   : > { %v10983_v12 = vpop.permute.xlu0 %2770  ;;  %v10998_v11 = vpop.permute.xlu1 %2780 }
 0x3f2   : > { %2319 = vrot.lane.b32.xlu2 %v1733_v31, %s9472_s17 }
 0x3f4   : > { %1958 = vmatpush.bf16.msrb.mxu0 %v1729_v13  ;;  %v10986_v32 = vpop.permute.xlu2 %2048 }
 0x3f8   : > { %1959 = vmatpush.bf16.msrb.mxu0 %v10891_v18 }
 0x3f9   : > { %7585 = vmatmul.msk.bf16.gmra.mxu3 %vm1735_vm9, %v10907_v53  ;;  %v2079_v44 = vpop.permute.xlu0 %2078 }
 0x3fa   : > { %2673 = vrot.lane.b32.xlu2 %v1733_v31, %s9469_s29  ;;  %v2125_v61 = vsel %vm1735_vm9, %v2079_v44, 0  ;;  %v2484_v44 = vsel %vm1735_vm9, %v10930_v47, 0 }
 0x3fc   : > { %1960 = vmatpush.bf16.msrb.mxu0 %v10875_v29  ;;  %v10995_v49 = vpop.permute.xlu2 %2796 }
 0x401   : > { %v2441_v13 = vpop.permute.xlu0 %2440 }
 0x402   : > { %2675 = vrot.lane.b32.xlu2 %v1734_v6, %s9469_s29 }
 0x404   : > { %v11000_v48 = vpop.permute.xlu2 %2661 }
 0x409   : > { %7586 = vmatmul.msk.bf16.gmra.mxu3 %vm1735_vm9, %v10776_v36 }
 0x40b   : > { %v2073_v18 = vpop.permute.xlu1 %2072  ;;  %v11004_v17 = vpop.permute.xlu0 %2788 }
 0x40c   : > { %v11006_v53 = vpop.permute.xlu2 %2309 }
 0x413   : > { %v2435_v31 = vpop.permute.xlu1 %2434  ;;  %v11008_v50 = vpop.permute.xlu0 %2418 }
 0x414   : > { %v11010_v29 = vpop.permute.xlu2 %3017 }
 0x419   : > { %7587 = vmatmul.msk.bf16.gmra.mxu3 %vm1735_vm9, %v10822_v14 }
 0x41b   : > { %v2081_v6 = vpop.permute.xlu1 %2080  ;;  %v11014_v19 = vpop.permute.xlu0 %2772 }
 0x41c   : > { %v11016_v27 = vpop.permute.xlu2 %2663  ;;  %v2128_v36 = vsel %vm1735_vm9, %v2081_v6, 0  ;;  %v2122_v6 = vsel %vm1735_vm9, %v10915_v3, 0 }
 0x41d   : > { %2130 = vmatpush.bf16.xpose.msrb.mxu1 %v2128_v36  ;;  %v2487_v36 = vsel %vm1735_vm9, %v2441_v13, 0 }
 0x423   : > { %v2443_v62 = vpop.permute.xlu0 %2442  ;;  %v11023_v28 = vpop.permute.xlu1 %2307 }
 0x424   : > { %v11019_v51 = vpop.permute.xlu2 %2315  ;;  %v2490_v20 = vsel %vm1735_vm9, %v2443_v62, 0 }
 0x425   : > { %2131 = vmatpush.bf16.xpose.msrb.mxu1 %v2125_v61  ;;  %2492 = vmatpush.bf16.xpose.msra.mxu3 %v2490_v20 }
 0x429   : > { %7588 = vmatmul.msk.bf16.gmra.mxu3 %vm1735_vm9, %v10830_v25  ;;  %v2119_v25 = vsel %vm1735_vm9, %v10897_v16, 0 }
 0x42b   : > { %v11034_v62 = vpop.permute.xlu1 %3015 }
 0x42c   : > { %v11027_v14 = vpop.permute.xlu2 %3023  ;;  %v11029_v22 = vpop.permute.xlu0 %2774 }
 0x42d   : > { %2132 = vmatpush.bf16.xpose.msrb.mxu1 %v2122_v6  ;;  %2493 = vmatpush.bf16.xpose.msra.mxu3 %v2487_v36  ;;  %v2116_v6 = vsel %vm1735_vm9, %v2073_v18, 0  ;;  %v2481_v36 = vsel %vm1735_vm9, %v10858_v40, 0 }
 0x433   : > { %v11044_v24 = vpop.permute.xlu1 %2050 }
 0x434   : > { %v11036_v61 = vpop.permute.xlu2 %2669  ;;  %v11038_v20 = vpop.permute.xlu0 %2311 }
 0x435   : > { %2133 = vmatpush.bf16.xpose.msrb.mxu1 %v2119_v25  ;;  %2494 = vmatpush.bf16.xpose.msra.mxu3 %v2484_v44  ;;  %v2113_v25 = vsel %vm1735_vm9, %v10952_v43, 0  ;;  %v2478_v44 = vsel %vm1735_vm9, %v2435_v31, 0 }
 0x43b   : > { %v11061_v18 = vpop.permute.xlu1 %2420 }
 0x43c   : > { %v11046_v3 = vpop.permute.xlu2 %3025  ;;  %v11048_v13 = vpop.permute.xlu0 %3019 }
 0x43d   : > { %v11053_v0 = vpop.f32.mrf.mxu3  ;;  %2134 = vmatpush.bf16.xpose.msrb.mxu1 %v2116_v6  ;;  %2495 = vmatpush.bf16.xpose.msra.mxu3 %v2481_v36  ;;  %v2110_v36 = vsel %vm1735_vm9, %v10938_v55, 0  ;;  %v2844_v55 = vsel %vm1735_vm9, %v10995_v49, 0 }
 0x43e   : > { %1833 = vmax.xlane.f32.xlu0 %v11053_v0 }
 0x443   : > { %v11071_v43 = vpop.permute.xlu1 %3021 }
 0x444   : > { %v2672_v16 = vpop.permute.xlu2 %2671  ;;  %v2666_v47 = vpop.permute.xlu0 %2665 }
 0x445   : > { %v11059_v60 = vpop.f32.mrf.mxu3  ;;  %2135 = vmatpush.bf16.xpose.msrb.mxu1 %v2113_v25  ;;  %2496 = vmatpush.bf16.xpose.msra.mxu3 %v2478_v44  ;;  %v2107_v44 = vsel %vm1735_vm9, %v10862_v57, 0 }
 0x446   : > { %1835 = vmax.xlane.f32.xlu1 %v11059_v60 }
 0x44c   : > { %v2320_v40 = vpop.permute.xlu2 %2319  ;;  %v2314_v6 = vpop.permute.xlu0 %2313 }
 0x44d   : > { %v11068_v52 = vpop.f32.mrf.mxu3  ;;  %2136 = vmatpush.bf16.xpose.msrb.mxu1 %v2110_v36  ;;  %2497 = vmatpush.bf16.xpose.msra.mxu3 %v2475_v15  ;;  %v2668_v15 = vpop.permute.xlu1 %2667 }
 0x44e   : > { %1837 = vmax.xlane.f32.xlu1 %v11068_v52 }
 0x454   : > { %v2674_v31 = vpop.permute.xlu2 %2673  ;;  %v3028_v25 = vpop.permute.xlu0 %3027 }
 0x455   : > { %v11079_v38 = vpop.f32.mrf.mxu3  ;;  %2137 = vmatpush.bf16.xpose.msrb.mxu1 %v2107_v44  ;;  %2498 = vmatpush.bf16.xpose.msra.mxu3 %v2472_v39  ;;  %v2841_v39 = vsel %vm1735_vm9, %v10981_v4, 0  ;;  %v2318_v49 = vpop.permute.xlu1 %2317 }
 0x456   : > { %1839 = vmax.xlane.f32.xlu0 %v11079_v38 }
 0x45c   : > { %v2676_v36 = vpop.permute.xlu2 %2675  ;;  %v2322_v26 = vpop.permute.xlu0 %2321  ;;  %7589 = vmatmul.msk.bf16.vlgmr.msrb.gmra.mxu1 %vm1735_vm9, %v10846_v30 }
 0x45d   : > { %2846 = vmatpush.bf16.xpose.msra.mxu1 %v2844_v55  ;;  %v11084_v57 = vpop.f32.mrf.mxu3  ;;  %2331 = vmatpush.bf16.msra.mxu2 %v2322_v26  ;;  %v2838_v26 = vsel %vm1735_vm9, %v10932_v34, 0 }
 0x45e   : > { %2685 = vmatpush.bf16.msra.mxu0 %v2676_v36  ;;  %1841 = vmax.xlane.f32.xlu0 %v11084_v57 }
 0x45f   : > { %2499 = vmatpush.bf16.xpose.msra.mxu3 %v2469_v46 }
 0x461   : > { %2332 = vmatpush.bf16.msra.mxu2 %v2320_v40 }
 0x462   : > { %2686 = vmatpush.bf16.msra.mxu0 %v2674_v31 }
 0x465   : > { %2847 = vmatpush.bf16.xpose.msra.mxu1 %v2841_v39  ;;  %v11091_v44 = vpop.f32.mrf.mxu3  ;;  %2333 = vmatpush.bf16.msra.mxu2 %v2318_v49 }
 0x466   : > { %7597 = vmatmul.msk.bf16.vlgmr.msra.gmra.mxu3 %vm1735_vm9, %v10849_v54  ;;  %2687 = vmatpush.bf16.msra.mxu0 %v2672_v16  ;;  %v2835_v54 = vsel %vm1735_vm9, %v10925_v37, 0  ;;  %v3030_v37 = vpop.permute.xlu1 %3029 }
 0x467   : > { %1843 = vmax.xlane.f32.xlu1 %v11091_v44 }
 0x469   : > { %2334 = vmatpush.bf16.msra.mxu2 %v11019_v51  ;;  %v2832_v51 = vsel %vm1735_vm9, %v11004_v17, 0 }
 0x46a   : > { %2688 = vmatpush.bf16.msra.mxu0 %v11036_v61 }
 0x46c   : > { %7590 = vmatmul.msk.bf16.gmra.mxu1 %vm1735_vm9, %v10948_v7 }
 0x46d   : > { %2848 = vmatpush.bf16.xpose.msra.mxu1 %v2838_v26  ;;  %v11102_v30 = vpop.f32.mrf.mxu3  ;;  %2335 = vmatpush.bf16.msra.mxu2 %v2314_v6 }
 0x46e   : > { %2689 = vmatpush.bf16.msra.mxu0 %v2668_v15  ;;  %1845 = vmax.xlane.f32.xlu0 %v11102_v30 }
 0x471   : > { %2336 = vmatpush.bf16.msra.mxu2 %v11038_v20 }
 0x472   : > { %2690 = vmatpush.bf16.msra.mxu0 %v2666_v47 }
 0x475   : > { %2849 = vmatpush.bf16.xpose.msra.mxu1 %v2835_v54  ;;  %v11108_v9 = vpop.f32.mrf.mxu3  ;;  %2337 = vmatpush.bf16.msra.mxu2 %v11006_v53 }
 0x476   : > { %7598 = vmatmul.msk.bf16.gmra.mxu3 %vm1735_vm9, %v10921_v21  ;;  %2691 = vmatpush.bf16.msra.mxu0 %v11016_v27  ;;  %v2829_v27 = vsel %vm1735_vm9, %v10966_v45, 0 }
 0x477   : > { %1847 = vmax.xlane.f32.xlu1 %v11108_v9 }
 0x479   : > { %2338 = vmatpush.bf16.msra.mxu2 %v11023_v28  ;;  %v2826_v28 = vsel %vm1735_vm9, %v10887_v42, 0 }
 0x47a   : > { %2692 = vmatpush.bf16.msra.mxu0 %v11000_v48 }
 0x47c   : > { %7591 = vmatmul.msk.bf16.gmra.mxu1 %vm1735_vm9, %v10945_v5  ;;  %v2823_v5 = vsel %vm1735_vm9, %v10877_v41, 0 }
 0x47d   : > { %2850 = vmatpush.bf16.xpose.msra.mxu1 %v2832_v51  ;;  %3039 = vmatpush.bf16.msrb.mxu2 %v3030_v37  ;;  %v11121_v34 = vpop.f32.mrf.mxu3 }
 0x47e   : > { %1849 = vmax.xlane.f32.xlu2 %v11121_v34 }
 0x481   : > { %3040 = vmatpush.bf16.msrb.mxu2 %v3028_v25 }
 0x485   : > { %2851 = vmatpush.bf16.xpose.msra.mxu1 %v2829_v27  ;;  %3041 = vmatpush.bf16.msrb.mxu2 %v11046_v3  ;;  %v11127_v17 = vpop.f32.mrf.mxu3 }
 0x486   : > { %7599 = vmatmul.msk.bf16.gmra.mxu3 %vm1735_vm9, %v10970_v35  ;;  %1851 = vmax.xlane.f32.xlu0 %v11127_v17 }
 0x489   : > { %3042 = vmatpush.bf16.msrb.mxu2 %v11027_v14 }
 0x48c   : > { %7592 = vmatmul.msk.bf16.gmra.mxu1 %vm1735_vm9, %v10986_v32 }
 0x48d   : > { %2852 = vmatpush.bf16.xpose.msra.mxu1 %v2826_v28  ;;  %3043 = vmatpush.bf16.msrb.mxu2 %v11071_v43  ;;  %v11138_v21 = vpop.f32.mrf.mxu3 }
 0x48e   : > { %1853 = vmax.xlane.f32.xlu0 %v11138_v21 }
 0x491   : > { %3044 = vmatpush.bf16.msrb.mxu2 %v11048_v13 }
 0x495   : > { %2853 = vmatpush.bf16.xpose.msra.mxu1 %v2823_v5  ;;  %3045 = vmatpush.bf16.msrb.mxu2 %v11010_v29  ;;  %v11145_v7 = vpop.f32.mrf.mxu3 }
 0x496   : > { %7600 = vmatmul.msk.bf16.gmra.mxu3 %vm1735_vm9, %v11008_v50  ;;  %1855 = vmax.xlane.f32.xlu0 %v11145_v7 }
 0x499   : > { %3046 = vmatpush.bf16.msrb.mxu2 %v11034_v62 }
 0x49c   : > { %7593 = vmatmul.msk.bf16.gmra.mxu1 %vm1735_vm9, %v11044_v24 }
 0x49d   : > { %v11153_v42 = vpop.f32.mrf.mxu3 }
 0x49e   : > { %1857 = vmax.xlane.f32.xlu0 %v11153_v42 }
 0x4a5   : > { %v11156_v41 = vpop.f32.mrf.mxu3 }
 0x4a6   : > { %7601 = vmatmul.msk.bf16.gmra.mxu3 %vm1735_vm9, %v11061_v18  ;;  %1859 = vmax.xlane.f32.xlu2 %v11156_v41 }
 0x4ac   : > { %7594 = vmatmul.msk.bf16.gmra.mxu1 %vm1735_vm9, %v10913_v63 }
 0x4ad   : > { %v11163_v50 = vpop.f32.mrf.mxu3 }
 0x4b1   : > { %v1834_v45 = vpop.xlane.xlu0 %1833 }
 0x4b2   : > { %v1865_v35 = vsub.f32 %v11053_v0, %v1834_v45 }
 0x4b4   : > { %v1881_v24 = vmul.f32 1.442695, %v1865_v35 }
 0x4b5   : > { %v11166_v4 = vpop.f32.mrf.mxu3 }
 0x4b6   : > { %7602 = vmatmul.msk.bf16.gmra.mxu3 %vm1735_vm9, %v10905_v8  ;;  %8558 = vpow2.f32 %v1881_v24  ;;  %1863 = vmax.xlane.f32.xlu0 %v11166_v4 }
 0x4b9   : > { %v1836_v32 = vpop.xlane.xlu1 %1835 }
 0x4ba   : > { %v1866_v48 = vsub.f32 %v11059_v60, %v1836_v32 }
 0x4bc   : > { %v8559_v53 = vpop.eup %8558  ;;  %v1883_v29 = vmul.f32 1.442695, %v1866_v48  ;;  %7595 = vmatmul.msk.bf16.gmra.mxu1 %vm1735_vm9, %v10942_v59 }
 0x4be   : > { %8560 = vpow2.f32 %v1883_v29  ;;  %1913 = vadd.xlane.f32.xlu0 %v8559_v53 }
 0x4c1   : > { %v1838_v0 = vpop.xlane.xlu1 %1837 }
 0x4c2   : > { %v1867_v14 = vsub.f32 %v11068_v52, %v1838_v0 }
 0x4c4   : > { %v8561_v63 = vpop.eup %8560  ;;  %v1885_v62 = vmul.f32 1.442695, %v1867_v14 }
 0x4c5   : > { %v1945_v8 = vpack.c.bf16 %v8561_v63, %v8559_v53 }
 0x4c6   : > { %7603 = vmatmul.msk.bf16.gmra.mxu3 %vm1735_vm9, %v10964_v1  ;;  %8562 = vpow2.f32 %v1885_v62 }
 0x4c7   : > { %1961 = vmatmul.bf16.vlgmr.msrb.gmra.mxu0 %v1945_v8 }
 0x4c9   : > { %v1840_v61 = vpop.xlane.xlu0 %1839 }
 0x4ca   : > { %v1868_v60 = vsub.f32 %v11079_v38, %v1840_v61 }
 0x4cc   : > { %v1887_v20 = vmul.f32 1.442695, %v1868_v60  ;;  %7596 = vmatmul.msk.bf16.gmra.mxu1 %vm1735_vm9, %v10989_v10  ;;  %v8563_v3 = vpop.eup %8562 }
 0x4ce   : > { %8564 = vpow2.f32 %v1887_v20 }
 0x4d1   : > { %v1842_v59 = vpop.xlane.xlu0 %1841 }
 0x4d2   : > { %v1869_v52 = vsub.f32 %v11084_v57, %v1842_v59 }
 0x4d4   : > { %v11180_v13 = vpop.eup %8564  ;;  %v1889_v16 = vmul.f32 1.442695, %v1869_v52 }
 0x4d5   : > { %v1946_v1 = vpack.c.bf16 %v11180_v13, %v8563_v3 }
 0x4d6   : > { %7604 = vmatmul.msk.bf16.gmra.mxu3 %vm1735_vm9, %v10979_v2  ;;  %8566 = vpow2.f32 %v1889_v16 }
 0x4d7   : > { %1966 = vmatmul.bf16.gmra.mxu0 %v1946_v1 }
 0x4d9   : > { %v11186_v18 = vpop.f32.mrf.mxu1 }
 0x4da   : > { %v1844_v47 = vpop.xlane.xlu1 %1843  ;;  %2179 = vmax.xlane.f32.xlu1 %v11186_v18 }
 0x4db   : > { %v1870_v10 = vsub.f32 %v11091_v44, %v1844_v47 }
 0x4dc   : > { %7605 = vmatmul.msk.bf16.vlgmr.msra.gmra.mxu1 %vm1735_vm9, %v10883_v33  ;;  %v11196_v43 = vpop.eup %8566 }
 0x4dd   : > { %v1891_v40 = vmul.f32 1.442695, %v1870_v10 }
 0x4df   : > { %8568 = vpow2.f32 %v1891_v40 }
 0x4e1   : > { %v11192_v6 = vpop.f32.mrf.mxu1  ;;  %v1846_v2 = vpop.xlane.xlu0 %1845 }
 0x4e2   : > { %1861 = vmax.xlane.f32.xlu1 %v11163_v50  ;;  %2181 = vmax.xlane.f32.xlu2 %v11192_v6  ;;  %v1871_v25 = vsub.f32 %v11102_v30, %v1846_v2 }
 0x4e4   : > { %v1893_v33 = vmul.f32 1.442695, %v1871_v25 }
 0x4e5   : > { %v8569_v31 = vpop.eup %8568 }
 0x4e6   : > { %v1947_v55 = vpack.c.bf16 %v8569_v31, %v11196_v43  ;;  %8570 = vpow2.f32 %v1893_v33 }
 0x4e8   : > { %1971 = vmatmul.bf16.gmra.mxu0 %v1947_v55 }
 0x4e9   : > { %v11200_v38 = vpop.f32.mrf.mxu3  ;;  %v11203_v36 = vpop.f32.mrf.mxu1 }
 0x4ea   : > { %v1848_v15 = vpop.xlane.xlu1 %1847  ;;  %2541 = vmax.xlane.f32.xlu0 %v11200_v38  ;;  %1915 = vadd.xlane.f32.xlu1 %v8561_v63 }
 0x4eb   : > { %v1872_v57 = vsub.f32 %v11108_v9, %v1848_v15  ;;  %2183 = vmax.xlane.f32.xlu2 %v11203_v36 }
 0x4ec   : > { %7606 = vmatmul.msk.bf16.gmra.mxu1 %vm1735_vm9, %v10901_v58  ;;  %v8571_v26 = vpop.eup %8570 }
 0x4ed   : > { %v1895_v46 = vmul.f32 1.442695, %v1872_v57 }
 0x4ef   : > { %8572 = vpow2.f32 %v1895_v46 }
 0x4f1   : > { %v11209_v39 = vpop.f32.mrf.mxu3  ;;  %v11211_v49 = vpop.f32.mrf.mxu1 }
 0x4f2   : > { %v1850_v44 = vpop.xlane.xlu2 %1849  ;;  %2543 = vmax.xlane.f32.xlu1 %v11209_v39  ;;  %2185 = vmax.xlane.f32.xlu0 %v11211_v49 }
 0x4f3   : > { %v1873_v54 = vsub.f32 %v11121_v34, %v1850_v44 }
 0x4f5   : > { %v11215_v30 = vpop.eup %8572  ;;  %v1897_v51 = vmul.f32 1.442695, %v1873_v54 }
 0x4f6   : > { %v1948_v9 = vpack.c.bf16 %v11215_v30, %v8571_v26 }
 0x4f7   : > { %8574 = vpow2.f32 %v1897_v51 }
 0x4f8   : > { %1976 = vmatmul.bf16.gmra.mxu0 %v1948_v9 }
 0x4f9   : > { %v11219_v58 = vpop.f32.mrf.mxu3  ;;  %v1852_v37 = vpop.xlane.xlu0 %1851 }
 0x4fa   : > { %v11221_v27 = vpop.f32.mrf.mxu1  ;;  %v1874_v28 = vsub.f32 %v11127_v17, %v1852_v37  ;;  %2545 = vmax.xlane.f32.xlu1 %v11219_v58  ;;  %1917 = vadd.xlane.f32.xlu0 %v8563_v3 }
 0x4fb   : > { %2187 = vmax.xlane.f32.xlu2 %v11221_v27 }
 0x4fc   : > { %v1899_v5 = vmul.f32 1.442695, %v1874_v28  ;;  %7607 = vmatmul.msk.bf16.gmra.mxu1 %vm1735_vm9, %v10983_v12 }
 0x4fd   : > { %v11233_v17 = vpop.eup %8574 }
 0x4fe   : > { %8576 = vpow2.f32 %v1899_v5 }
 0x501   : > { %v11228_v34 = vpop.f32.mrf.mxu3  ;;  %v1854_v45 = vpop.xlane.xlu0 %1853 }
 0x502   : > { %v11230_v35 = vpop.f32.mrf.mxu1  ;;  %1923 = vadd.xlane.f32.xlu1 %v8569_v31  ;;  %v1875_v32 = vsub.f32 %v11138_v21, %v1854_v45 }
 0x503   : > { %2189 = vmax.xlane.f32.xlu2 %v11230_v35 }
 0x504   : > { %v11235_v24 = vpop.eup %8576  ;;  %v1901_v53 = vmul.f32 1.442695, %v1875_v32 }
 0x505   : > { %v1949_v48 = vpack.c.bf16 %v11235_v24, %v11233_v17 }
 0x506   : > { %8578 = vpow2.f32 %v1901_v53 }
 0x508   : > { %1981 = vmatmul.bf16.gmra.mxu0 %v1949_v48 }
 0x509   : > { %v11240_v12 = vpop.f32.mrf.mxu3  ;;  %v1856_v29 = vpop.xlane.xlu0 %1855 }
 0x50a   : > { %v11242_v0 = vpop.f32.mrf.mxu1  ;;  %v1876_v63 = vsub.f32 %v11145_v7, %v1856_v29 }
 0x50b   : > { %2191 = vmax.xlane.f32.xlu0 %v11242_v0  ;;  %1919 = vadd.xlane.f32.xlu2 %v11180_v13 }
 0x50c   : > { %v1903_v14 = vmul.f32 1.442695, %v1876_v63  ;;  %7608 = vmatmul.msk.bf16.gmra.mxu1 %vm1735_vm9, %v11014_v19  ;;  %v11255_v7 = vpop.eup %8578 }
 0x50e   : > { %8580 = vpow2.f32 %v1903_v14 }
 0x511   : > { %v11249_v21 = vpop.f32.mrf.mxu3  ;;  %v1858_v62 = vpop.xlane.xlu0 %1857 }
 0x512   : > { %v11251_v8 = vpop.f32.mrf.mxu1  ;;  %v1877_v60 = vsub.f32 %v11153_v42, %v1858_v62 }
 0x513   : > { %2551 = vmax.xlane.f32.xlu0 %v11249_v21  ;;  %2547 = vmax.xlane.f32.xlu2 %v11228_v34 }
 0x514   : > { %v11257_v61 = vpop.eup %8580  ;;  %v1905_v59 = vmul.f32 1.442695, %v1877_v60 }
 0x515   : > { %v1950_v19 = vpack.c.bf16 %v11257_v61, %v11255_v7 }
 0x516   : > { %8582 = vpow2.f32 %v1905_v59 }
 0x518   : > { %1986 = vmatmul.bf16.gmra.mxu0 %v1950_v19 }
 0x519   : > { %v11262_v20 = vpop.f32.mrf.mxu3  ;;  %v1860_v3 = vpop.xlane.xlu2 %1859 }
 0x51a   : > { %v11264_v13 = vpop.f32.mrf.mxu1  ;;  %v1878_v52 = vsub.f32 %v11156_v41, %v1860_v3 }
 0x51b   : > { %1921 = vadd.xlane.f32.xlu2 %v11196_v43  ;;  %1925 = vadd.xlane.f32.xlu0 %v8571_v26 }
 0x51c   : > { %v1907_v1 = vmul.f32 1.442695, %v1878_v52  ;;  %7609 = vmatmul.msk.bf16.gmra.mxu1 %vm1735_vm9, %v11029_v22  ;;  %v11276_v47 = vpop.eup %8582 }
 0x51d   : > { %14357 = vst [vmem:[#allocation43_spill] sm:$0xff] %v11276_v47 }
 0x51e   : > { %8584 = vpow2.f32 %v1907_v1 }
 0x521   : > { %v11270_v42 = vpop.f32.mrf.mxu3 }
 0x522   : > { %v11272_v16 = vpop.f32.mrf.mxu1 }
 0x523   : > { %2197 = vmax.xlane.f32.xlu1 %v11272_v16  ;;  %2549 = vmax.xlane.f32.xlu2 %v11240_v12 }
 0x524   : > { %2553 = vmax.xlane.f32.xlu0 %v11262_v20  ;;  %v11279_v41 = vpop.eup %8584 }
 0x525   : > { %v1951_v10 = vpack.c.bf16 %v11279_v41, %v11276_v47 }
 0x528   : > { %1991 = vmatmul.bf16.gmra.mxu0 %v1951_v10 }
 0x529   : > { %v11283_v22 = vpop.f32.mrf.mxu3  ;;  %v1864_v57 = vpop.xlane.xlu0 %1863 }
 0x52a   : > { %v11285_v40 = vpop.f32.mrf.mxu1 }
 0x52b   : > { %2555 = vmax.xlane.f32.xlu1 %v11270_v42  ;;  %2193 = vmax.xlane.f32.xlu2 %v11251_v8 }
 0x52c   : > { %7610 = vmatmul.msk.bf16.gmra.mxu1 %vm1735_vm9, %v10870_v56 }
 0x531   : > { %v11291_v2 = vpop.f32.mrf.mxu3  ;;  %v11330_v9 = vpop.xlane.xlu0 %1913 }
 0x532   : > { %v11293_v43 = vpop.f32.mrf.mxu1 }
 0x533   : > { %2199 = vmax.xlane.f32.xlu1 %v11285_v40  ;;  %2195 = vmax.xlane.f32.xlu2 %v11264_v13 }
 0x534   : > { %2201 = vmax.xlane.f32.xlu0 %v11293_v43 }
 0x539   : > { %v11298_v31 = vpop.f32.mrf.mxu3 }
 0x53a   : > { %v11300_v25 = vpop.f32.mrf.mxu1 }
 0x53b   : > { %2557 = vmax.xlane.f32.xlu1 %v11283_v22  ;;  %1927 = vadd.xlane.f32.xlu2 %v11215_v30  ;;  %v1880_v30 = vsub.f32 %v11166_v4, %v1864_v57 }
 0x53c   : > { %2203 = vmax.xlane.f32.xlu0 %v11300_v25  ;;  %7611 = vmatmul.msk.bf16.gmra.mxu1 %vm1735_vm9, %v10975_v23 }
 0x541   : > { %v11307_v56 = vpop.f32.mrf.mxu3 }
 0x542   : > { %v11309_v55 = vpop.f32.mrf.mxu1 }
 0x543   : > { %2559 = vmax.xlane.f32.xlu2 %v11291_v2 }
 0x544   : > { %2563 = vmax.xlane.f32.xlu0 %v11307_v56 }
 0x549   : > { %v11313_v33 = vpop.f32.mrf.mxu3 }
 0x54a   : > { %v11315_v15 = vpop.f32.mrf.mxu1 }
 0x54b   : > { %2561 = vmax.xlane.f32.xlu2 %v11298_v31 }
 0x54c   : > { %2207 = vmax.xlane.f32.xlu0 %v11315_v15  ;;  %7612 = vmatmul.msk.bf16.gmra.mxu1 %vm1735_vm9, %v10998_v11  ;;  %v1911_v11 = vmul.f32 1.442695, %v1880_v30 }
 0x54d   : > { %v2180_v23 = vpop.xlane.xlu1 %2179 }
 0x54e   : > { %v2211_v46 = vsub.f32 %v11186_v18, %v2180_v23 }
 0x550   : > { %v2227_v44 = vmul.f32 1.442695, %v2211_v46 }
 0x551   : > { %v11322_v26 = vpop.f32.mrf.mxu3 }
 0x552   : > { %2567 = vmax.xlane.f32.xlu1 %v11322_v26  ;;  %v11326_v54 = vpop.f32.mrf.mxu1  ;;  %8586 = vpow2.f32 %v2227_v44 }
 0x553   : > { %2205 = vmax.xlane.f32.xlu2 %v11309_v55  ;;  %8588 = vpow2.f32 %v1911_v11 }
 0x554   : > { %2565 = vmax.xlane.f32.xlu0 %v11313_v33 }
 0x555   : > { %v1862_v51 = vpop.xlane.xlu1 %1861  ;;  %v2182_v37 = vpop.xlane.xlu2 %2181 }
 0x556   : > { %v1879_v18 = vsub.f32 %v11163_v50, %v1862_v51  ;;  %v2212_v28 = vsub.f32 %v11192_v6, %v2182_v37 }
 0x558   : > { %v8587_v5 = vpop.eup %8586  ;;  %v1909_v4 = vmul.f32 1.442695, %v1879_v18  ;;  %v2229_v45 = vmul.f32 1.442695, %v2212_v28 }
 0x559   : > { %v11334_v32 = vpop.f32.mrf.mxu3  ;;  %v11343_v63 = vpop.eup %8588 }
 0x55a   : > { %2569 = vmax.xlane.f32.xlu1 %v11334_v32  ;;  %v11337_v48 = vpop.f32.mrf.mxu1  ;;  %8590 = vpow2.f32 %v1909_v4  ;;  %14358 = vst [vmem:[#allocation44_spill] sm:$0xff] %v11343_v63 }
 0x55b   : > { %2209 = vmax.xlane.f32.xlu2 %v11326_v54  ;;  %8592 = vpow2.f32 %v2229_v45 }
 0x55c   : > { %2259 = vadd.xlane.f32.xlu0 %v8587_v5 }
 0x55d   : > { %v2542_v53 = vpop.xlane.xlu0 %2541  ;;  %v11340_v29 = vpop.xlane.xlu1 %1915 }
 0x55e   : > { %v2184_v50 = vpop.xlane.xlu2 %2183  ;;  %v2573_v19 = vsub.f32 %v11200_v38, %v2542_v53 }
 0x55f   : > { %v2213_v6 = vsub.f32 %v11203_v36, %v2184_v50 }
 0x560   : > { %v11345_v14 = vpop.eup %8590  ;;  %v2589_v36 = vmul.f32 1.442695, %v2573_v19 }
 0x561   : > { %14359 = vst [vmem:[#allocation45_spill] sm:$0xff] %v11345_v14  ;;  %v2231_v62 = vmul.f32 1.442695, %v2213_v6  ;;  %v8593_v60 = vpop.eup %8592  ;;  %v1952_v3 = vpack.c.bf16 %v11343_v63, %v11345_v14  ;;  %v11356_v30 = vpop.f32.mrf.mxu3 }
 0x562   : > { %v11348_v59 = vpop.f32.mrf.mxu1  ;;  %2261 = vadd.xlane.f32.xlu1 %v8593_v60  ;;  %v2291_v52 = vpack.c.bf16 %v8593_v60, %v8587_v5  ;;  %v11361_v5 = vpop.f32.mrf.mxu0 }
 0x563   : > { %8594 = vpow2.f32 %v2231_v62  ;;  %2897 = vmax.xlane.f32.xlu2 %v11348_v59  ;;  %1996 = vmatmul.bf16.gmra.mxu0 %v1952_v3 }
 0x564   : > { %2895 = vmax.xlane.f32.xlu0 %v11337_v48  ;;  %2339 = vmatmul.bf16.vlgmr.msra.gmra.mxu2 %v2291_v52  ;;  %8596 = vpow2.f32 %v2589_v36 }
 0x565   : > { %v2544_v1 = vpop.xlane.xlu1 %2543  ;;  %v2186_v10 = vpop.xlane.xlu0 %2185 }
 0x566   : > { %v2574_v57 = vsub.f32 %v11209_v39, %v2544_v1  ;;  %v2214_v38 = vsub.f32 %v11211_v49, %v2186_v10 }
 0x568   : > { %v2591_v46 = vmul.f32 1.442695, %v2574_v57  ;;  %v2233_v44 = vmul.f32 1.442695, %v2214_v38 }
 0x569   : > { %v8595_v23 = vpop.eup %8594 }
 0x56a   : > { %v11358_v11 = vpop.f32.mrf.mxu1  ;;  %8598 = vpow2.f32 %v2591_v46  ;;  %v8597_v37 = vpop.eup %8596 }
 0x56b   : > { %2571 = vmax.xlane.f32.xlu2 %v11356_v30  ;;  %8600 = vpow2.f32 %v2233_v44  ;;  %v11374_v36 = vpop.f32.mrf.mxu0 }
 0x56c   : > { %2263 = vadd.xlane.f32.xlu0 %v8595_v23 }
 0x56d   : > { %v2546_v28 = vpop.xlane.xlu1 %2545  ;;  %v11369_v62 = vpop.xlane.xlu0 %1917 }
 0x56e   : > { %v2188_v51 = vpop.xlane.xlu2 %2187  ;;  %v2575_v50 = vsub.f32 %v11219_v58, %v2546_v28 }
 0x56f   : > { %v2215_v4 = vsub.f32 %v11221_v27, %v2188_v51 }
 0x570   : > { %v8599_v18 = vpop.eup %8598  ;;  %v2593_v3 = vmul.f32 1.442695, %v2575_v50 }
 0x571   : > { %v8601_v39 = vpop.eup %8600  ;;  %v2653_v49 = vpack.c.bf16 %v8599_v18, %v8597_v37  ;;  %v2235_v6 = vmul.f32 1.442695, %v2215_v4 }
 0x572   : > { %v11364_v45 = vpop.f32.mrf.mxu1  ;;  %2265 = vadd.xlane.f32.xlu1 %v8601_v39  ;;  %v2292_v53 = vpack.c.bf16 %v8601_v39, %v8595_v23 }
 0x573   : > { %2899 = vmax.xlane.f32.xlu2 %v11358_v11  ;;  %2693 = vmatmul.bf16.vlgmr.msra.gmra.mxu0 %v2653_v49  ;;  %8602 = vpow2.f32 %v2235_v6  ;;  %v11381_v51 = vpop.f32.mrf.mxu0 }
 0x574   : > { %2901 = vmax.xlane.f32.xlu0 %v11364_v45  ;;  %2344 = vmatmul.bf16.gmra.mxu2 %v2292_v53 }
 0x575   : > { %v11388_v4 = vpop.xlane.xlu1 %1923 }
 0x576   : > { %v2190_v60 = vpop.xlane.xlu2 %2189 }
 0x577   : > { %v2216_v19 = vsub.f32 %v11230_v35, %v2190_v60 }
 0x579   : > { %v2237_v27 = vmul.f32 1.442695, %v2216_v19  ;;  %v8603_v57 = vpop.eup %8602 }
 0x57a   : > { %v11372_v52 = vpop.f32.mrf.mxu1 }
 0x57b   : > { %8604 = vpow2.f32 %v2237_v27  ;;  %2621 = vadd.xlane.f32.xlu2 %v8597_v37  ;;  %v11392_v50 = vpop.f32.mrf.mxu0 }
 0x57c   : > { %8606 = vpow2.f32 %v2593_v3  ;;  %2623 = vadd.xlane.f32.xlu0 %v8599_v18 }
 0x57e   : > { %v11376_v58 = vpop.xlane.xlu2 %1919  ;;  %v2192_v1 = vpop.xlane.xlu0 %2191 }
 0x57f   : > { %v2217_v10 = vsub.f32 %v11242_v0, %v2192_v1 }
 0x581   : > { %v8605_v38 = vpop.eup %8604  ;;  %v2239_v23 = vmul.f32 1.442695, %v2217_v10 }
 0x582   : > { %v8607_v35 = vpop.eup %8606  ;;  %v11379_v46 = vpop.f32.mrf.mxu1  ;;  %2269 = vadd.xlane.f32.xlu1 %v8605_v38  ;;  %v2293_v44 = vpack.c.bf16 %v8605_v38, %v8603_v57 }
 0x583   : > { %8608 = vpow2.f32 %v2239_v23  ;;  %2625 = vadd.xlane.f32.xlu2 %v8607_v35  ;;  %v11401_v23 = vpop.f32.mrf.mxu0 }
 0x584   : > { %2267 = vadd.xlane.f32.xlu0 %v8603_v57  ;;  %2349 = vmatmul.bf16.gmra.mxu2 %v2293_v44 }
 0x586   : > { %v2548_v37 = vpop.xlane.xlu2 %2547  ;;  %v2552_v49 = vpop.xlane.xlu0 %2551 }
 0x587   : > { %v2576_v18 = vsub.f32 %v11228_v34, %v2548_v37  ;;  %v2578_v60 = vsub.f32 %v11249_v21, %v2552_v49 }
 0x589   : > { %v8609_v28 = vpop.eup %8608  ;;  %v2595_v39 = vmul.f32 1.442695, %v2576_v18  ;;  %v2599_v10 = vmul.f32 1.442695, %v2578_v60 }
 0x58a   : > { %v11384_v0 = vpop.f32.mrf.mxu1  ;;  %2905 = vmax.xlane.f32.xlu1 %v11379_v46 }
 0x58b   : > { %8610 = vpow2.f32 %v2595_v39  ;;  %2271 = vadd.xlane.f32.xlu2 %v8609_v28 }
 0x58c   : > { %2903 = vmax.xlane.f32.xlu0 %v11372_v52  ;;  %8612 = vpow2.f32 %v2599_v10 }
 0x58e   : > { %v11390_v53 = vpop.xlane.xlu2 %1921  ;;  %v11398_v3 = vpop.xlane.xlu0 %1925 }
 0x591   : > { %v8611_v6 = vpop.eup %8610 }
 0x592   : > { %2907 = vmax.xlane.f32.xlu1 %v11384_v0  ;;  %v2654_v34 = vpack.c.bf16 %v8611_v6, %v8607_v35  ;;  %v11396_v19 = vpop.f32.mrf.mxu1  ;;  %v8613_v39 = vpop.eup %8612 }
 0x594   : > { %2627 = vadd.xlane.f32.xlu0 %v8611_v6  ;;  %2698 = vmatmul.bf16.gmra.mxu0 %v2654_v34 }
 0x596   : > { %v2198_v27 = vpop.xlane.xlu1 %2197  ;;  %v2550_v1 = vpop.xlane.xlu2 %2549 }
 0x597   : > { %v2577_v57 = vsub.f32 %v11240_v12, %v2550_v1  ;;  %v2554_v37 = vpop.xlane.xlu0 %2553  ;;  %v11408_v1 = vpop.f32.mrf.mxu0 }
 0x598   : > { %v2579_v60 = vsub.f32 %v11262_v20, %v2554_v37 }
 0x599   : > { %v2597_v38 = vmul.f32 1.442695, %v2577_v57 }
 0x59a   : > { %v11403_v44 = vpop.f32.mrf.mxu1  ;;  %v2601_v63 = vmul.f32 1.442695, %v2579_v60 }
 0x59b   : > { %8614 = vpow2.f32 %v2597_v38 }
 0x59e   : > { %v2556_v35 = vpop.xlane.xlu1 %2555  ;;  %v2194_v21 = vpop.xlane.xlu2 %2193 }
 0x59f   : > { %v2218_v18 = vsub.f32 %v11251_v8, %v2194_v21  ;;  %v2580_v34 = vsub.f32 %v11270_v42, %v2556_v35  ;;  %v2220_v42 = vsub.f32 %v11272_v16, %v2198_v27  ;;  %v11415_v35 = vpop.f32.mrf.mxu0 }
 0x5a0   : > { %14360 = vst [vmem:[#allocation46_spill] sm:$0xff] %v11415_v35 }
 0x5a1   : > { %v2241_v49 = vmul.f32 1.442695, %v2218_v18  ;;  %v8615_v6 = vpop.eup %8614  ;;  %v2603_v10 = vmul.f32 1.442695, %v2580_v34  ;;  %v2245_v34 = vmul.f32 1.442695, %v2220_v42 }
 0x5a2   : > { %2629 = vadd.xlane.f32.xlu2 %v8615_v6  ;;  %v2655_v12 = vpack.c.bf16 %v8613_v39, %v8615_v6  ;;  %v11411_v21 = vpop.f32.mrf.mxu1 }
 0x5a3   : > { %8616 = vpow2.f32 %v2241_v49 }
 0x5a4   : > { %2703 = vmatmul.bf16.gmra.mxu0 %v2655_v12  ;;  %8618 = vpow2.f32 %v2603_v10 }
 0x5a5   : > { %8620 = vpow2.f32 %v2601_v63 }
 0x5a6   : > { %v2200_v57 = vpop.xlane.xlu1 %2199  ;;  %v2196_v38 = vpop.xlane.xlu2 %2195 }
 0x5a7   : > { %v2219_v47 = vsub.f32 %v11264_v13, %v2196_v38  ;;  %v2202_v8 = vpop.xlane.xlu0 %2201 }
 0x5a9   : > { %v2243_v18 = vmul.f32 1.442695, %v2219_v47  ;;  %v8617_v14 = vpop.eup %8616 }
 0x5aa   : > { %2273 = vadd.xlane.f32.xlu0 %v8617_v14  ;;  %2909 = vmax.xlane.f32.xlu2 %v11396_v19  ;;  %v2294_v20 = vpack.c.bf16 %v8617_v14, %v8609_v28  ;;  %v8619_v6 = vpop.eup %8618  ;;  %v11419_v12 = vpop.f32.mrf.mxu1  ;;  %v2222_v14 = vsub.f32 %v11293_v43, %v2202_v8 }
 0x5ab   : > { %8622 = vpow2.f32 %v2243_v18  ;;  %v8621_v47 = vpop.eup %8620 }
 0x5ac   : > { %2354 = vmatmul.bf16.gmra.mxu2 %v2294_v20  ;;  %v2656_v16 = vpack.c.bf16 %v8619_v6, %v8621_v47  ;;  %8624 = vpow2.f32 %v2245_v34  ;;  %v2249_v18 = vmul.f32 1.442695, %v2222_v14  ;;  %v11425_v20 = vpop.f32.mrf.mxu0 }
 0x5ae   : > { %v11417_v37 = vpop.xlane.xlu2 %1927  ;;  %v2558_v13 = vpop.xlane.xlu1 %2557 }
 0x5af   : > { %v2204_v49 = vpop.xlane.xlu0 %2203  ;;  %v2581_v63 = vsub.f32 %v11283_v22, %v2558_v13  ;;  %v2221_v22 = vsub.f32 %v11285_v40, %v2200_v57 }
 0x5b0   : > { %v2223_v43 = vsub.f32 %v11300_v25, %v2204_v49 }
 0x5b1   : > { %v8623_v60 = vpop.eup %8622  ;;  %v2605_v28 = vmul.f32 1.442695, %v2581_v63 }
 0x5b2   : > { %2275 = vadd.xlane.f32.xlu1 %v8623_v60  ;;  %2911 = vmax.xlane.f32.xlu2 %v11403_v44  ;;  %v8625_v35 = vpop.eup %8624  ;;  %v2251_v40 = vmul.f32 1.442695, %v2223_v43 }
 0x5b3   : > { %2631 = vadd.xlane.f32.xlu0 %v8613_v39  ;;  %8626 = vpow2.f32 %v2605_v28  ;;  %v2295_v13 = vpack.c.bf16 %v8625_v35, %v8623_v60  ;;  %v11429_v39 = vpop.f32.mrf.mxu1 }
 0x5b4   : > { %2708 = vmatmul.bf16.gmra.mxu0 %v2656_v16  ;;  %v11437_v25 = vpop.f32.mrf.mxu0 }
 0x5b5   : > { %14361 = vst [vmem:[#allocation47_spill] sm:$0xff] %v11437_v25 }
 0x5b6   : > { %v2560_v27 = vpop.xlane.xlu2 %2559 }
 0x5b7   : > { %v2582_v10 = vsub.f32 %v11291_v2, %v2560_v27  ;;  %v2564_v38 = vpop.xlane.xlu0 %2563  ;;  %v2247_v2 = vmul.f32 1.442695, %v2221_v22 }
 0x5b9   : > { %v2607_v42 = vmul.f32 1.442695, %v2582_v10  ;;  %v8627_v16 = vpop.eup %8626 }
 0x5ba   : > { %2635 = vadd.xlane.f32.xlu2 %v8619_v6  ;;  %2633 = vadd.xlane.f32.xlu1 %v8621_v47 }
 0x5bb   : > { %8628 = vpow2.f32 %v2607_v42  ;;  %2277 = vadd.xlane.f32.xlu0 %v8625_v35  ;;  %v11442_v35 = vpop.f32.mrf.mxu1 }
 0x5bc   : > { %8630 = vpow2.f32 %v2249_v18  ;;  %2359 = vmatmul.bf16.gmra.mxu2 %v2295_v13  ;;  %v11445_v13 = vpop.f32.mrf.mxu0 }
 0x5bd   : > { %8632 = vpow2.f32 %v2247_v2  ;;  %14362 = vst [vmem:[#allocation48_spill] sm:$0xff] %v11445_v13 }
 0x5be   : > { %v2562_v8 = vpop.xlane.xlu2 %2561 }
 0x5bf   : > { %v2583_v34 = vsub.f32 %v11298_v31, %v2562_v8  ;;  %v11432_v63 = vpop.xlane.xlu0 %2207  ;;  %v2584_v31 = vsub.f32 %v11307_v56, %v2564_v38 }
 0x5c1   : > { %v11434_v57 = vpop.eup %8628  ;;  %v2609_v6 = vmul.f32 1.442695, %v2583_v34  ;;  %v2611_v27 = vmul.f32 1.442695, %v2584_v31 }
 0x5c2   : > { %v8631_v47 = vpop.eup %8630  ;;  %v2657_v60 = vpack.c.bf16 %v11434_v57, %v8627_v16  ;;  %2917 = vmax.xlane.f32.xlu1 %v11429_v39 }
 0x5c3   : > { %8634 = vpow2.f32 %v2609_v6  ;;  %2281 = vadd.xlane.f32.xlu2 %v8631_v47  ;;  %2913 = vmax.xlane.f32.xlu0 %v11411_v21  ;;  %v8633_v28 = vpop.eup %8632  ;;  %v11449_v2 = vpop.f32.mrf.mxu1 }
 0x5c4   : > { %8636 = vpow2.f32 %v2251_v40  ;;  %2713 = vmatmul.bf16.gmra.mxu0 %v2657_v60  ;;  %v2296_v22 = vpack.c.bf16 %v8631_v47, %v8633_v28  ;;  %v11456_v31 = vpop.f32.mrf.mxu0 }
 0x5c5   : > { %8638 = vpow2.f32 %v2611_v27  ;;  %v2568_v8 = vpop.xlane.xlu1 %2567  ;;  %14363 = vst [vmem:[#allocation49_spill] sm:$0xff] %v11456_v31 }
 0x5c6   : > { %v2206_v49 = vpop.xlane.xlu2 %2205 }
 0x5c7   : > { %v2566_v14 = vpop.xlane.xlu0 %2565  ;;  %v2224_v42 = vsub.f32 %v11309_v55, %v2206_v49  ;;  %v2586_v55 = vsub.f32 %v11322_v26, %v2568_v8 }
 0x5c8   : > { %v2585_v40 = vsub.f32 %v11313_v33, %v2566_v14 }
 0x5c9   : > { %v8635_v10 = vpop.eup %8634  ;;  %v2253_v56 = vmul.f32 1.442695, %v2224_v42  ;;  %v2615_v49 = vmul.f32 1.442695, %v2586_v55 }
 0x5ca   : > { %v8637_v18 = vpop.eup %8636  ;;  %v2613_v47 = vmul.f32 1.442695, %v2585_v40 }
 0x5cb   : > { %2641 = vadd.xlane.f32.xlu2 %v8635_v10  ;;  %2283 = vadd.xlane.f32.xlu1 %v8637_v18  ;;  %v8639_v34 = vpop.eup %8638  ;;  %8640 = vpow2.f32 %v2253_v56  ;;  %v11459_v33 = vpop.f32.mrf.mxu1 }
 0x5cc   : > { %2279 = vadd.xlane.f32.xlu0 %v8633_v28  ;;  %2364 = vmatmul.bf16.gmra.mxu2 %v2296_v22  ;;  %v2658_v6 = vpack.c.bf16 %v8639_v34, %v8635_v10  ;;  %8642 = vpow2.f32 %v2613_v47  ;;  %v2225_v10 = vsub.f32 %v11315_v15, %v11432_v63  ;;  %v11468_v15 = vpop.f32.mrf.mxu0 }
 0x5cd   : > { %8644 = vpow2.f32 %v2615_v49  ;;  %v2570_v22 = vpop.xlane.xlu1 %2569  ;;  %14364 = vst [vmem:[#allocation50_spill] sm:$0xff] %v11468_v15 }
 0x5ce   : > { %v2210_v38 = vpop.xlane.xlu2 %2209  ;;  %v2255_v55 = vmul.f32 1.442695, %v2225_v10  ;;  %v2587_v63 = vsub.f32 %v11334_v32, %v2570_v22 }
 0x5cf   : > { %v11447_v43 = vpop.xlane.xlu0 %2259  ;;  %v2226_v26 = vsub.f32 %v11326_v54, %v2210_v38 }
 0x5d1   : > { %v8641_v27 = vpop.eup %8640 }
 0x5d2   : > { %v2297_v56 = vpack.c.bf16 %v8641_v27, %v8637_v18  ;;  %v8643_v54 = vpop.eup %8642 }
 0x5d3   : > { %2921 = vmax.xlane.f32.xlu2 %v11449_v2  ;;  %2919 = vmax.xlane.f32.xlu1 %v11442_v35  ;;  %v8645_v47 = vpop.eup %8644 }
 0x5d4   : > { %2915 = vmax.xlane.f32.xlu0 %v11419_v12  ;;  %2718 = vmatmul.bf16.gmra.mxu0 %v2658_v6 }
 0x5d6   : > { %v2898_v60 = vpop.xlane.xlu2 %2897 }
 0x5d7   : > { %v2896_v28 = vpop.xlane.xlu0 %2895  ;;  %v2928_v8 = vsub.f32 %v11348_v59, %v2898_v60  ;;  %v2659_v59 = vpack.c.bf16 %v8645_v47, %v8643_v54 }
 0x5d8   : > { %v2927_v42 = vsub.f32 %v11337_v48, %v2896_v28  ;;  %v2257_v48 = vmul.f32 1.442695, %v2226_v26 }
 0x5d9   : > { %v2945_v38 = vmul.f32 1.442695, %v2928_v8  ;;  %v11479_v8 = vpop.f32.mrf.mxu0 }
 0x5da   : > { %v2943_v14 = vmul.f32 1.442695, %v2927_v42  ;;  %14365 = vst [vmem:[#allocation51_spill] sm:$0xff] %v11479_v8 }
 0x5db   : > { %2923 = vmax.xlane.f32.xlu2 %v11459_v33  ;;  %2643 = vadd.xlane.f32.xlu1 %v8639_v34  ;;  %v2262_v34 = vpop.xlane.xlu1 %2261 }
 0x5dc   : > { %8646 = vpow2.f32 %v2943_v14  ;;  %2637 = vadd.xlane.f32.xlu0 %v8627_v16  ;;  %2369 = vmatmul.bf16.gmra.mxu2 %v2297_v56  ;;  %v2617_v16 = vmul.f32 1.442695, %v2587_v63 }
 0x5dd   : > { %8648 = vpow2.f32 %v2257_v48 }
 0x5de   : > { %v2572_v40 = vpop.xlane.xlu2 %2571  ;;  %8650 = vpow2.f32 %v2255_v55 }
 0x5df   : > { %v11466_v6 = vpop.xlane.xlu0 %2263  ;;  %v2588_v18 = vsub.f32 %v11356_v30, %v2572_v40  ;;  %8652 = vpow2.f32 %v2945_v38 }
 0x5e0   : > { %8654 = vpow2.f32 %v2617_v16 }
 0x5e1   : > { %v2619_v60 = vmul.f32 1.442695, %v2588_v18 }
 0x5e2   : > { %v8647_v49 = vpop.eup %8646 }
 0x5e3   : > { %2647 = vadd.xlane.f32.xlu2 %v8645_v47  ;;  %2975 = vadd.xlane.f32.xlu1 %v8647_v49  ;;  %v11474_v32 = vpop.eup %8648  ;;  %8656 = vpow2.f32 %v2619_v60 }
 0x5e4   : > { %2639 = vadd.xlane.f32.xlu0 %v11434_v57  ;;  %2723 = vmatmul.bf16.gmra.mxu0 %v2659_v59  ;;  %v11477_v10 = vpop.eup %8650  ;;  %v11489_v59 = vpop.f32.mrf.mxu0 }
 0x5e5   : > { %v8653_v56 = vpop.eup %8652  ;;  %v2266_v48 = vpop.xlane.xlu1 %2265  ;;  %14366 = vst [vmem:[#allocation52_spill] sm:$0xff] %v11489_v59 }
 0x5e6   : > { %v2900_v28 = vpop.xlane.xlu2 %2899 }
 0x5e7   : > { %v2929_v42 = vsub.f32 %v11358_v11, %v2900_v28  ;;  %v2902_v26 = vpop.xlane.xlu0 %2901  ;;  %v2340_v30 = vpop.f32.mrf.mxu2  ;;  %v2298_v11 = vpack.c.bf16 %v11474_v32, %v11477_v10 }
 0x5e8   : > { %v2930_v14 = vsub.f32 %v11364_v45, %v2902_v26  ;;  %v11483_v45 = vpop.eup %8654  ;;  %v3007_v26 = vpack.c.bf16 %v8653_v56, %v8647_v49 }
 0x5e9   : > { %v2947_v22 = vmul.f32 1.442695, %v2929_v42  ;;  %v11485_v55 = vpop.eup %8656  ;;  %v11491_v42 = vpop.f32.mrf.mxu1 }
 0x5ea   : > { %v2949_v57 = vmul.f32 1.442695, %v2930_v14  ;;  %v2660_v18 = vpack.c.bf16 %v11485_v55, %v11483_v45 }
 0x5eb   : > { %8658 = vpow2.f32 %v2947_v22  ;;  %2977 = vadd.xlane.f32.xlu2 %v8653_v56 }
 0x5ec   : > { %8660 = vpow2.f32 %v2949_v57  ;;  %2285 = vadd.xlane.f32.xlu0 %v8641_v27  ;;  %2374 = vmatmul.bf16.gmra.mxu2 %v2298_v11  ;;  %v11494_v14 = vpop.f32.mrf.mxu0 }
 0x5ed   : > { %14367 = vst [vmem:[#allocation53_spill] sm:$0xff] %v11494_v14 }
 0x5ee   : > { %v2622_v28 = vpop.xlane.xlu2 %2621 }
 0x5ef   : > { %v2624_v40 = vpop.xlane.xlu0 %2623  ;;  %v2342_v38 = vpop.f32.mrf.mxu2 }
 0x5f1   : > { %v8659_v47 = vpop.eup %8658 }
 0x5f2   : > { %v8661_v63 = vpop.eup %8660  ;;  %2979 = vadd.xlane.f32.xlu1 %v8659_v47 }
 0x5f3   : > { %2981 = vadd.xlane.f32.xlu2 %v8661_v63 }
 0x5f4   : > { %2645 = vadd.xlane.f32.xlu0 %v8643_v54  ;;  %2728 = vmatmul.bf16.gmra.mxu0 %v2660_v18  ;;  %v11501_v49 = vpop.f32.mrf.mxu0 }
 0x5f5   : > { %v2270_v27 = vpop.xlane.xlu1 %2269  ;;  %14368 = vst [vmem:[#allocation54_spill] sm:$0xff] %v11501_v49 }
 0x5f6   : > { %v11498_v31 = vpop.xlane.xlu2 %2625 }
 0x5f7   : > { %v2268_v16 = vpop.xlane.xlu0 %2267  ;;  %v2345_v60 = vpop.f32.mrf.mxu2 }
 0x5fc   : > { %2925 = vmax.xlane.f32.xlu0 %v11491_v42  ;;  %3047 = vmatmul.bf16.vlgmr.msrb.gmra.mxu2 %v3007_v26 }
 0x5fd   : > { %v2906_v22 = vpop.xlane.xlu1 %2905 }
 0x5fe   : > { %v2932_v57 = vsub.f32 %v11379_v46, %v2906_v22 }
 0x5ff   : > { %v2904_v11 = vpop.xlane.xlu0 %2903  ;;  %v2347_v18 = vpop.f32.mrf.mxu2 }
 0x600   : > { %v2953_v54 = vmul.f32 1.442695, %v2932_v57  ;;  %v2931_v8 = vsub.f32 %v11372_v52, %v2904_v11  ;;  %v3008_v52 = vpack.c.bf16 %v8661_v63, %v8659_v47 }
 0x602   : > { %8662 = vpow2.f32 %v2953_v54  ;;  %v2951_v59 = vmul.f32 1.442695, %v2931_v8  ;;  %v11503_v8 = vpop.xlane.xlu2 %2271  ;;  %v2694_v54 = vpop.f32.mrf.mxu0 }
 0x603   : > { %8664 = vrcp.f32 %v2262_v34 }
 0x604   : > { %8666 = vpow2.f32 %v2951_v59 }
 0x605   : > { %8668 = vrcp.f32 %v11447_v43  ;;  %v2908_v63 = vpop.xlane.xlu1 %2907 }
 0x606   : > { %8670 = vrcp.f32 %v2270_v27 }
 0x607   : > { %v2350_v26 = vpop.f32.mrf.mxu2  ;;  %8672 = vrcp.f32 %v2268_v16  ;;  %v2933_v16 = vsub.f32 %v11384_v0, %v2908_v63 }
 0x608   : > { %v8663_v56 = vpop.eup %8662  ;;  %8674 = vrcp.f32 %v2266_v48 }
 0x609   : > { %v8665_v14 = vpop.eup %8664  ;;  %2985 = vadd.xlane.f32.xlu2 %v8663_v56  ;;  %8676 = vrcp.f32 %v11466_v6 }
 0x60a   : > { %v8667_v46 = vpop.eup %8666  ;;  %v2397_v22 = vmul.f32 %v8665_v14, %v2342_v38  ;;  %8678 = vrcp.f32 %v2622_v28  ;;  %v11507_v38 = vpop.xlane.xlu0 %2627 }
 0x60b   : > { %v8669_v57 = vpop.eup %8668  ;;  %2983 = vadd.xlane.f32.xlu1 %v8667_v46  ;;  %8680 = vrcp.f32 %v2624_v40  ;;  %v3009_v48 = vpack.c.bf16 %v8663_v56, %v8667_v46 }
 0x60c   : > { %v2396_v11 = vmul.f32 %v8669_v57, %v2340_v30  ;;  %3052 = vmatmul.bf16.gmra.mxu2 %v3008_v52  ;;  %v8671_v59 = vpop.eup %8670  ;;  %v2955_v52 = vmul.f32 1.442695, %v2933_v16 }
 0x60d   : > { %v8673_v15 = vpop.eup %8672 }
 0x60e   : > { %v8250_v34 = vpack.i.bf16 %v2397_v22, %v2396_v11  ;;  %v2400_v25 = vmul.f32 %v8673_v15, %v2350_v26  ;;  %v8675_v27 = vpop.eup %8674  ;;  %v2696_v22 = vpop.f32.mrf.mxu0  ;;  %8682 = vpow2.f32 %v2955_v52 }
 0x60f   : > { %v2352_v43 = vpop.f32.mrf.mxu2  ;;  %v8677_v14 = vpop.eup %8676  ;;  %v2399_v57 = vmul.f32 %v8675_v27, %v2347_v18 }
 0x610   : > { %8251 = vrot.lane.b32.xlu0 %v8250_v34, %s9473_s26  ;;  %v2401_v49 = vmul.f32 %v8671_v59, %v2352_v43  ;;  %v8679_v15 = vpop.eup %8678  ;;  %v2398_v6 = vmul.f32 %v8677_v14, %v2345_v60 }
 0x611   : > { %v8681_v26 = vpop.eup %8680  ;;  %v2750_v34 = vmul.f32 %v8679_v15, %v2694_v54 }
 0x612   : > { %v8270_v30 = vpack.i.bf16 %v2401_v49, %v2400_v25  ;;  %v2751_v28 = vmul.f32 %v8681_v26, %v2696_v22  ;;  %v8260_v11 = vpack.i.bf16 %v2399_v57, %v2398_v6 }
 0x614   : > { %v8255_v0 = vpack.i.bf16 %v2751_v28, %v2750_v34  ;;  %v8683_v60 = vpop.eup %8682 }
 0x615   : > { %v11509_v47 = vpop.xlane.xlu2 %2629 }
 0x616   : > { %v11528_v28 = vpop.f32.mrf.mxu0 }
 0x618   : > { %8271 = vrot.lane.b32.xlu0 %v8270_v30, %s9473_s26 }
 0x61c   : > { %3057 = vmatmul.bf16.gmra.mxu2 %v3009_v48 }
 0x61d   : > { %v2910_v25 = vpop.xlane.xlu2 %2909  ;;  %v2274_v49 = vpop.xlane.xlu0 %2273 }
 0x61e   : > { %v2934_v40 = vsub.f32 %v11396_v19, %v2910_v25 }
 0x620   : > { %v2957_v43 = vmul.f32 1.442695, %v2934_v40 }
 0x621   : > { %8261 = vrot.lane.b32.xlu2 %v8260_v11, %s9473_s26 }
 0x622   : > { %8684 = vpow2.f32 %v2957_v43 }
 0x624   : > { %8256 = vrot.lane.b32.xlu1 %v8255_v0, %s9469_s29  ;;  %v2701_v0 = vpop.f32.mrf.mxu0 }
 0x625   : > { %v2912_v18 = vpop.xlane.xlu2 %2911  ;;  %v11516_v46 = vpop.xlane.xlu1 %2275 }
 0x626   : > { %v2632_v56 = vpop.xlane.xlu0 %2631  ;;  %v2935_v16 = vsub.f32 %v11403_v44, %v2912_v18 }
 0x628   : > { %v8685_v59 = vpop.eup %8684  ;;  %v2959_v14 = vmul.f32 1.442695, %v2935_v16 }
 0x629   : > { %v3010_v30 = vpack.c.bf16 %v8685_v59, %v8683_v60 }
 0x62a   : > { %8686 = vpow2.f32 %v2959_v14 }
 0x62c   : > { %3062 = vmatmul.bf16.gmra.mxu2 %v3010_v30 }
 0x62d   : > { %v11520_v54 = vpop.xlane.xlu2 %2635  ;;  %v11522_v27 = vpop.xlane.xlu1 %2633 }
 0x62e   : > { %v11518_v63 = vpop.xlane.xlu0 %2277 }
 0x62f   : > { %v2355_v19 = vpop.f32.mrf.mxu2 }
 0x630   : > { %v11534_v11 = vpop.eup %8686 }
 0x635   : > { %v2918_v6 = vpop.xlane.xlu1 %2917 }
 0x636   : > { %v2914_v22 = vpop.xlane.xlu0 %2913  ;;  %v11526_v26 = vpop.xlane.xlu2 %2281 }
 0x637   : > { %v2936_v57 = vsub.f32 %v11411_v21, %v2914_v22  ;;  %v2357_v48 = vpop.f32.mrf.mxu2  ;;  %v2938_v21 = vsub.f32 %v11429_v39, %v2918_v6 }
 0x639   : > { %v2961_v15 = vmul.f32 1.442695, %v2936_v57  ;;  %v2965_v30 = vmul.f32 1.442695, %v2938_v21  ;;  %v2704_v21 = vpop.f32.mrf.mxu0 }
 0x63b   : > { %8688 = vpow2.f32 %v2961_v15 }
 0x63c   : > { %8690 = vrcp.f32 %v2274_v49 }
 0x63d   : > { %8692 = vrcp.f32 %v11503_v8 }
 0x63e   : > { %v11538_v34 = vpop.xlane.xlu2 %2641  ;;  %v11540_v43 = vpop.xlane.xlu1 %2283  ;;  %8694 = vpow2.f32 %v2965_v30 }
 0x63f   : > { %v11530_v52 = vpop.xlane.xlu0 %2279  ;;  %v11532_v25 = vpop.f32.mrf.mxu2 }
 0x641   : > { %v8689_v44 = vpop.eup %8688 }
 0x642   : > { %2993 = vadd.xlane.f32.xlu0 %v8689_v44  ;;  %v3011_v40 = vpack.c.bf16 %v8689_v44, %v11534_v11  ;;  %v8691_v15 = vpop.eup %8690 }
 0x644   : > { %3067 = vmatmul.bf16.gmra.mxu2 %v3011_v40  ;;  %v8693_v40 = vpop.eup %8692 }
 0x645   : > { %v2402_v8 = vmul.f32 %v8693_v40, %v2355_v19 }
 0x646   : > { %v2922_v39 = vpop.xlane.xlu2 %2921  ;;  %v2920_v6 = vpop.xlane.xlu1 %2919 }
 0x647   : > { %v2916_v18 = vpop.xlane.xlu0 %2915  ;;  %v11543_v14 = vpop.f32.mrf.mxu2  ;;  %v2940_v49 = vsub.f32 %v11449_v2, %v2922_v39  ;;  %v2939_v30 = vsub.f32 %v11442_v35, %v2920_v6 }
 0x648   : > { %v2937_v16 = vsub.f32 %v11419_v12, %v2916_v18  ;;  %v2403_v12 = vmul.f32 %v8691_v15, %v2357_v48  ;;  %v11550_v18 = vpop.eup %8694 }
 0x649   : > { %v2967_v13 = vmul.f32 1.442695, %v2939_v30 }
 0x64a   : > { %v2963_v22 = vmul.f32 1.442695, %v2937_v16  ;;  %2989 = vadd.xlane.f32.xlu2 %v8685_v59  ;;  %v8280_v16 = vpack.i.bf16 %v2403_v12, %v2402_v8 }
 0x64c   : > { %8696 = vpow2.f32 %v2963_v22  ;;  %v2969_v22 = vmul.f32 1.442695, %v2940_v49 }
 0x64d   : > { %8698 = vrcp.f32 %v2632_v56  ;;  %v2706_v56 = vpop.f32.mrf.mxu0 }
 0x64e   : > { %2987 = vadd.xlane.f32.xlu1 %v8683_v60  ;;  %8700 = vrcp.f32 %v11509_v47 }
 0x64f   : > { %v11546_v57 = vpop.xlane.xlu0 %2637  ;;  %v11548_v44 = vpop.f32.mrf.mxu2  ;;  %8702 = vrcp.f32 %v11507_v38 }
 0x650   : > { %8704 = vpow2.f32 %v2969_v22 }
 0x651   : > { %8706 = vpow2.f32 %v2967_v13 }
 0x652   : > { %v8697_v59 = vpop.eup %8696  ;;  %8708 = vrcp.f32 %v11498_v31 }
 0x653   : > { %v3012_v60 = vpack.c.bf16 %v11550_v18, %v8697_v59  ;;  %v8699_v2 = vpop.eup %8698 }
 0x654   : > { %v2755_v35 = vmul.f32 %v8699_v2, %v2706_v56  ;;  %v8701_v19 = vpop.eup %8700 }
 0x655   : > { %3072 = vmatmul.bf16.gmra.mxu2 %v3012_v60  ;;  %v2754_v39 = vmul.f32 %v8701_v19, %v2704_v21  ;;  %v8703_v6 = vpop.eup %8702 }
 0x656   : > { %8281 = vrot.lane.b32.xlu0 %v8280_v16, %s9473_s26  ;;  %v8705_v40 = vpop.eup %8704  ;;  %v2753_v30 = vmul.f32 %v8703_v6, %v2701_v0  ;;  %v2924_v16 = vpop.xlane.xlu2 %2923 }
 0x657   : > { %v11557_v48 = vpop.xlane.xlu0 %2639  ;;  %v11559_v15 = vpop.f32.mrf.mxu2  ;;  %v8275_v12 = vpack.i.bf16 %v2755_v35, %v2754_v39  ;;  %v2941_v2 = vsub.f32 %v11459_v33, %v2924_v16 }
 0x658   : > { %v11567_v8 = vpop.eup %8706  ;;  %v2709_v33 = vpop.f32.mrf.mxu0 }
 0x659   : > { %v8709_v60 = vpop.eup %8708  ;;  %v3013_v31 = vpack.c.bf16 %v8705_v40, %v11567_v8  ;;  %v2971_v56 = vmul.f32 1.442695, %v2941_v2 }
 0x65a   : > { %v2752_v13 = vmul.f32 %v8709_v60, %v11528_v28 }
 0x65b   : > { %8710 = vpow2.f32 %v2971_v56 }
 0x65c   : > { %v8265_v38 = vpack.i.bf16 %v2753_v30, %v2752_v13 }
 0x65e   : > { %v11589_v13 = vpop.xlane.xlu2 %2647 }
 0x65f   : > { %v11563_v47 = vpop.xlane.xlu0 %2285  ;;  %v11565_v49 = vpop.f32.mrf.mxu2 }
 0x661   : > { %v8711_v6 = vpop.eup %8710 }
 0x662   : > { %8276 = vrot.lane.b32.xlu2 %v8275_v12, %s9469_s29 }
 0x665   : > { %3077 = vmatmul.bf16.gmra.mxu2 %v3013_v31  ;;  %v2711_v31 = vpop.f32.mrf.mxu0 }
 0x667   : > { %v11572_v21 = vpop.xlane.xlu0 %2645  ;;  %8266 = vrot.lane.b32.xlu1 %v8265_v38, %s9469_s29  ;;  %v11575_v22 = vpop.f32.mrf.mxu2 }
 0x668   : > { %v2644_v38 = vpop.xlane.xlu1 %2643 }
 0x66f   : > { %v2926_v0 = vpop.xlane.xlu0 %2925  ;;  %v11579_v19 = vpop.f32.mrf.mxu2 }
 0x670   : > { %v2942_v35 = vsub.f32 %v11491_v42, %v2926_v0 }
 0x672   : > { %v2973_v28 = vmul.f32 1.442695, %v2942_v35 }
 0x674   : > { %8712 = vpow2.f32 %v2973_v28 }
 0x675   : > { %8714 = vrcp.f32 %v11520_v54 }
 0x676   : > { %8716 = vrcp.f32 %v11522_v27 }
 0x677   : > { %v11581_v39 = vpop.f32.mrf.mxu2 }
 0x67a   : > { %v8713_v12 = vpop.eup %8712 }
 0x67b   : > { %v3014_v30 = vpack.c.bf16 %v8713_v12, %v8711_v6 }
 0x67d   : > { %3082 = vmatmul.bf16.gmra.mxu2 %v3014_v30 }
 0x67f   : > { %v11584_v60 = vpop.f32.mrf.mxu2 }
 0x680   : > { %1929 = vadd.xlane.f32.xlu0 %v11233_v17  ;;  %v2978_v17 = vpop.xlane.xlu2 %2977 }
 0x687   : > { %v11587_v42 = vpop.f32.mrf.mxu2 }
 0x688   : > { %2289 = vadd.xlane.f32.xlu0 %v11474_v32  ;;  %v2714_v32 = vpop.f32.mrf.mxu0 }
 0x68b   : > { %2995 = vadd.xlane.f32.xlu2 %v8697_v59  ;;  %v2976_v59 = vpop.xlane.xlu1 %2975 }
 0x68f   : > { %v3053_v16 = vpop.f32.mrf.mxu2 }
 0x690   : > { %2649 = vadd.xlane.f32.xlu0 %v11483_v45  ;;  %v8715_v45 = vpop.eup %8714  ;;  %v2716_v30 = vpop.f32.mrf.mxu0 }
 0x691   : > { %2991 = vadd.xlane.f32.xlu1 %v11534_v11  ;;  %v8717_v56 = vpop.eup %8716  ;;  %v2982_v11 = vpop.xlane.xlu2 %2981 }
 0x692   : > { %v2756_v0 = vmul.f32 %v8717_v56, %v2709_v33  ;;  %8718 = vrcp.f32 %v2982_v11 }
 0x693   : > { %2287 = vadd.xlane.f32.xlu2 %v11477_v10  ;;  %v2757_v10 = vmul.f32 %v8715_v45, %v2711_v31  ;;  %v2980_v35 = vpop.xlane.xlu1 %2979 }
 0x694   : > { %8720 = vrcp.f32 %v2980_v35 }
 0x695   : > { %v8285_v28 = vpack.i.bf16 %v2757_v10, %v2756_v0  ;;  %8722 = vrcp.f32 %v11557_v48 }
 0x696   : > { %8724 = vrcp.f32 %v11546_v57 }
 0x697   : > { %v3055_v2 = vpop.f32.mrf.mxu2  ;;  %8726 = vrcp.f32 %v11526_v26 }
 0x698   : > { %2651 = vadd.xlane.f32.xlu0 %v11485_v55  ;;  %v8719_v27 = vpop.eup %8718  ;;  %8728 = vrcp.f32 %v11530_v52  ;;  %v2719_v45 = vpop.f32.mrf.mxu0 }
 0x699   : > { %v11600_v54 = vpop.xlane.xlu2 %2985  ;;  %8730 = vrcp.f32 %v2978_v17 }
 0x69a   : > { %8732 = vrcp.f32 %v2644_v38 }
 0x69b   : > { %3001 = vadd.xlane.f32.xlu2 %v8705_v40  ;;  %v3107_v40 = vmul.f32 %v8719_v27, %v3055_v2  ;;  %8734 = vrcp.f32 %v2976_v59 }
 0x69c   : > { %8736 = vrcp.f32 %v11538_v34 }
 0x69f   : > { %v11597_v55 = vpop.f32.mrf.mxu2 }
 0x6a0   : > { %3005 = vadd.xlane.f32.xlu0 %v8713_v12  ;;  %v11605_v12 = vpop.xlane.xlu1 %2983 }
 0x6a1   : > { %v11610_v48 = vpop.permute.xlu2 %8261 }
 0x6a3   : > { %3003 = vadd.xlane.f32.xlu2 %v8711_v6  ;;  %v8721_v6 = vpop.eup %8720 }
 0x6a4   : > { %v3106_v33 = vmul.f32 %v8721_v6, %v3053_v16  ;;  %v8723_v31 = vpop.eup %8722 }
 0x6a5   : > { %v8725_v11 = vpop.eup %8724  ;;  %v2759_v0 = vmul.f32 %v8723_v31, %v2716_v30 }
 0x6a6   : > { %v8305_v56 = vpack.i.bf16 %v3107_v40, %v3106_v33  ;;  %v8727_v57 = vpop.eup %8726  ;;  %v2758_v26 = vmul.f32 %v8725_v11, %v2714_v32  ;;  %v2721_v40 = vpop.f32.mrf.mxu0 }
 0x6a7   : > { %v11608_v10 = vpop.f32.mrf.mxu2  ;;  %v2407_v2 = vmul.f32 %v8727_v57, %v11559_v15  ;;  %v8729_v16 = vpop.eup %8728 }
 0x6a8   : > { %v2406_v52 = vmul.f32 %v8729_v16, %v11548_v44  ;;  %v11615_v35 = vpop.permute.xlu1 %8256  ;;  %v8731_v27 = vpop.eup %8730 }
 0x6a9   : > { %v8733_v6 = vpop.eup %8732  ;;  %v3105_v38 = vmul.f32 %v8731_v27, %v11587_v42 }
 0x6aa   : > { %8286 = vrot.lane.b32.xlu1 %v8285_v28, %s9469_s29  ;;  %v8295_v28 = vpack.i.bf16 %v2759_v0, %v2758_v26  ;;  %v8320_v30 = vpack.i.bf16 %v2407_v2, %v2406_v52  ;;  %v8735_v17 = vpop.eup %8734  ;;  %v2761_v59 = vmul.f32 %v8733_v6, %v2721_v40 }
 0x6ab   : > { %v3104_v44 = vmul.f32 %v8735_v17, %v11584_v60  ;;  %v8737_v33 = vpop.eup %8736  ;;  %v11626_v60 = vpop.permute.xlu0 %8251 }
 0x6ac   : > { %v2760_v31 = vmul.f32 %v8737_v33, %v2719_v45 }
 0x6ad   : > { %v8300_v34 = vpack.i.bf16 %v3105_v38, %v3104_v44 }
 0x6ae   : > { %v8325_v11 = vpack.i.bf16 %v2761_v59, %v2760_v31  ;;  %v8031_v59 = vld [vmem:[%s14231_s6 + $0x18] sm:$0xff] }
 0x6af   : > { %v3063_v32 = vpop.f32.mrf.mxu2 }
 0x6b3   : > { %v11629_v45 = vpop.permute.xlu0 %8271 }
 0x6b4   : > { %8306 = vrot.lane.b32.xlu0 %v8305_v56, %s9472_s17 }
 0x6b7   : > { %v3065_v57 = vpop.f32.mrf.mxu2 }
 0x6bb   : > { %8296 = vrot.lane.b32.xlu2 %v8295_v28, %s9469_s29  ;;  %v2994_v52 = vpop.xlane.xlu0 %2993 }
 0x6bc   : > { %8321 = vrot.lane.b32.xlu0 %v8320_v30, %s9473_s26  ;;  %v8035_v30 = vld [vmem:[%s14231_s6 + $0x38] sm:$0xff] }
 0x6bd   : > { %v2990_v15 = vpop.xlane.xlu2 %2989  ;;  %3434 = vmatpush.bf16.msrb.mxu3 %v8035_v30 }
 0x6be   : > { %8738 = vrcp.f32 %v2990_v15 }
 0x6c1   : > { %v2988_v56 = vpop.xlane.xlu1 %2987 }
 0x6c2   : > { %8740 = vrcp.f32 %v2988_v56 }
 0x6c3   : > { %8301 = vrot.lane.b32.xlu2 %v8300_v34, %s9472_s17  ;;  %8742 = vrcp.f32 %v11518_v63 }
 0x6c4   : > { %8326 = vrot.lane.b32.xlu0 %v8325_v11, %s9469_s29  ;;  %v8739_v42 = vpop.eup %8738  ;;  %8744 = vrcp.f32 %v11516_v46 }
 0x6c5   : > { %v3111_v26 = vmul.f32 %v8739_v42, %v3065_v57  ;;  %v11639_v27 = vpop.permute.xlu2 %8276  ;;  %8746 = vrcp.f32 %v11600_v54  ;;  %v8029_v42 = vld [vmem:[%s14231_s6 + $0x8] sm:$0xff] }
 0x6c6   : > { %8748 = vrcp.f32 %v11605_v12 }
 0x6c7   : > { %v3068_v17 = vpop.f32.mrf.mxu2  ;;  %8750 = vrcp.f32 %v11563_v47  ;;  %v8030_v47 = vld [vmem:[%s14231_s6 + $0x10] sm:$0xff] }
 0x6c8   : > { %v8741_v0 = vpop.eup %8740  ;;  %v11634_v28 = vpop.permute.xlu0 %8281  ;;  %8752 = vrcp.f32 %v11540_v43 }
 0x6c9   : > { %v3110_v2 = vmul.f32 %v8741_v0, %v3063_v32  ;;  %8754 = vrcp.f32 %v2994_v52 }
 0x6cb   : > { %v8315_v16 = vpack.i.bf16 %v3111_v26, %v3110_v2 }
 0x6cd   : > { %8316 = vrot.lane.b32.xlu2 %v8315_v16, %s9472_s17 }
 0x6cf   : > { %v3070_v11 = vpop.f32.mrf.mxu2 }
 0x6d4   : > { %2997 = vadd.xlane.f32.xlu1 %v11550_v18  ;;  %v8743_v18 = vpop.eup %8742 }
 0x6d5   : > { %v2405_v63 = vmul.f32 %v8743_v18, %v11543_v14 }
 0x6d9   : > { %v11649_v6 = vpop.permute.xlu1 %8266 }
 0x6dc   : > { %2999 = vadd.xlane.f32.xlu1 %v11567_v8  ;;  %v8745_v8 = vpop.eup %8744 }
 0x6dd   : > { %v2404_v46 = vmul.f32 %v8745_v8, %v11532_v25  ;;  %v8747_v14 = vpop.eup %8746  ;;  %v8032_v25 = vld [vmem:[%s14231_s6 + $0x20] sm:$0xff] }
 0x6de   : > { %v3109_v54 = vmul.f32 %v8747_v14, %v11608_v10  ;;  %v8749_v12 = vpop.eup %8748 }
 0x6df   : > { %v8290_v40 = vpack.i.bf16 %v2405_v63, %v2404_v46  ;;  %v3108_v32 = vmul.f32 %v8749_v12, %v11597_v55  ;;  %v8751_v55 = vpop.eup %8750  ;;  %v8259_v12 = vunpack.i.h.bf16 %v11615_v35 }
 0x6e0   : > { %v2409_v34 = vmul.f32 %v8751_v55, %v11575_v22  ;;  %v8753_v56 = vpop.eup %8752  ;;  %v3073_v55 = vpop.f32.mrf.mxu2 }
 0x6e1   : > { %v8310_v44 = vpack.i.bf16 %v3109_v54, %v3108_v32  ;;  %v2408_v43 = vmul.f32 %v8753_v56, %v11565_v49  ;;  %v8755_v0 = vpop.eup %8754  ;;  %v8028_v49 = vld [vmem:[%s14231_s6] sm:$0xff] }
 0x6e2   : > { %v3113_v16 = vmul.f32 %v8755_v0, %v3070_v11  ;;  %v8264_v11 = vunpack.i.h.bf16 %v11610_v48  ;;  %v8268_v0 = vunpack.i.l.bf16 %v11649_v6 }
 0x6e3   : > { %v8340_v26 = vpack.i.bf16 %v2409_v34, %v2408_v43 }
 0x6e4   : > { %1931 = vadd.xlane.f32.xlu1 %v11235_v24  ;;  %v8034_v24 = vld [vmem:[%s14231_s6 + $0x30] sm:$0xff] }
 0x6e5   : > { %3435 = vmatpush.bf16.msrb.mxu3 %v8034_v24 }
 0x6f3   : > { %v11651_v38 = vpop.xlane.xlu0 %1929 }
 0x6f6   : > { %1935 = vadd.xlane.f32.xlu2 %v11257_v61  ;;  %v8033_v61 = vld [vmem:[%s14231_s6 + $0x28] sm:$0xff] }
 0x6f7   : > { %3436 = vmatpush.bf16.msrb.mxu3 %v8033_v61 }
 0x6fb   : > { %3437 = vmatpush.bf16.msrb.mxu3 %v8032_v25  ;;  %v2290_v31 = vpop.xlane.xlu0 %2289  ;;  %v8254_v25 = vunpack.i.h.bf16 %v11626_v60 }
 0x6fd   : > { %8291 = vrot.lane.b32.xlu1 %v8290_v40, %s9473_s26 }
 0x6fe   : > { %v11657_v15 = vpop.xlane.xlu2 %2995 }
 0x6ff   : > { %3438 = vmatpush.bf16.msrb.mxu3 %v8031_v59 }
 0x703   : > { %3439 = vmatpush.bf16.msrb.mxu3 %v8030_v47  ;;  %v11687_v8 = vpop.xlane.xlu0 %2649 }
 0x704   : > { %v2992_v33 = vpop.xlane.xlu1 %2991 }
 0x705   : > { %8311 = vrot.lane.b32.xlu1 %v8310_v44, %s9472_s17  ;;  %8756 = vrcp.f32 %v2992_v33 }
 0x706   : > { %v2288_v10 = vpop.xlane.xlu2 %2287 }
 0x707   : > { %8758 = vrcp.f32 %v2288_v10  ;;  %3440 = vmatpush.bf16.msrb.mxu3 %v8029_v42  ;;  %v8263_v42 = vunpack.i.l.bf16 %v11610_v48 }
 0x708   : > { %8760 = vrcp.f32 %v2290_v31 }
 0x709   : > { %8762 = vrcp.f32 %v11340_v29 }
 0x70a   : > { %8764 = vrcp.f32 %v11330_v9 }
 0x70b   : > { %v8757_v57 = vpop.eup %8756  ;;  %3441 = vmatpush.bf16.msrb.mxu3 %v8028_v49  ;;  %v11694_v61 = vpop.xlane.xlu0 %2651  ;;  %8766 = vrcp.f32 %v11369_v62  ;;  %v8269_v62 = vunpack.i.h.bf16 %v11649_v6 }
 0x70c   : > { %v3112_v52 = vmul.f32 %v8757_v57, %v3068_v17  ;;  %v8258_v17 = vunpack.i.l.bf16 %v11615_v35  ;;  %8768 = vrcp.f32 %v11376_v58 }
 0x70d   : > { %v8759_v2 = vpop.eup %8758  ;;  %8770 = vrcp.f32 %v11572_v21 }
 0x70e   : > { %8341 = vrot.lane.b32.xlu2 %v8340_v26, %s9473_s26  ;;  %v11679_v30 = vpop.xlane.xlu2 %3001  ;;  %v8761_v22 = vpop.eup %8760  ;;  %v8330_v18 = vpack.i.bf16 %v3113_v16, %v3112_v52  ;;  %v2410_v24 = vmul.f32 %v8759_v2, %v11579_v19  ;;  %8772 = vrcp.f32 %v11589_v13 }
 0x70f   : > { %v2411_v63 = vmul.f32 %v8761_v22, %v11581_v39  ;;  %v8763_v19 = vpop.eup %8762  ;;  %v8253_v39 = vunpack.i.l.bf16 %v11626_v60  ;;  %v3075_v22 = vpop.f32.mrf.mxu2  ;;  %8774 = vrcp.f32 %v11657_v15 }
 0x710   : > { %8331 = vrot.lane.b32.xlu0 %v8330_v18, %s9472_s17  ;;  %v8765_v54 = vpop.eup %8764  ;;  %v2019_v29 = vmul.f32 %v8763_v19, %v11374_v36 }
 0x711   : > { %v8350_v46 = vpack.i.bf16 %v2411_v63, %v2410_v24  ;;  %v2018_v32 = vmul.f32 %v8765_v54, %v11361_v5  ;;  %v8767_v34 = vpop.eup %8766 }
 0x712   : > { %v3313_v59 = vsel %vm1735_vm9, %v2019_v29, %v8254_v25  ;;  %v8769_v56 = vpop.eup %8768  ;;  %v2020_v57 = vmul.f32 %v8767_v34, %v11381_v51 }
 0x713   : > { %v3312_v44 = vsel %vm1735_vm9, %v2018_v32, %v8253_v39  ;;  %v3329_v60 = vsel %vm561_vm0, %v3313_v59, %v8259_v12  ;;  %v3006_v47 = vpop.xlane.xlu0 %3005  ;;  %v2021_v58 = vmul.f32 %v8769_v56, %v11392_v50  ;;  %v2724_v50 = vpop.f32.mrf.mxu0 }
 0x714   : > { %v3328_v10 = vsel %vm561_vm0, %v3312_v44, %v8258_v17  ;;  %v8771_v63 = vpop.eup %8770 }
 0x715   : > { %v3315_v16 = vsel %vm1735_vm9, %v2021_v58, %v8264_v11  ;;  %v2762_v19 = vmul.f32 %v8771_v63, %v2724_v50  ;;  %v8773_v25 = vpop.eup %8772  ;;  %v8273_v11 = vunpack.i.l.bf16 %v11629_v45 }
 0x716   : > { %8351 = vrot.lane.b32.xlu2 %v8350_v46, %s9473_s26  ;;  %v11690_v40 = vpop.xlane.xlu2 %3003  ;;  %v3331_v49 = vsel %vm561_vm0, %v3315_v16, %v8269_v62  ;;  %v8775_v39 = vpop.eup %8774  ;;  %v8278_v62 = vunpack.i.l.bf16 %v11639_v27 }
 0x717   : > { %v3078_v24 = vpop.f32.mrf.mxu2  ;;  %v3114_v29 = vmul.f32 %v8775_v39, %v3073_v55  ;;  %v14371_v39 = vld [vmem:[#allocation46_spill] sm:$0xff] }
 0x71c   : > { %v11726_v18 = vpop.permute.xlu1 %8286 }
 0x71e   : > { %v11696_v14 = vpop.permute.xlu2 %8296 }
 0x71f   : > { %v3080_v12 = vpop.f32.mrf.mxu2 }
 0x726   : > { %v8302_v9 = vpop.permute.xlu2 %8301  ;;  %v8307_v43 = vpop.permute.xlu0 %8306 }
 0x727   : > { %v8304_v33 = vunpack.i.h.bf16 %v8302_v9  ;;  %v8303_v31 = vunpack.i.l.bf16 %v8302_v9  ;;  %v8309_v26 = vunpack.i.h.bf16 %v8307_v43  ;;  %v8308_v2 = vunpack.i.l.bf16 %v8307_v43  ;;  %v3083_v59 = vpop.f32.mrf.mxu2 }
 0x728   : > { %v8274_v43 = vunpack.i.h.bf16 %v11629_v45  ;;  %v14369_v45 = vld [vmem:[#allocation45_spill] sm:$0xff] }
 0x729   : > { %v3345_v35 = vsel %vm3344_vm10, %v3328_v10, %v8303_v31  ;;  %v3346_v5 = vsel %vm3344_vm10, %v3329_v60, %v8304_v33  ;;  %v3348_v6 = vsel %vm3344_vm10, %v3331_v49, %v8309_v26  ;;  %v7735_v49 = vld [vmem:[%s14233_s8 + $0x70] sm:$0xf] }
 0x72a   : > { %v3377_v36 = vpack.c.bf16 %v3346_v5, %v3345_v35 }
 0x72c   : > { %3442 = vmatmul.bf16.vlgmr.msrb.gmra.mxu3 %v3377_v36 }
 0x72e   : > { %v8317_v63 = vpop.permute.xlu2 %8316 }
 0x72f   : > { %1933 = vadd.xlane.f32.xlu1 %v11255_v7  ;;  %v3314_v7 = vsel %vm1735_vm9, %v2020_v57, %v8263_v42  ;;  %v3085_v5 = vpop.f32.mrf.mxu2  ;;  %v8279_v42 = vunpack.i.h.bf16 %v11639_v27 }
 0x730   : > { %v3330_v52 = vsel %vm561_vm0, %v3314_v7, %v8268_v0 }
 0x731   : > { %v3347_v48 = vsel %vm3344_vm10, %v3330_v52, %v8308_v2  ;;  %v14370_v52 = vld [vmem:[#allocation43_spill] sm:$0xff] }
 0x732   : > { %v3378_v51 = vpack.c.bf16 %v3348_v6, %v3347_v48  ;;  %v8058_v48 = vld [vmem:[%s14233_s8 + $0x74] sm:$0xf] }
 0x737   : > { %1939 = vadd.xlane.f32.xlu1 %v11279_v41  ;;  %v2726_v41 = vpop.f32.mrf.mxu0 }
 0x738   : > { %v2763_v54 = vmul.f32 %v8773_v25, %v2726_v41  ;;  %v8283_v41 = vunpack.i.l.bf16 %v11634_v28  ;;  %v8288_v25 = vunpack.i.l.bf16 %v11726_v18 }
 0x73a   : > { %v8345_v32 = vpack.i.bf16 %v2763_v54, %v2762_v19  ;;  %v8289_v19 = vunpack.i.h.bf16 %v11726_v18 }
 0x73c   : > { %3447 = vmatmul.bf16.gmra.mxu3 %v3378_v51 }
 0x747   : > { %v2998_v46 = vpop.xlane.xlu1 %2997 }
 0x748   : > { %8776 = vrcp.f32 %v2998_v46  ;;  %v8284_v46 = vunpack.i.h.bf16 %v11634_v28 }
 0x749   : > { %8778 = vrcp.f32 %v11679_v30 }
 0x74e   : > { %v8777_v17 = vpop.eup %8776 }
 0x74f   : > { %v3115_v21 = vmul.f32 %v8777_v17, %v3075_v22  ;;  %v3000_v9 = vpop.xlane.xlu1 %2999  ;;  %v8779_v15 = vpop.eup %8778  ;;  %v8319_v17 = vunpack.i.h.bf16 %v8317_v63 }
 0x750   : > { %8780 = vrcp.f32 %v3000_v9  ;;  %8346 = vrot.lane.b32.xlu1 %v8345_v32, %s9469_s29  ;;  %v3117_v33 = vmul.f32 %v8779_v15, %v3080_v12  ;;  %v11769_v22 = vpop.permute.xlu0 %8321  ;;  %v8318_v32 = vunpack.i.l.bf16 %v8317_v63  ;;  %v2729_v15 = vpop.f32.mrf.mxu0 }
 0x751   : > { %v8335_v13 = vpack.i.bf16 %v3115_v21, %v3114_v29  ;;  %8782 = vrcp.f32 %v11690_v40  ;;  %v14372_v29 = vld [vmem:[#allocation44_spill] sm:$0xff] }
 0x752   : > { %8784 = vrcp.f32 %v3006_v47 }
 0x753   : > { %8336 = vrot.lane.b32.xlu0 %v8335_v13, %s9472_s17  ;;  %8786 = vrcp.f32 %v11388_v4 }
 0x754   : > { %8788 = vrcp.f32 %v11390_v53 }
 0x755   : > { %8790 = vrcp.f32 %v11398_v3  ;;  %v8059_v3 = vld [vmem:[%s14233_s8 + $0x74] sm:$0xf0] }
 0x756   : > { %v8781_v44 = vpop.eup %8780  ;;  %8792 = vrcp.f32 %v11417_v37  ;;  %v7736_v6 = vor.u32 %v8059_v3, %v7735_v49  ;;  %v7737_v37 = vld [vmem:[%s14233_s8 + $0x78] sm:$0xf0] }
 0x757   : > { %v3116_v31 = vmul.f32 %v8781_v44, %v3078_v24  ;;  %v8783_v60 = vpop.eup %8782  ;;  %v1932_v34 = vpop.xlane.xlu1 %1931  ;;  %v7740_v51 = vor.u32 %v8058_v48, %v7737_v37  ;;  %v7727_v44 = vld [vmem:[%s14233_s8 + $0x60] sm:$0xf]  ;;  %v8051_v48 = vld [vmem:[%s14233_s8 + $0x34] sm:$0xf0]  ;;  %v7705_v37 = vld [vmem:[%s14233_s8 + $0x38] sm:$0xf0] }
 0x758   : > { %v8785_v30 = vpop.eup %8784  ;;  %v3118_v35 = vmul.f32 %v8783_v60, %v3083_v59  ;;  %4076 = vmatpush.bf16.msrb.mxu1 %v7736_v6  ;;  %8794 = vrcp.f32 %v1932_v34  ;;  %v8050_v6 = vld [vmem:[%s14233_s8 + $0x34] sm:$0xf] }
 0x759   : > { %v8360_v10 = vpack.i.bf16 %v3117_v33, %v3116_v31  ;;  %v3119_v36 = vmul.f32 %v8785_v30, %v3085_v5  ;;  %v8787_v47 = vpop.eup %8786  ;;  %4125 = vmatpush.bf16.msra.mxu2 %v7740_v51  ;;  %8796 = vrcp.f32 %v11651_v38  ;;  %v8057_v33 = vld [vmem:[%s14233_s8 + $0x64] sm:$0xf0]  ;;  %v8056_v31 = vld [vmem:[%s14233_s8 + $0x64] sm:$0xf]  ;;  %v7729_v38 = vld [vmem:[%s14233_s8 + $0x68] sm:$0xf0] }
 0x75a   : > { %v8789_v56 = vpop.eup %8788  ;;  %v2023_v0 = vmul.f32 %v8787_v47, %v11408_v1  ;;  %8798 = vrcp.f32 %v11694_v61  ;;  %v7728_v60 = vor.u32 %v8057_v33, %v7727_v44  ;;  %v7719_v61 = vld [vmem:[%s14233_s8 + $0x50] sm:$0xf]  ;;  %v8055_v30 = vld [vmem:[%s14233_s8 + $0x54] sm:$0xf0]  ;;  %v8054_v5 = vld [vmem:[%s14233_s8 + $0x54] sm:$0xf] }
 0x75b   : > { %8361 = vrot.lane.b32.xlu2 %v8360_v10, %s9472_s17  ;;  %v8365_v55 = vpack.i.bf16 %v3119_v36, %v3118_v35  ;;  %v2022_v57 = vmul.f32 %v8789_v56, %v11401_v23  ;;  %v8791_v50 = vpop.eup %8790  ;;  %8800 = vrcp.f32 %v11687_v8  ;;  %v7732_v35 = vor.u32 %v8056_v31, %v7729_v38  ;;  %v7721_v36 = vld [vmem:[%s14233_s8 + $0x58] sm:$0xf0]  ;;  %v7679_v33 = vld [vmem:[%s14233_s8] sm:$0xf]  ;;  %v8045_v31 = vld [vmem:[%s14233_s8 + $0x4] sm:$0xf0] }
 0x75c   : > { %v3317_v4 = vsel %vm1735_vm9, %v2023_v0, %v8274_v43  ;;  %v8793_v24 = vpop.eup %8792  ;;  %v2024_v54 = vmul.f32 %v8791_v50, %v14371_v39  ;;  %4077 = vmatpush.bf16.msrb.mxu1 %v7728_v60  ;;  %v7724_v47 = vor.u32 %v8054_v5, %v7721_v36  ;;  %v8299_v50 = vunpack.i.h.bf16 %v11696_v14  ;;  %v7681_v60 = vld [vmem:[%s14233_s8 + $0x8] sm:$0xf0] }
 0x75d   : > { %v3316_v53 = vsel %vm1735_vm9, %v2022_v57, %v8273_v11  ;;  %v3333_v7 = vsel %vm561_vm0, %v3317_v4, %v8279_v42  ;;  %v2025_v12 = vmul.f32 %v8793_v24, %v11425_v20  ;;  %v11785_v20 = vpop.permute.xlu0 %8326  ;;  %4126 = vmatpush.bf16.msra.mxu2 %v7732_v35  ;;  %v14373_v42 = vld [vmem:[#allocation48_spill] sm:$0xff]  ;;  %v14374_v4 = vld [vmem:[#allocation47_spill] sm:$0xff]  ;;  %v8298_v24 = vunpack.i.l.bf16 %v11696_v14 }
 0x75e   : > { %v3332_v16 = vsel %vm561_vm0, %v3316_v53, %v8278_v62  ;;  %v3318_v9 = vsel %vm1735_vm9, %v2024_v54, %v8283_v41  ;;  %v8795_v34 = vpop.eup %8794  ;;  %v7695_v41 = vld [vmem:[%s14233_s8 + $0x20] sm:$0xf]  ;;  %v8048_v14 = vld [vmem:[%s14233_s8 + $0x24] sm:$0xf]  ;;  %v7680_v38 = vor.u32 %v8045_v31, %v7679_v33 }
 0x75f   : > { %v3319_v21 = vsel %vm1735_vm9, %v2025_v12, %v8284_v46  ;;  %v3334_v13 = vsel %vm561_vm0, %v3318_v9, %v8288_v25  ;;  %v8797_v56 = vpop.eup %8796  ;;  %v2027_v62 = vmul.f32 %v8795_v34, %v14373_v42  ;;  %v7708_v46 = vor.u32 %v8050_v6, %v7705_v37  ;;  %v7697_v12 = vld [vmem:[%s14233_s8 + $0x28] sm:$0xf0] }
 0x760   : > { %v3335_v28 = vsel %vm561_vm0, %v3319_v21, %v8289_v19  ;;  %v3351_v18 = vsel %vm3344_vm10, %v3334_v13, %v8318_v32  ;;  %v8799_v11 = vpop.eup %8798  ;;  %v2026_v53 = vmul.f32 %v8797_v56, %v14374_v4  ;;  %v8049_v19 = vld [vmem:[%s14233_s8 + $0x24] sm:$0xf0]  ;;  %v7700_v21 = vor.u32 %v8048_v14, %v7697_v12  ;;  %v7687_v13 = vld [vmem:[%s14233_s8 + $0x10] sm:$0xf]  ;;  %v14379_v4 = vld [vmem:[#allocation50_spill] sm:$0xff] }
 0x761   : > { %v3352_v59 = vsel %vm3344_vm10, %v3335_v28, %v8319_v17  ;;  %v8801_v57 = vpop.eup %8800  ;;  %4127 = vmatpush.bf16.msra.mxu2 %v7724_v47  ;;  %v8047_v28 = vld [vmem:[%s14233_s8 + $0x14] sm:$0xf0] }
 0x762   : > { %v3380_v10 = vpack.c.bf16 %v3352_v59, %v3351_v18  ;;  %v2764_v51 = vmul.f32 %v8801_v57, %v2729_v15  ;;  %v8046_v15 = vld [vmem:[%s14233_s8 + $0x14] sm:$0xf]  ;;  %v7688_v18 = vor.u32 %v8047_v28, %v7687_v13  ;;  %v7689_v59 = vld [vmem:[%s14233_s8 + $0x18] sm:$0xf0] }
 0x763   : > { %8366 = vrot.lane.b32.xlu2 %v8365_v55, %s9472_s17  ;;  %v7720_v55 = vor.u32 %v8055_v30, %v7719_v61  ;;  %v7692_v44 = vor.u32 %v8046_v15, %v7689_v59  ;;  %v9198_v30 = vld [vmem:[#allocation5] sm:$0xff] }
 0x764   : > { %v11886_v35 = vperm.slane %v9198_v30, 4 }
 0x765   : > { %4078 = vmatpush.bf16.msrb.mxu1 %v7720_v55  ;;  %v14375_v55 = vld [vmem:[#allocation33_spill] sm:$0xff] }
 0x769   : > { %v1936_v47 = vpop.xlane.xlu2 %1935 }
 0x76a   : > { %8802 = vrcp.f32 %v1936_v47 }
 0x76f   : > { %v11739_v40 = vpop.permute.xlu1 %8291 }
 0x770   : > { %v8294_v43 = vunpack.i.h.bf16 %v11739_v40  ;;  %v8293_v8 = vunpack.i.l.bf16 %v11739_v40  ;;  %v8052_v40 = vld [vmem:[%s14233_s8 + $0x44] sm:$0xf] }
 0x777   : > { %v8312_v58 = vpop.permute.xlu1 %8311 }
 0x778   : > { %v8314_v26 = vunpack.i.h.bf16 %v8312_v58  ;;  %v8313_v2 = vunpack.i.l.bf16 %v8312_v58  ;;  %v2731_v58 = vpop.f32.mrf.mxu0 }
 0x77a   : > { %1941 = vadd.xlane.f32.xlu1 %v14369_v45  ;;  %v3349_v27 = vsel %vm3344_vm10, %v3332_v16, %v8313_v2  ;;  %v3350_v1 = vsel %vm3344_vm10, %v3333_v7, %v8314_v26  ;;  %v7711_v26 = vld [vmem:[%s14233_s8 + $0x40] sm:$0xf]  ;;  %v8053_v2 = vld [vmem:[%s14233_s8 + $0x44] sm:$0xf0]  ;;  %v2765_v16 = vmul.f32 %v8799_v11, %v2731_v58  ;;  %v3321_v7 = vsel %vm1735_vm9, %v2027_v62, %v8294_v43  ;;  %v8803_v62 = vpop.eup %8802 }
 0x77b   : > { %v3379_v23 = vpack.c.bf16 %v3350_v1, %v3349_v27  ;;  %v7712_v45 = vor.u32 %v8053_v2, %v7711_v26  ;;  %v7713_v27 = vld [vmem:[%s14233_s8 + $0x48] sm:$0xf0]  ;;  %v7703_v1 = vld [vmem:[%s14233_s8 + $0x30] sm:$0xf]  ;;  %v3337_v54 = vsel %vm561_vm0, %v3321_v7, %v8299_v50  ;;  %v14380_v26 = vld [vmem:[#allocation49_spill] sm:$0xff]  ;;  %v8323_v7 = vunpack.i.l.bf16 %v11769_v22 }
 0x77c   : > { %v7716_v3 = vor.u32 %v8052_v40, %v7713_v27  ;;  %v7704_v63 = vor.u32 %v8051_v48, %v7703_v1  ;;  %v8355_v25 = vpack.i.bf16 %v2765_v16, %v2764_v51  ;;  %v8324_v16 = vunpack.i.h.bf16 %v11769_v22 }
 0x77d   : > { %1937 = vadd.xlane.f32.xlu0 %v14370_v52  ;;  %3452 = vmatmul.bf16.gmra.mxu3 %v3379_v23  ;;  %v3320_v23 = vsel %vm1735_vm9, %v2026_v53, %v8293_v8  ;;  %v14377_v8 = vld [vmem:[#allocation26_spill] sm:$0xff]  ;;  %v2029_v53 = vmul.f32 %v8803_v62, %v14379_v4  ;;  %v14389_v4 = vld [vmem:[#allocation53_spill] sm:$0xff] }
 0x77e   : > { %4079 = vmatpush.bf16.msrb.mxu1 %v7712_v45  ;;  %4128 = vmatpush.bf16.msra.mxu2 %v7716_v3  ;;  %v3336_v39 = vsel %vm561_vm0, %v3320_v23, %v8298_v24  ;;  %v14381_v45 = vld [vmem:[#allocation31_spill] sm:$0xff] }
 0x77f   : > { %v3323_v23 = vsel %vm1735_vm9, %v2029_v53, %v8324_v16 }
 0x782   : > { %v8332_v0 = vpop.permute.xlu0 %8331  ;;  %4080 = vmatpush.bf16.msrb.mxu1 %v7704_v63  ;;  %4129 = vmatpush.bf16.msra.mxu2 %v7708_v46 }
 0x783   : > { %v8334_v52 = vunpack.i.h.bf16 %v8332_v0  ;;  %v8333_v49 = vunpack.i.l.bf16 %v8332_v0 }
 0x785   : > { %1943 = vadd.xlane.f32.xlu0 %v14372_v29  ;;  %v3353_v17 = vsel %vm3344_vm10, %v3336_v39, %v8333_v49  ;;  %v3354_v32 = vsel %vm3344_vm10, %v3337_v54, %v8334_v52  ;;  %v7696_v29 = vor.u32 %v8049_v19, %v7695_v41  ;;  %v8329_v52 = vunpack.i.h.bf16 %v11785_v20  ;;  %v14383_v41 = vld [vmem:[#allocation35_spill] sm:$0xff] }
 0x786   : > { %v3381_v9 = vpack.c.bf16 %v3354_v32, %v3353_v17  ;;  %4130 = vmatpush.bf16.msra.mxu2 %v7700_v21  ;;  %v8328_v49 = vunpack.i.l.bf16 %v11785_v20  ;;  %v14385_v32 = vld [vmem:[#allocation52_spill] sm:$0xff] }
 0x787   : > { %4081 = vmatpush.bf16.msrb.mxu1 %v7696_v29  ;;  %v3339_v51 = vsel %vm561_vm0, %v3323_v23, %v8329_v52 }
 0x78a   : > { %4131 = vmatpush.bf16.msra.mxu2 %v7692_v44 }
 0x78b   : > { %4082 = vmatpush.bf16.msrb.mxu1 %v7688_v18  ;;  %v14386_v18 = vld [vmem:[#allocation51_spill] sm:$0xff] }
 0x78d   : > { %3457 = vmatmul.bf16.gmra.mxu3 %v3380_v10  ;;  %v8044_v10 = vld [vmem:[%s14233_s8 + $0x4] sm:$0xf] }
 0x78e   : > { %v7684_v61 = vor.u32 %v8044_v10, %v7681_v60 }
 0x78f   : > { %4083 = vmatpush.bf16.msrb.mxu1 %v7680_v38 }
 0x790   : > { %4132 = vmatpush.bf16.msra.mxu2 %v7684_v61 }
 0x799   : > { %8356 = vrot.lane.b32.xlu0 %v8355_v25, %s9469_s29  ;;  %v8342_v25 = vpop.permute.xlu2 %8341 }
 0x79a   : > { %v8343_v15 = vunpack.i.l.bf16 %v8342_v25 }
 0x79d   : > { %3462 = vmatmul.bf16.gmra.mxu3 %v3381_v9  ;;  %v8344_v9 = vunpack.i.h.bf16 %v8342_v25  ;;  %v14393_v25 = vld [vmem:[#allocation39_spill] sm:$0xff] }
 0x7a1   : > { %v8352_v54 = vpop.permute.xlu2 %8351 }
 0x7a2   : > { %v1934_v56 = vpop.xlane.xlu1 %1933  ;;  %v8354_v16 = vunpack.i.h.bf16 %v8352_v54 }
 0x7a3   : > { %8804 = vrcp.f32 %v1934_v56 }
 0x7a9   : > { %v8805_v57 = vpop.eup %8804 }
 0x7aa   : > { %v2028_v2 = vmul.f32 %v8805_v57, %v14380_v26  ;;  %v1940_v39 = vpop.xlane.xlu1 %1939  ;;  %v14390_v26 = vld [vmem:[#allocation54_spill] sm:$0xff] }
 0x7ab   : > { %8806 = vrcp.f32 %v1940_v39 }
 0x7ac   : > { %v3322_v1 = vsel %vm1735_vm9, %v2028_v2, %v8323_v7  ;;  %v8353_v7 = vunpack.i.l.bf16 %v8352_v54 }
 0x7ad   : > { %v3338_v22 = vsel %vm561_vm0, %v3322_v1, %v8328_v49 }
 0x7af   : > { %v3443_v5 = vpop.f32.mrf.mxu3 }
 0x7b0   : > { %v3444_v36 = vadd.f32 %v3443_v5, %v11886_v35 }
 0x7b1   : > { %v8807_v12 = vpop.eup %8806 }
 0x7b2   : > { %v11890_v34 = vadd.f32 %v3444_v36, %v14375_v55  ;;  %v2031_v29 = vmul.f32 %v8807_v12, %v14385_v32  ;;  %v14395_v12 = vld [vmem:[#allocation40_spill] sm:$0xff] }
 0x7b4   : > { %14376 = vst [vmem:[#allocation45_spill] sm:$0xff] %v11890_v34  ;;  %3499 = vadd.xlane.f32.xlu2 %v11890_v34  ;;  %v3325_v44 = vsel %vm1735_vm9, %v2031_v29, %v8344_v9  ;;  %v14397_v9 = vld [vmem:[#allocation30_spill] sm:$0xff] }
 0x7b5   : > { %v8362_v28 = vpop.permute.xlu2 %8361 }
 0x7b6   : > { %v8364_v10 = vunpack.i.h.bf16 %v8362_v28  ;;  %v8363_v60 = vunpack.i.l.bf16 %v8362_v28 }
 0x7b7   : > { %v3445_v43 = vpop.f32.mrf.mxu3 }
 0x7b8   : > { %v3446_v11 = vadd.f32 %v3445_v43, %v11886_v35 }
 0x7ba   : > { %v11895_v42 = vadd.f32 %v3446_v11, %v14377_v8  ;;  %v14387_v11 = vld [vmem:[#allocation36_spill] sm:$0xff] }
 0x7bc   : > { %14378 = vst [vmem:[#allocation43_spill] sm:$0xff] %v11895_v42  ;;  %v3988_v0 = vpack.c.bf16 %v11895_v42, %v11890_v34 }
 0x7be   : > { %4084 = vmatmul.bf16.vlgmr.msrb.gmra.mxu1 %v3988_v0  ;;  %4133 = vmatmul.bf16.vlgmr.msra.gmra.mxu2 %v3988_v0 }
 0x7bf   : > { %v3448_v58 = vpop.f32.mrf.mxu3 }
 0x7c0   : > { %v3449_v40 = vadd.f32 %v3448_v58, %v11886_v35  ;;  %v8367_v58 = vpop.permute.xlu2 %8366 }
 0x7c1   : > { %v8369_v52 = vunpack.i.h.bf16 %v8367_v58 }
 0x7c2   : > { %v11905_v27 = vadd.f32 %v3449_v40, %v14381_v45  ;;  %v8347_v17 = vpop.permute.xlu1 %8346  ;;  %v14391_v45 = vld [vmem:[#allocation37_spill] sm:$0xff] }
 0x7c3   : > { %3501 = vadd.xlane.f32.xlu0 %v11895_v42  ;;  %v8349_v21 = vunpack.i.h.bf16 %v8347_v17  ;;  %v8348_v33 = vunpack.i.l.bf16 %v8347_v17 }
 0x7c4   : > { %14382 = vst [vmem:[#allocation46_spill] sm:$0xff] %v11905_v27  ;;  %3503 = vadd.xlane.f32.xlu1 %v11905_v27 }
 0x7c5   : > { %v8337_v3 = vpop.permute.xlu0 %8336  ;;  %v3341_v31 = vsel %vm561_vm0, %v3325_v44, %v8349_v21 }
 0x7c6   : > { %v8339_v48 = vunpack.i.h.bf16 %v8337_v3  ;;  %v8338_v6 = vunpack.i.l.bf16 %v8337_v3  ;;  %v3358_v36 = vsel %vm3344_vm10, %v3341_v31, %v8364_v10  ;;  %v14401_v10 = vld [vmem:[#allocation32_spill] sm:$0xff] }
 0x7c7   : > { %v3450_v37 = vpop.f32.mrf.mxu3 }
 0x7c8   : > { %v3451_v50 = vadd.f32 %v3450_v37, %v11886_v35  ;;  %v3355_v24 = vsel %vm3344_vm10, %v3338_v22, %v8338_v6  ;;  %v3356_v63 = vsel %vm3344_vm10, %v3339_v51, %v8339_v48  ;;  %v8368_v48 = vunpack.i.l.bf16 %v8367_v58 }
 0x7c9   : > { %v3382_v46 = vpack.c.bf16 %v3356_v63, %v3355_v24 }
 0x7ca   : > { %v11919_v19 = vadd.f32 %v3451_v50, %v14383_v41 }
 0x7cb   : > { %3467 = vmatmul.bf16.gmra.mxu3 %v3382_v46 }
 0x7cc   : > { %14384 = vst [vmem:[#allocation44_spill] sm:$0xff] %v11919_v19  ;;  %3505 = vadd.xlane.f32.xlu1 %v11919_v19  ;;  %v3989_v20 = vpack.c.bf16 %v11919_v19, %v11905_v27 }
 0x7ce   : > { %4089 = vmatmul.bf16.gmra.mxu1 %v3989_v20  ;;  %4138 = vmatmul.bf16.gmra.mxu2 %v3989_v20 }
 0x7ed   : > { %v1942_v30 = vpop.xlane.xlu1 %1941 }
 0x7f0   : > { %v1938_v14 = vpop.xlane.xlu0 %1937 }
 0x7f1   : > { %8808 = vrcp.f32 %v1938_v14 }
 0x7f2   : > { %8810 = vrcp.f32 %v1942_v30  ;;  %v14403_v30 = vld [vmem:[#allocation25_spill] sm:$0xff] }
 0x7f7   : > { %v8809_v13 = vpop.eup %8808 }
 0x7f8   : > { %v2030_v59 = vmul.f32 %v8809_v13, %v14386_v18  ;;  %v1944_v55 = vpop.xlane.xlu0 %1943  ;;  %v8811_v62 = vpop.eup %8810  ;;  %v14399_v18 = vld [vmem:[#allocation24_spill] sm:$0xff] }
 0x7f9   : > { %8812 = vrcp.f32 %v1944_v55  ;;  %v2032_v53 = vmul.f32 %v8811_v62, %v14389_v4 }
 0x7fa   : > { %v3324_v38 = vsel %vm1735_vm9, %v2030_v59, %v8343_v15 }
 0x7fb   : > { %v3340_v61 = vsel %vm561_vm0, %v3324_v38, %v8348_v33  ;;  %v3326_v37 = vsel %vm1735_vm9, %v2032_v53, %v8353_v7 }
 0x7fc   : > { %v3357_v5 = vsel %vm3344_vm10, %v3340_v61, %v8363_v60 }
 0x7fd   : > { %v3383_v47 = vpack.c.bf16 %v3358_v36, %v3357_v5 }
 0x7ff   : > { %3472 = vmatmul.bf16.gmra.mxu3 %v3383_v47  ;;  %v8813_v0 = vpop.eup %8812 }
 0x800   : > { %v3453_v56 = vpop.f32.mrf.mxu3  ;;  %v2033_v2 = vmul.f32 %v8813_v0, %v14390_v26  ;;  %v14406_v0 = vld [vmem:[#allocation27_spill] sm:$0xff]  ;;  %v14408_v26 = vld [vmem:[#allocation29_spill] sm:$0xff] }
 0x801   : > { %v3454_v43 = vadd.f32 %v3453_v56, %v11886_v35 }
 0x802   : > { %v3327_v22 = vsel %vm1735_vm9, %v2033_v2, %v8354_v16 }
 0x803   : > { %v11934_v8 = vadd.f32 %v3454_v43, %v14387_v11  ;;  %v14405_v11 = vld [vmem:[#allocation38_spill] sm:$0xff] }
 0x805   : > { %14388 = vst [vmem:[#allocation48_spill] sm:$0xff] %v11934_v8  ;;  %3507 = vadd.xlane.f32.xlu1 %v11934_v8 }
 0x808   : > { %v3455_v57 = vpop.f32.mrf.mxu3 }
 0x809   : > { %v3456_v40 = vadd.f32 %v3455_v57, %v11886_v35 }
 0x80b   : > { %v11941_v1 = vadd.f32 %v3456_v40, %v14391_v45  ;;  %v8357_v23 = vpop.permute.xlu0 %8356 }
 0x80c   : > { %v8359_v49 = vunpack.i.h.bf16 %v8357_v23  ;;  %v8358_v3 = vunpack.i.l.bf16 %v8357_v23 }
 0x80d   : > { %14392 = vst [vmem:[#allocation47_spill] sm:$0xff] %v11941_v1  ;;  %3509 = vadd.xlane.f32.xlu2 %v11941_v1  ;;  %v3990_v6 = vpack.c.bf16 %v11941_v1, %v11934_v8 }
 0x80e   : > { %v3342_v51 = vsel %vm561_vm0, %v3326_v37, %v8358_v3  ;;  %v3343_v50 = vsel %vm561_vm0, %v3327_v22, %v8359_v49  ;;  %v14410_v3 = vld [vmem:[#allocation28_spill] sm:$0xff] }
 0x80f   : > { %4094 = vmatmul.bf16.gmra.mxu1 %v3990_v6  ;;  %4143 = vmatmul.bf16.gmra.mxu2 %v3990_v6  ;;  %v3359_v24 = vsel %vm3344_vm10, %v3342_v51, %v8368_v48  ;;  %v3360_v63 = vsel %vm3344_vm10, %v3343_v50, %v8369_v52 }
 0x810   : > { %v3458_v46 = vpop.f32.mrf.mxu3  ;;  %v3384_v41 = vpack.c.bf16 %v3360_v63, %v3359_v24  ;;  %v14412_v63 = vld [vmem:[#allocation34_spill] sm:$0xff] }
 0x811   : > { %v3459_v20 = vadd.f32 %v3458_v46, %v11886_v35 }
 0x812   : > { %3477 = vmatmul.bf16.gmra.mxu3 %v3384_v41 }
 0x813   : > { %v11954_v39 = vadd.f32 %v3459_v20, %v14393_v25 }
 0x815   : > { %14394 = vst [vmem:[#allocation33_spill] sm:$0xff] %v11954_v39  ;;  %3511 = vadd.xlane.f32.xlu0 %v11954_v39 }
 0x818   : > { %v3460_v54 = vpop.f32.mrf.mxu3 }
 0x819   : > { %v3461_v14 = vadd.f32 %v3460_v54, %v11886_v35 }
 0x81b   : > { %v11959_v17 = vadd.f32 %v3461_v14, %v14395_v12 }
 0x81d   : > { %14396 = vst [vmem:[#allocation26_spill] sm:$0xff] %v11959_v17  ;;  %3513 = vadd.xlane.f32.xlu1 %v11959_v17  ;;  %v3991_v32 = vpack.c.bf16 %v11959_v17, %v11954_v39 }
 0x81f   : > { %4099 = vmatmul.bf16.gmra.mxu1 %v3991_v32  ;;  %4148 = vmatmul.bf16.gmra.mxu2 %v3991_v32 }
 0x820   : > { %v3463_v29 = vpop.f32.mrf.mxu3 }
 0x821   : > { %v3464_v21 = vadd.f32 %v3463_v29, %v11886_v35 }
 0x823   : > { %v11966_v13 = vadd.f32 %v3464_v21, %v14397_v9 }
 0x825   : > { %14398 = vst [vmem:[#allocation50_spill] sm:$0xff] %v11966_v13  ;;  %3515 = vadd.xlane.f32.xlu1 %v11966_v13 }
 0x827   : > { %v3500_v45 = vpop.xlane.xlu2 %3499 }
 0x828   : > { %v3465_v28 = vpop.f32.mrf.mxu3  ;;  %v3531_v49 = vmul.f32 %v3500_v45, %v14405_v11 }
 0x829   : > { %v3466_v15 = vadd.f32 %v3465_v28, %v11886_v35 }
 0x82a   : > { %v12013_v6 = vsub.f32 %v11890_v34, %v3531_v49 }
 0x82b   : > { %v11971_v59 = vadd.f32 %v3466_v15, %v14399_v18 }
 0x82c   : > { %v3563_v41 = vmul.f32 %v12013_v6, %v12013_v6 }
 0x82d   : > { %14400 = vst [vmem:[#allocation49_spill] sm:$0xff] %v11971_v59  ;;  %3517 = vadd.xlane.f32.xlu2 %v11971_v59  ;;  %v3992_v44 = vpack.c.bf16 %v11971_v59, %v11966_v13 }
 0x82f   : > { %4104 = vmatmul.bf16.gmra.mxu1 %v3992_v44  ;;  %4153 = vmatmul.bf16.gmra.mxu2 %v3992_v44 }
 0x836   : > { %v3502_v37 = vpop.xlane.xlu0 %3501 }
 0x837   : > { %v3504_v55 = vpop.xlane.xlu1 %3503  ;;  %v3532_v24 = vmul.f32 %v3502_v37, %v14405_v11 }
 0x838   : > { %v3533_v14 = vmul.f32 %v3504_v55, %v14405_v11 }
 0x83a   : > { %v12038_v32 = vsub.f32 %v11905_v27, %v3533_v14 }
 0x83b   : > { %v4085_v7 = vpop.f32.mrf.mxu1 }
 0x83c   : > { %v3565_v21 = vmul.f32 %v12038_v32, %v12038_v32 }
 0x83f   : > { %v3506_v47 = vpop.xlane.xlu1 %3505 }
 0x840   : > { %v3534_v62 = vmul.f32 %v3506_v47, %v14405_v11 }
 0x841   : > { %v4134_v25 = vpop.f32.mrf.mxu2 }
 0x842   : > { %v11995_v58 = vsub.f32 %v11919_v19, %v3534_v62 }
 0x843   : > { %v4087_v51 = vpop.f32.mrf.mxu1 }
 0x844   : > { %v3566_v40 = vmul.f32 %v11995_v58, %v11995_v58  ;;  %v12022_v20 = vpack.c.bf16 %v4087_v51, %v4085_v7 }
 0x849   : > { %v4136_v29 = vpop.f32.mrf.mxu2 }
 0x84a   : > { %v12042_v9 = vpack.c.bf16 %v4136_v29, %v4134_v25 }
 0x84b   : > { %v4090_v28 = vpop.f32.mrf.mxu1 }
 0x84e   : > { %v3468_v33 = vpop.f32.mrf.mxu3 }
 0x84f   : > { %v3469_v31 = vadd.f32 %v3468_v33, %v11886_v35 }
 0x851   : > { %v11978_v60 = vadd.f32 %v3469_v31, %v14401_v10  ;;  %v4139_v15 = vpop.f32.mrf.mxu2 }
 0x853   : > { %14402 = vst [vmem:[#allocation31_spill] sm:$0xff] %v11978_v60  ;;  %3519 = vadd.xlane.f32.xlu2 %v11978_v60  ;;  %v4092_v18 = vpop.f32.mrf.mxu1 }
 0x856   : > { %v3470_v38 = vpop.f32.mrf.mxu3 }
 0x857   : > { %v3471_v61 = vadd.f32 %v3470_v38, %v11886_v35  ;;  %v12052_v38 = vpack.c.bf16 %v4092_v18, %v4090_v28 }
 0x859   : > { %v11983_v5 = vadd.f32 %v3471_v61, %v14403_v30  ;;  %v4141_v44 = vpop.f32.mrf.mxu2 }
 0x85a   : > { %v12080_v7 = vpack.c.bf16 %v4141_v44, %v4139_v15  ;;  %v8041_v15 = vld [vmem:[#allocation8 + $0x28] sm:$0xff]  ;;  %v8040_v44 = vld [vmem:[#allocation8 + $0x20] sm:$0xff] }
 0x85b   : > { %14404 = vst [vmem:[#allocation35_spill] sm:$0xff] %v11983_v5  ;;  %3521 = vadd.xlane.f32.xlu0 %v11983_v5  ;;  %v3993_v36 = vpack.c.bf16 %v11983_v5, %v11978_v60 }
 0x85d   : > { %4109 = vmatmul.bf16.gmra.mxu1 %v3993_v36  ;;  %4158 = vmatmul.bf16.gmra.mxu2 %v3993_v36 }
 0x878   : > { %v3508_v61 = vpop.xlane.xlu1 %3507 }
 0x879   : > { %v3535_v36 = vmul.f32 %v3508_v61, %v14405_v11 }
 0x87b   : > { %v12058_v55 = vsub.f32 %v11934_v8, %v3535_v36  ;;  %v8038_v36 = vld [vmem:[#allocation8 + $0x10] sm:$0xff] }
 0x880   : > { %v3510_v62 = vpop.xlane.xlu2 %3509 }
 0x882   : > { %v3473_v56 = vpop.f32.mrf.mxu3 }
 0x883   : > { %v3474_v43 = vadd.f32 %v3473_v56, %v11886_v35  ;;  %v3567_v56 = vmul.f32 %v12058_v55, %v12058_v55 }
 0x885   : > { %v11991_v57 = vadd.f32 %v3474_v43, %v14406_v0 }
 0x887   : > { %14407 = vst [vmem:[#allocation52_spill] sm:$0xff] %v11991_v57  ;;  %3523 = vadd.xlane.f32.xlu0 %v11991_v57 }
 0x88a   : > { %v3475_v4 = vpop.f32.mrf.mxu3 }
 0x88b   : > { %v3476_v53 = vadd.f32 %v3475_v4, %v11886_v35  ;;  %v3536_v4 = vmul.f32 %v3510_v62, %v14405_v11 }
 0x88c   : > { %v4095_v33 = vpop.f32.mrf.mxu1 }
 0x88d   : > { %v11999_v2 = vadd.f32 %v3476_v53, %v14408_v26  ;;  %v12074_v26 = vsub.f32 %v11941_v1, %v3536_v4 }
 0x88f   : > { %14409 = vst [vmem:[#allocation51_spill] sm:$0xff] %v11999_v2  ;;  %3525 = vadd.xlane.f32.xlu1 %v11999_v2  ;;  %3585 = vadd.xlane.f32.xlu0 %v3566_v40  ;;  %v3994_v16 = vpack.c.bf16 %v11999_v2, %v11991_v57 }
 0x891   : > { %4114 = vmatmul.bf16.gmra.mxu1 %v3994_v16  ;;  %4163 = vmatmul.bf16.gmra.mxu2 %v3994_v16  ;;  %v3568_v16 = vmul.f32 %v12074_v26, %v12074_v26 }
 0x892   : > { %v4144_v31 = vpop.f32.mrf.mxu2 }
 0x894   : > { %v4097_v10 = vpop.f32.mrf.mxu1 }
 0x895   : > { %v3478_v23 = vpop.f32.mrf.mxu3  ;;  %v12088_v49 = vpack.c.bf16 %v4097_v10, %v4095_v33 }
 0x896   : > { %v3479_v52 = vadd.f32 %v3478_v23, %v11886_v35  ;;  %v3514_v23 = vpop.xlane.xlu1 %3513 }
 0x897   : > { %v3538_v37 = vmul.f32 %v3514_v23, %v14405_v11 }
 0x898   : > { %v12009_v48 = vadd.f32 %v3479_v52, %v14410_v3  ;;  %v8043_v3 = vld [vmem:[#allocation8 + $0x38] sm:$0xff] }
 0x899   : > { %3923 = vmatpush.bf16.msrb.mxu0 %v8043_v3  ;;  %v8037_v3 = vld [vmem:[#allocation8 + $0x8] sm:$0xff] }
 0x89a   : > { %14411 = vst [vmem:[#allocation36_spill] sm:$0xff] %v12009_v48  ;;  %3527 = vadd.xlane.f32.xlu1 %v12009_v48  ;;  %v4146_v30 = vpop.f32.mrf.mxu2 }
 0x89c   : > { %v12060_v47 = vpop.f32.mrf.mxu1 }
 0x89d   : > { %v3480_v22 = vpop.f32.mrf.mxu3 }
 0x89e   : > { %v3481_v50 = vadd.f32 %v3480_v22, %v11886_v35  ;;  %v12030_v35 = vsub.f32 %v11895_v42, %v3532_v24  ;;  %v12093_v22 = vpop.xlane.xlu0 %3511  ;;  %v12100_v24 = vpop.xlane.xlu1 %3515 }
 0x8a0   : > { %v12018_v46 = vadd.f32 %v3481_v50, %v14412_v63  ;;  %v3564_v12 = vmul.f32 %v12030_v35, %v12030_v35  ;;  %v12098_v50 = vsub.f32 %v11959_v17, %v3538_v37  ;;  %v3518_v29 = vpop.xlane.xlu2 %3517 }
 0x8a1   : > { %v3540_v1 = vmul.f32 %v3518_v29, %v14405_v11 }
 0x8a2   : > { %14413 = vst [vmem:[#allocation53_spill] sm:$0xff] %v12018_v46  ;;  %3529 = vadd.xlane.f32.xlu2 %v12018_v46  ;;  %3579 = vadd.xlane.f32.xlu1 %v3563_v41  ;;  %v3995_v54 = vpack.c.bf16 %v12018_v46, %v12009_v48  ;;  %v12066_v43 = vpop.f32.mrf.mxu2  ;;  %v12104_v41 = vpack.c.bf16 %v4146_v30, %v4144_v31  ;;  %v8039_v30 = vld [vmem:[#allocation8 + $0x18] sm:$0xff] }
 0x8a3   : > { %4528 = vrot.lane.b32.xlu0 %v12022_v20, %s9472_s17  ;;  %14414 = vst [vmem:[#allocation54_spill] sm:$0xff] %v12098_v50  ;;  %v3570_v25 = vmul.f32 %v12098_v50, %v12098_v50 }
 0x8a4   : > { %4119 = vmatmul.bf16.gmra.mxu1 %v3995_v54  ;;  %4168 = vmatmul.bf16.gmra.mxu2 %v3995_v54  ;;  %v12068_v0 = vpop.f32.mrf.mxu1 }
 0x8aa   : > { %3581 = vadd.xlane.f32.xlu2 %v3564_v12  ;;  %v12071_v53 = vpop.f32.mrf.mxu2  ;;  %v8042_v12 = vld [vmem:[#allocation8 + $0x30] sm:$0xff] }
 0x8ab   : > { %5244 = vrot.lane.b32.xlu0 %v12022_v20, %s9473_s26  ;;  %3924 = vmatpush.bf16.msrb.mxu0 %v8042_v12 }
 0x8ac   : > { %v12076_v40 = vpop.f32.mrf.mxu1 }
 0x8af   : > { %3925 = vmatpush.bf16.msrb.mxu0 %v8041_v15  ;;  %v8036_v15 = vld [vmem:[#allocation8] sm:$0xff] }
 0x8b2   : > { %3583 = vadd.xlane.f32.xlu2 %v3565_v21  ;;  %v12082_v45 = vpop.f32.mrf.mxu2 }
 0x8b3   : > { %4769 = vrot.lane.b32.xlu0 %v12042_v9, %s9472_s17  ;;  %3926 = vmatpush.bf16.msrb.mxu0 %v8040_v44 }
 0x8b4   : > { %v12086_v52 = vpop.f32.mrf.mxu1 }
 0x8b7   : > { %3927 = vmatpush.bf16.msrb.mxu0 %v8039_v30 }
 0x8ba   : > { %v12095_v51 = vpop.f32.mrf.mxu2 }
 0x8bb   : > { %5477 = vrot.lane.b32.xlu1 %v12042_v9, %s9473_s26  ;;  %3928 = vmatpush.bf16.msrb.mxu0 %v8038_v36 }
 0x8bf   : > { %3929 = vmatpush.bf16.msrb.mxu0 %v8037_v3 }
 0x8c3   : > { %5123 = vrot.lane.b32.xlu1 %v12042_v9, %s9469_s29  ;;  %3930 = vmatpush.bf16.msrb.mxu0 %v8036_v15 }
 0x8c6   : > { %v12124_v31 = vpop.xlane.xlu2 %3519 }
 0x8ca   : > { %4890 = vrot.lane.b32.xlu2 %v12022_v20, %s9469_s29 }
 0x8ce   : > { %v12110_v54 = vpop.xlane.xlu0 %3521 }
 0x8d2   : > { %4530 = vrot.lane.b32.xlu2 %v12052_v38, %s9472_s17 }
 0x8da   : > { %4892 = vrot.lane.b32.xlu2 %v12052_v38, %s9469_s29  ;;  %v12102_v63 = vpop.f32.mrf.mxu1 }
 0x8dd   : > { %3587 = vadd.xlane.f32.xlu0 %v3567_v56 }
 0x8e0   : > { %v12112_v14 = vpop.f32.mrf.mxu2 }
 0x8e2   : > { %v12118_v28 = vpop.f32.mrf.mxu1 }
 0x8e8   : > { %v12122_v33 = vpop.f32.mrf.mxu2 }
 0x8ed   : > { %3589 = vadd.xlane.f32.xlu1 %v3568_v16 }
 0x8f1   : > { %5125 = vrot.lane.b32.xlu0 %v12080_v7, %s9469_s29 }
 0x8f9   : > { %4894 = vrot.lane.b32.xlu0 %v12088_v49, %s9469_s29 }
 0x8fa   : > { %v12120_v18 = vpop.xlane.xlu0 %3523 }
 0x901   : > { %5481 = vrot.lane.b32.xlu0 %v12104_v41, %s9473_s26 }
 0x902   : > { %v12114_v21 = vpop.xlane.xlu1 %3525  ;;  %v3586_v56 = vpop.xlane.xlu0 %3585 }
 0x903   : > { %3593 = vadd.xlane.f32.xlu2 %v3570_v25  ;;  %v3614_v37 = vmul.f32 %v3586_v56, %v14405_v11 }
 0x905   : > { %v12142_v44 = vadd.f32 1e-05, %v3614_v37  ;;  %v12150_v37 = vsub.f32 %v11971_v59, %v3540_v1 }
 0x906   : > { %5246 = vrot.lane.b32.xlu1 %v12052_v38, %s9473_s26 }
 0x907   : > { %14417 = vst [vmem:[#allocation40_spill] sm:$0xff] %v12150_v37  ;;  %v3572_v48 = vmul.f32 %v12150_v37, %v12150_v37  ;;  %vm3679_vm6 = vweird.f32 %v12142_v44 }
 0x90d   : > { %v12126_v10 = vpop.xlane.xlu1 %3527 }
 0x90e   : > { %14415 = vst [vmem:[#allocation37_spill] sm:$0xff] %v12126_v10  ;;  %4771 = vrot.lane.b32.xlu1 %v12080_v7, %s9472_s17  ;;  %v12130_v61 = vpop.f32.mrf.mxu1 }
 0x914   : > { %v12132_v62 = vpop.f32.mrf.mxu2 }
 0x915   : > { %v3580_v4 = vpop.xlane.xlu1 %3579  ;;  %v12134_v16 = vpop.xlane.xlu2 %3529 }
 0x916   : > { %14416 = vst [vmem:[#allocation39_spill] sm:$0xff] %v12134_v16  ;;  %v3611_v23 = vmul.f32 %v3580_v4, %v14405_v11  ;;  %5479 = vrot.lane.b32.xlu1 %v12080_v7, %s9473_s26  ;;  %v4117_v12 = vpop.f32.mrf.mxu1 }
 0x918   : > { %v3627_v25 = vadd.f32 1e-05, %v3611_v23 }
 0x91a   : > { %8814 = vrsqrt.f32 %v3627_v25  ;;  %vm3649_vm12 = vweird.f32 %v3627_v25 }
 0x91b   : > { %4773 = vrot.lane.b32.xlu2 %v12104_v41, %s9472_s17  ;;  %8816 = vrsqrt.f32 %v12142_v44 }
 0x91c   : > { %v4166_v4 = vpop.f32.mrf.mxu2 }
 0x91d   : > { %v3582_v30 = vpop.xlane.xlu2 %3581 }
 0x91e   : > { %v3612_v36 = vmul.f32 %v3582_v30, %v14405_v11 }
 0x920   : > { %v8815_v17 = vpop.eup %8814  ;;  %v3628_v56 = vadd.f32 1e-05, %v3612_v36 }
 0x921   : > { %v3644_v23 = vmul.f32 %v8815_v17, %v3627_v25  ;;  %v4120_v3 = vpop.f32.mrf.mxu1  ;;  %v12152_v30 = vpop.eup %8816  ;;  %vm3650_vm11 = vweird.f32 %v8815_v17 }
 0x922   : > { %8818 = vrsqrt.f32 %v3628_v56  ;;  %vm3651_vm13 = vmor %vm3649_vm12, %vm3650_vm11  ;;  %vm3659_vm15 = vweird.f32 %v3628_v56  ;;  %vm3680_vm3 = vweird.f32 %v12152_v30 }
 0x923   : > { %v3645_v8 = vmul.f32 %v8815_v17, %v3644_v23  ;;  %5127 = vrot.lane.b32.xlu2 %v12104_v41, %s9469_s29  ;;  %v3674_v23 = vmul.f32 %v12152_v30, %v12142_v44  ;;  %vm3681_vm7 = vmor %vm3679_vm6, %vm3680_vm3  ;;  %v3539_v44 = vmul.f32 %v12100_v24, %v14405_v11 }
 0x925   : > { %v3646_v15 = vmul.f32 0.5, %v3645_v8  ;;  %v3584_v19 = vpop.xlane.xlu2 %3583 }
 0x926   : > { %v3613_v27 = vmul.f32 %v3584_v19, %v14405_v11  ;;  %v3675_v19 = vmul.f32 %v12152_v30, %v3674_v23  ;;  %v12172_v23 = vpop.permute.xlu0 %4528 }
 0x927   : > { %v3647_v29 = vsub.f32 1.5, %v3646_v15  ;;  %v4169_v42 = vpop.f32.mrf.mxu2 }
 0x928   : > { %v8819_v34 = vpop.eup %8818  ;;  %v3629_v36 = vadd.f32 1e-05, %v3613_v27 }
 0x929   : > { %v3648_v10 = vmul.f32 %v8815_v17, %v3647_v29  ;;  %v3654_v1 = vmul.f32 %v8819_v34, %v3628_v56  ;;  %v4122_v59 = vpop.f32.mrf.mxu1  ;;  %vm3660_vm14 = vweird.f32 %v8819_v34 }
 0x92a   : > { %8820 = vrsqrt.f32 %v3629_v36  ;;  %v12159_v8 = vpack.c.bf16 %v4122_v59, %v4120_v3  ;;  %v12166_v59 = vpack.c.bf16 %v4117_v12, %v12130_v61  ;;  %vm3661_vm1 = vmor %vm3659_vm15, %vm3660_vm14  ;;  %vm3669_vm4 = vweird.f32 %v3629_v36 }
 0x92b   : > { %v3655_v46 = vmul.f32 %v8819_v34, %v3654_v1  ;;  %3597 = vadd.xlane.f32.xlu0 %v3572_v48  ;;  %v3652_v15 = vsel %vm3651_vm13, %v8815_v17, %v3648_v10  ;;  %v3676_v48 = vmul.f32 0.5, %v3675_v19  ;;  %v14418_v10 = vld [vmem:[#allocation41_spill] sm:$0xff] }
 0x92c   : > { %v4244_v27 = vsel %vm1735_vm9, %v12159_v8, 0  ;;  %v3803_v2 = vmul.f32 %v3652_v15, %v12013_v6  ;;  %v12175_v6 = vpack.c.bf16 %v4166_v4, %v12132_v62  ;;  %v12186_v62 = vpack.c.bf16 %v12118_v28, %v12102_v63  ;;  %v14419_v4 = vld [vmem:[#allocation42_spill] sm:$0xff] }
 0x92d   : > { %v3656_v16 = vmul.f32 0.5, %v3655_v46  ;;  %4246 = vmatpush.bf16.xpose.msra.mxu3 %v4244_v27  ;;  %v3677_v12 = vsub.f32 1.5, %v3676_v48  ;;  %v12203_v28 = vpack.c.bf16 %v12095_v51, %v12082_v45  ;;  %v12219_v51 = vpack.c.bf16 %v12071_v53, %v12066_v43 }
 0x92e   : > { %v12234_v53 = vsub.f32 %v11966_v13, %v3539_v44 }
 0x92f   : > { %v3657_v37 = vsub.f32 1.5, %v3656_v16  ;;  %v4171_v29 = vpop.f32.mrf.mxu2  ;;  %v3819_v16 = vmul.f32 %v3803_v2, %v14418_v10 }
 0x930   : > { %v8821_v50 = vpop.eup %8820  ;;  %v12168_v25 = vpack.c.bf16 %v4171_v29, %v4169_v42  ;;  %v4241_v42 = vsel %vm1735_vm9, %v12166_v59, 0 }
 0x931   : > { %v3658_v3 = vmul.f32 %v8819_v34, %v3657_v37  ;;  %v3664_v1 = vmul.f32 %v8821_v50, %v3629_v36  ;;  %v3537_v37 = vmul.f32 %v12093_v22, %v14405_v11  ;;  %vm3670_vm2 = vweird.f32 %v8821_v50 }
 0x932   : > { %4415 = vmatpush.bf16.msra.mxu0 %v12168_v25  ;;  %v3835_v27 = vadd.f32 %v3819_v16, %v14419_v4  ;;  %v3678_v22 = vmul.f32 %v12152_v30, %v3677_v12  ;;  %vm3671_vm5 = vmor %vm3669_vm4, %vm3670_vm2  ;;  %v4185_v36 = vpack.c.bf16 %v12068_v0, %v12060_v47  ;;  %v12223_v47 = vpack.c.bf16 %v12086_v52, %v12076_v40 }
 0x933   : > { %v3662_v17 = vsel %vm3661_vm1, %v8819_v34, %v3658_v3  ;;  %v3665_v46 = vmul.f32 %v8821_v50, %v3664_v1  ;;  %v12197_v29 = vsub.f32 %v11954_v39, %v3537_v37  ;;  %v12210_v3 = vpop.permute.xlu0 %5244  ;;  %v3571_v1 = vmul.f32 %v12234_v53, %v12234_v53 }
 0x934   : > { %v3804_v61 = vmul.f32 %v3662_v17, %v12030_v35  ;;  %v12190_v35 = vpack.c.bf16 %v12122_v33, %v12112_v14  ;;  %v4238_v33 = vsel %vm1735_vm9, %v12186_v62, 0  ;;  %v3682_v48 = vsel %vm3681_vm7, %v12152_v30, %v3678_v22 }
 0x935   : > { %v3666_v56 = vmul.f32 0.5, %v3665_v46  ;;  %4247 = vmatpush.bf16.xpose.msra.mxu3 %v4241_v42  ;;  %v3806_v0 = vmul.f32 %v3682_v48, %v11995_v58  ;;  %v4235_v30 = vsel %vm1735_vm9, %v12223_v47, 0  ;;  %v4232_v17 = vsel %vm1735_vm9, %v4185_v36, 0 }
 0x936   : > { %v3820_v34 = vmul.f32 %v3804_v61, %v14418_v10  ;;  %4416 = vmatpush.bf16.msra.mxu0 %v12175_v6  ;;  %v4226_v37 = vsel %vm1735_vm9, %v12052_v38, 0  ;;  %v4223_v22 = vsel %vm1735_vm9, %v12022_v20, 0  ;;  %v3541_v38 = vmul.f32 %v12124_v31, %v14405_v11 }
 0x937   : > { %v3667_v2 = vsub.f32 1.5, %v3666_v56  ;;  %v3822_v43 = vmul.f32 %v3806_v0, %v14418_v10 }
 0x938   : > { %v3836_v19 = vadd.f32 %v3820_v34, %v14419_v4 }
 0x939   : > { %v3668_v15 = vmul.f32 %v8821_v50, %v3667_v2  ;;  %v3838_v52 = vadd.f32 %v3822_v43, %v14419_v4 }
 0x93a   : > { %4417 = vmatpush.bf16.msra.mxu0 %v12190_v35  ;;  %v3867_v63 = vpack.c.bf16 %v3836_v19, %v3835_v27 }
 0x93b   : > { %v3672_v14 = vsel %vm3671_vm5, %v8821_v50, %v3668_v15  ;;  %v3569_v50 = vmul.f32 %v12197_v29, %v12197_v29  ;;  %v12239_v40 = vpop.permute.xlu0 %4769 }
 0x93c   : > { %3931 = vmatmul.bf16.vlgmr.msrb.gmra.mxu0 %v3867_v63  ;;  %v3805_v45 = vmul.f32 %v3672_v14, %v12038_v32  ;;  %v12267_v14 = vsub.f32 %v11978_v60, %v3541_v38 }
 0x93d   : > { %4248 = vmatpush.bf16.xpose.msra.mxu3 %v4238_v33 }
 0x93e   : > { %4418 = vmatpush.bf16.msra.mxu0 %v12203_v28  ;;  %v3821_v32 = vmul.f32 %v3805_v45, %v14418_v10  ;;  %v3573_v20 = vmul.f32 %v12267_v14, %v12267_v14 }
 0x93f   : > { %4534 = vrot.lane.b32.xlu0 %v4185_v36, %s9472_s17 }
 0x940   : > { %3591 = vadd.xlane.f32.xlu1 %v3569_v50  ;;  %v3837_v58 = vadd.f32 %v3821_v32, %v14419_v4 }
 0x942   : > { %4419 = vmatpush.bf16.msra.mxu0 %v12219_v51  ;;  %v3868_v24 = vpack.c.bf16 %v3838_v52, %v3837_v58 }
 0x945   : > { %4249 = vmatpush.bf16.xpose.msra.mxu3 %v4235_v30 }
 0x946   : > { %4420 = vmatpush.bf16.msra.mxu0 %v12104_v41  ;;  %v12246_v41 = vpop.permute.xlu1 %5477 }
 0x947   : > { %4896 = vrot.lane.b32.xlu0 %v4185_v36, %s9469_s29 }
 0x94a   : > { %4421 = vmatpush.bf16.msra.mxu0 %v12080_v7  ;;  %v4229_v7 = vsel %vm1735_vm9, %v12088_v49, 0 }
 0x94c   : > { %3936 = vmatmul.bf16.gmra.mxu0 %v3868_v24  ;;  %3595 = vadd.xlane.f32.xlu2 %v3571_v1  ;;  %v12283_v24 = vpop.permute.xlu2 %4890  ;;  %v3542_v1 = vmul.f32 %v12110_v54, %v14405_v11 }
 0x94d   : > { %4250 = vmatpush.bf16.xpose.msra.mxu3 %v4232_v17 }
 0x94e   : > { %4422 = vmatpush.bf16.msra.mxu0 %v12042_v9  ;;  %v12252_v42 = vpop.permute.xlu1 %5123 }
 0x950   : > { %v3588_v46 = vpop.xlane.xlu0 %3587 }
 0x951   : > { %v3615_v16 = vmul.f32 %v3588_v46, %v14405_v11 }
 0x953   : > { %v3631_v61 = vadd.f32 1e-05, %v3615_v16 }
 0x954   : > { %v12294_v17 = vpop.permute.xlu2 %4530 }
 0x955   : > { %8822 = vrsqrt.f32 %v3631_v61  ;;  %4251 = vmatpush.bf16.xpose.msra.mxu3 %v4229_v7  ;;  %vm3689_vm11 = vweird.f32 %v3631_v61 }
 0x959   : > { %4532 = vrot.lane.b32.xlu1 %v12088_v49, %s9472_s17 }
 0x95b   : > { %v8823_v12 = vpop.eup %8822 }
 0x95c   : > { %v3684_v56 = vmul.f32 %v8823_v12, %v3631_v61  ;;  %vm3690_vm8 = vweird.f32 %v8823_v12  ;;  %v12300_v16 = vpop.permute.xlu2 %4892 }
 0x95d   : > { %4252 = vmatpush.bf16.xpose.msra.mxu3 %v4226_v37  ;;  %vm3691_vm12 = vmor %vm3689_vm11, %vm3690_vm8 }
 0x95e   : > { %v3685_v9 = vmul.f32 %v8823_v12, %v3684_v56 }
 0x960   : > { %v3590_v34 = vpop.xlane.xlu1 %3589  ;;  %v3686_v19 = vmul.f32 0.5, %v3685_v9  ;;  %v3543_v9 = vmul.f32 %v12120_v18, %v14405_v11 }
 0x961   : > { %v3616_v2 = vmul.f32 %v3590_v34, %v14405_v11  ;;  %5248 = vrot.lane.b32.xlu1 %v12088_v49, %s9473_s26 }
 0x962   : > { %v3687_v15 = vsub.f32 1.5, %v3686_v19  ;;  %v14420_v19 = vld [vmem:[#allocation51_spill] sm:$0xff] }
 0x963   : > { %v3632_v27 = vadd.f32 1e-05, %v3616_v2  ;;  %v12298_v46 = vpop.permute.xlu0 %5125  ;;  %v3544_v2 = vmul.f32 %v12114_v21, %v14405_v11 }
 0x964   : > { %5250 = vrot.lane.b32.xlu2 %v4185_v36, %s9473_s26  ;;  %v3688_v33 = vmul.f32 %v8823_v12, %v3687_v15 }
 0x965   : > { %8824 = vrsqrt.f32 %v3632_v27  ;;  %4253 = vmatpush.bf16.xpose.msra.mxu3 %v4223_v22  ;;  %vm3699_vm14 = vweird.f32 %v3632_v27  ;;  %v12321_v22 = vsub.f32 %v14420_v19, %v3544_v2 }
 0x966   : > { %v3692_v48 = vsel %vm3691_vm12, %v8823_v12, %v3688_v33 }
 0x967   : > { %v3807_v45 = vmul.f32 %v3692_v48, %v12058_v55  ;;  %v3576_v21 = vmul.f32 %v12321_v22, %v12321_v22 }
 0x969   : > { %v3823_v30 = vmul.f32 %v3807_v45, %v14418_v10 }
 0x96b   : > { %v8825_v63 = vpop.eup %8824  ;;  %v3839_v58 = vadd.f32 %v3823_v30, %v14419_v4  ;;  %v12304_v61 = vpop.permute.xlu0 %4894 }
 0x96c   : > { %v3694_v49 = vmul.f32 %v8825_v63, %v3632_v27  ;;  %4775 = vrot.lane.b32.xlu2 %v12219_v51, %s9472_s17  ;;  %vm3700_vm13 = vweird.f32 %v8825_v63  ;;  %v12318_v27 = vsub.f32 %v11991_v57, %v3543_v9 }
 0x96d   : > { %vm3701_vm15 = vmor %vm3699_vm14, %vm3700_vm13 }
 0x96e   : > { %v3695_v36 = vmul.f32 %v8825_v63, %v3694_v49  ;;  %v3575_v18 = vmul.f32 %v12318_v27, %v12318_v27 }
 0x970   : > { %v3696_v50 = vmul.f32 0.5, %v3695_v36 }
 0x971   : > { %3599 = vadd.xlane.f32.xlu0 %v3573_v20 }
 0x972   : > { %v3697_v31 = vsub.f32 1.5, %v3696_v50 }
 0x973   : > { %v12311_v34 = vpop.permute.xlu0 %5481 }
 0x974   : > { %v3698_v0 = vmul.f32 %v8825_v63, %v3697_v31  ;;  %5483 = vrot.lane.b32.xlu2 %v12219_v51, %s9473_s26 }
 0x976   : > { %v3702_v44 = vsel %vm3701_vm15, %v8825_v63, %v3698_v0  ;;  %v3594_v7 = vpop.xlane.xlu2 %3593 }
 0x977   : > { %v3808_v32 = vmul.f32 %v3702_v44, %v12074_v26  ;;  %v12290_v26 = vsub.f32 %v11983_v5, %v3542_v1  ;;  %v3618_v12 = vmul.f32 %v3594_v7, %v14405_v11 }
 0x978   : > { %v12302_v54 = vpop.permute.xlu1 %5246 }
 0x979   : > { %v3824_v43 = vmul.f32 %v3808_v32, %v14418_v10  ;;  %v3634_v37 = vadd.f32 1e-05, %v3618_v12 }
 0x97b   : > { %v3840_v52 = vadd.f32 %v3824_v43, %v14419_v4  ;;  %8826 = vrsqrt.f32 %v3634_v37  ;;  %vm3719_vm2 = vweird.f32 %v3634_v37 }
 0x97c   : > { %5129 = vrot.lane.b32.xlu2 %v12219_v51, %s9469_s29  ;;  %v3574_v51 = vmul.f32 %v12290_v26, %v12290_v26 }
 0x97d   : > { %v3869_v55 = vpack.c.bf16 %v3840_v52, %v3839_v58 }
 0x97f   : > { %3941 = vmatmul.bf16.gmra.mxu0 %v3869_v55 }
 0x980   : > { %v12307_v56 = vpop.permute.xlu1 %4771 }
 0x981   : > { %v8827_v63 = vpop.eup %8826 }
 0x982   : > { %v3714_v49 = vmul.f32 %v8827_v63, %v3634_v37  ;;  %vm3720_vm1 = vweird.f32 %v8827_v63 }
 0x983   : > { %vm3721_vm3 = vmor %vm3719_vm2, %vm3720_vm1 }
 0x984   : > { %5252 = vrot.lane.b32.xlu2 %v12223_v47, %s9473_s26  ;;  %v3715_v20 = vmul.f32 %v8827_v63, %v3714_v49 }
 0x985   : > { %4536 = vrot.lane.b32.xlu0 %v12223_v47, %s9472_s17 }
 0x986   : > { %v3716_v45 = vmul.f32 0.5, %v3715_v20 }
 0x988   : > { %v12323_v38 = vpop.permute.xlu1 %5479  ;;  %v3717_v32 = vsub.f32 1.5, %v3716_v45 }
 0x98a   : > { %v3718_v58 = vmul.f32 %v8827_v63, %v3717_v32 }
 0x98b   : > { %3601 = vadd.xlane.f32.xlu1 %v3574_v51 }
 0x99e   : > { %v3598_v15 = vpop.xlane.xlu0 %3597 }
 0x99f   : > { %v3620_v33 = vmul.f32 %v3598_v15, %v14405_v11  ;;  %v3722_v15 = vsel %vm3721_vm3, %v8827_v63, %v3718_v58 }
 0x9a1   : > { %v12334_v36 = vadd.f32 1e-05, %v3620_v33 }
 0x9a3   : > { %8828 = vrsqrt.f32 %v12334_v36  ;;  %vm3739_vm8 = vweird.f32 %v12334_v36 }
 0x9a4   : > { %4898 = vrot.lane.b32.xlu1 %v12223_v47, %s9469_s29  ;;  %v12329_v47 = vpop.permute.xlu2 %4773 }
 0x9a9   : > { %v12342_v30 = vpop.eup %8828 }
 0x9aa   : > { %v3734_v52 = vmul.f32 %v12342_v30, %v12334_v36  ;;  %vm3740_vm7 = vweird.f32 %v12342_v30 }
 0x9ab   : > { %vm3741_vm12 = vmor %vm3739_vm8, %vm3740_vm7 }
 0x9ac   : > { %4777 = vrot.lane.b32.xlu1 %v12203_v28, %s9472_s17  ;;  %v12340_v0 = vpop.permute.xlu2 %5127 }
 0x9ad   : > { %3603 = vadd.xlane.f32.xlu2 %v3575_v18 }
 0x9af   : > { %3605 = vadd.xlane.f32.xlu0 %v3576_v21  ;;  %v14421_v21 = vld [vmem:[#allocation54_spill] sm:$0xff] }
 0x9b0   : > { %v3810_v63 = vmul.f32 %v3722_v15, %v14421_v21  ;;  %v14422_v21 = vld [vmem:[#allocation40_spill] sm:$0xff] }
 0x9b3   : > { %v3592_v48 = vpop.xlane.xlu1 %3591 }
 0x9b4   : > { %v3617_v50 = vmul.f32 %v3592_v48, %v14405_v11  ;;  %5485 = vrot.lane.b32.xlu1 %v12203_v28, %s9473_s26 }
 0x9b6   : > { %v3633_v31 = vadd.f32 1e-05, %v3617_v50 }
 0x9b8   : > { %8830 = vrsqrt.f32 %v3633_v31  ;;  %vm3709_vm5 = vweird.f32 %v3633_v31 }
 0x9b9   : > { %v3932_v44 = vpop.f32.mrf.mxu0 }
 0x9bc   : > { %5131 = vrot.lane.b32.xlu1 %v12203_v28, %s9469_s29  ;;  %v3735_v28 = vmul.f32 %v12342_v30, %v3734_v52 }
 0x9be   : > { %v8831_v43 = vpop.eup %8830  ;;  %v3736_v33 = vmul.f32 0.5, %v3735_v28 }
 0x9bf   : > { %v3704_v55 = vmul.f32 %v8831_v43, %v3633_v31  ;;  %v3596_v1 = vpop.xlane.xlu2 %3595  ;;  %vm3710_vm4 = vweird.f32 %v8831_v43 }
 0x9c0   : > { %v3619_v51 = vmul.f32 %v3596_v1, %v14405_v11  ;;  %vm3711_vm6 = vmor %vm3709_vm5, %vm3710_vm4  ;;  %v3737_v32 = vsub.f32 1.5, %v3736_v33 }
 0x9c1   : > { %v3705_v7 = vmul.f32 %v8831_v43, %v3704_v55  ;;  %v3934_v12 = vpop.f32.mrf.mxu0 }
 0x9c2   : > { %v3635_v9 = vadd.f32 1e-05, %v3619_v51  ;;  %v12349_v2 = vpack.c.bf16 %v3934_v12, %v3932_v44  ;;  %v3826_v44 = vmul.f32 %v3810_v63, %v14418_v10  ;;  %v3738_v55 = vmul.f32 %v12342_v30, %v3737_v32 }
 0x9c3   : > { %v3706_v18 = vmul.f32 0.5, %v3705_v7  ;;  %5254 = vrot.lane.b32.xlu0 %v12186_v62, %s9473_s26 }
 0x9c4   : > { %8832 = vrsqrt.f32 %v3635_v9  ;;  %4900 = vrot.lane.b32.xlu1 %v12186_v62, %s9469_s29  ;;  %7741 = vmatmul.msk.bf16.vlgmr.msra.gmra.mxu3 %vm1735_vm9, %v12349_v2  ;;  %v3742_v15 = vsel %vm3741_vm12, %v12342_v30, %v3738_v55  ;;  %vm3729_vm13 = vweird.f32 %v3635_v9 }
 0x9c5   : > { %v3707_v37 = vsub.f32 1.5, %v3706_v18  ;;  %4538 = vrot.lane.b32.xlu2 %v12186_v62, %s9472_s17  ;;  %v12378_v18 = vpop.permute.xlu0 %4534  ;;  %v3812_v63 = vmul.f32 %v3742_v15, %v14422_v21 }
 0x9c7   : > { %v3708_v49 = vmul.f32 %v8831_v43, %v3707_v37 }
 0x9c9   : > { %v3712_v20 = vsel %vm3711_vm6, %v8831_v43, %v3708_v49  ;;  %v3937_v48 = vpop.f32.mrf.mxu0  ;;  %v3842_v43 = vadd.f32 %v3826_v44, %v14419_v4 }
 0x9ca   : > { %v8833_v50 = vpop.eup %8832  ;;  %v3809_v45 = vmul.f32 %v3712_v20, %v12197_v29 }
 0x9cb   : > { %v3724_v58 = vmul.f32 %v8833_v50, %v3635_v9  ;;  %4779 = vrot.lane.b32.xlu0 %v12190_v35, %s9472_s17  ;;  %vm3730_vm11 = vweird.f32 %v8833_v50  ;;  %v3828_v9 = vmul.f32 %v3812_v63, %v14418_v10 }
 0x9cc   : > { %5487 = vrot.lane.b32.xlu1 %v12190_v35, %s9473_s26  ;;  %v3825_v62 = vmul.f32 %v3809_v45, %v14418_v10  ;;  %vm3731_vm14 = vmor %vm3729_vm13, %vm3730_vm11  ;;  %v14424_v45 = vld [vmem:[#allocation53_spill] sm:$0xff] }
 0x9cd   : > { %v3725_v52 = vmul.f32 %v8833_v50, %v3724_v58  ;;  %v12391_v49 = vpop.permute.xlu0 %4896  ;;  %v12404_v58 = vpop.permute.xlu1 %4532 }
 0x9ce   : > { %v3841_v31 = vadd.f32 %v3825_v62, %v14419_v4 }
 0x9cf   : > { %v3726_v29 = vmul.f32 0.5, %v3725_v52 }
 0x9d0   : > { %v3870_v1 = vpack.c.bf16 %v3842_v43, %v3841_v31  ;;  %v12408_v31 = vpop.permute.xlu2 %5250  ;;  %v14425_v43 = vld [vmem:[#allocation37_spill] sm:$0xff] }
 0x9d1   : > { %v3727_v51 = vsub.f32 1.5, %v3726_v29  ;;  %v3939_v7 = vpop.f32.mrf.mxu0  ;;  %v3545_v55 = vmul.f32 %v14425_v43, %v14405_v11 }
 0x9d2   : > { %v12373_v12 = vpack.c.bf16 %v3939_v7, %v3937_v48  ;;  %3946 = vmatmul.bf16.gmra.mxu0 %v3870_v1 }
 0x9d3   : > { %v3728_v28 = vmul.f32 %v8833_v50, %v3727_v51  ;;  %5256 = vrot.lane.b32.xlu0 %v12166_v59, %s9473_s26  ;;  %v14426_v51 = vld [vmem:[#allocation36_spill] sm:$0xff] }
 0x9d4   : > { %5133 = vrot.lane.b32.xlu1 %v12190_v35, %s9469_s29  ;;  %7742 = vmatmul.msk.bf16.gmra.mxu3 %vm1735_vm9, %v12373_v12  ;;  %v3844_v35 = vadd.f32 %v3828_v9, %v14419_v4  ;;  %v12415_v7 = vsub.f32 %v14426_v51, %v3545_v55 }
 0x9d5   : > { %v3732_v36 = vsel %vm3731_vm14, %v8833_v50, %v3728_v28  ;;  %v12412_v29 = vpop.permute.xlu1 %5248 }
 0x9d6   : > { %v3811_v37 = vmul.f32 %v3732_v36, %v12234_v53  ;;  %v14423_v53 = vld [vmem:[#allocation39_spill] sm:$0xff] }
 0x9d7   : > { %v3546_v48 = vmul.f32 %v14423_v53, %v14405_v11 }
 0x9d8   : > { %v3827_v30 = vmul.f32 %v3811_v37, %v14418_v10  ;;  %v12417_v15 = vpop.permute.xlu2 %4775  ;;  %v3577_v37 = vmul.f32 %v12415_v7, %v12415_v7 }
 0x9d9   : > { %v12399_v44 = vsub.f32 %v14424_v45, %v3546_v48 }
 0x9da   : > { %v3843_v33 = vadd.f32 %v3827_v30, %v14419_v4 }
 0x9db   : > { %4542 = vrot.lane.b32.xlu0 %v12159_v8, %s9472_s17  ;;  %v3578_v62 = vmul.f32 %v12399_v44, %v12399_v44 }
 0x9dc   : > { %v3871_v20 = vpack.c.bf16 %v3844_v35, %v3843_v33 }
 0x9e0   : > { %v12422_v35 = vpop.permute.xlu2 %5483 }
 0x9e2   : > { %3951 = vmatmul.bf16.gmra.mxu0 %v3871_v20 }
 0x9e3   : > { %5137 = vrot.lane.b32.xlu0 %v12168_v25, %s9469_s29 }
 0x9e4   : > { %v3600_v50 = vpop.xlane.xlu0 %3599 }
 0x9e5   : > { %v3621_v32 = vmul.f32 %v3600_v50, %v14405_v11 }
 0x9e7   : > { %v3637_v52 = vadd.f32 1e-05, %v3621_v32 }
 0x9e8   : > { %v12432_v55 = vpop.permute.xlu2 %5129 }
 0x9e9   : > { %8834 = vrsqrt.f32 %v3637_v52  ;;  %vm3749_vm1 = vweird.f32 %v3637_v52 }
 0x9eb   : > { %4876 = vrot.lane.b32.xlu0 %v12373_v12, %s9469_s29 }
 0x9ee   : > { %3609 = vadd.xlane.f32.xlu2 %v3578_v62 }
 0x9ef   : > { %v8835_v1 = vpop.eup %8834 }
 0x9f0   : > { %v3744_v28 = vmul.f32 %v8835_v1, %v3637_v52  ;;  %vm3750_vm15 = vweird.f32 %v8835_v1 }
 0x9f1   : > { %vm3751_vm2 = vmor %vm3749_vm1, %vm3750_vm15 }
 0x9f2   : > { %v3745_v21 = vmul.f32 %v8835_v1, %v3744_v28 }
 0x9f4   : > { %v3746_v33 = vmul.f32 0.5, %v3745_v21 }
 0x9f6   : > { %v3747_v48 = vsub.f32 1.5, %v3746_v33 }
 0x9f8   : > { %v3748_v32 = vmul.f32 %v8835_v1, %v3747_v48  ;;  %v12450_v48 = vpop.permute.xlu0 %4536 }
 0x9fa   : > { %v3752_v28 = vsel %vm3751_vm2, %v8835_v1, %v3748_v32 }
 0x9fb   : > { %v3813_v21 = vmul.f32 %v3752_v28, %v12267_v14 }
 0x9fc   : > { %v3942_v36 = vpop.f32.mrf.mxu0 }
 0x9fd   : > { %v3829_v33 = vmul.f32 %v3813_v21, %v14418_v10 }
 0x9fe   : > { %v3602_v63 = vpop.xlane.xlu1 %3601  ;;  %3607 = vadd.xlane.f32.xlu1 %v3577_v37 }
 0x9ff   : > { %v3622_v30 = vmul.f32 %v3602_v63, %v14405_v11  ;;  %v3845_v14 = vadd.f32 %v3829_v33, %v14419_v4 }
 0xa01   : > { %v3638_v9 = vadd.f32 1e-05, %v3622_v30 }
 0xa03   : > { %8836 = vrsqrt.f32 %v3638_v9  ;;  %vm3759_vm4 = vweird.f32 %v3638_v9 }
 0xa04   : > { %v3944_v20 = vpop.f32.mrf.mxu0 }
 0xa05   : > { %v12424_v53 = vpack.c.bf16 %v3944_v20, %v3942_v36  ;;  %v12446_v20 = vpop.permute.xlu2 %5252 }
 0xa06   : > { %4902 = vrot.lane.b32.xlu2 %v12166_v59, %s9469_s29 }
 0xa07   : > { %4508 = vrot.lane.b32.xlu0 %v12424_v53, %s9472_s17  ;;  %7743 = vmatmul.msk.bf16.gmra.mxu3 %vm1735_vm9, %v12424_v53 }
 0xa09   : > { %v8837_v50 = vpop.eup %8836 }
 0xa0a   : > { %v3754_v62 = vmul.f32 %v8837_v50, %v3638_v9  ;;  %vm3760_vm3 = vweird.f32 %v8837_v50 }
 0xa0b   : > { %vm3761_vm5 = vmor %vm3759_vm4, %vm3760_vm3 }
 0xa0c   : > { %v3755_v43 = vmul.f32 %v8837_v50, %v3754_v62 }
 0xa0e   : > { %v3756_v36 = vmul.f32 0.5, %v3755_v43  ;;  %4904 = vrot.lane.b32.xlu2 %v12159_v8, %s9469_s29 }
 0xa0f   : > { %4878 = vrot.lane.b32.xlu0 %v12424_v53, %s9469_s29 }
 0xa10   : > { %v3757_v37 = vsub.f32 1.5, %v3756_v36 }
 0xa12   : > { %v3758_v63 = vmul.f32 %v8837_v50, %v3757_v37 }
 0xa14   : > { %v3762_v52 = vsel %vm3761_vm5, %v8837_v50, %v3758_v63 }
 0xa15   : > { %v3814_v30 = vmul.f32 %v3762_v52, %v12290_v26 }
 0xa16   : > { %4783 = vrot.lane.b32.xlu2 %v12168_v25, %s9472_s17  ;;  %v12462_v21 = vpop.permute.xlu1 %4898 }
 0xa17   : > { %4540 = vrot.lane.b32.xlu1 %v12166_v59, %s9472_s17  ;;  %v3830_v1 = vmul.f32 %v3814_v30, %v14418_v10 }
 0xa19   : > { %v3846_v9 = vadd.f32 %v3830_v1, %v14419_v4 }
 0xa1b   : > { %v3872_v50 = vpack.c.bf16 %v3846_v9, %v3845_v14 }
 0xa1d   : > { %3956 = vmatmul.bf16.gmra.mxu0 %v3872_v50 }
 0xa1e   : > { %5491 = vrot.lane.b32.xlu2 %v12168_v25, %s9473_s26 }
 0xa1f   : > { %4781 = vrot.lane.b32.xlu1 %v12175_v6, %s9472_s17 }
 0xa20   : > { %v3604_v26 = vpop.xlane.xlu2 %3603 }
 0xa21   : > { %v3623_v59 = vmul.f32 %v3604_v26, %v14405_v11 }
 0xa22   : > { %v3606_v32 = vpop.xlane.xlu0 %3605 }
 0xa23   : > { %v3639_v62 = vadd.f32 1e-05, %v3623_v59  ;;  %v3624_v43 = vmul.f32 %v3606_v32, %v14405_v11 }
 0xa25   : > { %8838 = vrsqrt.f32 %v3639_v62  ;;  %v3640_v28 = vadd.f32 1e-05, %v3624_v43  ;;  %vm3769_vm7 = vweird.f32 %v3639_v62  ;;  %v12472_v43 = vpop.permute.xlu1 %4777 }
 0xa26   : > { %5228 = vrot.lane.b32.xlu2 %v12349_v2, %s9473_s26 }
 0xa27   : > { %8840 = vrsqrt.f32 %v3640_v28  ;;  %5489 = vrot.lane.b32.xlu1 %v12175_v6, %s9473_s26  ;;  %vm3779_vm12 = vweird.f32 %v3640_v28 }
 0xa2b   : > { %v8839_v25 = vpop.eup %8838 }
 0xa2c   : > { %v3764_v36 = vmul.f32 %v8839_v25, %v3639_v62  ;;  %vm3770_vm6 = vweird.f32 %v8839_v25 }
 0xa2d   : > { %v8841_v37 = vpop.eup %8840  ;;  %vm3771_vm11 = vmor %vm3769_vm7, %vm3770_vm6 }
 0xa2e   : > { %v3765_v63 = vmul.f32 %v8839_v25, %v3764_v36  ;;  %v3774_v52 = vmul.f32 %v8841_v37, %v3640_v28  ;;  %4506 = vrot.lane.b32.xlu2 %v12373_v12, %s9472_s17  ;;  %vm3780_vm8 = vweird.f32 %v8841_v37 }
 0xa2f   : > { %5135 = vrot.lane.b32.xlu1 %v12175_v6, %s9469_s29  ;;  %vm3781_vm13 = vmor %vm3779_vm12, %vm3780_vm8 }
 0xa30   : > { %v3766_v30 = vmul.f32 0.5, %v3765_v63  ;;  %v3775_v33 = vmul.f32 %v8841_v37, %v3774_v52 }
 0xa32   : > { %v3767_v1 = vsub.f32 1.5, %v3766_v30  ;;  %v3776_v14 = vmul.f32 0.5, %v3775_v33 }
 0xa34   : > { %v3768_v9 = vmul.f32 %v8839_v25, %v3767_v1  ;;  %v3777_v50 = vsub.f32 1.5, %v3776_v14 }
 0xa35   : > { %v12468_v26 = vpop.permute.xlu0 %5254 }
 0xa36   : > { %v3772_v59 = vsel %vm3771_vm11, %v8839_v25, %v3768_v9  ;;  %v3778_v32 = vmul.f32 %v8841_v37, %v3777_v50  ;;  %5232 = vrot.lane.b32.xlu2 %v12424_v53, %s9473_s26 }
 0xa37   : > { %5258 = vrot.lane.b32.xlu1 %v12159_v8, %s9473_s26  ;;  %v3815_v6 = vmul.f32 %v3772_v59, %v12318_v27  ;;  %v12486_v8 = vpop.permute.xlu1 %5485 }
 0xa38   : > { %v3782_v62 = vsel %vm3781_vm13, %v8841_v37, %v3778_v32  ;;  %v12497_v32 = vpop.permute.xlu2 %4538 }
 0xa39   : > { %v3816_v36 = vmul.f32 %v3782_v62, %v12321_v22  ;;  %v3831_v63 = vmul.f32 %v3815_v6, %v14418_v10 }
 0xa3b   : > { %v3832_v25 = vmul.f32 %v3816_v36, %v14418_v10  ;;  %v3847_v28 = vadd.f32 %v3831_v63, %v14419_v4 }
 0xa3d   : > { %v12480_v52 = vpop.permute.xlu0 %4779  ;;  %v3848_v53 = vadd.f32 %v3832_v25, %v14419_v4 }
 0xa3f   : > { %4504 = vrot.lane.b32.xlu1 %v12349_v2, %s9472_s17  ;;  %v3873_v30 = vpack.c.bf16 %v3848_v53, %v3847_v28  ;;  %v12492_v22 = vpop.permute.xlu1 %5131 }
 0xa41   : > { %3961 = vmatmul.bf16.gmra.mxu0 %v3873_v30 }
 0xa45   : > { %v12488_v27 = vpop.permute.xlu0 %5256 }
 0xa47   : > { %4874 = vrot.lane.b32.xlu1 %v12349_v2, %s9469_s29  ;;  %v4901_v14 = vpop.permute.xlu1 %4900 }
 0xa4d   : > { %v4543_v37 = vpop.permute.xlu0 %4542 }
 0xa4e   : > { %v4590_v33 = vsel %vm1735_vm9, %v4543_v37, 0 }
 0xa4f   : > { %v3947_v1 = vpop.f32.mrf.mxu0  ;;  %5230 = vrot.lane.b32.xlu1 %v12373_v12, %s9473_s26  ;;  %4592 = vmatpush.bf16.xpose.msra.mxu1 %v4590_v33  ;;  %v12502_v2 = vpop.permute.xlu1 %5487 }
 0xa55   : > { %v5138_v9 = vpop.permute.xlu0 %5137 }
 0xa56   : > { %5147 = vmatpush.bf16.msrb.mxu0 %v5138_v9 }
 0xa57   : > { %v3949_v50 = vpop.f32.mrf.mxu0  ;;  %v12506_v28 = vpop.permute.xlu1 %5133 }
 0xa58   : > { %v4177_v59 = vpack.c.bf16 %v3949_v50, %v3947_v1 }
 0xa5a   : > { %4510 = vrot.lane.b32.xlu1 %v4177_v59, %s9472_s17  ;;  %4880 = vrot.lane.b32.xlu2 %v4177_v59, %s9469_s29 }
 0xa5b   : > { %7744 = vmatmul.msk.bf16.gmra.mxu3 %vm1735_vm9, %v4177_v59 }
 0xa5f   : > { %v3952_v6 = vpop.f32.mrf.mxu0 }
 0xa61   : > { %v3610_v62 = vpop.xlane.xlu2 %3609 }
 0xa62   : > { %v3626_v12 = vmul.f32 %v3610_v62, %v14405_v11  ;;  %5234 = vrot.lane.b32.xlu2 %v4177_v59, %s9473_s26 }
 0xa64   : > { %v3642_v36 = vadd.f32 1e-05, %v3626_v12 }
 0xa66   : > { %8842 = vrsqrt.f32 %v3642_v36  ;;  %vm3799_vm15 = vweird.f32 %v3642_v36 }
 0xa67   : > { %v3954_v63 = vpop.f32.mrf.mxu0 }
 0xa68   : > { %v4178_v25 = vpack.c.bf16 %v3954_v63, %v3952_v6 }
 0xa69   : > { %v4903_v53 = vpop.permute.xlu2 %4902 }
 0xa6a   : > { %5236 = vrot.lane.b32.xlu2 %v4178_v25, %s9473_s26  ;;  %4512 = vrot.lane.b32.xlu0 %v4178_v25, %s9472_s17  ;;  %v4949_v45 = vsel %vm1735_vm9, %v4903_v53, 0 }
 0xa6b   : > { %7745 = vmatmul.msk.bf16.gmra.mxu3 %vm1735_vm9, %v4178_v25 }
 0xa6c   : > { %v8843_v30 = vpop.eup %8842 }
 0xa6d   : > { %v3794_v37 = vmul.f32 %v8843_v30, %v3642_v36  ;;  %vm3800_vm14 = vweird.f32 %v8843_v30 }
 0xa6e   : > { %vm3801_vm1 = vmor %vm3799_vm15, %vm3800_vm14 }
 0xa6f   : > { %v3795_v33 = vmul.f32 %v8843_v30, %v3794_v37 }
 0xa71   : > { %v3608_v1 = vpop.xlane.xlu1 %3607  ;;  %v4905_v9 = vpop.permute.xlu2 %4904  ;;  %v3796_v62 = vmul.f32 0.5, %v3795_v33 }
 0xa72   : > { %v3625_v50 = vmul.f32 %v3608_v1, %v14405_v11  ;;  %v4952_v59 = vsel %vm1735_vm9, %v4905_v9, 0  ;;  %4882 = vrot.lane.b32.xlu0 %v4178_v25, %s9469_s29  ;;  %v4946_v25 = vsel %vm1735_vm9, %v4901_v14, 0 }
 0xa73   : > { %4954 = vmatpush.bf16.xpose.msrb.mxu3 %v4952_v59  ;;  %v3797_v12 = vsub.f32 1.5, %v3796_v62 }
 0xa74   : > { %v3641_v6 = vadd.f32 1e-05, %v3625_v50 }
 0xa75   : > { %v3798_v37 = vmul.f32 %v8843_v30, %v3797_v12  ;;  %v4940_v12 = vsel %vm1735_vm9, %v12391_v49, 0 }
 0xa76   : > { %8844 = vrsqrt.f32 %v3641_v6  ;;  %vm3789_vm3 = vweird.f32 %v3641_v6 }
 0xa77   : > { %v3802_v9 = vsel %vm3801_vm1, %v8843_v30, %v3798_v37  ;;  %v4943_v30 = vsel %vm1735_vm9, %v12462_v21, 0 }
 0xa78   : > { %v3818_v33 = vmul.f32 %v3802_v9, %v12399_v44 }
 0xa79   : > { %v4784_v63 = vpop.permute.xlu2 %4783 }
 0xa7a   : > { %4793 = vmatpush.bf16.msrb.mxu2 %v4784_v63  ;;  %v3834_v62 = vmul.f32 %v3818_v33, %v14418_v10  ;;  %v4937_v63 = vsel %vm1735_vm9, %v12304_v61, 0  ;;  %v4931_v61 = vsel %vm1735_vm9, %v12283_v24, 0  ;;  %v4569_v24 = vsel %vm1735_vm9, %v12172_v23, 0 }
 0xa7b   : > { %4955 = vmatpush.bf16.xpose.msrb.mxu3 %v4949_v45 }
 0xa7c   : > { %v8845_v51 = vpop.eup %8844  ;;  %v3850_v14 = vadd.f32 %v3834_v62, %v14419_v4 }
 0xa7d   : > { %v3784_v19 = vmul.f32 %v8845_v51, %v3641_v6  ;;  %vm3790_vm2 = vweird.f32 %v8845_v51 }
 0xa7e   : > { %vm3791_vm4 = vmor %vm3789_vm3, %vm3790_vm2 }
 0xa7f   : > { %v3785_v1 = vmul.f32 %v8845_v51, %v3784_v19 }
 0xa81   : > { %v3786_v57 = vmul.f32 0.5, %v3785_v1 }
 0xa83   : > { %v3787_v50 = vsub.f32 1.5, %v3786_v57  ;;  %4956 = vmatpush.bf16.xpose.msrb.mxu3 %v4946_v25  ;;  %v5285_v25 = vsel %vm1735_vm9, %v12210_v3, 0 }
 0xa85   : > { %v3788_v59 = vmul.f32 %v8845_v51, %v3787_v50 }
 0xa87   : > { %v3792_v45 = vsel %vm3791_vm4, %v8845_v51, %v3788_v59 }
 0xa88   : > { %v3817_v53 = vmul.f32 %v3792_v45, %v12415_v7  ;;  %v4584_v7 = vsel %vm1735_vm9, %v12497_v32, 0 }
 0xa89   : > { %v4541_v36 = vpop.permute.xlu1 %4540 }
 0xa8a   : > { %v4587_v19 = vsel %vm1735_vm9, %v4541_v36, 0  ;;  %v3833_v57 = vmul.f32 %v3817_v53, %v14418_v10 }
 0xa8b   : > { %4593 = vmatpush.bf16.xpose.msra.mxu1 %v4587_v19  ;;  %4957 = vmatpush.bf16.xpose.msrb.mxu3 %v4943_v30 }
 0xa8c   : > { %v3849_v44 = vadd.f32 %v3833_v57, %v14419_v4  ;;  %v4581_v4 = vsel %vm1735_vm9, %v12450_v48, 0  ;;  %v5294_v48 = vsel %vm1735_vm9, %v12408_v31, 0 }
 0xa8e   : > { %v3874_v6 = vpack.c.bf16 %v3850_v14, %v3849_v44 }
 0xa90   : > { %3966 = vmatmul.bf16.gmra.mxu0 %v3874_v6 }
 0xa91   : > { %v4782_v51 = vpop.permute.xlu1 %4781 }
 0xa92   : > { %4794 = vmatpush.bf16.msrb.mxu2 %v4782_v51 }
 0xa93   : > { %4594 = vmatpush.bf16.xpose.msra.mxu1 %v4584_v7  ;;  %4958 = vmatpush.bf16.xpose.msrb.mxu3 %v4940_v12 }
 0xa96   : > { %4795 = vmatpush.bf16.msrb.mxu2 %v12480_v52  ;;  %v4578_v52 = vsel %vm1735_vm9, %v12378_v18, 0 }
 0xa99   : > { %v5490_v10 = vpop.permute.xlu1 %5489 }
 0xa9a   : > { %v3957_v21 = vpop.f32.mrf.mxu0  ;;  %4796 = vmatpush.bf16.msrb.mxu2 %v12472_v43  ;;  %v4934_v43 = vsel %vm1735_vm9, %v12300_v16, 0  ;;  %v4575_v16 = vsel %vm1735_vm9, %v12404_v58, 0 }
 0xa9b   : > { %4595 = vmatpush.bf16.xpose.msra.mxu1 %v4581_v4  ;;  %4959 = vmatpush.bf16.xpose.msrb.mxu3 %v4937_v63 }
 0xa9e   : > { %4797 = vmatpush.bf16.msrb.mxu2 %v12417_v15  ;;  %v5300_v15 = vsel %vm1735_vm9, %v12468_v26, 0 }
 0xaa1   : > { %v5136_v32 = vpop.permute.xlu1 %5135 }
 0xaa2   : > { %v3959_v49 = vpop.f32.mrf.mxu0  ;;  %4798 = vmatpush.bf16.msrb.mxu2 %v12329_v47  ;;  %5148 = vmatpush.bf16.msrb.mxu0 %v5136_v32  ;;  %v5492_v47 = vpop.permute.xlu2 %5491 }
 0xaa3   : > { %v4179_v37 = vpack.c.bf16 %v3959_v49, %v3957_v21  ;;  %4596 = vmatpush.bf16.xpose.msra.mxu1 %v4578_v52  ;;  %4960 = vmatpush.bf16.xpose.msrb.mxu3 %v4934_v43 }
 0xaa5   : > { %5238 = vrot.lane.b32.xlu1 %v4179_v37, %s9473_s26  ;;  %4514 = vrot.lane.b32.xlu2 %v4179_v37, %s9472_s17 }
 0xaa6   : > { %4884 = vrot.lane.b32.xlu0 %v4179_v37, %s9469_s29  ;;  %7746 = vmatmul.msk.bf16.gmra.mxu3 %vm1735_vm9, %v4179_v37 }
 0xaa7   : > { %4799 = vmatpush.bf16.msrb.mxu2 %v12307_v56  ;;  %5149 = vmatpush.bf16.msrb.mxu0 %v12506_v28  ;;  %v5288_v28 = vsel %vm1735_vm9, %v12302_v54, 0 }
 0xaa9   : > { %v5259_v56 = vpop.permute.xlu1 %5258 }
 0xaaa   : > { %v5306_v18 = vsel %vm1735_vm9, %v5259_v56, 0  ;;  %v12570_v58 = vpop.permute.xlu2 %5228 }
 0xaab   : > { %4800 = vmatpush.bf16.msrb.mxu2 %v12239_v40  ;;  %5150 = vmatpush.bf16.msrb.mxu0 %v12492_v22  ;;  %v4572_v40 = vsel %vm1735_vm9, %v12294_v17, 0  ;;  %v5291_v22 = vsel %vm1735_vm9, %v12412_v29, 0 }
 0xaac   : > { %4597 = vmatpush.bf16.xpose.msra.mxu1 %v4575_v16  ;;  %4961 = vmatpush.bf16.xpose.msrb.mxu3 %v4931_v61 }
 0xaaf   : > { %5501 = vmatpush.bf16.msra.mxu2 %v5492_v47  ;;  %5151 = vmatpush.bf16.msrb.mxu0 %v12432_v55  ;;  %v4877_v55 = vpop.permute.xlu0 %4876 }
 0xab3   : > { %5502 = vmatpush.bf16.msra.mxu2 %v5490_v10  ;;  %5152 = vmatpush.bf16.msrb.mxu0 %v12340_v0  ;;  %v4505_v0 = vpop.permute.xlu1 %4504 }
 0xab4   : > { %4598 = vmatpush.bf16.xpose.msra.mxu1 %v4572_v40 }
 0xab7   : > { %5503 = vmatpush.bf16.msra.mxu2 %v12502_v2  ;;  %5153 = vmatpush.bf16.msrb.mxu0 %v12298_v46  ;;  %v5303_v46 = vsel %vm1735_vm9, %v12488_v27, 0  ;;  %v4509_v27 = vpop.permute.xlu0 %4508 }
 0xabb   : > { %5504 = vmatpush.bf16.msra.mxu2 %v12486_v8  ;;  %5154 = vmatpush.bf16.msrb.mxu0 %v12252_v42  ;;  %v4875_v26 = vpop.permute.xlu1 %4874 }
 0xabc   : > { %4599 = vmatpush.bf16.xpose.msra.mxu1 %v4569_v24 }
 0xabe   : > { %v3962_v17 = vpop.f32.mrf.mxu0 }
 0xabf   : > { %5505 = vmatpush.bf16.msra.mxu2 %v12422_v35  ;;  %v4879_v50 = vpop.permute.xlu0 %4878 }
 0xac3   : > { %5506 = vmatpush.bf16.msra.mxu2 %v12311_v34  ;;  %7749 = vmatmul.msk.bf16.vlgmr.msra.gmra.mxu1 %vm1735_vm9, %v4505_v0  ;;  %v12576_v34 = vpop.f32.mrf.mxu3 }
 0xac4   : > { %5308 = vmatpush.bf16.xpose.msrb.mxu1 %v5306_v18 }
 0xac6   : > { %v3964_v42 = vpop.f32.mrf.mxu0 }
 0xac7   : > { %5507 = vmatpush.bf16.msra.mxu2 %v12323_v38  ;;  %v4180_v23 = vpack.c.bf16 %v3964_v42, %v3962_v17  ;;  %v4507_v38 = vpop.permute.xlu2 %4506 }
 0xac9   : > { %4516 = vrot.lane.b32.xlu1 %v4180_v23, %s9472_s17  ;;  %4886 = vrot.lane.b32.xlu2 %v4180_v23, %s9469_s29 }
 0xaca   : > { %7747 = vmatmul.msk.bf16.gmra.mxu3 %vm1735_vm9, %v4180_v23 }
 0xacb   : > { %5508 = vmatpush.bf16.msra.mxu2 %v12246_v41  ;;  %v5297_v41 = vsel %vm1735_vm9, %v12446_v20, 0  ;;  %v12584_v35 = vpop.f32.mrf.mxu3  ;;  %v12595_v20 = vpop.permute.xlu1 %5230 }
 0xacc   : > { %5309 = vmatpush.bf16.xpose.msrb.mxu1 %v5303_v46 }
 0xacf   : > { %v12599_v31 = vpop.permute.xlu2 %5232 }
 0xad1   : > { %5240 = vrot.lane.b32.xlu2 %v4180_v23, %s9473_s26 }
 0xad3   : > { %7750 = vmatmul.msk.bf16.gmra.mxu1 %vm1735_vm9, %v4507_v38  ;;  %v12588_v8 = vpop.f32.mrf.mxu3  ;;  %v4511_v9 = vpop.permute.xlu1 %4510 }
 0xad4   : > { %5310 = vmatpush.bf16.xpose.msrb.mxu1 %v5300_v15 }
 0xad7   : > { %v4881_v29 = vpop.permute.xlu2 %4880 }
 0xadb   : > { %v12593_v2 = vpop.f32.mrf.mxu3 }
 0xadc   : > { %5311 = vmatpush.bf16.xpose.msrb.mxu1 %v5297_v41  ;;  %v4513_v54 = vpop.permute.xlu0 %4512 }
 0xadf   : > { %v12609_v59 = vpop.permute.xlu2 %5234 }
 0xae3   : > { %7751 = vmatmul.msk.bf16.gmra.mxu1 %vm1735_vm9, %v4509_v27  ;;  %v12601_v1 = vpop.f32.mrf.mxu3 }
 0xae4   : > { %5312 = vmatpush.bf16.xpose.msrb.mxu1 %v5294_v48  ;;  %v4883_v49 = vpop.permute.xlu0 %4882 }
 0xae7   : > { %v12615_v53 = vpop.permute.xlu2 %5236 }
 0xaeb   : > { %v12606_v33 = vpop.f32.mrf.mxu3 }
 0xaec   : > { %5313 = vmatpush.bf16.xpose.msrb.mxu1 %v5291_v22 }
 0xaf3   : > { %7752 = vmatmul.msk.bf16.gmra.mxu1 %vm1735_vm9, %v4511_v9  ;;  %v12611_v45 = vpop.f32.mrf.mxu3 }
 0xaf4   : > { %5314 = vmatpush.bf16.xpose.msrb.mxu1 %v5288_v28 }
 0xafa   : > { %4295 = vmax.xlane.f32.xlu2 %v12576_v34 }
 0xafb   : > { %v12618_v3 = vpop.f32.mrf.mxu3 }
 0xafc   : > { %5315 = vmatpush.bf16.xpose.msrb.mxu1 %v5285_v25 }
 0xaff   : > { %v4515_v36 = vpop.permute.xlu2 %4514 }
 0xb02   : > { %4301 = vmax.xlane.f32.xlu2 %v12593_v2 }
 0xb03   : > { %7753 = vmatmul.msk.bf16.gmra.mxu1 %vm1735_vm9, %v4513_v54  ;;  %v12622_v57 = vpop.f32.mrf.mxu3 }
 0xb0a   : > { %4305 = vmax.xlane.f32.xlu2 %v12606_v33 }
 0xb0b   : > { %v12628_v44 = vpop.f32.mrf.mxu3 }
 0xb0d   : > { %v3967_v62 = vpop.f32.mrf.mxu0 }
 0xb12   : > { %4309 = vmax.xlane.f32.xlu2 %v12618_v3 }
 0xb13   : > { %7754 = vmatmul.msk.bf16.gmra.mxu1 %vm1735_vm9, %v4515_v36 }
 0xb15   : > { %v3969_v19 = vpop.f32.mrf.mxu0 }
 0xb16   : > { %v4181_v30 = vpack.c.bf16 %v3969_v19, %v3967_v62 }
 0xb17   : > { %v12637_v51 = vpop.permute.xlu1 %5238 }
 0xb18   : > { %5242 = vrot.lane.b32.xlu1 %v4181_v30, %s9473_s26  ;;  %4518 = vrot.lane.b32.xlu0 %v4181_v30, %s9472_s17  ;;  %v4885_v37 = vpop.permute.xlu0 %4884 }
 0xb19   : > { %7748 = vmatmul.msk.bf16.gmra.mxu3 %vm1735_vm9, %v4181_v30 }
 0xb20   : > { %4888 = vrot.lane.b32.xlu0 %v4181_v30, %s9469_s29 }
 0xb23   : > { %v4887_v16 = vpop.permute.xlu2 %4886 }
 0xb29   : > { %v12630_v14 = vpop.f32.mrf.mxu3  ;;  %7757 = vmatmul.msk.bf16.vlgmr.msrb.gmra.mxu3 %vm1735_vm9, %v4875_v26 }
 0xb2a   : > { %4315 = vmax.xlane.f32.xlu2 %v12630_v14 }
 0xb2b   : > { %v12675_v47 = vpop.permute.xlu2 %5240 }
 0xb31   : > { %v12634_v6 = vpop.f32.mrf.mxu3 }
 0xb32   : > { %4317 = vmax.xlane.f32.xlu2 %v12634_v6 }
 0xb39   : > { %7758 = vmatmul.msk.bf16.gmra.mxu3 %vm1735_vm9, %v4877_v55 }
 0xb3b   : > { %v4517_v7 = vpop.permute.xlu1 %4516 }
 0xb3c   : > { %7755 = vmatmul.msk.bf16.gmra.mxu1 %vm1735_vm9, %v4517_v7 }
 0xb40   : > { %v12641_v12 = vpop.f32.mrf.mxu1 }
 0xb42   : > { %4313 = vmax.xlane.f32.xlu1 %v12628_v44 }
 0xb48   : > { %v12644_v10 = vpop.f32.mrf.mxu1 }
 0xb49   : > { %7759 = vmatmul.msk.bf16.gmra.mxu3 %vm1735_vm9, %v4879_v50 }
 0xb4a   : > { %4297 = vmax.xlane.f32.xlu0 %v12584_v35 }
 0xb4d   : > { %v12648_v21 = vpop.f32.mrf.mxu3 }
 0xb4e   : > { %4319 = vmax.xlane.f32.xlu1 %v12648_v21 }
 0xb50   : > { %v12651_v4 = vpop.f32.mrf.mxu1 }
 0xb52   : > { %4299 = vmax.xlane.f32.xlu0 %v12588_v8 }
 0xb55   : > { %v12669_v43 = vpop.f32.mrf.mxu3 }
 0xb56   : > { %4643 = vmax.xlane.f32.xlu1 %v12644_v10 }
 0xb58   : > { %v12655_v63 = vpop.f32.mrf.mxu1 }
 0xb59   : > { %7760 = vmatmul.msk.bf16.gmra.mxu3 %vm1735_vm9, %v4881_v29 }
 0xb5a   : > { %4303 = vmax.xlane.f32.xlu0 %v12601_v1 }
 0xb5e   : > { %4645 = vmax.xlane.f32.xlu1 %v12651_v4 }
 0xb60   : > { %v12661_v32 = vpop.f32.mrf.mxu1 }
 0xb62   : > { %4307 = vmax.xlane.f32.xlu0 %v12611_v45 }
 0xb66   : > { %4649 = vmax.xlane.f32.xlu1 %v12661_v32 }
 0xb68   : > { %v12666_v52 = vpop.f32.mrf.mxu1 }
 0xb69   : > { %7761 = vmatmul.msk.bf16.gmra.mxu3 %vm1735_vm9, %v4883_v49 }
 0xb6a   : > { %4311 = vmax.xlane.f32.xlu0 %v12622_v57 }
 0xb6d   : > { %v4296_v40 = vpop.xlane.xlu2 %4295 }
 0xb6e   : > { %4651 = vmax.xlane.f32.xlu1 %v12666_v52  ;;  %v4327_v56 = vsub.f32 %v12576_v34, %v4296_v40 }
 0xb70   : > { %v4343_v18 = vmul.f32 1.442695, %v4327_v56 }
 0xb72   : > { %4321 = vmax.xlane.f32.xlu0 %v12669_v43  ;;  %8846 = vpow2.f32 %v4343_v18 }
 0xb75   : > { %v4302_v22 = vpop.xlane.xlu2 %4301 }
 0xb76   : > { %v4330_v9 = vsub.f32 %v12593_v2, %v4302_v22 }
 0xb78   : > { %v8847_v0 = vpop.eup %8846 }
 0xb79   : > { %7762 = vmatmul.msk.bf16.gmra.mxu3 %vm1735_vm9, %v4885_v37 }
 0xb7a   : > { %4641 = vmax.xlane.f32.xlu0 %v12641_v12 }
 0xb7d   : > { %v4306_v7 = vpop.xlane.xlu2 %4305 }
 0xb89   : > { %7763 = vmatmul.msk.bf16.gmra.mxu3 %vm1735_vm9, %v4887_v16  ;;  %v4332_v16 = vsub.f32 %v12606_v33, %v4306_v7 }
 0xb8a   : > { %v4519_v61 = vpop.permute.xlu0 %4518 }
 0xb8b   : > { %7756 = vmatmul.msk.bf16.gmra.mxu1 %vm1735_vm9, %v4519_v61 }
 0xb92   : > { %v4889_v24 = vpop.permute.xlu0 %4888 }
 0xb99   : > { %7764 = vmatmul.msk.bf16.gmra.mxu3 %vm1735_vm9, %v4889_v24  ;;  %v4353_v24 = vmul.f32 1.442695, %v4332_v16 }
 0xb9b   : > { %7765 = vmatmul.msk.bf16.vlgmr.msrb.gmra.mxu1 %vm1735_vm9, %v12570_v58  ;;  %v12698_v58 = vpop.f32.mrf.mxu1 }
 0xb9c   : > { %v12682_v17 = vpop.f32.mrf.mxu3 }
 0xb9d   : > { %4323 = vmax.xlane.f32.xlu2 %v12682_v17 }
 0xba3   : > { %v12706_v26 = vpop.f32.mrf.mxu1 }
 0xba4   : > { %v12685_v46 = vpop.f32.mrf.mxu3 }
 0xba5   : > { %4375 = vadd.xlane.f32.xlu2 %v8847_v0  ;;  %4325 = vmax.xlane.f32.xlu0 %v12685_v46 }
 0xbab   : > { %7766 = vmatmul.msk.bf16.gmra.mxu1 %vm1735_vm9, %v12595_v20  ;;  %v12717_v54 = vpop.f32.mrf.mxu1 }
 0xbac   : > { %v12690_v42 = vpop.f32.mrf.mxu3 }
 0xbad   : > { %5003 = vmax.xlane.f32.xlu2 %v12690_v42 }
 0xbb3   : > { %v12730_v61 = vpop.f32.mrf.mxu1 }
 0xbb4   : > { %v12693_v23 = vpop.f32.mrf.mxu3 }
 0xbb5   : > { %4647 = vmax.xlane.f32.xlu2 %v12655_v63 }
 0xbbb   : > { %7767 = vmatmul.msk.bf16.gmra.mxu1 %vm1735_vm9, %v12599_v31  ;;  %v12738_v33 = vpop.f32.mrf.mxu1 }
 0xbbc   : > { %v12700_v34 = vpop.f32.mrf.mxu3 }
 0xbbd   : > { %v4298_v15 = vpop.xlane.xlu0 %4297 }
 0xbbe   : > { %v4328_v38 = vsub.f32 %v12584_v35, %v4298_v15  ;;  %v12712_v35 = vpop.permute.xlu1 %5242 }
 0xbc0   : > { %v4345_v41 = vmul.f32 1.442695, %v4328_v38  ;;  %v4310_v38 = vpop.xlane.xlu2 %4309 }
 0xbc2   : > { %8848 = vpow2.f32 %v4345_v41 }
 0xbc4   : > { %v12703_v55 = vpop.f32.mrf.mxu3 }
 0xbc5   : > { %5009 = vmax.xlane.f32.xlu1 %v12703_v55  ;;  %v4300_v48 = vpop.xlane.xlu0 %4299 }
 0xbc6   : > { %v4329_v27 = vsub.f32 %v12588_v8, %v4300_v48  ;;  %v4349_v8 = vmul.f32 1.442695, %v4330_v9  ;;  %v12721_v2 = vpop.xlane.xlu1 %4313 }
 0xbc8   : > { %v8849_v20 = vpop.eup %8848  ;;  %v4347_v28 = vmul.f32 1.442695, %v4329_v27  ;;  %v4334_v27 = vsub.f32 %v12618_v3, %v4310_v38 }
 0xbc9   : > { %v4407_v31 = vpack.c.bf16 %v8849_v20, %v8847_v0  ;;  %4377 = vadd.xlane.f32.xlu0 %v8849_v20 }
 0xbca   : > { %8850 = vpow2.f32 %v4347_v28  ;;  %v4357_v28 = vmul.f32 1.442695, %v4334_v27 }
 0xbcb   : > { %4423 = vmatmul.bf16.vlgmr.msra.gmra.mxu0 %v4407_v31  ;;  %7768 = vmatmul.msk.bf16.gmra.mxu1 %vm1735_vm9, %v12609_v59  ;;  %8852 = vpow2.f32 %v4349_v8  ;;  %v12752_v8 = vpop.f32.mrf.mxu1 }
 0xbcc   : > { %v12714_v25 = vpop.f32.mrf.mxu3 }
 0xbcd   : > { %5011 = vmax.xlane.f32.xlu1 %v12714_v25  ;;  %v4304_v29 = vpop.xlane.xlu0 %4303 }
 0xbce   : > { %v4331_v62 = vsub.f32 %v12601_v1, %v4304_v29  ;;  %v12734_v40 = vpop.xlane.xlu1 %4319 }
 0xbd0   : > { %v8851_v50 = vpop.eup %8850  ;;  %v4351_v36 = vmul.f32 1.442695, %v4331_v62 }
 0xbd1   : > { %4379 = vadd.xlane.f32.xlu2 %v8851_v50  ;;  %5005 = vmax.xlane.f32.xlu0 %v12693_v23  ;;  %v8853_v49 = vpop.eup %8852 }
 0xbd2   : > { %8854 = vpow2.f32 %v4351_v36  ;;  %v4408_v1 = vpack.c.bf16 %v8853_v49, %v8851_v50 }
 0xbd3   : > { %v12761_v36 = vpop.f32.mrf.mxu1 }
 0xbd4   : > { %v12723_v59 = vpop.f32.mrf.mxu3 }
 0xbd5   : > { %4655 = vmax.xlane.f32.xlu1 %v12706_v26  ;;  %v4308_v19 = vpop.xlane.xlu0 %4307 }
 0xbd6   : > { %v4333_v30 = vsub.f32 %v12611_v45, %v4308_v19 }
 0xbd8   : > { %v4355_v37 = vmul.f32 1.442695, %v4333_v30  ;;  %v8855_v18 = vpop.eup %8854 }
 0xbd9   : > { %4653 = vmax.xlane.f32.xlu2 %v12698_v58  ;;  %5007 = vmax.xlane.f32.xlu0 %v12700_v34 }
 0xbda   : > { %8856 = vpow2.f32 %v4355_v37  ;;  %v4316_v37 = vpop.xlane.xlu2 %4315 }
 0xbdb   : > { %4428 = vmatmul.bf16.gmra.mxu0 %v4408_v1  ;;  %7769 = vmatmul.msk.bf16.gmra.mxu1 %vm1735_vm9, %v12615_v53  ;;  %8858 = vpow2.f32 %v4353_v24  ;;  %v4644_v53 = vpop.xlane.xlu1 %4643  ;;  %v12777_v24 = vpop.f32.mrf.mxu1 }
 0xbdc   : > { %v12736_v45 = vpop.f32.mrf.mxu3  ;;  %v4674_v22 = vsub.f32 %v12644_v10, %v4644_v53  ;;  %8860 = vpow2.f32 %v4357_v28  ;;  %v4337_v53 = vsub.f32 %v12630_v14, %v4316_v37 }
 0xbdd   : > { %v4312_v56 = vpop.xlane.xlu0 %4311 }
 0xbde   : > { %v4691_v9 = vmul.f32 1.442695, %v4674_v22  ;;  %v4335_v50 = vsub.f32 %v12622_v57, %v4312_v56 }
 0xbe0   : > { %v8857_v0 = vpop.eup %8856  ;;  %8862 = vpow2.f32 %v4691_v9  ;;  %v4359_v19 = vmul.f32 1.442695, %v4335_v50  ;;  %v4339_v50 = vsub.f32 %v12648_v21, %v12734_v40 }
 0xbe1   : > { %4383 = vadd.xlane.f32.xlu2 %v8855_v18  ;;  %4381 = vadd.xlane.f32.xlu0 %v8853_v49  ;;  %v8859_v48 = vpop.eup %8858  ;;  %v4336_v49 = vsub.f32 %v12628_v44, %v12721_v2 }
 0xbe2   : > { %4387 = vadd.xlane.f32.xlu1 %v8857_v0  ;;  %v4409_v20 = vpack.c.bf16 %v8859_v48, %v8855_v18  ;;  %v8861_v62 = vpop.eup %8860  ;;  %v4318_v2 = vpop.xlane.xlu2 %4317 }
 0xbe3   : > { %v4410_v57 = vpack.c.bf16 %v8861_v62, %v8857_v0  ;;  %v4361_v16 = vmul.f32 1.442695, %v4336_v49  ;;  %v4338_v0 = vsub.f32 %v12634_v6, %v4318_v2  ;;  %v4363_v6 = vmul.f32 1.442695, %v4337_v53 }
 0xbe4   : > { %v12740_v15 = vpop.f32.mrf.mxu3 }
 0xbe5   : > { %v12742_v41 = vpop.xlane.xlu0 %4321 }
 0xbe6   : > { %v12763_v30 = vpop.eup %8862 }
 0xbe9   : > { %4385 = vadd.xlane.f32.xlu0 %v8859_v48  ;;  %5013 = vmax.xlane.f32.xlu2 %v12723_v59  ;;  %v4365_v48 = vmul.f32 1.442695, %v4338_v0 }
 0xbea   : > { %4659 = vmax.xlane.f32.xlu1 %v12730_v61 }
 0xbeb   : > { %4433 = vmatmul.bf16.gmra.mxu0 %v4409_v20  ;;  %7770 = vmatmul.msk.bf16.gmra.mxu1 %vm1735_vm9, %v12637_v51 }
 0xbec   : > { %v12750_v31 = vpop.f32.mrf.mxu3 }
 0xbed   : > { %v4642_v29 = vpop.xlane.xlu0 %4641 }
 0xbee   : > { %v4673_v3 = vsub.f32 %v12641_v12, %v4642_v29  ;;  %v4340_v29 = vsub.f32 %v12669_v43, %v12742_v41 }
 0xbf0   : > { %v4689_v10 = vmul.f32 1.442695, %v4673_v3 }
 0xbf1   : > { %4657 = vmax.xlane.f32.xlu0 %v12717_v54  ;;  %5015 = vmax.xlane.f32.xlu2 %v12736_v45 }
 0xbf2   : > { %8864 = vpow2.f32 %v4689_v10 }
 0xbf3   : > { %8866 = vpow2.f32 %v4359_v19  ;;  %v4369_v19 = vmul.f32 1.442695, %v4340_v29 }
 0xbf4   : > { %v12758_v51 = vpop.f32.mrf.mxu3  ;;  %8868 = vpow2.f32 %v4361_v16 }
 0xbf5   : > { %5021 = vmax.xlane.f32.xlu1 %v12758_v51  ;;  %8870 = vpow2.f32 %v4365_v48 }
 0xbf6   : > { %8872 = vpow2.f32 %v4363_v6 }
 0xbf7   : > { %8874 = vpow2.f32 %v4369_v19 }
 0xbf8   : > { %v12765_v12 = vpop.eup %8864 }
 0xbf9   : > { %v4753_v7 = vpack.c.bf16 %v12763_v30, %v12765_v12  ;;  %4389 = vadd.xlane.f32.xlu0 %v8861_v62  ;;  %4661 = vmax.xlane.f32.xlu2 %v12738_v33  ;;  %v8867_v56 = vpop.eup %8866  ;;  %v4646_v62 = vpop.xlane.xlu1 %4645 }
 0xbfa   : > { %v12782_v18 = vpop.eup %8868  ;;  %v4675_v49 = vsub.f32 %v12651_v4, %v4646_v62 }
 0xbfb   : > { %4438 = vmatmul.bf16.gmra.mxu0 %v4410_v57  ;;  %4801 = vmatmul.bf16.vlgmr.msrb.gmra.mxu2 %v4753_v7  ;;  %v12802_v28 = vpop.eup %8870  ;;  %v4367_v7 = vmul.f32 1.442695, %v4339_v50 }
 0xbfc   : > { %v12772_v1 = vpop.f32.mrf.mxu3  ;;  %7771 = vmatmul.msk.bf16.gmra.mxu1 %vm1735_vm9, %v12675_v47  ;;  %v4411_v47 = vpack.c.bf16 %v12782_v18, %v8867_v56  ;;  %v12804_v9 = vpop.eup %8872  ;;  %v4693_v37 = vmul.f32 1.442695, %v4675_v49 }
 0xbfd   : > { %5023 = vmax.xlane.f32.xlu1 %v12772_v1  ;;  %v4412_v10 = vpack.c.bf16 %v12802_v28, %v12804_v9  ;;  %8876 = vpow2.f32 %v4367_v7  ;;  %v12826_v40 = vpop.eup %8874 }
 0xbfe   : > { %8878 = vpow2.f32 %v4693_v37 }
 0xc01   : > { %4391 = vadd.xlane.f32.xlu2 %v8867_v56  ;;  %5017 = vmax.xlane.f32.xlu0 %v12740_v15  ;;  %v4650_v16 = vpop.xlane.xlu1 %4649 }
 0xc02   : > { %v4677_v7 = vsub.f32 %v12661_v32, %v4650_v16 }
 0xc03   : > { %v12828_v56 = vpop.eup %8876 }
 0xc04   : > { %v12780_v44 = vpop.f32.mrf.mxu3  ;;  %v4413_v4 = vpack.c.bf16 %v12826_v40, %v12828_v56  ;;  %v8879_v62 = vpop.eup %8878 }
 0xc08   : > { %v12785_v38 = vpop.f32.mrf.mxu1 }
 0xc09   : > { %4663 = vmax.xlane.f32.xlu2 %v12752_v8  ;;  %5019 = vmax.xlane.f32.xlu0 %v12750_v31 }
 0xc0a   : > { %4669 = vmax.xlane.f32.xlu1 %v12785_v38 }
 0xc0b   : > { %4443 = vmatmul.bf16.gmra.mxu0 %v4411_v47 }
 0xc0c   : > { %v12792_v27 = vpop.f32.mrf.mxu3  ;;  %7772 = vmatmul.msk.bf16.gmra.mxu1 %vm1735_vm9, %v12712_v35 }
 0xc10   : > { %v4324_v22 = vpop.xlane.xlu2 %4323  ;;  %v12796_v20 = vpop.f32.mrf.mxu1 }
 0xc11   : > { %4667 = vmax.xlane.f32.xlu2 %v12777_v24  ;;  %4665 = vmax.xlane.f32.xlu0 %v12761_v36  ;;  %v4341_v6 = vsub.f32 %v12682_v17, %v4324_v22 }
 0xc14   : > { %v12800_v14 = vpop.f32.mrf.mxu3 }
 0xc18   : > { %v12808_v35 = vpop.xlane.xlu2 %4375  ;;  %v12810_v3 = vpop.f32.mrf.mxu1 }
 0xc19   : > { %4671 = vmax.xlane.f32.xlu0 %v12796_v20  ;;  %5025 = vmax.xlane.f32.xlu2 %v12780_v44  ;;  %v4326_v21 = vpop.xlane.xlu0 %4325 }
 0xc1a   : > { %v4342_v2 = vsub.f32 %v12685_v46, %v4326_v21 }
 0xc1b   : > { %4448 = vmatmul.bf16.gmra.mxu0 %v4412_v10 }
 0xc1c   : > { %v12818_v57 = vpop.f32.mrf.mxu3  ;;  %v4373_v10 = vmul.f32 1.442695, %v4342_v2 }
 0xc20   : > { %v5004_v43 = vpop.xlane.xlu2 %5003  ;;  %v12820_v41 = vpop.f32.mrf.mxu1 }
 0xc21   : > { %5027 = vmax.xlane.f32.xlu2 %v12792_v27  ;;  %5029 = vmax.xlane.f32.xlu0 %v12800_v14  ;;  %v5035_v46 = vsub.f32 %v12690_v42, %v5004_v43 }
 0xc22   : > { %5359 = vmax.xlane.f32.xlu1 %v12820_v41 }
 0xc23   : > { %v5051_v50 = vmul.f32 1.442695, %v5035_v46 }
 0xc24   : > { %v12831_v47 = vpop.f32.mrf.mxu3 }
 0xc28   : > { %v4648_v0 = vpop.xlane.xlu2 %4647  ;;  %v12834_v48 = vpop.f32.mrf.mxu1 }
 0xc29   : > { %v4676_v53 = vsub.f32 %v12655_v63, %v4648_v0  ;;  %4721 = vadd.xlane.f32.xlu2 %v12765_v12  ;;  %5357 = vmax.xlane.f32.xlu0 %v12810_v3  ;;  %v4371_v63 = vmul.f32 1.442695, %v4341_v6  ;;  %v4652_v12 = vpop.xlane.xlu1 %4651  ;;  %v4697_v0 = vmul.f32 1.442695, %v4677_v7 }
 0xc2a   : > { %5033 = vmax.xlane.f32.xlu1 %v12831_v47  ;;  %v4678_v42 = vsub.f32 %v12666_v52, %v4652_v12 }
 0xc2b   : > { %v4695_v29 = vmul.f32 1.442695, %v4676_v53  ;;  %4453 = vmatmul.bf16.gmra.mxu0 %v4413_v4 }
 0xc2c   : > { %v4699_v49 = vmul.f32 1.442695, %v4678_v42 }
 0xc2d   : > { %8880 = vpow2.f32 %v4695_v29 }
 0xc2e   : > { %8882 = vpow2.f32 %v4373_v10 }
 0xc2f   : > { %8884 = vpow2.f32 %v4371_v63 }
 0xc30   : > { %v12843_v19 = vpop.f32.mrf.mxu1  ;;  %8886 = vpow2.f32 %v5051_v50 }
 0xc31   : > { %4725 = vadd.xlane.f32.xlu2 %v8879_v62  ;;  %5031 = vmax.xlane.f32.xlu0 %v12818_v57  ;;  %8888 = vpow2.f32 %v4699_v49 }
 0xc32   : > { %5361 = vmax.xlane.f32.xlu1 %v12834_v48  ;;  %8890 = vpow2.f32 %v4697_v0 }
 0xc33   : > { %v8881_v17 = vpop.eup %8880 }
 0xc34   : > { %v4754_v22 = vpack.c.bf16 %v8881_v17, %v8879_v62  ;;  %v12849_v43 = vpop.eup %8882 }
 0xc35   : > { %14427 = vst [vmem:[#allocation30_spill] sm:$0xff] %v12849_v43  ;;  %v12851_v21 = vpop.eup %8884 }
 0xc36   : > { %4806 = vmatmul.bf16.gmra.mxu2 %v4754_v22  ;;  %v8887_v2 = vpop.eup %8886  ;;  %v4414_v52 = vpack.c.bf16 %v12849_v43, %v12851_v21 }
 0xc37   : > { %v8889_v4 = vpop.eup %8888 }
 0xc38   : > { %v5010_v37 = vpop.xlane.xlu1 %5009  ;;  %v12853_v53 = vpop.f32.mrf.mxu1 }
 0xc39   : > { %5363 = vmax.xlane.f32.xlu2 %v12843_v19  ;;  %4723 = vadd.xlane.f32.xlu0 %v12763_v30  ;;  %v8891_v46 = vpop.eup %8890 }
 0xc3a   : > { %5083 = vadd.xlane.f32.xlu1 %v8887_v2  ;;  %v4755_v63 = vpack.c.bf16 %v8889_v4, %v8891_v46 }
 0xc3b   : > { %4458 = vmatmul.bf16.gmra.mxu0 %v4414_v52 }
 0xc3c   : > { %v12859_v32 = vpop.xlane.xlu0 %4377 }
 0xc40   : > { %v5012_v16 = vpop.xlane.xlu1 %5011  ;;  %v12861_v6 = vpop.f32.mrf.mxu1 }
 0xc41   : > { %4727 = vadd.xlane.f32.xlu0 %v8881_v17 }
 0xc44   : > { %v12863_v29 = vpop.xlane.xlu2 %4379  ;;  %v5006_v10 = vpop.xlane.xlu0 %5005 }
 0xc45   : > { %v5036_v30 = vsub.f32 %v12693_v23, %v5006_v10 }
 0xc46   : > { %4811 = vmatmul.bf16.gmra.mxu2 %v4755_v63 }
 0xc47   : > { %v5053_v50 = vmul.f32 1.442695, %v5036_v30 }
 0xc48   : > { %v4656_v62 = vpop.xlane.xlu1 %4655  ;;  %v12866_v12 = vpop.f32.mrf.mxu0 }
 0xc49   : > { %8892 = vpow2.f32 %v5053_v50  ;;  %v4680_v42 = vsub.f32 %v12706_v26, %v4656_v62  ;;  %v12869_v22 = vpop.f32.mrf.mxu1  ;;  %4731 = vadd.xlane.f32.xlu0 %v8889_v4  ;;  %v5038_v26 = vsub.f32 %v12703_v55, %v5010_v37  ;;  %v5039_v37 = vsub.f32 %v12714_v25, %v5012_v16 }
 0xc4b   : > { %v4703_v7 = vmul.f32 1.442695, %v4680_v42  ;;  %v5057_v4 = vmul.f32 1.442695, %v5038_v26 }
 0xc4c   : > { %v4654_v17 = vpop.xlane.xlu2 %4653  ;;  %v5008_v49 = vpop.xlane.xlu0 %5007 }
 0xc4d   : > { %v4679_v0 = vsub.f32 %v12698_v58, %v4654_v17  ;;  %v5037_v52 = vsub.f32 %v12700_v34, %v5008_v49  ;;  %8894 = vpow2.f32 %v4703_v7 }
 0xc4f   : > { %v8893_v5 = vpop.eup %8892  ;;  %v4701_v23 = vmul.f32 1.442695, %v4679_v0  ;;  %v5055_v10 = vmul.f32 1.442695, %v5037_v52 }
 0xc50   : > { %v5115_v63 = vpack.c.bf16 %v8893_v5, %v8887_v2  ;;  %v12873_v30 = vpop.f32.mrf.mxu0  ;;  %5085 = vadd.xlane.f32.xlu2 %v8893_v5 }
 0xc51   : > { %8896 = vpow2.f32 %v4701_v23  ;;  %v12876_v50 = vpop.f32.mrf.mxu1  ;;  %5367 = vmax.xlane.f32.xlu0 %v12861_v6  ;;  %v5059_v23 = vmul.f32 1.442695, %v5039_v37 }
 0xc52   : > { %8898 = vpow2.f32 %v5055_v10  ;;  %5155 = vmatmul.bf16.vlgmr.msrb.gmra.mxu0 %v5115_v63 }
 0xc53   : > { %v8895_v2 = vpop.eup %8894  ;;  %8900 = vpow2.f32 %v5057_v4 }
 0xc54   : > { %v12879_v58 = vpop.xlane.xlu2 %4383  ;;  %v12881_v34 = vpop.xlane.xlu0 %4381  ;;  %8902 = vpow2.f32 %v5059_v23 }
 0xc55   : > { %v4388_v62 = vpop.xlane.xlu1 %4387 }
 0xc57   : > { %v8897_v42 = vpop.eup %8896 }
 0xc58   : > { %v8899_v7 = vpop.eup %8898  ;;  %v12883_v17 = vpop.f32.mrf.mxu0  ;;  %4729 = vadd.xlane.f32.xlu2 %v8891_v46  ;;  %v4756_v5 = vpack.c.bf16 %v8895_v2, %v8897_v42 }
 0xc59   : > { %v12885_v55 = vpop.f32.mrf.mxu1  ;;  %5087 = vadd.xlane.f32.xlu1 %v8899_v7  ;;  %5369 = vmax.xlane.f32.xlu0 %v12869_v22  ;;  %v8901_v10 = vpop.eup %8900 }
 0xc5a   : > { %4816 = vmatmul.bf16.gmra.mxu2 %v4756_v5  ;;  %v5116_v4 = vpack.c.bf16 %v8901_v10, %v8899_v7 }
 0xc5c   : > { %v12889_v49 = vpop.xlane.xlu0 %4385  ;;  %v5014_v0 = vpop.xlane.xlu2 %5013 }
 0xc5d   : > { %v4660_v52 = vpop.xlane.xlu1 %4659  ;;  %v5040_v63 = vsub.f32 %v12723_v59, %v5014_v0 }
 0xc5e   : > { %v4682_v46 = vsub.f32 %v12730_v61, %v4660_v52  ;;  %v8903_v52 = vpop.eup %8902 }
 0xc5f   : > { %v5061_v25 = vmul.f32 1.442695, %v5040_v63 }
 0xc60   : > { %v12893_v26 = vpop.f32.mrf.mxu0  ;;  %5365 = vmax.xlane.f32.xlu2 %v12853_v53  ;;  %v4707_v5 = vmul.f32 1.442695, %v4682_v46 }
 0xc61   : > { %4733 = vadd.xlane.f32.xlu1 %v8897_v42  ;;  %v12896_v16 = vpop.f32.mrf.mxu1  ;;  %8904 = vpow2.f32 %v5061_v25 }
 0xc62   : > { %5160 = vmatmul.bf16.gmra.mxu0 %v5116_v4  ;;  %8906 = vpow2.f32 %v4707_v5 }
 0xc64   : > { %v4658_v60 = vpop.xlane.xlu0 %4657  ;;  %v5016_v13 = vpop.xlane.xlu2 %5015 }
 0xc65   : > { %v4681_v37 = vsub.f32 %v12717_v54, %v4658_v60  ;;  %v5041_v59 = vsub.f32 %v12736_v45, %v5016_v13 }
 0xc67   : > { %v4705_v61 = vmul.f32 1.442695, %v4681_v37  ;;  %v5063_v0 = vmul.f32 1.442695, %v5041_v59  ;;  %v8905_v23 = vpop.eup %8904 }
 0xc68   : > { %v12900_v11 = vpop.f32.mrf.mxu0  ;;  %5089 = vadd.xlane.f32.xlu2 %v8901_v10  ;;  %v8907_v63 = vpop.eup %8906  ;;  %v5117_v25 = vpack.c.bf16 %v8905_v23, %v8903_v52 }
 0xc69   : > { %8908 = vpow2.f32 %v4705_v61  ;;  %5091 = vadd.xlane.f32.xlu1 %v8903_v52  ;;  %v12904_v46 = vpop.f32.mrf.mxu1  ;;  %v5022_v13 = vpop.xlane.xlu1 %5021 }
 0xc6a   : > { %8910 = vpow2.f32 %v5063_v0  ;;  %v5044_v10 = vsub.f32 %v12758_v51, %v5022_v13 }
 0xc6b   : > { %8912 = vrcp.f32 %v4388_v62 }
 0xc6c   : > { %v12902_v42 = vpop.xlane.xlu0 %4389  ;;  %v4662_v7 = vpop.xlane.xlu2 %4661  ;;  %v5069_v61 = vmul.f32 1.442695, %v5044_v10 }
 0xc6d   : > { %14428 = vst [vmem:[#allocation24_spill] sm:$0xff] %v12902_v42  ;;  %v4683_v43 = vsub.f32 %v12738_v33, %v4662_v7 }
 0xc6f   : > { %v8909_v60 = vpop.eup %8908  ;;  %v4709_v51 = vmul.f32 1.442695, %v4683_v43 }
 0xc70   : > { %v8911_v54 = vpop.eup %8910  ;;  %v12906_v45 = vpop.f32.mrf.mxu0  ;;  %4735 = vadd.xlane.f32.xlu2 %v8895_v2  ;;  %v4757_v4 = vpack.c.bf16 %v8907_v63, %v8909_v60 }
 0xc71   : > { %5095 = vadd.xlane.f32.xlu0 %v8911_v54  ;;  %5371 = vmax.xlane.f32.xlu1 %v12876_v50  ;;  %v8913_v39 = vpop.eup %8912  ;;  %v12912_v2 = vpop.f32.mrf.mxu1 }
 0xc72   : > { %4821 = vmatmul.bf16.gmra.mxu2 %v4757_v4  ;;  %5165 = vmatmul.bf16.gmra.mxu0 %v5117_v25  ;;  %v5024_v25 = vpop.xlane.xlu1 %5023 }
 0xc73   : > { %v5045_v43 = vsub.f32 %v12772_v1, %v5024_v25 }
 0xc74   : > { %v4392_v5 = vpop.xlane.xlu2 %4391  ;;  %v5018_v37 = vpop.xlane.xlu0 %5017 }
 0xc75   : > { %v5042_v59 = vsub.f32 %v12740_v15, %v5018_v37 }
 0xc77   : > { %v5065_v0 = vmul.f32 1.442695, %v5042_v59 }
 0xc78   : > { %v4439_v52 = vpop.f32.mrf.mxu0  ;;  %5093 = vadd.xlane.f32.xlu2 %v8905_v23 }
 0xc79   : > { %8914 = vpow2.f32 %v5065_v0  ;;  %v12914_v42 = vmul.f32 %v8913_v39, %v4439_v52  ;;  %5379 = vmax.xlane.f32.xlu0 %v12912_v2  ;;  %4737 = vadd.xlane.f32.xlu1 %v8909_v60  ;;  %v12925_v52 = vpop.f32.mrf.mxu1 }
 0xc7a   : > { %8916 = vpow2.f32 %v5069_v61  ;;  %v5071_v61 = vmul.f32 1.442695, %v5045_v43 }
 0xc7b   : > { %8918 = vpow2.f32 %v4709_v51 }
 0xc7c   : > { %v4664_v62 = vpop.xlane.xlu2 %4663  ;;  %v5020_v13 = vpop.xlane.xlu0 %5019 }
 0xc7d   : > { %v4684_v15 = vsub.f32 %v12752_v8, %v4664_v62  ;;  %v5043_v33 = vsub.f32 %v12750_v31, %v5020_v13 }
 0xc7f   : > { %v8915_v4 = vpop.eup %8914  ;;  %v4711_v10 = vmul.f32 1.442695, %v4684_v15  ;;  %v5067_v8 = vmul.f32 1.442695, %v5043_v33 }
 0xc80   : > { %v8917_v7 = vpop.eup %8916  ;;  %v12919_v23 = vpop.f32.mrf.mxu0  ;;  %4739 = vadd.xlane.f32.xlu2 %v8907_v63  ;;  %v5118_v39 = vpack.c.bf16 %v8915_v4, %v8911_v54 }
 0xc81   : > { %8920 = vpow2.f32 %v4711_v10  ;;  %5101 = vadd.xlane.f32.xlu0 %v8917_v7  ;;  %5373 = vmax.xlane.f32.xlu1 %v12885_v55  ;;  %v8919_v59 = vpop.eup %8918 }
 0xc82   : > { %8922 = vrcp.f32 %v4392_v5  ;;  %5170 = vmatmul.bf16.gmra.mxu0 %v5118_v39 }
 0xc83   : > { %8924 = vpow2.f32 %v5067_v8 }
 0xc84   : > { %v4668_v60 = vpop.xlane.xlu2 %4667  ;;  %v4666_v37 = vpop.xlane.xlu0 %4665  ;;  %8926 = vpow2.f32 %v5071_v61 }
 0xc85   : > { %v4686_v31 = vsub.f32 %v12777_v24, %v4668_v60  ;;  %v4685_v63 = vsub.f32 %v12761_v36, %v4666_v37  ;;  %v4670_v36 = vpop.xlane.xlu1 %4669 }
 0xc87   : > { %v8921_v0 = vpop.eup %8920  ;;  %v4715_v62 = vmul.f32 1.442695, %v4686_v31  ;;  %v4713_v24 = vmul.f32 1.442695, %v4685_v63 }
 0xc88   : > { %v8923_v54 = vpop.eup %8922  ;;  %v4444_v51 = vpop.f32.mrf.mxu0  ;;  %5375 = vmax.xlane.f32.xlu2 %v12896_v16  ;;  %v4758_v1 = vpack.c.bf16 %v8921_v0, %v8919_v59 }
 0xc89   : > { %v12928_v5 = vmul.f32 %v8923_v54, %v4444_v51  ;;  %5381 = vmax.xlane.f32.xlu0 %v12925_v52  ;;  %5097 = vadd.xlane.f32.xlu1 %v8915_v4  ;;  %v8925_v25 = vpop.eup %8924  ;;  %8928 = vpow2.f32 %v4715_v62  ;;  %v4687_v51 = vsub.f32 %v12785_v38, %v4670_v36 }
 0xc8a   : > { %4826 = vmatmul.bf16.gmra.mxu2 %v4758_v1  ;;  %8930 = vpow2.f32 %v4713_v24  ;;  %v8927_v33 = vpop.eup %8926  ;;  %v5119_v43 = vpack.c.bf16 %v8917_v7, %v8925_v25 }
 0xc8b   : > { %v4717_v62 = vmul.f32 1.442695, %v4687_v51 }
 0xc8c   : > { %v4672_v13 = vpop.xlane.xlu0 %4671  ;;  %v5026_v15 = vpop.xlane.xlu2 %5025 }
 0xc8d   : > { %v5046_v10 = vsub.f32 %v12780_v44, %v5026_v15  ;;  %v4688_v54 = vsub.f32 %v12796_v20, %v4672_v13  ;;  %v12943_v13 = vpop.f32.mrf.mxu1 }
 0xc8f   : > { %v5073_v4 = vmul.f32 1.442695, %v5046_v10  ;;  %v8929_v8 = vpop.eup %8928 }
 0xc90   : > { %v12932_v39 = vpop.f32.mrf.mxu0  ;;  %5377 = vmax.xlane.f32.xlu2 %v12904_v46  ;;  %v8931_v61 = vpop.eup %8930 }
 0xc91   : > { %5103 = vadd.xlane.f32.xlu0 %v8927_v33  ;;  %4741 = vadd.xlane.f32.xlu1 %v8919_v59  ;;  %8932 = vpow2.f32 %v5073_v4  ;;  %v4759_v7 = vpack.c.bf16 %v8929_v8, %v8931_v61  ;;  %v4719_v59 = vmul.f32 1.442695, %v4688_v54 }
 0xc92   : > { %5175 = vmatmul.bf16.gmra.mxu0 %v5119_v43 }
 0xc94   : > { %v5028_v60 = vpop.xlane.xlu2 %5027  ;;  %v5030_v37 = vpop.xlane.xlu0 %5029 }
 0xc95   : > { %v5360_v31 = vpop.xlane.xlu1 %5359  ;;  %v5047_v63 = vsub.f32 %v12792_v27, %v5028_v60  ;;  %v5048_v38 = vsub.f32 %v12800_v14, %v5030_v37 }
 0xc97   : > { %v5075_v44 = vmul.f32 1.442695, %v5047_v63  ;;  %v8933_v10 = vpop.eup %8932 }
 0xc98   : > { %v12938_v1 = vpop.f32.mrf.mxu0  ;;  %5099 = vadd.xlane.f32.xlu2 %v8925_v25  ;;  %v5120_v4 = vpack.c.bf16 %v8933_v10, %v8927_v33  ;;  %v12958_v33 = vpop.f32.mrf.mxu1 }
 0xc99   : > { %8934 = vpow2.f32 %v5075_v44  ;;  %4747 = vadd.xlane.f32.xlu1 %v8929_v8  ;;  %v5077_v8 = vmul.f32 1.442695, %v5048_v38 }
 0xc9a   : > { %4831 = vmatmul.bf16.gmra.mxu2 %v4759_v7  ;;  %8936 = vpow2.f32 %v4719_v59  ;;  %v5390_v59 = vsub.f32 %v12820_v41, %v5360_v31 }
 0xc9b   : > { %8938 = vpow2.f32 %v4717_v62 }
 0xc9c   : > { %v12940_v24 = vpop.xlane.xlu2 %4721  ;;  %v5358_v15 = vpop.xlane.xlu0 %5357 }
 0xc9d   : > { %v5389_v27 = vsub.f32 %v12810_v3, %v5358_v15  ;;  %v5034_v20 = vpop.xlane.xlu1 %5033 }
 0xc9f   : > { %v8935_v43 = vpop.eup %8934  ;;  %v5405_v25 = vmul.f32 1.442695, %v5389_v27  ;;  %v5407_v27 = vmul.f32 1.442695, %v5390_v59 }
 0xca0   : > { %v12946_v36 = vpop.f32.mrf.mxu0  ;;  %4743 = vadd.xlane.f32.xlu2 %v8921_v0  ;;  %5107 = vadd.xlane.f32.xlu0 %v8935_v43  ;;  %v12949_v60 = vpop.eup %8936 }
 0xca1   : > { %8940 = vpow2.f32 %v5405_v25  ;;  %5383 = vmax.xlane.f32.xlu1 %v12943_v13  ;;  %v12953_v44 = vpop.eup %8938  ;;  %v12956_v0 = vpop.f32.mrf.mxu2 }
 0xca2   : > { %5180 = vmatmul.bf16.gmra.mxu0 %v5120_v4  ;;  %8942 = vpow2.f32 %v5077_v8  ;;  %v4760_v7 = vpack.c.bf16 %v12949_v60, %v12953_v44  ;;  %v5050_v8 = vsub.f32 %v12831_v47, %v5034_v20 }
 0xca4   : > { %v5032_v3 = vpop.xlane.xlu0 %5031  ;;  %v12951_v63 = vpop.xlane.xlu2 %4725 }
 0xca5   : > { %v5362_v54 = vpop.xlane.xlu1 %5361  ;;  %v5049_v38 = vsub.f32 %v12818_v57, %v5032_v3  ;;  %v12971_v3 = vpop.f32.mrf.mxu1 }
 0xca6   : > { %v5391_v14 = vsub.f32 %v12834_v48, %v5362_v54 }
 0xca7   : > { %v8941_v37 = vpop.eup %8940  ;;  %v5079_v54 = vmul.f32 1.442695, %v5049_v38 }
 0xca8   : > { %v5409_v51 = vmul.f32 1.442695, %v5391_v14  ;;  %4745 = vadd.xlane.f32.xlu2 %v8931_v61  ;;  %5437 = vadd.xlane.f32.xlu0 %v8941_v37  ;;  %v12963_v62 = vpop.f32.mrf.mxu0  ;;  %v8943_v15 = vpop.eup %8942 }
 0xca9   : > { %14429 = vst [vmem:[#allocation32_spill] sm:$0xff] %v12963_v62  ;;  %5385 = vmax.xlane.f32.xlu1 %v12958_v33  ;;  %v5121_v61 = vpack.c.bf16 %v8943_v15, %v8935_v43  ;;  %v4804_v41 = vpop.f32.mrf.mxu2 }
 0xcaa   : > { %8944 = vpow2.f32 %v5409_v51  ;;  %4836 = vmatmul.bf16.gmra.mxu2 %v4760_v7  ;;  %v5081_v7 = vmul.f32 1.442695, %v5050_v8 }
 0xcab   : > { %8946 = vpow2.f32 %v5407_v27 }
 0xcac   : > { %v4724_v48 = vpop.xlane.xlu0 %4723  ;;  %v5364_v25 = vpop.xlane.xlu2 %5363  ;;  %8948 = vpow2.f32 %v5079_v54 }
 0xcad   : > { %v5392_v31 = vsub.f32 %v12843_v19, %v5364_v25  ;;  %8950 = vpow2.f32 %v5081_v7 }
 0xcaf   : > { %v5411_v59 = vmul.f32 1.442695, %v5392_v31 }
 0xcb0   : > { %v8945_v4 = vpop.eup %8944  ;;  %5105 = vadd.xlane.f32.xlu2 %v8933_v10  ;;  %v12969_v14 = vpop.f32.mrf.mxu0 }
 0xcb1   : > { %5109 = vadd.xlane.f32.xlu1 %v8943_v15  ;;  %5441 = vadd.xlane.f32.xlu0 %v8945_v4  ;;  %14430 = vst [vmem:[#allocation25_spill] sm:$0xff] %v12969_v14  ;;  %v8947_v57 = vpop.eup %8946  ;;  %8952 = vpow2.f32 %v5411_v59 }
 0xcb2   : > { %5185 = vmatmul.bf16.gmra.mxu0 %v5121_v61  ;;  %v5469_v10 = vpack.c.bf16 %v8947_v57, %v8941_v37  ;;  %v12976_v20 = vpop.eup %8948  ;;  %8954 = vrcp.f32 %v4724_v48  ;;  %v5084_v37 = vpop.xlane.xlu1 %5083 }
 0xcb3   : > { %v12980_v15 = vpop.eup %8950  ;;  %8956 = vrcp.f32 %v12940_v24 }
 0xcb4   : > { %v4728_v51 = vpop.xlane.xlu0 %4727  ;;  %v5122_v38 = vpack.c.bf16 %v12980_v15, %v12976_v20 }
 0xcb7   : > { %v8953_v27 = vpop.eup %8952 }
 0xcb8   : > { %5387 = vmax.xlane.f32.xlu2 %v12971_v3  ;;  %v12978_v43 = vpop.f32.mrf.mxu0  ;;  %v8955_v54 = vpop.eup %8954 }
 0xcb9   : > { %5439 = vadd.xlane.f32.xlu1 %v8947_v57  ;;  %v4807_v47 = vpop.f32.mrf.mxu2  ;;  %14431 = vst [vmem:[#allocation27_spill] sm:$0xff] %v12978_v43  ;;  %v5470_v57 = vpack.c.bf16 %v8953_v27, %v8945_v4  ;;  %v4859_v43 = vmul.f32 %v8955_v54, %v4804_v41 }
 0xcba   : > { %5509 = vmatmul.bf16.vlgmr.msra.gmra.mxu2 %v5469_v10  ;;  %v8957_v10 = vpop.eup %8956 }
 0xcbb   : > { %v4858_v24 = vmul.f32 %v8957_v10, %v12956_v0 }
 0xcbc   : > { %v12974_v19 = vpop.xlane.xlu0 %4731 }
 0xcc0   : > { %v12986_v7 = vpop.f32.mrf.mxu0 }
 0xcc1   : > { %5443 = vadd.xlane.f32.xlu1 %v8953_v27  ;;  %v4809_v61 = vpop.f32.mrf.mxu2  ;;  %14432 = vst [vmem:[#allocation29_spill] sm:$0xff] %v12986_v7 }
 0xcc2   : > { %5190 = vmatmul.bf16.gmra.mxu0 %v5122_v38 }
 0xcc3   : > { %v5086_v25 = vpop.xlane.xlu2 %5085 }
 0xcc4   : > { %v5368_v8 = vpop.xlane.xlu0 %5367 }
 0xcc5   : > { %v5394_v31 = vsub.f32 %v12861_v6, %v5368_v8  ;;  %v8370_v6 = vpack.i.bf16 %v4859_v43, %v4858_v24 }
 0xcc7   : > { %v5415_v59 = vmul.f32 1.442695, %v5394_v31 }
 0xcc9   : > { %8958 = vpow2.f32 %v5415_v59  ;;  %v12992_v62 = vpop.f32.mrf.mxu2 }
 0xcca   : > { %5514 = vmatmul.bf16.gmra.mxu2 %v5470_v57  ;;  %8960 = vrcp.f32 %v4728_v51 }
 0xccb   : > { %v12988_v48 = vpop.xlane.xlu2 %4729  ;;  %8962 = vrcp.f32 %v12951_v63 }
 0xccc   : > { %v5088_v38 = vpop.xlane.xlu1 %5087  ;;  %v5370_v24 = vpop.xlane.xlu0 %5369 }
 0xccf   : > { %v8959_v8 = vpop.eup %8958  ;;  %v5156_v14 = vpop.f32.mrf.mxu0 }
 0xcd0   : > { %8371 = vrot.lane.b32.xlu2 %v8370_v6, %s9473_s26  ;;  %5447 = vadd.xlane.f32.xlu1 %v8959_v8  ;;  %v8961_v4 = vpop.eup %8960 }
 0xcd1   : > { %v4861_v27 = vmul.f32 %v8961_v4, %v4809_v61  ;;  %v8963_v41 = vpop.eup %8962  ;;  %v12996_v63 = vpop.f32.mrf.mxu2  ;;  %v5395_v61 = vsub.f32 %v12869_v22, %v5370_v24 }
 0xcd2   : > { %v4860_v51 = vmul.f32 %v8963_v41, %v4807_v47 }
 0xcd3   : > { %v5366_v31 = vpop.xlane.xlu2 %5365 }
 0xcd4   : > { %v5393_v54 = vsub.f32 %v12853_v53, %v5366_v31  ;;  %v4734_v59 = vpop.xlane.xlu1 %4733  ;;  %v8380_v0 = vpack.i.bf16 %v4861_v27, %v4860_v51  ;;  %v5417_v27 = vmul.f32 1.442695, %v5395_v61 }
 0xcd6   : > { %v5413_v57 = vmul.f32 1.442695, %v5393_v54 }
 0xcd7   : > { %v5158_v10 = vpop.f32.mrf.mxu0 }
 0xcd8   : > { %8964 = vpow2.f32 %v5413_v57  ;;  %8381 = vrot.lane.b32.xlu2 %v8380_v0, %s9473_s26 }
 0xcd9   : > { %8966 = vrcp.f32 %v5088_v38 }
 0xcdb   : > { %v5090_v43 = vpop.xlane.xlu2 %5089 }
 0xcdc   : > { %v5092_v6 = vpop.xlane.xlu1 %5091  ;;  %8968 = vrcp.f32 %v5090_v43 }
 0xcdd   : > { %v4817_v53 = vpop.f32.mrf.mxu2  ;;  %8970 = vrcp.f32 %v4734_v59 }
 0xcde   : > { %v8965_v7 = vpop.eup %8964 }
 0xcdf   : > { %v5161_v4 = vpop.f32.mrf.mxu0  ;;  %5445 = vadd.xlane.f32.xlu0 %v8965_v7  ;;  %v5471_v47 = vpack.c.bf16 %v8959_v8, %v8965_v7  ;;  %v8967_v54 = vpop.eup %8966 }
 0xce0   : > { %v13001_v7 = vmul.f32 %v8967_v54, %v5161_v4 }
 0xce1   : > { %5519 = vmatmul.bf16.gmra.mxu2 %v5471_v47 }
 0xce2   : > { %v8969_v0 = vpop.eup %8968 }
 0xce3   : > { %v4736_v41 = vpop.xlane.xlu2 %4735  ;;  %v8971_v8 = vpop.eup %8970 }
 0xce4   : > { %8972 = vrcp.f32 %v4736_v41  ;;  %v5372_v31 = vpop.xlane.xlu1 %5371 }
 0xce5   : > { %8974 = vrcp.f32 %v5084_v37  ;;  %v5396_v51 = vsub.f32 %v12876_v50, %v5372_v31  ;;  %v4819_v43 = vpop.f32.mrf.mxu2  ;;  %v4864_v50 = vmul.f32 %v8971_v8, %v4817_v53 }
 0xce6   : > { %8976 = vrcp.f32 %v5086_v25 }
 0xce7   : > { %8978 = vpow2.f32 %v5417_v27  ;;  %v5419_v22 = vmul.f32 1.442695, %v5396_v51  ;;  %v5163_v57 = vpop.f32.mrf.mxu0 }
 0xce8   : > { %8980 = vrcp.f32 %v5092_v6  ;;  %v13003_v38 = vmul.f32 %v8969_v0, %v5163_v57 }
 0xce9   : > { %8982 = vpow2.f32 %v5419_v22 }
 0xcea   : > { %v8973_v59 = vpop.eup %8972 }
 0xceb   : > { %v8975_v24 = vpop.eup %8974  ;;  %v4865_v61 = vmul.f32 %v8973_v59, %v4819_v43  ;;  %v5094_v25 = vpop.xlane.xlu2 %5093 }
 0xcec   : > { %v8977_v47 = vpop.eup %8976  ;;  %v4738_v27 = vpop.xlane.xlu1 %4737  ;;  %v5212_v54 = vmul.f32 %v8975_v24, %v5156_v14  ;;  %8984 = vrcp.f32 %v5094_v25 }
 0xced   : > { %v13007_v41 = vpop.eup %8978  ;;  %v5213_v6 = vmul.f32 %v8977_v47, %v5158_v10  ;;  %v8400_v4 = vpack.i.bf16 %v4865_v61, %v4864_v50  ;;  %v5096_v43 = vpop.xlane.xlu0 %5095  ;;  %8986 = vrcp.f32 %v4738_v27 }
 0xcee   : > { %v8981_v31 = vpop.eup %8980 }
 0xcef   : > { %v8983_v51 = vpop.eup %8982  ;;  %v5166_v0 = vpop.f32.mrf.mxu0  ;;  %8401 = vrot.lane.b32.xlu2 %v8400_v4, %s9473_s26  ;;  %v8375_v53 = vpack.i.bf16 %v5213_v6, %v5212_v54 }
 0xcf0   : > { %v13010_v22 = vmul.f32 %v8981_v31, %v5166_v0  ;;  %5451 = vadd.xlane.f32.xlu1 %v8983_v51  ;;  %v5472_v57 = vpack.c.bf16 %v8983_v51, %v13007_v41 }
 0xcf2   : > { %5524 = vmatmul.bf16.gmra.mxu2 %v5472_v57  ;;  %v8985_v50 = vpop.eup %8984 }
 0xcf3   : > { %v4740_v8 = vpop.xlane.xlu2 %4739  ;;  %8376 = vrot.lane.b32.xlu0 %v8375_v53, %s9469_s29  ;;  %v8987_v4 = vpop.eup %8986 }
 0xcf4   : > { %v5374_v59 = vpop.xlane.xlu1 %5373  ;;  %8988 = vrcp.f32 %v4740_v8 }
 0xcf5   : > { %v4822_v10 = vpop.f32.mrf.mxu2  ;;  %v5397_v14 = vsub.f32 %v12885_v55, %v5374_v59  ;;  %8990 = vrcp.f32 %v5096_v43 }
 0xcf6   : > { %8992 = vrcp.f32 %v12988_v48  ;;  %v13022_v55 = vmul.f32 %v8987_v4, %v4822_v10 }
 0xcf7   : > { %v5168_v24 = vpop.f32.mrf.mxu0  ;;  %v5421_v47 = vmul.f32 1.442695, %v5397_v14  ;;  %8994 = vrcp.f32 %v12974_v19 }
 0xcf8   : > { %v13015_v61 = vmul.f32 %v8985_v50, %v5168_v24 }
 0xcf9   : > { %8996 = vpow2.f32 %v5421_v47 }
 0xcfa   : > { %v8989_v27 = vpop.eup %8988 }
 0xcfb   : > { %v5376_v6 = vpop.xlane.xlu2 %5375  ;;  %v8991_v53 = vpop.eup %8990 }
 0xcfc   : > { %v5398_v31 = vsub.f32 %v12896_v16, %v5376_v6  ;;  %v5098_v51 = vpop.xlane.xlu1 %5097  ;;  %v8993_v8 = vpop.eup %8992 }
 0xcfd   : > { %v4824_v54 = vpop.f32.mrf.mxu2  ;;  %v5380_v16 = vpop.xlane.xlu0 %5379  ;;  %v4862_v50 = vmul.f32 %v8993_v8, %v12992_v62 }
 0xcfe   : > { %v5423_v0 = vmul.f32 1.442695, %v5398_v31  ;;  %v13024_v57 = vmul.f32 %v8989_v27, %v4824_v54  ;;  %v8995_v10 = vpop.eup %8994  ;;  %v5400_v62 = vsub.f32 %v12912_v2, %v5380_v16 }
 0xcff   : > { %v5171_v48 = vpop.f32.mrf.mxu0  ;;  %v13031_v24 = vpop.eup %8996  ;;  %v4863_v6 = vmul.f32 %v8995_v10, %v12996_v63 }
 0xd00   : > { %8998 = vpow2.f32 %v5423_v0  ;;  %v13028_v43 = vmul.f32 %v8991_v53, %v5171_v48  ;;  %v5427_v8 = vmul.f32 1.442695, %v5400_v62 }
 0xd01   : > { %9000 = vrcp.f32 %v5098_v51  ;;  %v8390_v27 = vpack.i.bf16 %v4863_v6, %v4862_v50 }
 0xd03   : > { %v5378_v19 = vpop.xlane.xlu2 %5377 }
 0xd04   : > { %v4742_v14 = vpop.xlane.xlu1 %4741  ;;  %v5399_v4 = vsub.f32 %v12904_v46, %v5378_v19 }
 0xd05   : > { %9002 = vrcp.f32 %v4742_v14  ;;  %v13045_v48 = vpop.xlane.xlu0 %5101 }
 0xd06   : > { %v13034_v47 = vpop.eup %8998  ;;  %v5425_v53 = vmul.f32 1.442695, %v5399_v4 }
 0xd07   : > { %v9001_v31 = vpop.eup %9000  ;;  %v5173_v54 = vpop.f32.mrf.mxu0  ;;  %v5473_v51 = vpack.c.bf16 %v13034_v47, %v13031_v24 }
 0xd08   : > { %v13040_v0 = vmul.f32 %v9001_v31, %v5173_v54  ;;  %9004 = vpow2.f32 %v5425_v53 }
 0xd09   : > { %8391 = vrot.lane.b32.xlu1 %v8390_v27, %s9473_s26  ;;  %5529 = vmatmul.bf16.gmra.mxu2 %v5473_v51  ;;  %9006 = vpow2.f32 %v5427_v8 }
 0xd0b   : > { %v13047_v46 = vpop.xlane.xlu2 %5099  ;;  %v9003_v19 = vpop.eup %9002 }
 0xd0c   : > { %v4748_v50 = vpop.xlane.xlu1 %4747 }
 0xd0d   : > { %v4827_v10 = vpop.f32.mrf.mxu2  ;;  %v5382_v31 = vpop.xlane.xlu0 %5381 }
 0xd0e   : > { %v13049_v14 = vmul.f32 %v9003_v19, %v4827_v10  ;;  %v13053_v6 = vpop.eup %9004  ;;  %v5401_v53 = vsub.f32 %v12925_v52, %v5382_v31 }
 0xd0f   : > { %v13051_v2 = vpop.f32.mrf.mxu0  ;;  %v9007_v54 = vpop.eup %9006 }
 0xd10   : > { %v5474_v63 = vpack.c.bf16 %v9007_v54, %v13053_v6  ;;  %v5429_v59 = vmul.f32 1.442695, %v5401_v53 }
 0xd13   : > { %v4744_v16 = vpop.xlane.xlu2 %4743 }
 0xd14   : > { %9008 = vrcp.f32 %v4744_v16  ;;  %v5384_v4 = vpop.xlane.xlu1 %5383 }
 0xd15   : > { %v4829_v27 = vpop.f32.mrf.mxu2  ;;  %v5402_v51 = vsub.f32 %v12943_v13, %v5384_v4 }
 0xd17   : > { %v5178_v62 = vpop.f32.mrf.mxu0  ;;  %v5431_v10 = vmul.f32 1.442695, %v5402_v51 }
 0xd18   : > { %5459 = vadd.xlane.f32.xlu2 %v9007_v54 }
 0xd19   : > { %5534 = vmatmul.bf16.gmra.mxu2 %v5474_v63  ;;  %v13066_v63 = vpop.xlane.xlu0 %5103 }
 0xd1a   : > { %v9009_v19 = vpop.eup %9008 }
 0xd1b   : > { %v13058_v8 = vmul.f32 %v9009_v19, %v4829_v27  ;;  %v4746_v25 = vpop.xlane.xlu2 %4745 }
 0xd1c   : > { %9010 = vrcp.f32 %v4746_v25  ;;  %v5386_v27 = vpop.xlane.xlu1 %5385 }
 0xd1d   : > { %v4832_v37 = vpop.f32.mrf.mxu2  ;;  %5449 = vadd.xlane.f32.xlu0 %v13007_v41  ;;  %9012 = vpow2.f32 %v5431_v10 }
 0xd1e   : > { %9014 = vrcp.f32 %v4748_v50  ;;  %v5403_v50 = vsub.f32 %v12958_v33, %v5386_v27  ;;  %v14433_v27 = vpack.i.bf16 %v13003_v38, %v13001_v7 }
 0xd1f   : > { %v13063_v13 = vpop.f32.mrf.mxu0  ;;  %9016 = vpow2.f32 %v5429_v59 }
 0xd20   : > { %4751 = vadd.xlane.f32.xlu2 %v12949_v60  ;;  %v5433_v10 = vmul.f32 1.442695, %v5403_v50 }
 0xd21   : > { %v5108_v19 = vpop.xlane.xlu0 %5107 }
 0xd22   : > { %v9011_v52 = vpop.eup %9010  ;;  %9018 = vrcp.f32 %v5108_v19 }
 0xd23   : > { %v13068_v4 = vmul.f32 %v9011_v52, %v4832_v37  ;;  %v5106_v31 = vpop.xlane.xlu2 %5105  ;;  %v13070_v25 = vpop.eup %9012  ;;  %9020 = vpow2.f32 %v5433_v10 }
 0xd24   : > { %v9015_v54 = vpop.eup %9014 }
 0xd25   : > { %v4834_v51 = vpop.f32.mrf.mxu2  ;;  %v13072_v53 = vpop.eup %9016 }
 0xd26   : > { %v13074_v41 = vmul.f32 %v9015_v54, %v4834_v51  ;;  %v5475_v60 = vpack.c.bf16 %v13070_v25, %v13072_v53  ;;  %v5110_v54 = vpop.xlane.xlu1 %5109 }
 0xd27   : > { %v13077_v59 = vpop.f32.mrf.mxu0 }
 0xd28   : > { %v8455_v37 = vpack.i.bf16 %v13074_v41, %v13068_v4  ;;  %5111 = vadd.xlane.f32.xlu2 %v12976_v20  ;;  %v9019_v20 = vpop.eup %9018 }
 0xd29   : > { %5539 = vmatmul.bf16.gmra.mxu2 %v5475_v60 }
 0xd2b   : > { %v5388_v52 = vpop.xlane.xlu2 %5387 }
 0xd2c   : > { %v5404_v16 = vsub.f32 %v12971_v3, %v5388_v52  ;;  %v9021_v3 = vpop.eup %9020 }
 0xd2e   : > { %v5435_v51 = vmul.f32 1.442695, %v5404_v16 }
 0xd2f   : > { %v5186_v33 = vpop.f32.mrf.mxu0 }
 0xd30   : > { %9022 = vpow2.f32 %v5435_v51  ;;  %v13095_v52 = vmul.f32 %v9019_v20, %v5186_v33  ;;  %v13104_v51 = vpop.f32.mrf.mxu2  ;;  %v14434_v33 = vpack.i.bf16 %v13024_v57, %v13022_v55  ;;  %v5440_v20 = vpop.xlane.xlu1 %5439 }
 0xd31   : > { %9024 = vrcp.f32 %v5110_v54  ;;  %8386 = vrot.lane.b32.xlu0 %v14433_v27, %s9469_s29 }
 0xd32   : > { %9026 = vrcp.f32 %v13045_v48 }
 0xd33   : > { %9028 = vrcp.f32 %v13047_v46  ;;  %5455 = vadd.xlane.f32.xlu1 %v13034_v47  ;;  %v13136_v48 = vpop.permute.xlu2 %8371 }
 0xd34   : > { %9030 = vrcp.f32 %v12879_v58  ;;  %v14436_v58 = vpack.i.bf16 %v13058_v8, %v13049_v14 }
 0xd35   : > { %9032 = vrcp.f32 %v5106_v31 }
 0xd36   : > { %v13092_v50 = vpop.eup %9022  ;;  %9034 = vrcp.f32 %v13066_v63 }
 0xd37   : > { %v9025_v16 = vpop.eup %9024  ;;  %v5188_v60 = vpop.f32.mrf.mxu0  ;;  %v5476_v19 = vpack.c.bf16 %v13092_v50, %v9021_v3 }
 0xd38   : > { %v9027_v10 = vpop.eup %9026  ;;  %v13097_v54 = vmul.f32 %v9025_v16, %v5188_v60  ;;  %v13106_v27 = vpop.f32.mrf.mxu2 }
 0xd39   : > { %v9029_v7 = vpop.eup %9028  ;;  %5544 = vmatmul.bf16.gmra.mxu2 %v5476_v19  ;;  %v5221_v38 = vmul.f32 %v9027_v10, %v5178_v62  ;;  %v14435_v19 = vpack.i.bf16 %v13015_v61, %v13010_v22  ;;  %v5438_v10 = vpop.xlane.xlu0 %5437 }
 0xd3a   : > { %v5220_v47 = vmul.f32 %v9029_v7, %v13051_v2  ;;  %v9031_v57 = vpop.eup %9030 }
 0xd3b   : > { %4749 = vadd.xlane.f32.xlu1 %v12953_v44  ;;  %v5444_v44 = vpop.xlane.xlu1 %5443  ;;  %v9033_v61 = vpop.eup %9032 }
 0xd3c   : > { %v8415_v46 = vpack.i.bf16 %v5221_v38, %v5220_v47  ;;  %v5223_v31 = vmul.f32 %v9033_v61, %v13077_v59 }
 0xd40   : > { %8416 = vrot.lane.b32.xlu2 %v8415_v46, %s9469_s29  ;;  %v5510_v62 = vpop.f32.mrf.mxu2 }
 0xd41   : > { %v5442_v38 = vpop.xlane.xlu0 %5441 }
 0xd43   : > { %v5448_v2 = vpop.xlane.xlu1 %5447 }
 0xd44   : > { %9036 = vrcp.f32 %v5448_v2 }
 0xd48   : > { %v5512_v16 = vpop.f32.mrf.mxu2 }
 0xd50   : > { %v5515_v60 = vpop.f32.mrf.mxu2 }
 0xd54   : > { %8411 = vrot.lane.b32.xlu1 %v14434_v33, %s9473_s26  ;;  %v5446_v33 = vpop.xlane.xlu0 %5445 }
 0xd55   : > { %9038 = vrcp.f32 %v5446_v33 }
 0xd56   : > { %9040 = vrcp.f32 %v5440_v20 }
 0xd57   : > { %9042 = vrcp.f32 %v5438_v10 }
 0xd58   : > { %v5517_v55 = vpop.f32.mrf.mxu2  ;;  %9044 = vrcp.f32 %v5444_v44 }
 0xd59   : > { %9046 = vrcp.f32 %v5442_v38 }
 0xd5b   : > { %5453 = vadd.xlane.f32.xlu0 %v13031_v24 }
 0xd63   : > { %v13117_v7 = vpop.xlane.xlu1 %5451 }
 0xd64   : > { %v5520_v46 = vpop.f32.mrf.mxu2 }
 0xd69   : > { %5465 = vadd.xlane.f32.xlu2 %v9021_v3  ;;  %v4484_v3 = vmul.f32 %v9031_v57, %v12900_v11  ;;  %v9035_v11 = vpop.eup %9034 }
 0xd6c   : > { %v5522_v57 = vpop.f32.mrf.mxu2 }
 0xd6f   : > { %8396 = vrot.lane.b32.xlu0 %v14435_v19, %s9469_s29  ;;  %v5222_v19 = vmul.f32 %v9035_v11, %v13063_v13 }
 0xd71   : > { %v8435_v63 = vpack.i.bf16 %v5223_v31, %v5222_v19  ;;  %v13139_v31 = vpop.permute.xlu2 %8381 }
 0xd79   : > { %v13143_v19 = vpop.permute.xlu2 %8401 }
 0xd7b   : > { %v13120_v24 = vpop.permute.xlu1 %8391 }
 0xd7c   : > { %v8393_v47 = vunpack.i.l.bf16 %v13120_v24 }
 0xd7e   : > { %v13126_v22 = vsel %vm1735_vm9, %v4484_v3, %v8393_v47  ;;  %5463 = vadd.xlane.f32.xlu1 %v13070_v25  ;;  %v9037_v3 = vpop.eup %9036 }
 0xd7f   : > { %v5571_v25 = vmul.f32 %v9037_v3, %v5522_v57  ;;  %v9039_v47 = vpop.eup %9038 }
 0xd80   : > { %v5570_v14 = vmul.f32 %v9039_v47, %v5520_v46  ;;  %v9041_v59 = vpop.eup %9040 }
 0xd81   : > { %8431 = vrot.lane.b32.xlu2 %v14436_v58, %s9473_s26  ;;  %v5567_v61 = vmul.f32 %v9041_v59, %v5512_v16  ;;  %v9043_v2 = vpop.eup %9042  ;;  %v5525_v59 = vpop.f32.mrf.mxu2 }
 0xd82   : > { %v8440_v8 = vpack.i.bf16 %v5571_v25, %v5570_v14  ;;  %v5566_v13 = vmul.f32 %v9043_v2, %v5510_v62  ;;  %v9045_v20 = vpop.eup %9044  ;;  %v14437_v62 = vpack.i.bf16 %v13040_v0, %v13028_v43  ;;  %v13166_v0 = vpop.permute.xlu0 %8376  ;;  %v8065_v14 = vld [vmem:[#allocation10 + $0x28] sm:$0xff]  ;;  %v8064_v2 = vld [vmem:[#allocation10 + $0x20] sm:$0xff] }
 0xd83   : > { %v5569_v33 = vmul.f32 %v9045_v20, %v5517_v55  ;;  %v9047_v10 = vpop.eup %9046  ;;  %v8067_v55 = vld [vmem:[#allocation10 + $0x38] sm:$0xff] }
 0xd84   : > { %v8420_v58 = vpack.i.bf16 %v5567_v61, %v5566_v13  ;;  %v5568_v46 = vmul.f32 %v9047_v10, %v5515_v60  ;;  %5895 = vmatpush.bf16.msra.mxu3 %v8067_v55 }
 0xd86   : > { %v8425_v11 = vpack.i.bf16 %v5569_v33, %v5568_v46  ;;  %v8062_v46 = vld [vmem:[#allocation10 + $0x10] sm:$0xff] }
 0xd89   : > { %8436 = vrot.lane.b32.xlu2 %v8435_v63, %s9469_s29  ;;  %v8066_v63 = vld [vmem:[#allocation10 + $0x30] sm:$0xff]  ;;  %v5527_v13 = vpop.f32.mrf.mxu2 }
 0xd8a   : > { %5896 = vmatpush.bf16.msra.mxu3 %v8066_v63  ;;  %v8060_v63 = vld [vmem:[#allocation10] sm:$0xff] }
 0xd8b   : > { %v13146_v16 = vpop.xlane.xlu2 %5459 }
 0xd8e   : > { %5897 = vmatpush.bf16.msra.mxu3 %v8065_v14 }
 0xd91   : > { %8441 = vrot.lane.b32.xlu2 %v8440_v8, %s9472_s17  ;;  %v5450_v8 = vpop.xlane.xlu0 %5449 }
 0xd92   : > { %9048 = vrcp.f32 %v5450_v8  ;;  %5898 = vmatpush.bf16.msra.mxu3 %v8064_v2 }
 0xd93   : > { %v13152_v44 = vpop.xlane.xlu2 %4751  ;;  %9050 = vrcp.f32 %v13117_v7 }
 0xd94   : > { %9052 = vrcp.f32 %v12889_v49 }
 0xd97   : > { %8421 = vrot.lane.b32.xlu1 %v8420_v58, %s9472_s17  ;;  %v8063_v58 = vld [vmem:[#allocation10 + $0x18] sm:$0xff] }
 0xd98   : > { %v9049_v61 = vpop.eup %9048  ;;  %5899 = vmatpush.bf16.msra.mxu3 %v8063_v58 }
 0xd99   : > { %5457 = vadd.xlane.f32.xlu0 %v13053_v6 }
 0xd9b   : > { %v13157_v6 = vpop.xlane.xlu2 %5111 }
 0xd9c   : > { %5900 = vmatpush.bf16.msra.mxu3 %v8062_v46 }
 0xd9f   : > { %8426 = vrot.lane.b32.xlu1 %v8425_v11, %s9472_s17 }
 0xda3   : > { %v13161_v57 = vpop.permute.xlu2 %8416  ;;  %v13179_v10 = vpop.permute.xlu0 %8386 }
 0xda4   : > { %v8418_v25 = vunpack.i.l.bf16 %v13161_v57 }
 0xda6   : > { %v13154_v38 = vpop.xlane.xlu1 %5455 }
 0xdad   : > { %8406 = vrot.lane.b32.xlu0 %v14437_v62, %s9469_s29 }
 0xdae   : > { %v13159_v60 = vpop.xlane.xlu1 %4749 }
 0xdba   : > { %4399 = vadd.xlane.f32.xlu2 %v12828_v56 }
 0xdc6   : > { %v13163_v3 = vpop.permute.xlu1 %8411 }
 0xdc7   : > { %v8413_v43 = vunpack.i.l.bf16 %v13163_v3 }
 0xdc9   : > { %v5782_v47 = vsel %vm1735_vm9, %v12928_v5, %v8413_v43  ;;  %4395 = vadd.xlane.f32.xlu1 %v12804_v9  ;;  %v5572_v5 = vmul.f32 %v9049_v61, %v5525_v59  ;;  %v9051_v9 = vpop.eup %9050  ;;  %v5530_v59 = vpop.f32.mrf.mxu2 }
 0xdca   : > { %v13173_v56 = vsel %vm561_vm0, %v5782_v47, %v8418_v25  ;;  %v5573_v33 = vmul.f32 %v9051_v9, %v5527_v13  ;;  %v9053_v25 = vpop.eup %9052 }
 0xdcb   : > { %v4485_v8 = vmul.f32 %v9053_v25, %v12906_v45 }
 0xdcc   : > { %v8445_v11 = vpack.i.bf16 %v5573_v33, %v5572_v5 }
 0xdce   : > { %v5454_v62 = vpop.xlane.xlu0 %5453 }
 0xdcf   : > { %9054 = vrcp.f32 %v5454_v62  ;;  %v8379_v62 = vunpack.i.h.bf16 %v13166_v0 }
 0xdd0   : > { %9056 = vrcp.f32 %v13154_v38 }
 0xdd1   : > { %v5532_v5 = vpop.f32.mrf.mxu2  ;;  %9058 = vrcp.f32 %v12808_v35 }
 0xdd2   : > { %9060 = vrcp.f32 %v12859_v32 }
 0xdd3   : > { %9062 = vrcp.f32 %v13146_v16 }
 0xdd7   : > { %5461 = vadd.xlane.f32.xlu0 %v13072_v53  ;;  %v8061_v53 = vld [vmem:[#allocation10 + $0x8] sm:$0xff] }
 0xdd8   : > { %5901 = vmatpush.bf16.msra.mxu3 %v8061_v53  ;;  %v8373_v53 = vunpack.i.l.bf16 %v13136_v48 }
 0xdd9   : > { %v5535_v38 = vpop.f32.mrf.mxu2 }
 0xddc   : > { %v13177_v20 = vpop.xlane.xlu2 %5465  ;;  %5902 = vmatpush.bf16.msra.mxu3 %v8060_v63 }
 0xddf   : > { %4393 = vadd.xlane.f32.xlu0 %v12782_v18  ;;  %v8394_v18 = vunpack.i.h.bf16 %v13120_v24 }
 0xde1   : > { %v8397_v43 = vpop.permute.xlu0 %8396 }
 0xde2   : > { %8446 = vrot.lane.b32.xlu1 %v8445_v11, %s9472_s17  ;;  %v8399_v47 = vunpack.i.h.bf16 %v8397_v43  ;;  %v8398_v14 = vunpack.i.l.bf16 %v8397_v43  ;;  %v8374_v11 = vunpack.i.h.bf16 %v13136_v48  ;;  %v8378_v43 = vunpack.i.l.bf16 %v13166_v0 }
 0xde4   : > { %v13183_v7 = vpop.permute.xlu2 %8431  ;;  %v5794_v13 = vsel %vm561_vm0, %v13126_v22, %v8398_v14 }
 0xde7   : > { %5113 = vadd.xlane.f32.xlu0 %v12980_v15  ;;  %v5779_v15 = vsel %vm1735_vm9, %v4485_v8, %v8394_v18 }
 0xde8   : > { %v5795_v58 = vsel %vm561_vm0, %v5779_v15, %v8399_v47 }
 0xdec   : > { %v13187_v55 = vpop.permute.xlu2 %8436 }
 0xdef   : > { %5467 = vadd.xlane.f32.xlu0 %v13092_v50 }
 0xdf1   : > { %v13208_v22 = vpop.xlane.xlu1 %5463 }
 0xdf4   : > { %v8442_v61 = vpop.permute.xlu2 %8441 }
 0xdf5   : > { %v8444_v2 = vunpack.i.h.bf16 %v8442_v61  ;;  %v8443_v49 = vunpack.i.l.bf16 %v8442_v61 }
 0xdf7   : > { %4397 = vadd.xlane.f32.xlu0 %v12802_v28  ;;  %v13198_v50 = vsel %vm3344_vm10, %v5794_v13, %v8443_v49  ;;  %v13201_v24 = vsel %vm3344_vm10, %v5795_v58, %v8444_v2  ;;  %v9055_v28 = vpop.eup %9054  ;;  %v5537_v49 = vpop.f32.mrf.mxu2 }
 0xdf8   : > { %v5840_v45 = vpack.c.bf16 %v13201_v24, %v13198_v50  ;;  %v9057_v9 = vpop.eup %9056  ;;  %v5574_v33 = vmul.f32 %v9055_v28, %v5530_v59  ;;  %v8383_v28 = vunpack.i.l.bf16 %v13139_v31  ;;  %v14439_v24 = vld [vmem:[#allocation24_spill] sm:$0xff] }
 0xdf9   : > { %v9059_v46 = vpop.eup %9058  ;;  %v5575_v18 = vmul.f32 %v9057_v9, %v5532_v5 }
 0xdfa   : > { %v9061_v63 = vpop.eup %9060  ;;  %v4480_v35 = vmul.f32 %v9059_v46, %v12866_v12  ;;  %v8389_v46 = vunpack.i.h.bf16 %v13179_v10 }
 0xdfb   : > { %v4481_v32 = vmul.f32 %v9061_v63, %v12873_v30  ;;  %v8450_v47 = vpack.i.bf16 %v5575_v18, %v5574_v33  ;;  %v9063_v13 = vpop.eup %9062  ;;  %v14438_v18 = vpack.i.bf16 %v13097_v54, %v13095_v52  ;;  %v8433_v52 = vunpack.i.l.bf16 %v13183_v7 }
 0xdfc   : > { %v5774_v8 = vsel %vm1735_vm9, %v4480_v35, %v8373_v53  ;;  %v5577_v9 = vmul.f32 %v9063_v13, %v5537_v49 }
 0xdfd   : > { %v5775_v14 = vsel %vm1735_vm9, %v4481_v32, %v8374_v11  ;;  %v5790_v15 = vsel %vm561_vm0, %v5774_v8, %v8378_v43  ;;  %v8388_v11 = vunpack.i.l.bf16 %v13179_v10 }
 0xdfe   : > { %v5791_v48 = vsel %vm561_vm0, %v5775_v14, %v8379_v62 }
 0xdff   : > { %v5540_v8 = vpop.f32.mrf.mxu2 }
 0xe09   : > { %v8422_v25 = vpop.permute.xlu1 %8421 }
 0xe0a   : > { %v8424_v59 = vunpack.i.h.bf16 %v8422_v25  ;;  %v8423_v61 = vunpack.i.l.bf16 %v8422_v25 }
 0xe0b   : > { %8451 = vrot.lane.b32.xlu0 %v8450_v47, %s9472_s17 }
 0xe0c   : > { %v5807_v12 = vsel %vm3344_vm10, %v5791_v48, %v8424_v59  ;;  %v5806_v30 = vsel %vm3344_vm10, %v5790_v15, %v8423_v61  ;;  %4401 = vadd.xlane.f32.xlu1 %v12826_v40  ;;  %v5458_v0 = vpop.xlane.xlu0 %5457  ;;  %v8384_v40 = vunpack.i.h.bf16 %v13139_v31  ;;  %v8404_v61 = vunpack.i.h.bf16 %v13143_v19  ;;  %v5542_v48 = vpop.f32.mrf.mxu2 }
 0xe0d   : > { %v5838_v2 = vpack.c.bf16 %v5807_v12, %v5806_v30  ;;  %9064 = vrcp.f32 %v5458_v0 }
 0xe0e   : > { %9066 = vrcp.f32 %v12863_v29 }
 0xe0f   : > { %9068 = vrcp.f32 %v12881_v34  ;;  %5903 = vmatmul.bf16.vlgmr.msra.gmra.mxu3 %v5838_v2 }
 0xe10   : > { %9070 = vrcp.f32 %v13159_v60 }
 0xe11   : > { %v8427_v5 = vpop.permute.xlu1 %8426  ;;  %9072 = vrcp.f32 %v13152_v44 }
 0xe12   : > { %v8429_v63 = vunpack.i.h.bf16 %v8427_v5  ;;  %v8428_v62 = vunpack.i.l.bf16 %v8427_v5 }
 0xe13   : > { %v9065_v58 = vpop.eup %9064  ;;  %8456 = vrot.lane.b32.xlu0 %v8455_v37, %s9473_s26 }
 0xe14   : > { %v9067_v16 = vpop.eup %9066  ;;  %v5576_v33 = vmul.f32 %v9065_v58, %v5535_v38 }
 0xe15   : > { %v9069_v29 = vpop.eup %9068  ;;  %v4482_v34 = vmul.f32 %v9067_v16, %v12883_v17 }
 0xe16   : > { %v4483_v53 = vmul.f32 %v9069_v29, %v12893_v26  ;;  %v8465_v4 = vpack.i.bf16 %v5577_v9, %v5576_v33  ;;  %v9071_v26 = vpop.eup %9070  ;;  %v5191_v33 = vpop.f32.mrf.mxu0 }
 0xe17   : > { %v5776_v37 = vsel %vm1735_vm9, %v4482_v34, %v8383_v28  ;;  %v9073_v35 = vpop.eup %9072  ;;  %v4872_v32 = vmul.f32 %v9071_v26, %v13104_v51  ;;  %v8438_v51 = vunpack.i.l.bf16 %v13187_v55 }
 0xe18   : > { %v5777_v41 = vsel %vm1735_vm9, %v4483_v53, %v8384_v40  ;;  %8466 = vrot.lane.b32.xlu2 %v8465_v4, %s9472_s17  ;;  %v5792_v43 = vsel %vm561_vm0, %v5776_v37, %v8388_v11  ;;  %v4873_v25 = vmul.f32 %v9073_v35, %v13106_v27  ;;  %v8414_v11 = vunpack.i.h.bf16 %v13163_v3  ;;  %v5545_v37 = vpop.f32.mrf.mxu2 }
 0xe19   : > { %v5793_v31 = vsel %vm561_vm0, %v5777_v41, %v8389_v46  ;;  %v5808_v17 = vsel %vm3344_vm10, %v5792_v43, %v8428_v62 }
 0xe1a   : > { %v5809_v38 = vsel %vm3344_vm10, %v5793_v31, %v8429_v63  ;;  %v8475_v47 = vpack.i.bf16 %v4873_v25, %v4872_v32  ;;  %v8419_v63 = vunpack.i.h.bf16 %v13161_v57 }
 0xe1b   : > { %v5839_v10 = vpack.c.bf16 %v5809_v38, %v5808_v17 }
 0xe1e   : > { %v5193_v43 = vpop.f32.mrf.mxu0 }
 0xe1f   : > { %5908 = vmatmul.bf16.gmra.mxu3 %v5839_v10  ;;  %v8407_v44 = vpop.permute.xlu0 %8406 }
 0xe20   : > { %v8409_v30 = vunpack.i.h.bf16 %v8407_v44  ;;  %v8408_v0 = vunpack.i.l.bf16 %v8407_v44  ;;  %v5547_v10 = vpop.f32.mrf.mxu2 }
 0xe25   : > { %8461 = vrot.lane.b32.xlu1 %v14438_v18, %s9469_s29 }
 0xe2d   : > { %8476 = vrot.lane.b32.xlu1 %v8475_v47, %s9473_s26  ;;  %v4400_v18 = vpop.xlane.xlu2 %4399 }
 0xe2f   : > { %5913 = vmatmul.bf16.gmra.mxu3 %v5840_v45 }
 0xe3c   : > { %v4396_v60 = vpop.xlane.xlu1 %4395 }
 0xe3d   : > { %9074 = vrcp.f32 %v4396_v60 }
 0xe3e   : > { %9076 = vrcp.f32 %v13208_v22 }
 0xe41   : > { %4403 = vadd.xlane.f32.xlu2 %v12851_v21 }
 0xe43   : > { %v9075_v14 = vpop.eup %9074 }
 0xe44   : > { %v4490_v54 = vmul.f32 %v9075_v14, %v12938_v1  ;;  %v9077_v21 = vpop.eup %9076  ;;  %v8403_v1 = vunpack.i.l.bf16 %v13143_v19  ;;  %v8439_v14 = vunpack.i.h.bf16 %v13187_v55 }
 0xe45   : > { %v5579_v12 = vmul.f32 %v9077_v21, %v5542_v48  ;;  %v13298_v48 = vld [vmem:[#allocation5] sm:$0xff] }
 0xe46   : > { %v5784_v27 = vsel %vm1735_vm9, %v4490_v54, %v8433_v52  ;;  %v5780_v16 = vsel %vm1735_vm9, %v12914_v42, %v8403_v1 }
 0xe47   : > { %v13262_v59 = vsel %vm561_vm0, %v5784_v27, %v8438_v51  ;;  %v5796_v9 = vsel %vm561_vm0, %v5780_v16, %v8408_v0 }
 0xe4a   : > { %v5462_v50 = vpop.xlane.xlu0 %5461 }
 0xe4b   : > { %9078 = vrcp.f32 %v5462_v50 }
 0xe4c   : > { %9080 = vrcp.f32 %v14439_v24 }
 0xe51   : > { %v9079_v45 = vpop.eup %9078 }
 0xe52   : > { %v9081_v15 = vpop.eup %9080  ;;  %v5578_v2 = vmul.f32 %v9079_v45, %v5540_v8  ;;  %v4394_v49 = vpop.xlane.xlu0 %4393 }
 0xe53   : > { %v4487_v13 = vmul.f32 %v9081_v15, %v12919_v23  ;;  %9082 = vrcp.f32 %v4394_v49  ;;  %v13301_v15 = vperm.slane %v13298_v48, 5  ;;  %v14442_v49 = vld [vmem:[#allocation43_spill] sm:$0xff] }
 0xe54   : > { %v8447_v22 = vpop.permute.xlu1 %8446  ;;  %v8470_v58 = vpack.i.bf16 %v5579_v12, %v5578_v2  ;;  %9084 = vrcp.f32 %v13157_v6 }
 0xe55   : > { %v5781_v5 = vsel %vm1735_vm9, %v4487_v13, %v8404_v61  ;;  %v8449_v40 = vunpack.i.h.bf16 %v8447_v22  ;;  %v8448_v28 = vunpack.i.l.bf16 %v8447_v22  ;;  %v14440_v61 = vld [vmem:[#allocation30_spill] sm:$0xff] }
 0xe56   : > { %v5797_v19 = vsel %vm561_vm0, %v5781_v5, %v8409_v30  ;;  %8471 = vrot.lane.b32.xlu0 %v8470_v58, %s9472_s17  ;;  %v14441_v30 = vld [vmem:[#allocation45_spill] sm:$0xff]  ;;  %v14443_v5 = vld [vmem:[#allocation46_spill] sm:$0xff] }
 0xe57   : > { %v5812_v29 = vsel %vm3344_vm10, %v5796_v9, %v8448_v28  ;;  %v5813_v23 = vsel %vm3344_vm10, %v5797_v19, %v8449_v40  ;;  %v14444_v19 = vld [vmem:[#allocation44_spill] sm:$0xff] }
 0xe58   : > { %v5841_v34 = vpack.c.bf16 %v5813_v23, %v5812_v29  ;;  %v14445_v23 = vld [vmem:[#allocation48_spill] sm:$0xff] }
 0xe59   : > { %v9083_v46 = vpop.eup %9082 }
 0xe5a   : > { %v4489_v42 = vmul.f32 %v9083_v46, %v12932_v39  ;;  %5918 = vmatmul.bf16.gmra.mxu3 %v5841_v34  ;;  %v5114_v53 = vpop.xlane.xlu0 %5113  ;;  %v9085_v41 = vpop.eup %9084 }
 0xe5b   : > { %9086 = vrcp.f32 %v5114_v53  ;;  %v5226_v6 = vmul.f32 %v9085_v41, %v5191_v33  ;;  %v14446_v53 = vld [vmem:[#allocation47_spill] sm:$0xff] }
 0xe5c   : > { %v5783_v62 = vsel %vm1735_vm9, %v4489_v42, %v8414_v11  ;;  %9088 = vrcp.f32 %v13177_v20  ;;  %v8434_v20 = vunpack.i.h.bf16 %v13183_v7 }
 0xe5d   : > { %v5799_v4 = vsel %vm561_vm0, %v5783_v62, %v8419_v63 }
 0xe61   : > { %v9087_v31 = vpop.eup %9086 }
 0xe62   : > { %v5227_v17 = vmul.f32 %v9087_v31, %v5193_v43  ;;  %v5468_v3 = vpop.xlane.xlu0 %5467  ;;  %v9089_v38 = vpop.eup %9088  ;;  %v14447_v31 = vld [vmem:[#allocation25_spill] sm:$0xff] }
 0xe63   : > { %9090 = vrcp.f32 %v5468_v3  ;;  %v5580_v26 = vmul.f32 %v9089_v38, %v5545_v37  ;;  %v14448_v38 = vld [vmem:[#allocation32_spill] sm:$0xff] }
 0xe64   : > { %v8480_v39 = vpack.i.bf16 %v5227_v17, %v5226_v6 }
 0xe66   : > { %8481 = vrot.lane.b32.xlu2 %v8480_v39, %s9469_s29  ;;  %s7329_s29 = sshll.u32 %s7326_s30, 4  ;;  %s7330_s29 = int_to_ptr.hbm [resolvable:$true] %s7329_s29 }
 0xe69   : > { %v9091_v57 = vpop.eup %9090 }
 0xe6a   : > { %v5581_v35 = vmul.f32 %v9091_v57, %v5547_v10  ;;  %v4398_v32 = vpop.xlane.xlu0 %4397 }
 0xe6b   : > { %9092 = vrcp.f32 %v4398_v32 }
 0xe6c   : > { %v8485_v25 = vpack.i.bf16 %v5581_v35, %v5580_v26 }
 0xe6e   : > { %8486 = vrot.lane.b32.xlu1 %v8485_v25, %s9472_s17  ;;  %s9395_s17 = sshra.s32 %s7330_s29, 4  ;;  %s9396_s17 = int_to_ptr.hbm [resolvable:$true] %s9395_s17 }
 0xe6f   : > { %s9397_s26 = scalar_lea.hbm %s9396_s17, 128  ;;  %p9402_p3 = scmp.lt.s32.totalorder %s9396_s17, %s14237_s12 }
 0xe70   : > { %p9398_p0 = scmp.ne.s32.totalorder %s9396_s17, %s9397_s26  ;;  %p9403_p4 = scmp.lt.s32.totalorder %s9401_s18, %s9397_s26 }
 0xe71   : > { %v9093_v47 = vpop.eup %9092 }
 0xe72   : > { %v4491_v60 = vmul.f32 %v9093_v47, %v12946_v36  ;;  %v8467_v44 = vpop.permute.xlu2 %8466  ;;  %p9399_p1 = pnand %p9398_p0, %p9579_p5  ;;  %p9404_p7 = por %p9403_p4, %p9402_p3 }
 0xe73   : > { %v8469_v52 = vunpack.i.h.bf16 %v8467_v44  ;;  %v8468_v54 = vunpack.i.l.bf16 %v8467_v44 }
 0xe74   : > { %v5785_v51 = vsel %vm1735_vm9, %v4491_v60, %v8434_v20  ;;  %p9400_p2 = pneg %p9399_p1 }
 0xe75   : > { %v5801_v27 = vsel %vm561_vm0, %v5785_v51, %v8439_v14  ;;  %v5816_v8 = vsel %vm3344_vm10, %v13262_v59, %v8468_v54  ;;  %v14449_v54 = vld [vmem:[#allocation33_spill] sm:$0xff] }
 0xe76   : > { %v5817_v50 = vsel %vm3344_vm10, %v5801_v27, %v8469_v52  ;;  %p9405_p8 = pnand %p9404_p7, %p9400_p2 }
 0xe77   : > { %v5843_v24 = vpack.c.bf16 %v5817_v50, %v5816_v8 }
 0xe7d   : > { %v8452_v21 = vpop.permute.xlu0 %8451 }
 0xe7e   : > { %v8454_v45 = vunpack.i.h.bf16 %v8452_v21  ;;  %v8453_v7 = vunpack.i.l.bf16 %v8452_v21 }
 0xe7f   : > { %v4402_v46 = vpop.xlane.xlu1 %4401 }
 0xe80   : > { %4405 = vadd.xlane.f32.xlu0 %v14440_v61  ;;  %v5814_v36 = vsel %vm3344_vm10, %v13173_v56, %v8453_v7  ;;  %v5815_v55 = vsel %vm3344_vm10, %v5799_v4, %v8454_v45  ;;  %9094 = vrcp.f32 %v4402_v46  ;;  %v14450_v7 = vld [vmem:[#allocation27_spill] sm:$0xff]  ;;  %v14452_v46 = vld [vmem:[#allocation38_spill] sm:$0xff] }
 0xe81   : > { %v5842_v1 = vpack.c.bf16 %v5815_v55, %v5814_v36  ;;  %9096 = vrcp.f32 %v4400_v18 }
 0xe83   : > { %5923 = vmatmul.bf16.gmra.mxu3 %v5842_v1 }
 0xe85   : > { %v8457_v62 = vpop.permute.xlu0 %8456 }
 0xe86   : > { %v9095_v4 = vpop.eup %9094  ;;  %v8459_v6 = vunpack.i.h.bf16 %v8457_v62  ;;  %v8458_v17 = vunpack.i.l.bf16 %v8457_v62 }
 0xe87   : > { %v9097_v37 = vpop.eup %9096  ;;  %v4493_v43 = vmul.f32 %v9095_v4, %v14447_v31 }
 0xe88   : > { %v4492_v57 = vmul.f32 %v9097_v37, %v14448_v38 }
 0xe89   : > { %v5787_v35 = vsel %vm1735_vm9, %v4493_v43, %v8459_v6  ;;  %v14453_v6 = vld [vmem:[#allocation26_spill] sm:$0xff] }
 0xe8a   : > { %v5786_v26 = vsel %vm1735_vm9, %v4492_v57, %v8458_v17 }
 0xe92   : > { %v5904_v59 = vpop.f32.mrf.mxu3 }
 0xe93   : > { %v5905_v12 = vadd.f32 %v5904_v59, %v13301_v15  ;;  %5928 = vmatmul.bf16.gmra.mxu3 %v5843_v24 }
 0xe95   : > { %v13305_v0 = vadd.f32 %v5905_v12, %v14441_v30  ;;  %v14451_v30 = vld [vmem:[#allocation29_spill] sm:$0xff] }
 0xe97   : > { %v8462_v41 = vpop.permute.xlu1 %8461 }
 0xe98   : > { %5960 = vadd.xlane.f32.xlu1 %v13305_v0  ;;  %v8464_v3 = vunpack.i.h.bf16 %v8462_v41  ;;  %v8463_v39 = vunpack.i.l.bf16 %v8462_v41 }
 0xe9a   : > { %v5906_v2 = vpop.f32.mrf.mxu3  ;;  %v5803_v25 = vsel %vm561_vm0, %v5787_v35, %v8464_v3  ;;  %v5802_v47 = vsel %vm561_vm0, %v5786_v26, %v8463_v39  ;;  %v14454_v35 = vld [vmem:[#allocation50_spill] sm:$0xff] }
 0xe9b   : > { %v5907_v56 = vadd.f32 %v5906_v2, %v13301_v15 }
 0xe9d   : > { %v13310_v13 = vadd.f32 %v5907_v56, %v14442_v49 }
 0xe9f   : > { %5962 = vadd.xlane.f32.xlu2 %v13310_v13  ;;  %v8477_v8 = vpop.permute.xlu1 %8476 }
 0xea0   : > { %v8479_v1 = vunpack.i.h.bf16 %v8477_v8  ;;  %v8478_v59 = vunpack.i.l.bf16 %v8477_v8 }
 0xea2   : > { %v5909_v22 = vpop.f32.mrf.mxu3 }
 0xea3   : > { %v5910_v58 = vadd.f32 %v5909_v22, %v13301_v15 }
 0xea5   : > { %v13315_v16 = vadd.f32 %v5910_v58, %v14443_v5 }
 0xea7   : > { %5964 = vadd.xlane.f32.xlu0 %v13315_v16 }
 0xeaa   : > { %v5911_v40 = vpop.f32.mrf.mxu3 }
 0xeab   : > { %v5912_v28 = vadd.f32 %v5911_v40, %v13301_v15 }
 0xead   : > { %v13320_v9 = vadd.f32 %v5912_v28, %v14444_v19 }
 0xeaf   : > { %5966 = vadd.xlane.f32.xlu0 %v13320_v9 }
 0xeb2   : > { %v5914_v33 = vpop.f32.mrf.mxu3 }
 0xeb3   : > { %v5915_v29 = vadd.f32 %v5914_v33, %v13301_v15 }
 0xeb4   : > { %v4404_v27 = vpop.xlane.xlu2 %4403 }
 0xeb5   : > { %v13325_v34 = vadd.f32 %v5915_v29, %v14445_v23  ;;  %9098 = vrcp.f32 %v4404_v27 }
 0xeb7   : > { %5968 = vadd.xlane.f32.xlu0 %v13325_v34 }
 0xeba   : > { %v5916_v11 = vpop.f32.mrf.mxu3 }
 0xebb   : > { %v5917_v42 = vadd.f32 %v5916_v11, %v13301_v15  ;;  %v9099_v24 = vpop.eup %9098 }
 0xebc   : > { %v4494_v61 = vmul.f32 %v9099_v24, %v14450_v7  ;;  %v14456_v24 = vld [vmem:[#allocation31_spill] sm:$0xff] }
 0xebd   : > { %v13330_v63 = vadd.f32 %v5917_v42, %v14446_v53 }
 0xebe   : > { %v5788_v49 = vsel %vm1735_vm9, %v4494_v61, %v8478_v59  ;;  %v14457_v59 = vld [vmem:[#allocation35_spill] sm:$0xff] }
 0xebf   : > { %5970 = vadd.xlane.f32.xlu1 %v13330_v63 }
 0xec0   : > { %v8482_v21 = vpop.permute.xlu2 %8481 }
 0xec1   : > { %v8483_v55 = vunpack.i.l.bf16 %v8482_v21  ;;  %v8484_v56 = vunpack.i.h.bf16 %v8482_v21 }
 0xec3   : > { %v5804_v5 = vsel %vm561_vm0, %v5788_v49, %v8483_v55  ;;  %v14458_v49 = vld [vmem:[#allocation52_spill] sm:$0xff] }
 0xec8   : > { %v8472_v10 = vpop.permute.xlu0 %8471 }
 0xec9   : > { %v8474_v18 = vunpack.i.h.bf16 %v8472_v10  ;;  %v8473_v32 = vunpack.i.l.bf16 %v8472_v10 }
 0xecb   : > { %v5818_v20 = vsel %vm3344_vm10, %v5802_v47, %v8473_v32  ;;  %v5819_v60 = vsel %vm3344_vm10, %v5803_v25, %v8474_v18 }
 0xecc   : > { %v5844_v44 = vpack.c.bf16 %v5819_v60, %v5818_v20 }
 0xece   : > { %5933 = vmatmul.bf16.gmra.mxu3 %v5844_v44  ;;  %v14455_v44 = vld [vmem:[#allocation49_spill] sm:$0xff] }
 0xedd   : > { %v5919_v14 = vpop.f32.mrf.mxu3 }
 0xede   : > { %v5920_v52 = vadd.f32 %v5919_v14, %v13301_v15 }
 0xee0   : > { %v13343_v51 = vadd.f32 %v5920_v52, %v14449_v54  ;;  %v8487_v45 = vpop.permute.xlu1 %8486 }
 0xee1   : > { %v8488_v12 = vunpack.i.l.bf16 %v8487_v45  ;;  %v8489_v22 = vunpack.i.h.bf16 %v8487_v45 }
 0xee2   : > { %5972 = vadd.xlane.f32.xlu2 %v13343_v51 }
 0xee3   : > { %v5820_v28 = vsel %vm3344_vm10, %v5804_v5, %v8488_v12 }
 0xee5   : > { %v5921_v29 = vpop.f32.mrf.mxu3 }
 0xee6   : > { %v5922_v37 = vadd.f32 %v5921_v29, %v13301_v15  ;;  %v14459_v29 = vld [vmem:[#allocation51_spill] sm:$0xff] }
 0xee8   : > { %v13368_v17 = vadd.f32 %v5922_v37, %v14453_v6  ;;  %v7927_v37 = vld [vmem:[%s14235_s10 + $0xe8] sm:$0xf] }
 0xef3   : > { %v4406_v50 = vpop.xlane.xlu0 %4405 }
 0xef4   : > { %9100 = vrcp.f32 %v4406_v50 }
 0xefa   : > { %v9101_v36 = vpop.eup %9100 }
 0xefb   : > { %v4495_v2 = vmul.f32 %v9101_v36, %v14451_v30 }
 0xefd   : > { %v5789_v58 = vsel %vm1735_vm9, %v4495_v2, %v8479_v1 }
 0xefe   : > { %v5805_v40 = vsel %vm561_vm0, %v5789_v58, %v8484_v56 }
 0xeff   : > { %v5821_v19 = vsel %vm3344_vm10, %v5805_v40, %v8489_v22 }
 0xf00   : > { %v5845_v33 = vpack.c.bf16 %v5821_v19, %v5820_v28 }
 0xf02   : > { %5938 = vmatmul.bf16.gmra.mxu3 %v5845_v33 }
 0xf06   : > { %v5924_v62 = vpop.f32.mrf.mxu3 }
 0xf07   : > { %v5925_v38 = vadd.f32 %v5924_v62, %v13301_v15  ;;  %v8096_v62 = vld [vmem:[%s14235_s10 + $0xe4] sm:$0xf] }
 0xf09   : > { %v13379_v18 = vadd.f32 %v5925_v38, %v14454_v35  ;;  %v7929_v38 = vld [vmem:[%s14235_s10 + $0xf8] sm:$0xf0]  ;;  %v8094_v35 = vld [vmem:[%s14235_s10 + $0xcc] sm:$0xf0] }
 0xf0b   : > { %v5961_v23 = vpop.xlane.xlu1 %5960 }
 0xf0c   : > { %v5992_v11 = vmul.f32 %v5961_v23, %v14452_v46 }
 0xf0e   : > { %v13356_v42 = vsub.f32 %v13305_v0, %v5992_v11  ;;  %v5926_v57 = vpop.f32.mrf.mxu3  ;;  %v7919_v11 = vld [vmem:[%s14235_s10 + $0xe0] sm:$0xf] }
 0xf0f   : > { %v5927_v25 = vadd.f32 %v5926_v57, %v13301_v15 }
 0xf10   : > { %v6024_v53 = vmul.f32 %v13356_v42, %v13356_v42 }
 0xf11   : > { %v13388_v14 = vadd.f32 %v5927_v25, %v14455_v44  ;;  %v8095_v44 = vld [vmem:[%s14235_s10 + $0xd4] sm:$0xf0] }
 0xf12   : > { %v5963_v4 = vpop.xlane.xlu2 %5962  ;;  %6040 = vadd.xlane.f32.xlu0 %v6024_v53  ;;  %v8098_v53 = vld [vmem:[%s14235_s10 + $0xec] sm:$0xf0] }
 0xf13   : > { %v5993_v41 = vmul.f32 %v5963_v4, %v14452_v46  ;;  %v7920_v4 = vor.u32 %v8098_v53, %v7919_v11  ;;  %v7873_v11 = vld [vmem:[%s14235_s10 + $0x90] sm:$0xf0]  ;;  %v7879_v53 = vld [vmem:[%s14235_s10 + $0x88] sm:$0xf] }
 0xf15   : > { %v13363_v31 = vsub.f32 %v13310_v13, %v5993_v41  ;;  %v7921_v41 = vld [vmem:[%s14235_s10 + $0xf0] sm:$0xf0]  ;;  %6523 = vmatpush.bf16.msra.mxu0 %v7920_v4 }
 0xf16   : > { %v5929_v60 = vpop.f32.mrf.mxu3  ;;  %v7924_v6 = vor.u32 %v8096_v62, %v7921_v41  ;;  %v8087_v62 = vld [vmem:[%s14235_s10 + $0x94] sm:$0xf0] }
 0xf17   : > { %v6025_v43 = vmul.f32 %v13363_v31, %v13363_v31  ;;  %v5930_v27 = vadd.f32 %v5929_v60, %v13301_v15  ;;  %v7911_v60 = vld [vmem:[%s14235_s10 + $0xc8] sm:$0xf]  ;;  %v7880_v41 = vor.u32 %v8087_v62, %v7879_v53  ;;  %v8074_v53 = vld [vmem:[%s14235_s10 + $0x2c] sm:$0xf0]  ;;  %v8072_v62 = vld [vmem:[%s14235_s10 + $0x24] sm:$0xf] }
 0xf18   : > { %6572 = vmatpush.bf16.msra.mxu1 %v7924_v6 }
 0xf19   : > { %6042 = vadd.xlane.f32.xlu1 %v6025_v43  ;;  %v13399_v21 = vadd.f32 %v5930_v27, %v14456_v24  ;;  %v8099_v43 = vld [vmem:[%s14235_s10 + $0xf4] sm:$0xf0]  ;;  %v8093_v27 = vld [vmem:[%s14235_s10 + $0xcc] sm:$0xf] }
 0xf1a   : > { %v5965_v3 = vpop.xlane.xlu0 %5964  ;;  %5974 = vadd.xlane.f32.xlu0 %v13368_v17 }
 0xf1b   : > { %v5994_v39 = vmul.f32 %v5965_v3, %v14452_v46  ;;  %v7928_v3 = vor.u32 %v8099_v43, %v7927_v37  ;;  %v8085_v37 = vld [vmem:[%s14235_s10 + $0x8c] sm:$0xf]  ;;  %v7881_v43 = vld [vmem:[%s14235_s10 + $0x98] sm:$0xf0] }
 0xf1c   : > { %v7884_v6 = vor.u32 %v8085_v37, %v7881_v43  ;;  %v7825_v43 = vld [vmem:[%s14235_s10 + $0x30] sm:$0xf0] }
 0xf1d   : > { %v13374_v10 = vsub.f32 %v13315_v16, %v5994_v39  ;;  %v8097_v39 = vld [vmem:[%s14235_s10 + $0xec] sm:$0xf]  ;;  %6621 = vmatpush.bf16.msrb.mxu2 %v7928_v3  ;;  %v7855_v3 = vld [vmem:[%s14235_s10 + $0x60] sm:$0xf] }
 0xf1e   : > { %v5931_v7 = vpop.f32.mrf.mxu3  ;;  %v7932_v57 = vor.u32 %v8097_v39, %v7929_v38  ;;  %v8082_v39 = vld [vmem:[%s14235_s10 + $0x6c] sm:$0xf0]  ;;  %v8080_v38 = vld [vmem:[%s14235_s10 + $0x64] sm:$0xf] }
 0xf1f   : > { %v6026_v26 = vmul.f32 %v13374_v10, %v13374_v10  ;;  %v5932_v36 = vadd.f32 %v5931_v7, %v13301_v15  ;;  %v8090_v7 = vld [vmem:[%s14235_s10 + $0xac] sm:$0xf0] }
 0xf20   : > { %6670 = vmatpush.bf16.msrb.mxu3 %v7932_v57 }
 0xf21   : > { %6044 = vadd.xlane.f32.xlu1 %v6026_v26  ;;  %v13410_v12 = vadd.f32 %v5932_v36, %v14457_v59  ;;  %v7903_v26 = vld [vmem:[%s14235_s10 + $0xc0] sm:$0xf]  ;;  %v7895_v59 = vld [vmem:[%s14235_s10 + $0xa8] sm:$0xf] }
 0xf22   : > { %v5967_v32 = vpop.xlane.xlu0 %5966  ;;  %5976 = vadd.xlane.f32.xlu0 %v13379_v18  ;;  %v7904_v25 = vor.u32 %v8094_v35, %v7903_v26  ;;  %v7856_v35 = vor.u32 %v8082_v39, %v7855_v3  ;;  %v8075_v3 = vld [vmem:[%s14235_s10 + $0x34] sm:$0xf0] }
 0xf23   : > { %v5995_v47 = vmul.f32 %v5967_v32, %v14452_v46  ;;  %v8092_v32 = vld [vmem:[%s14235_s10 + $0xc4] sm:$0xf] }
 0xf24   : > { %6524 = vmatpush.bf16.msra.mxu0 %v7904_v25  ;;  %v7863_v25 = vld [vmem:[%s14235_s10 + $0x68] sm:$0xf] }
 0xf25   : > { %v13385_v20 = vsub.f32 %v13320_v9, %v5995_v47  ;;  %v7905_v47 = vld [vmem:[%s14235_s10 + $0xd0] sm:$0xf0] }
 0xf27   : > { %v6027_v52 = vmul.f32 %v13385_v20, %v13385_v20 }
 0xf29   : > { %6046 = vadd.xlane.f32.xlu2 %v6027_v52  ;;  %5978 = vadd.xlane.f32.xlu1 %v13388_v14  ;;  %v7908_v52 = vor.u32 %v8092_v32, %v7905_v47  ;;  %v7857_v32 = vld [vmem:[%s14235_s10 + $0x70] sm:$0xf0]  ;;  %v8083_v47 = vld [vmem:[%s14235_s10 + $0x74] sm:$0xf0] }
 0xf2a   : > { %v5969_v54 = vpop.xlane.xlu0 %5968 }
 0xf2b   : > { %v5996_v8 = vmul.f32 %v5969_v54, %v14452_v46  ;;  %v7912_v54 = vor.u32 %v8095_v44, %v7911_v60  ;;  %6573 = vmatpush.bf16.msra.mxu1 %v7908_v52  ;;  %v7860_v52 = vor.u32 %v8080_v38, %v7857_v32  ;;  %v7828_v38 = vor.u32 %v8072_v62, %v7825_v43 }
 0xf2d   : > { %v13396_v50 = vsub.f32 %v13325_v34, %v5996_v8  ;;  %v7913_v8 = vld [vmem:[%s14235_s10 + $0xd8] sm:$0xf0]  ;;  %6622 = vmatpush.bf16.msrb.mxu2 %v7912_v54  ;;  %v7864_v54 = vor.u32 %v8083_v47, %v7863_v25 }
 0xf2e   : > { %v7916_v24 = vor.u32 %v8093_v27, %v7913_v8  ;;  %v8081_v27 = vld [vmem:[%s14235_s10 + $0x6c] sm:$0xf]  ;;  %v7865_v8 = vld [vmem:[%s14235_s10 + $0x78] sm:$0xf0] }
 0xf2f   : > { %v6028_v45 = vmul.f32 %v13396_v50, %v13396_v50 }
 0xf30   : > { %6671 = vmatpush.bf16.msrb.mxu3 %v7916_v24  ;;  %v7868_v24 = vor.u32 %v8081_v27, %v7865_v8  ;;  %v7809_v8 = vld [vmem:[%s14235_s10 + $0x10] sm:$0xf0] }
 0xf31   : > { %5980 = vadd.xlane.f32.xlu1 %v13399_v21  ;;  %6048 = vadd.xlane.f32.xlu2 %v6028_v45  ;;  %v7887_v45 = vld [vmem:[%s14235_s10 + $0xa0] sm:$0xf] }
 0xf32   : > { %v5971_v61 = vpop.xlane.xlu1 %5970  ;;  %v7888_v36 = vor.u32 %v8090_v7, %v7887_v45  ;;  %v14460_v45 = vld [vmem:[#allocation36_spill] sm:$0xff] }
 0xf33   : > { %v5997_v55 = vmul.f32 %v5971_v61, %v14452_v46  ;;  %v8088_v61 = vld [vmem:[%s14235_s10 + $0xa4] sm:$0xf] }
 0xf34   : > { %6525 = vmatpush.bf16.msra.mxu0 %v7888_v36  ;;  %v7839_v36 = vld [vmem:[%s14235_s10 + $0x40] sm:$0xf] }
 0xf35   : > { %v13407_v1 = vsub.f32 %v13330_v63, %v5997_v55  ;;  %v7889_v55 = vld [vmem:[%s14235_s10 + $0xb0] sm:$0xf0] }
 0xf37   : > { %v6029_v30 = vmul.f32 %v13407_v1, %v13407_v1 }
 0xf39   : > { %6050 = vadd.xlane.f32.xlu0 %v6029_v30  ;;  %5982 = vadd.xlane.f32.xlu2 %v13410_v12  ;;  %v8091_v30 = vld [vmem:[%s14235_s10 + $0xb4] sm:$0xf0] }
 0xf51   : > { %v5934_v2 = vpop.f32.mrf.mxu3 }
 0xf52   : > { %v5935_v56 = vadd.f32 %v5934_v2, %v13301_v15  ;;  %v7892_v2 = vor.u32 %v8088_v61, %v7889_v55  ;;  %v8078_v55 = vld [vmem:[%s14235_s10 + $0x4c] sm:$0xf0] }
 0xf54   : > { %v13417_v22 = vadd.f32 %v5935_v56, %v14458_v49  ;;  %v7896_v56 = vor.u32 %v8091_v30, %v7895_v59  ;;  %v8089_v49 = vld [vmem:[%s14235_s10 + $0xac] sm:$0xf]  ;;  %6574 = vmatpush.bf16.msra.mxu1 %v7892_v2  ;;  %v7840_v59 = vor.u32 %v8078_v55, %v7839_v36  ;;  %v8076_v30 = vld [vmem:[%s14235_s10 + $0x44] sm:$0xf]  ;;  %v7841_v2 = vld [vmem:[%s14235_s10 + $0x50] sm:$0xf0] }
 0xf55   : > { %v5973_v58 = vpop.xlane.xlu2 %5972 }
 0xf56   : > { %v5998_v5 = vmul.f32 %v5973_v58, %v14452_v46  ;;  %5984 = vadd.xlane.f32.xlu2 %v13417_v22  ;;  %v7897_v58 = vld [vmem:[%s14235_s10 + $0xb8] sm:$0xf0]  ;;  %6623 = vmatpush.bf16.msrb.mxu2 %v7896_v56  ;;  %v7847_v56 = vld [vmem:[%s14235_s10 + $0x48] sm:$0xf] }
 0xf58   : > { %v13422_v40 = vsub.f32 %v13343_v51, %v5998_v5  ;;  %v7900_v5 = vor.u32 %v8089_v49, %v7897_v58  ;;  %v7844_v49 = vor.u32 %v8076_v30, %v7841_v2  ;;  %v8079_v58 = vld [vmem:[%s14235_s10 + $0x54] sm:$0xf0]  ;;  %v8069_v2 = vld [vmem:[%s14235_s10 + $0xc] sm:$0xf] }
 0xf59   : > { %v5936_v19 = vpop.f32.mrf.mxu3 }
 0xf5a   : > { %v6030_v28 = vmul.f32 %v13422_v40, %v13422_v40  ;;  %v5937_v33 = vadd.f32 %v5936_v19, %v13301_v15  ;;  %v8086_v19 = vld [vmem:[%s14235_s10 + $0x8c] sm:$0xf0]  ;;  %6672 = vmatpush.bf16.msrb.mxu3 %v7900_v5  ;;  %6624 = vmatpush.bf16.msrb.mxu2 %v7880_v41  ;;  %v8077_v5 = vld [vmem:[%s14235_s10 + $0x4c] sm:$0xf] }
 0xf5c   : > { %6052 = vadd.xlane.f32.xlu0 %v6030_v28  ;;  %v13428_v23 = vadd.f32 %v5937_v33, %v14459_v29  ;;  %v7871_v28 = vld [vmem:[%s14235_s10 + $0x80] sm:$0xf]  ;;  %v8084_v33 = vld [vmem:[%s14235_s10 + $0x84] sm:$0xf] }
 0xf5d   : > { %v7872_v29 = vor.u32 %v8086_v19, %v7871_v28  ;;  %v7876_v4 = vor.u32 %v8084_v33, %v7873_v11  ;;  %v7849_v28 = vld [vmem:[%s14235_s10 + $0x58] sm:$0xf0]  ;;  %v7848_v19 = vor.u32 %v8079_v58, %v7847_v56  ;;  %v7823_v11 = vld [vmem:[%s14235_s10 + $0x20] sm:$0xf] }
 0xf5e   : > { %6673 = vmatpush.bf16.msrb.mxu3 %v7884_v6  ;;  %6625 = vmatpush.bf16.msrb.mxu2 %v7864_v54  ;;  %v7852_v33 = vor.u32 %v8077_v5, %v7849_v28  ;;  %v7824_v37 = vor.u32 %v8074_v53, %v7823_v11  ;;  %v7831_v6 = vld [vmem:[%s14235_s10 + $0x28] sm:$0xf]  ;;  %v8068_v54 = vld [vmem:[%s14235_s10 + $0x4] sm:$0xf]  ;;  %v7817_v56 = vld [vmem:[%s14235_s10 + $0x18] sm:$0xf0] }
 0xf5f   : > { %6526 = vmatpush.bf16.msra.mxu0 %v7872_v29  ;;  %6575 = vmatpush.bf16.msra.mxu1 %v7876_v4  ;;  %v7820_v58 = vor.u32 %v8069_v2, %v7817_v56 }
 0xf62   : > { %6674 = vmatpush.bf16.msrb.mxu3 %v7868_v24  ;;  %6626 = vmatpush.bf16.msrb.mxu2 %v7848_v19  ;;  %v7815_v24 = vld [vmem:[%s14235_s10 + $0x8] sm:$0xf] }
 0xf63   : > { %6527 = vmatpush.bf16.msra.mxu0 %v7856_v35  ;;  %6576 = vmatpush.bf16.msra.mxu1 %v7860_v52  ;;  %v7833_v35 = vld [vmem:[%s14235_s10 + $0x38] sm:$0xf0]  ;;  %v8070_v52 = vld [vmem:[%s14235_s10 + $0xc] sm:$0xf0] }
 0xf64   : > { %5986 = vadd.xlane.f32.xlu0 %v13428_v23 }
 0xf66   : > { %6675 = vmatpush.bf16.msrb.mxu3 %v7852_v33 }
 0xf67   : > { %6528 = vmatpush.bf16.msra.mxu0 %v7840_v59  ;;  %6577 = vmatpush.bf16.msra.mxu1 %v7844_v49  ;;  %v7812_v59 = vor.u32 %v8068_v54, %v7809_v8  ;;  %v13656_v54 = vperm.slane %v13298_v48, 2 }
 0xf6b   : > { %6529 = vmatpush.bf16.msra.mxu0 %v7824_v37  ;;  %6578 = vmatpush.bf16.msra.mxu1 %v7828_v38 }
 0xf6f   : > { %6579 = vmatpush.bf16.msra.mxu1 %v7812_v59 }
 0xf85   : > { %v5939_v57 = vpop.f32.mrf.mxu3  ;;  %v6041_v26 = vpop.xlane.xlu0 %6040 }
 0xf86   : > { %v5940_v60 = vadd.f32 %v5939_v57, %v13301_v15  ;;  %v6072_v44 = vmul.f32 %v6041_v26, %v14452_v46  ;;  %v7832_v57 = vor.u32 %v8075_v3, %v7831_v6  ;;  %v8073_v26 = vld [vmem:[%s14235_s10 + $0x2c] sm:$0xf] }
 0xf87   : > { %v7836_v25 = vor.u32 %v8073_v26, %v7833_v35 }
 0xf88   : > { %v13554_v7 = vadd.f32 %v5940_v60, %v14460_v45  ;;  %v13556_v61 = vadd.f32 1e-05, %v6072_v44  ;;  %v7807_v44 = vld [vmem:[%s14235_s10] sm:$0xf]  ;;  %6627 = vmatpush.bf16.msrb.mxu2 %v7832_v57  ;;  %v8071_v45 = vld [vmem:[%s14235_s10 + $0x14] sm:$0xf0] }
 0xf89   : > { %6676 = vmatpush.bf16.msrb.mxu3 %v7836_v25  ;;  %v7808_v55 = vor.u32 %v8070_v52, %v7807_v44  ;;  %v7816_v30 = vor.u32 %v8071_v45, %v7815_v24 }
 0xf8a   : > { %14461 = vst [vmem:[#allocation28_spill] sm:$0xff] %v13554_v7  ;;  %9102 = vrsqrt.f32 %v13556_v61  ;;  %5988 = vadd.xlane.f32.xlu0 %v13554_v7  ;;  %vm6110_vm9 = vweird.f32 %v13556_v61 }
 0xf8b   : > { %6530 = vmatpush.bf16.msra.mxu0 %v7808_v55  ;;  %v14462_v55 = vld [vmem:[#allocation53_spill] sm:$0xff] }
 0xf8c   : > { %v6043_v29 = vpop.xlane.xlu1 %6042  ;;  %6628 = vmatpush.bf16.msrb.mxu2 %v7816_v30 }
 0xf8d   : > { %v6073_v4 = vmul.f32 %v6043_v29, %v14452_v46  ;;  %v5975_v41 = vpop.xlane.xlu0 %5974  ;;  %6677 = vmatpush.bf16.msrb.mxu3 %v7820_v58  ;;  %v5941_v3 = vpop.f32.mrf.mxu3 }
 0xf8e   : > { %v5999_v39 = vmul.f32 %v5975_v41, %v14452_v46  ;;  %v5942_v52 = vadd.f32 %v5941_v3, %v13301_v15 }
 0xf8f   : > { %v13610_v32 = vadd.f32 1e-05, %v6073_v4 }
 0xf90   : > { %v9103_v47 = vpop.eup %9102  ;;  %v13613_v60 = vsub.f32 %v13368_v17, %v5999_v39  ;;  %v13666_v59 = vadd.f32 %v5942_v52, %v14462_v55 }
 0xf91   : > { %v6105_v27 = vmul.f32 %v9103_v47, %v13556_v61  ;;  %9104 = vrsqrt.f32 %v13610_v32  ;;  %vm6111_vm0 = vweird.f32 %v9103_v47  ;;  %vm6120_vm6 = vweird.f32 %v13610_v32 }
 0xf92   : > { %v6031_v36 = vmul.f32 %v13613_v60, %v13613_v60  ;;  %vm6112_vm10 = vmor %vm6110_vm9, %vm6111_vm0  ;;  %14463 = vst [vmem:[#allocation34_spill] sm:$0xff] %v13666_v59 }
 0xf93   : > { %v6106_v49 = vmul.f32 %v9103_v47, %v6105_v27 }
 0xf94   : > { %v6045_v5 = vpop.xlane.xlu1 %6044  ;;  %6054 = vadd.xlane.f32.xlu1 %v6031_v36 }
 0xf95   : > { %v6107_v28 = vmul.f32 0.5, %v6106_v49  ;;  %v6074_v19 = vmul.f32 %v6045_v5, %v14452_v46  ;;  %v5977_v33 = vpop.xlane.xlu0 %5976 }
 0xf96   : > { %v6000_v29 = vmul.f32 %v5977_v33, %v14452_v46 }
 0xf97   : > { %v9105_v11 = vpop.eup %9104  ;;  %v6108_v53 = vsub.f32 1.5, %v6107_v28  ;;  %v6090_v62 = vadd.f32 1e-05, %v6074_v19 }
 0xf98   : > { %v6115_v4 = vmul.f32 %v9105_v11, %v13610_v32  ;;  %v13647_v41 = vsub.f32 %v13379_v18, %v6000_v29  ;;  %vm6121_vm5 = vweird.f32 %v9105_v11 }
 0xf99   : > { %v6109_v37 = vmul.f32 %v9103_v47, %v6108_v53  ;;  %9106 = vrsqrt.f32 %v6090_v62  ;;  %vm6122_vm7 = vmor %vm6120_vm6, %vm6121_vm5  ;;  %vm6130_vm11 = vweird.f32 %v6090_v62 }
 0xf9a   : > { %v6116_v43 = vmul.f32 %v9105_v11, %v6115_v4  ;;  %v6032_v6 = vmul.f32 %v13647_v41, %v13647_v41 }
 0xf9b   : > { %v6113_v39 = vsel %vm6112_vm10, %v9103_v47, %v6109_v37 }
 0xf9c   : > { %v6117_v38 = vmul.f32 0.5, %v6116_v43  ;;  %v6047_v57 = vpop.xlane.xlu2 %6046  ;;  %v5979_v26 = vpop.xlane.xlu1 %5978  ;;  %6056 = vadd.xlane.f32.xlu1 %v6032_v6  ;;  %v6264_v27 = vmul.f32 %v6113_v39, %v13356_v42  ;;  %v13669_v42 = vperm.slane %v13298_v48, 3 }
 0xf9d   : > { %v6075_v35 = vmul.f32 %v6047_v57, %v14452_v46  ;;  %v6001_v25 = vmul.f32 %v5979_v26, %v14452_v46 }
 0xf9e   : > { %v6118_v44 = vsub.f32 1.5, %v6117_v38  ;;  %v6281_v2 = vmul.f32 %v13656_v54, %v6264_v27 }
 0xf9f   : > { %v9107_v61 = vpop.eup %9106  ;;  %v6091_v8 = vadd.f32 1e-05, %v6075_v35  ;;  %v13660_v47 = vsub.f32 %v13388_v14, %v6001_v25 }
 0xfa0   : > { %v6119_v24 = vmul.f32 %v9105_v11, %v6118_v44  ;;  %v6125_v45 = vmul.f32 %v9107_v61, %v6090_v62  ;;  %v6298_v48 = vadd.f32 %v13669_v42, %v6281_v2  ;;  %vm6131_vm8 = vweird.f32 %v9107_v61 }
 0xfa1   : > { %9108 = vrsqrt.f32 %v6091_v8  ;;  %v6033_v36 = vmul.f32 %v13660_v47, %v13660_v47  ;;  %vm6132_vm12 = vmor %vm6130_vm11, %vm6131_vm8  ;;  %vm6140_vm14 = vweird.f32 %v6091_v8 }
 0xfa2   : > { %v6123_v15 = vsel %vm6122_vm7, %v9105_v11, %v6119_v24  ;;  %v6126_v30 = vmul.f32 %v9107_v61, %v6125_v45 }
 0xfa3   : > { %v6265_v56 = vmul.f32 %v6123_v15, %v13363_v31  ;;  %6058 = vadd.xlane.f32.xlu2 %v6033_v36 }
 0xfa4   : > { %v6127_v32 = vmul.f32 0.5, %v6126_v30  ;;  %v5981_v49 = vpop.xlane.xlu1 %5980  ;;  %v6049_v58 = vpop.xlane.xlu2 %6048  ;;  %5990 = vadd.xlane.f32.xlu1 %v13666_v59 }
 0xfa5   : > { %v6282_v5 = vmul.f32 %v13656_v54, %v6265_v56  ;;  %v6002_v28 = vmul.f32 %v5981_v49, %v14452_v46  ;;  %v6076_v19 = vmul.f32 %v6049_v58, %v14452_v46 }
 0xfa6   : > { %v6128_v33 = vsub.f32 1.5, %v6127_v32 }
 0xfa7   : > { %v9109_v29 = vpop.eup %9108  ;;  %v6299_v11 = vadd.f32 %v13669_v42, %v6282_v5  ;;  %v13680_v31 = vsub.f32 %v13399_v21, %v6002_v28  ;;  %v6092_v53 = vadd.f32 1e-05, %v6076_v19 }
 0xfa8   : > { %v6129_v4 = vmul.f32 %v9107_v61, %v6128_v33  ;;  %v6135_v37 = vmul.f32 %v9109_v29, %v6091_v8  ;;  %vm6141_vm13 = vweird.f32 %v9109_v29 }
 0xfa9   : > { %9110 = vrsqrt.f32 %v6092_v53  ;;  %v6034_v43 = vmul.f32 %v13680_v31, %v13680_v31  ;;  %v6346_v6 = vpack.c.bf16 %v6299_v11, %v6298_v48  ;;  %vm6142_vm15 = vmor %vm6140_vm14, %vm6141_vm13  ;;  %vm6150_vm2 = vweird.f32 %v6092_v53 }
 0xfaa   : > { %v6136_v3 = vmul.f32 %v9109_v29, %v6135_v37  ;;  %v6133_v39 = vsel %vm6132_vm12, %v9107_v61, %v6129_v4 }
 0xfab   : > { %6060 = vadd.xlane.f32.xlu2 %v6034_v43  ;;  %6531 = vmatmul.bf16.vlgmr.msra.gmra.mxu0 %v6346_v6  ;;  %v6266_v62 = vmul.f32 %v6133_v39, %v13374_v10 }
 0xfac   : > { %v6137_v38 = vmul.f32 0.5, %v6136_v3  ;;  %6580 = vmatmul.bf16.vlgmr.msra.gmra.mxu1 %v6346_v6  ;;  %6629 = vmatmul.bf16.vlgmr.msrb.gmra.mxu2 %v6346_v6  ;;  %v5983_v57 = vpop.xlane.xlu2 %5982  ;;  %v6051_v26 = vpop.xlane.xlu0 %6050 }
 0xfad   : > { %6678 = vmatmul.bf16.vlgmr.msrb.gmra.mxu3 %v6346_v6  ;;  %v6003_v35 = vmul.f32 %v5983_v57, %v14452_v46  ;;  %v6077_v25 = vmul.f32 %v6051_v26, %v14452_v46  ;;  %v6283_v2 = vmul.f32 %v13656_v54, %v6266_v62 }
 0xfae   : > { %v6138_v44 = vsub.f32 1.5, %v6137_v38 }
 0xfaf   : > { %v9111_v52 = vpop.eup %9110  ;;  %v13688_v27 = vsub.f32 %v13410_v12, %v6003_v35  ;;  %v6093_v24 = vadd.f32 1e-05, %v6077_v25  ;;  %v6300_v8 = vadd.f32 %v13669_v42, %v6283_v2 }
 0xfb0   : > { %v6139_v61 = vmul.f32 %v9109_v29, %v6138_v44  ;;  %v6145_v45 = vmul.f32 %v9111_v52, %v6092_v53  ;;  %vm6151_vm1 = vweird.f32 %v9111_v52 }
 0xfb1   : > { %9112 = vrsqrt.f32 %v6093_v24  ;;  %v6035_v36 = vmul.f32 %v13688_v27, %v13688_v27  ;;  %vm6152_vm3 = vmor %vm6150_vm2, %vm6151_vm1  ;;  %vm6160_vm0 = vweird.f32 %v6093_v24 }
 0xfb2   : > { %v6143_v15 = vsel %vm6142_vm15, %v9109_v29, %v6139_v61  ;;  %v6146_v55 = vmul.f32 %v9111_v52, %v6145_v45 }
 0xfb3   : > { %v6267_v30 = vmul.f32 %v6143_v15, %v13385_v20  ;;  %6062 = vadd.xlane.f32.xlu0 %v6035_v36 }
 0xfb4   : > { %v6147_v10 = vmul.f32 0.5, %v6146_v55 }
 0xfb5   : > { %v6284_v56 = vmul.f32 %v13656_v54, %v6267_v30 }
 0xfb6   : > { %v6148_v32 = vsub.f32 1.5, %v6147_v10 }
 0xfb7   : > { %v9113_v49 = vpop.eup %9112  ;;  %v6301_v58 = vadd.f32 %v13669_v42, %v6284_v56 }
 0xfb8   : > { %v6149_v5 = vmul.f32 %v9111_v52, %v6148_v32  ;;  %v6155_v28 = vmul.f32 %v9113_v49, %v6093_v24  ;;  %vm6161_vm4 = vweird.f32 %v9113_v49 }
 0xfb9   : > { %v6347_v19 = vpack.c.bf16 %v6301_v58, %v6300_v8  ;;  %vm6162_vm9 = vmor %vm6160_vm0, %vm6161_vm4 }
 0xfba   : > { %v6156_v33 = vmul.f32 %v9113_v49, %v6155_v28  ;;  %v6153_v20 = vsel %vm6152_vm3, %v9111_v52, %v6149_v5 }
 0xfbb   : > { %6536 = vmatmul.bf16.gmra.mxu0 %v6347_v19  ;;  %v6268_v11 = vmul.f32 %v6153_v20, %v13396_v50 }
 0xfbc   : > { %v6157_v29 = vmul.f32 0.5, %v6156_v33  ;;  %6585 = vmatmul.bf16.gmra.mxu1 %v6347_v19  ;;  %6634 = vmatmul.bf16.gmra.mxu2 %v6347_v19 }
 0xfbd   : > { %6683 = vmatmul.bf16.gmra.mxu3 %v6347_v19  ;;  %v6285_v53 = vmul.f32 %v13656_v54, %v6268_v11 }
 0xfbe   : > { %v6158_v48 = vsub.f32 1.5, %v6157_v29 }
 0xfbf   : > { %v6302_v3 = vadd.f32 %v13669_v42, %v6285_v53 }
 0xfc0   : > { %v6159_v4 = vmul.f32 %v9113_v49, %v6158_v48 }
 0xfc2   : > { %v6163_v37 = vsel %vm6162_vm9, %v9113_v49, %v6159_v4 }
 0xfc3   : > { %v6269_v43 = vmul.f32 %v6163_v37, %v13407_v1 }
 0xfc5   : > { %v6286_v6 = vmul.f32 %v13656_v54, %v6269_v43 }
 0xfc7   : > { %v6303_v39 = vadd.f32 %v13669_v42, %v6286_v6 }
 0xfc9   : > { %v5985_v38 = vpop.xlane.xlu2 %5984  ;;  %v6348_v57 = vpack.c.bf16 %v6303_v39, %v6302_v3 }
 0xfca   : > { %v6004_v26 = vmul.f32 %v5985_v38, %v14452_v46 }
 0xfcb   : > { %6541 = vmatmul.bf16.gmra.mxu0 %v6348_v57 }
 0xfcc   : > { %v13705_v50 = vsub.f32 %v13417_v22, %v6004_v26  ;;  %6590 = vmatmul.bf16.gmra.mxu1 %v6348_v57  ;;  %6639 = vmatmul.bf16.gmra.mxu2 %v6348_v57 }
 0xfcd   : > { %6688 = vmatmul.bf16.gmra.mxu3 %v6348_v57 }
 0xfce   : > { %v6036_v1 = vmul.f32 %v13705_v50, %v13705_v50 }
 0xfcf   : > { %v6053_v35 = vpop.xlane.xlu0 %6052 }
 0xfd0   : > { %6064 = vadd.xlane.f32.xlu1 %v6036_v1  ;;  %v6078_v24 = vmul.f32 %v6053_v35, %v14452_v46 }
 0xfd2   : > { %v6094_v61 = vadd.f32 1e-05, %v6078_v24 }
 0xfd4   : > { %9114 = vrsqrt.f32 %v6094_v61  ;;  %vm6170_vm5 = vweird.f32 %v6094_v61 }
 0xfd7   : > { %v5987_v25 = vpop.xlane.xlu0 %5986 }
 0xfd8   : > { %v6005_v44 = vmul.f32 %v5987_v25, %v14452_v46 }
 0xfda   : > { %v13711_v52 = vsub.f32 %v13428_v23, %v6005_v44  ;;  %v9115_v15 = vpop.eup %9114 }
 0xfdb   : > { %v6165_v2 = vmul.f32 %v9115_v15, %v6094_v61  ;;  %vm6171_vm10 = vweird.f32 %v9115_v15 }
 0xfdc   : > { %v6037_v62 = vmul.f32 %v13711_v52, %v13711_v52  ;;  %vm6172_vm6 = vmor %vm6170_vm5, %vm6171_vm10 }
 0xfdd   : > { %v6166_v10 = vmul.f32 %v9115_v15, %v6165_v2 }
 0xfde   : > { %6066 = vadd.xlane.f32.xlu2 %v6037_v62 }
 0xfdf   : > { %v6167_v8 = vmul.f32 0.5, %v6166_v10 }
 0xfe1   : > { %v6168_v58 = vsub.f32 1.5, %v6167_v8 }
 0xfe3   : > { %v6169_v20 = vmul.f32 %v9115_v15, %v6168_v58 }
 0xfe5   : > { %v6173_v4 = vsel %vm6172_vm6, %v9115_v15, %v6169_v20 }
 0xfe6   : > { %v6270_v57 = vmul.f32 %v6173_v4, %v13422_v40 }
 0xffd   : > { %v5989_v45 = vpop.xlane.xlu0 %5988 }
 0xffe   : > { %v6006_v36 = vmul.f32 %v5989_v45, %v14452_v46  ;;  %v6287_v45 = vmul.f32 %v13656_v54, %v6270_v57 }
0x1000   : > { %v13718_v55 = vsub.f32 %v13554_v7, %v6006_v36 }
0x1002   : > { %v6038_v30 = vmul.f32 %v13718_v55, %v13718_v55 }
0x1004   : > { %6068 = vadd.xlane.f32.xlu0 %v6038_v30 }
0x1007   : > { %v6055_v56 = vpop.xlane.xlu1 %6054 }
0x1008   : > { %v6079_v32 = vmul.f32 %v6055_v56, %v14452_v46 }
0x100a   : > { %v6095_v49 = vadd.f32 1e-05, %v6079_v32  ;;  %v6304_v32 = vadd.f32 %v13669_v42, %v6287_v45 }
0x100c   : > { %9116 = vrsqrt.f32 %v6095_v49  ;;  %vm6180_vm8 = vweird.f32 %v6095_v49 }
0x100f   : > { %v6057_v5 = vpop.xlane.xlu1 %6056 }
0x1010   : > { %v6080_v28 = vmul.f32 %v6057_v5, %v14452_v46 }
0x1012   : > { %v9117_v19 = vpop.eup %9116  ;;  %v6096_v33 = vadd.f32 1e-05, %v6080_v28 }
0x1013   : > { %v6175_v29 = vmul.f32 %v9117_v19, %v6095_v49  ;;  %vm6181_vm7 = vweird.f32 %v9117_v19 }
0x1014   : > { %9118 = vrsqrt.f32 %v6096_v33  ;;  %vm6182_vm11 = vmor %vm6180_vm8, %vm6181_vm7  ;;  %vm6190_vm13 = vweird.f32 %v6096_v33 }
0x1015   : > { %v6176_v48 = vmul.f32 %v9117_v19, %v6175_v29 }
0x1016   : > { %v6059_v11 = vpop.xlane.xlu2 %6058 }
0x1017   : > { %v6177_v37 = vmul.f32 0.5, %v6176_v48  ;;  %v6081_v43 = vmul.f32 %v6059_v11, %v14452_v46  ;;  %v5991_v53 = vpop.xlane.xlu1 %5990 }
0x1018   : > { %v6007_v6 = vmul.f32 %v5991_v53, %v14452_v46 }
0x1019   : > { %v6178_v3 = vsub.f32 1.5, %v6177_v37  ;;  %v6097_v39 = vadd.f32 1e-05, %v6081_v43 }
0x101a   : > { %v9119_v38 = vpop.eup %9118  ;;  %v13728_v26 = vsub.f32 %v13666_v59, %v6007_v6 }
0x101b   : > { %v6179_v1 = vmul.f32 %v9117_v19, %v6178_v3  ;;  %v6185_v35 = vmul.f32 %v9119_v38, %v6096_v33  ;;  %9120 = vrsqrt.f32 %v6097_v39  ;;  %vm6191_vm12 = vweird.f32 %v9119_v38 }
0x101c   : > { %v6039_v25 = vmul.f32 %v13728_v26, %v13728_v26  ;;  %vm6192_vm14 = vmor %vm6190_vm13, %vm6191_vm12  ;;  %vm6200_vm1 = vweird.f32 %v6097_v39 }
0x101d   : > { %v6183_v44 = vsel %vm6182_vm11, %v9117_v19, %v6179_v1  ;;  %v6186_v62 = vmul.f32 %v9119_v38, %v6185_v35 }
0x101e   : > { %v6271_v24 = vmul.f32 %v6183_v44, %v13613_v60  ;;  %v6061_v61 = vpop.xlane.xlu2 %6060  ;;  %6070 = vadd.xlane.f32.xlu1 %v6039_v25 }
0x101f   : > { %v6187_v40 = vmul.f32 0.5, %v6186_v62  ;;  %v6082_v36 = vmul.f32 %v6061_v61, %v14452_v46 }
0x1020   : > { %v6288_v15 = vmul.f32 %v13656_v54, %v6271_v24 }
0x1021   : > { %v9121_v30 = vpop.eup %9120  ;;  %v6188_v2 = vsub.f32 1.5, %v6187_v40  ;;  %v6098_v10 = vadd.f32 1e-05, %v6082_v36 }
0x1022   : > { %v6195_v56 = vmul.f32 %v9121_v30, %v6097_v39  ;;  %v6305_v49 = vadd.f32 %v13669_v42, %v6288_v15  ;;  %vm6201_vm15 = vweird.f32 %v9121_v30 }
0x1023   : > { %v6189_v8 = vmul.f32 %v9119_v38, %v6188_v2  ;;  %9122 = vrsqrt.f32 %v6098_v10  ;;  %vm6202_vm2 = vmor %vm6200_vm1, %vm6201_vm15  ;;  %vm6210_vm4 = vweird.f32 %v6098_v10 }
0x1024   : > { %v6196_v60 = vmul.f32 %v9121_v30, %v6195_v56  ;;  %v6349_v58 = vpack.c.bf16 %v6305_v49, %v6304_v32 }
0x1025   : > { %v6193_v19 = vsel %vm6192_vm14, %v9119_v38, %v6189_v8 }
0x1026   : > { %v6197_v5 = vmul.f32 0.5, %v6196_v60  ;;  %v6063_v28 = vpop.xlane.xlu0 %6062  ;;  %6546 = vmatmul.bf16.gmra.mxu0 %v6349_v58  ;;  %6595 = vmatmul.bf16.gmra.mxu1 %v6349_v58  ;;  %v6272_v4 = vmul.f32 %v6193_v19, %v13647_v41 }
0x1027   : > { %v6083_v20 = vmul.f32 %v6063_v28, %v14452_v46  ;;  %6644 = vmatmul.bf16.gmra.mxu2 %v6349_v58  ;;  %6693 = vmatmul.bf16.gmra.mxu3 %v6349_v58 }
0x1028   : > { %v6198_v29 = vsub.f32 1.5, %v6197_v5  ;;  %v6289_v38 = vmul.f32 %v13656_v54, %v6272_v4 }
0x1029   : > { %v9123_v48 = vpop.eup %9122  ;;  %v6099_v11 = vadd.f32 1e-05, %v6083_v20 }
0x102a   : > { %v6199_v37 = vmul.f32 %v9121_v30, %v6198_v29  ;;  %v6205_v43 = vmul.f32 %v9123_v48, %v6098_v10  ;;  %v6306_v41 = vadd.f32 %v13669_v42, %v6289_v38  ;;  %vm6211_vm3 = vweird.f32 %v9123_v48 }
0x102b   : > { %9124 = vrsqrt.f32 %v6099_v11  ;;  %vm6212_vm0 = vmor %vm6210_vm4, %vm6211_vm3  ;;  %vm6220_vm10 = vweird.f32 %v6099_v11 }
0x102c   : > { %v6203_v33 = vsel %vm6202_vm2, %v9121_v30, %v6199_v37  ;;  %v6206_v53 = vmul.f32 %v9123_v48, %v6205_v43 }
0x102d   : > { %v6273_v6 = vmul.f32 %v6203_v33, %v13660_v47 }
0x102e   : > { %v6207_v3 = vmul.f32 0.5, %v6206_v53 }
0x102f   : > { %v6290_v57 = vmul.f32 %v13656_v54, %v6273_v6 }
0x1030   : > { %v6208_v1 = vsub.f32 1.5, %v6207_v3 }
0x1031   : > { %v9125_v35 = vpop.eup %9124  ;;  %v6307_v25 = vadd.f32 %v13669_v42, %v6290_v57 }
0x1032   : > { %v6215_v44 = vmul.f32 %v9125_v35, %v6099_v11  ;;  %v6209_v39 = vmul.f32 %v9123_v48, %v6208_v1  ;;  %vm6221_vm9 = vweird.f32 %v9125_v35 }
0x1033   : > { %v6350_v24 = vpack.c.bf16 %v6307_v25, %v6306_v41  ;;  %vm6222_vm5 = vmor %vm6220_vm10, %vm6221_vm9 }
0x1034   : > { %v6216_v62 = vmul.f32 %v9125_v35, %v6215_v44  ;;  %v6213_v47 = vsel %vm6212_vm0, %v9123_v48, %v6209_v39 }
0x1035   : > { %v6274_v40 = vmul.f32 %v6213_v47, %v13680_v31 }
0x1036   : > { %v6217_v61 = vmul.f32 0.5, %v6216_v62  ;;  %6551 = vmatmul.bf16.gmra.mxu0 %v6350_v24  ;;  %6600 = vmatmul.bf16.gmra.mxu1 %v6350_v24  ;;  %v6630_v62 = vpop.f32.mrf.mxu2 }
0x1037   : > { %6649 = vmatmul.bf16.gmra.mxu2 %v6350_v24  ;;  %6698 = vmatmul.bf16.gmra.mxu3 %v6350_v24  ;;  %v6291_v2 = vmul.f32 %v13656_v54, %v6274_v40 }
0x1038   : > { %v6218_v45 = vsub.f32 1.5, %v6217_v61 }
0x1039   : > { %v6308_v32 = vadd.f32 %v13669_v42, %v6291_v2 }
0x103a   : > { %v6219_v36 = vmul.f32 %v9125_v35, %v6218_v45 }
0x103c   : > { %v6223_v15 = vsel %vm6222_vm5, %v9125_v35, %v6219_v36 }
0x103d   : > { %v6275_v30 = vmul.f32 %v6223_v15, %v13688_v27  ;;  %v8107_v15 = vld [vmem:[#allocation11 + $0x38] sm:$0xff] }
0x103e   : > { %v6632_v61 = vpop.f32.mrf.mxu2  ;;  %7184 = vmatpush.bf16.msrb.mxu0 %v8107_v15  ;;  %8133 = vmatpush.bf16.msra.mxu2 %v8107_v15 }
0x103f   : > { %v6292_v10 = vmul.f32 %v13656_v54, %v6275_v30  ;;  %v8115_v30 = vld [vmem:[#allocation11 + $0x78] sm:$0xff] }
0x1040   : > { %7233 = vmatpush.bf16.msrb.mxu1 %v8115_v30 }
0x1041   : > { %v6309_v56 = vadd.f32 %v13669_v42, %v6292_v10  ;;  %v8106_v10 = vld [vmem:[#allocation11 + $0x30] sm:$0xff] }
0x1042   : > { %7185 = vmatpush.bf16.msrb.mxu0 %v8106_v10  ;;  %8134 = vmatpush.bf16.msra.mxu2 %v8106_v10 }
0x1043   : > { %v6065_v49 = vpop.xlane.xlu1 %6064  ;;  %v6351_v8 = vpack.c.bf16 %v6309_v56, %v6308_v32  ;;  %v8114_v56 = vld [vmem:[#allocation11 + $0x70] sm:$0xff]  ;;  %v13769_v32 = vld [vmem:[#allocation7] sm:$0xf] }
0x1044   : > { %v6084_v60 = vmul.f32 %v6065_v49, %v14452_v46  ;;  %7234 = vmatpush.bf16.msrb.mxu1 %v8114_v56 }
0x1046   : > { %6556 = vmatmul.bf16.gmra.mxu0 %v6351_v8  ;;  %6605 = vmatmul.bf16.gmra.mxu1 %v6351_v8  ;;  %v6100_v31 = vadd.f32 1e-05, %v6084_v60  ;;  %v13763_v40 = vpop.f32.mrf.mxu2  ;;  %v13777_v60 = vperm.slane %v13769_v32, 3 }
0x1047   : > { %6654 = vmatmul.bf16.gmra.mxu2 %v6351_v8  ;;  %6703 = vmatmul.bf16.gmra.mxu3 %v6351_v8  ;;  %v13774_v8 = vperm.slane %v13769_v32, 2 }
0x1048   : > { %9126 = vrsqrt.f32 %v6100_v31  ;;  %vm6230_vm7 = vweird.f32 %v6100_v31 }
0x104e   : > { %v9127_v58 = vpop.eup %9126 }
0x104f   : > { %v6225_v27 = vmul.f32 %v9127_v58, %v6100_v31  ;;  %vm6231_vm6 = vweird.f32 %v9127_v58  ;;  %v6637_v31 = vpop.f32.mrf.mxu2 }
0x1050   : > { %vm6232_vm8 = vmor %vm6230_vm7, %vm6231_vm6 }
0x1051   : > { %v6067_v5 = vpop.xlane.xlu2 %6066  ;;  %v6226_v28 = vmul.f32 %v9127_v58, %v6225_v27 }
0x1052   : > { %v6085_v19 = vmul.f32 %v6067_v5, %v14452_v46 }
0x1053   : > { %v6227_v29 = vmul.f32 0.5, %v6226_v28 }
0x1054   : > { %v6101_v20 = vadd.f32 1e-05, %v6085_v19 }
0x1055   : > { %v6228_v48 = vsub.f32 1.5, %v6227_v29  ;;  %v8113_v29 = vld [vmem:[#allocation11 + $0x68] sm:$0xff] }
0x1056   : > { %9128 = vrsqrt.f32 %v6101_v20  ;;  %vm6240_vm12 = vweird.f32 %v6101_v20  ;;  %7235 = vmatpush.bf16.msrb.mxu1 %v8113_v29 }
0x1057   : > { %v6229_v4 = vmul.f32 %v9127_v58, %v6228_v48  ;;  %v13787_v48 = vadd.f32 %v6630_v62, %v13774_v8  ;;  %v8111_v62 = vld [vmem:[#allocation11 + $0x58] sm:$0xff] }
0x1059   : > { %v6233_v33 = vsel %vm6232_vm8, %v9127_v58, %v6229_v4  ;;  %v13780_v58 = vadd.f32 %v6632_v61, %v13774_v8 }
0x105a   : > { %v6276_v3 = vmul.f32 %v6233_v33, %v13705_v50  ;;  %v6679_v50 = vpop.f32.mrf.mxu3 }
0x105b   : > { %v13791_v4 = vadd.f32 %v6679_v50, %v13777_v60  ;;  %v6753_v33 = vmul.f32 0.044715, %v13780_v58 }
0x105c   : > { %v9129_v11 = vpop.eup %9128  ;;  %v6293_v35 = vmul.f32 %v13656_v54, %v6276_v3 }
0x105d   : > { %v6235_v37 = vmul.f32 %v9129_v11, %v6101_v20  ;;  %vm6241_vm11 = vweird.f32 %v9129_v11  ;;  %v8105_v20 = vld [vmem:[#allocation11 + $0x28] sm:$0xff] }
0x105e   : > { %vm6242_vm13 = vmor %vm6240_vm12, %vm6241_vm11  ;;  %v6310_v44 = vadd.f32 %v13669_v42, %v6293_v35  ;;  %7186 = vmatpush.bf16.msrb.mxu0 %v8105_v20  ;;  %8135 = vmatpush.bf16.msra.mxu2 %v8105_v20  ;;  %v6785_v35 = vmul.f32 %v6753_v33, %v13780_v58 }
0x105f   : > { %v6236_v43 = vmul.f32 %v9129_v11, %v6235_v37  ;;  %v8104_v37 = vld [vmem:[#allocation11 + $0x20] sm:$0xff] }
0x1060   : > { %v6817_v30 = vmul.f32 %v6785_v35, %v13780_v58 }
0x1061   : > { %v6237_v53 = vmul.f32 0.5, %v6236_v43  ;;  %v8112_v43 = vld [vmem:[#allocation11 + $0x60] sm:$0xff] }
0x1062   : > { %v6681_v47 = vpop.f32.mrf.mxu3  ;;  %7187 = vmatpush.bf16.msrb.mxu0 %v8104_v37  ;;  %7236 = vmatpush.bf16.msrb.mxu1 %v8112_v43 }
0x1063   : > { %v6238_v6 = vsub.f32 1.5, %v6237_v53  ;;  %v13783_v5 = vadd.f32 %v6681_v47, %v13777_v60  ;;  %8136 = vmatpush.bf16.msra.mxu2 %v8104_v37  ;;  %v8102_v47 = vld [vmem:[#allocation11 + $0x10] sm:$0xff]  ;;  %v13824_v37 = vadd.f32 %v6637_v31, %v13774_v8  ;;  %v8109_v31 = vld [vmem:[#allocation11 + $0x48] sm:$0xff] }
0x1065   : > { %v6239_v38 = vmul.f32 %v9129_v11, %v6238_v6  ;;  %v6754_v6 = vmul.f32 0.044715, %v13783_v5 }
0x1066   : > { %7237 = vmatpush.bf16.msrb.mxu1 %v8111_v62 }
0x1067   : > { %v6243_v57 = vsel %vm6242_vm13, %v9129_v11, %v6239_v38  ;;  %v13797_v38 = vpop.f32.mrf.mxu0 }
0x1068   : > { %v6277_v1 = vmul.f32 %v6243_v57, %v13711_v52  ;;  %v6751_v57 = vmul.f32 0.044715, %v13787_v48 }
0x106a   : > { %v6294_v25 = vmul.f32 %v13656_v54, %v6277_v1  ;;  %v13765_v36 = vpop.f32.mrf.mxu3  ;;  %v6752_v1 = vmul.f32 0.044715, %v13791_v4  ;;  %v6783_v50 = vmul.f32 %v6751_v57, %v13787_v48 }
0x106c   : > { %v6311_v41 = vadd.f32 %v13669_v42, %v6294_v25  ;;  %v6786_v25 = vmul.f32 %v6754_v6, %v13783_v5  ;;  %v6784_v61 = vmul.f32 %v6752_v1, %v13791_v4  ;;  %v8101_v1 = vld [vmem:[#allocation11 + $0x8] sm:$0xff] }
0x106e   : > { %v6352_v39 = vpack.c.bf16 %v6311_v41, %v6310_v44  ;;  %v13806_v44 = vpop.f32.mrf.mxu2  ;;  %v6818_v10 = vmul.f32 %v6786_v25, %v13783_v5  ;;  %v13842_v25 = vadd.f32 %v13763_v40, %v13774_v8 }
0x106f   : > { %v13820_v29 = vpop.f32.mrf.mxu0 }
0x1070   : > { %6561 = vmatmul.bf16.gmra.mxu0 %v6352_v39  ;;  %6610 = vmatmul.bf16.gmra.mxu1 %v6352_v39  ;;  %v6850_v6 = vadd.f32 %v6818_v10, %v13783_v5 }
0x1071   : > { %6659 = vmatmul.bf16.gmra.mxu2 %v6352_v39  ;;  %6708 = vmatmul.bf16.gmra.mxu3 %v6352_v39  ;;  %v8103_v39 = vld [vmem:[#allocation11 + $0x18] sm:$0xff] }
0x1072   : > { %v6686_v27 = vpop.f32.mrf.mxu3  ;;  %7188 = vmatpush.bf16.msrb.mxu0 %v8103_v39  ;;  %8137 = vmatpush.bf16.msra.mxu2 %v8103_v39  ;;  %v13847_v39 = vadd.f32 %v13765_v36, %v13777_v60 }
0x1076   : > { %7189 = vmatpush.bf16.msrb.mxu0 %v8102_v47  ;;  %8138 = vmatpush.bf16.msra.mxu2 %v8102_v47  ;;  %v6757_v47 = vmul.f32 0.044715, %v13824_v37 }
0x1077   : > { %v6069_v24 = vpop.xlane.xlu0 %6068 }
0x1078   : > { %v6086_v52 = vmul.f32 %v6069_v24, %v14452_v46 }
0x107a   : > { %v13760_v45 = vadd.f32 1e-05, %v6086_v52  ;;  %v13809_v24 = vpop.f32.mrf.mxu3  ;;  %v8110_v52 = vld [vmem:[#allocation11 + $0x50] sm:$0xff]  ;;  %7190 = vmatpush.bf16.msrb.mxu0 %v8101_v1  ;;  %8139 = vmatpush.bf16.msra.mxu2 %v8101_v1 }
0x107b   : > { %7238 = vmatpush.bf16.msrb.mxu1 %v8110_v52 }
0x107c   : > { %9130 = vrsqrt.f32 %v13760_v45  ;;  %vm6250_vm15 = vweird.f32 %v13760_v45 }
0x107f   : > { %7239 = vmatpush.bf16.msrb.mxu1 %v8109_v31 }
0x1082   : > { %v13767_v2 = vpop.eup %9130  ;;  %v6691_v52 = vpop.f32.mrf.mxu3 }
0x1083   : > { %v6245_v49 = vmul.f32 %v13767_v2, %v13760_v45  ;;  %vm6251_vm14 = vweird.f32 %v13767_v2  ;;  %v13834_v45 = vadd.f32 %v6686_v27, %v13777_v60  ;;  %v6642_v27 = vpop.f32.mrf.mxu2 }
0x1084   : > { %vm13826_vm1 = vmor %vm6250_vm15, %vm6251_vm14 }
0x1085   : > { %v6246_v28 = vmul.f32 %v13767_v2, %v6245_v49  ;;  %v6758_v10 = vmul.f32 0.044715, %v13834_v45 }
0x1087   : > { %v6247_v3 = vmul.f32 0.5, %v6246_v28  ;;  %v6815_v28 = vmul.f32 %v6783_v50, %v13787_v48  ;;  %v8108_v50 = vld [vmem:[#allocation11 + $0x40] sm:$0xff] }
0x1088   : > { %7240 = vmatpush.bf16.msrb.mxu1 %v8108_v50 }
0x1089   : > { %v6248_v41 = vsub.f32 1.5, %v6247_v3  ;;  %v6847_v35 = vadd.f32 %v6815_v28, %v13787_v48 }
0x108b   : > { %v6249_v56 = vmul.f32 %v13767_v2, %v6248_v41  ;;  %v6879_v36 = vmul.f32 0.7978846, %v6847_v35 }
0x108d   : > { %v6253_v3 = vsel %vm13826_vm1, %v13767_v2, %v6249_v56  ;;  %v8100_v2 = vld [vmem:[#allocation11] sm:$0xff] }
0x108e   : > { %v6278_v40 = vmul.f32 %v6253_v3, %v13718_v55  ;;  %7191 = vmatpush.bf16.msrb.mxu0 %v8100_v2  ;;  %v6789_v55 = vmul.f32 %v6757_v47, %v13824_v37  ;;  %8140 = vmatpush.bf16.msra.mxu2 %v8100_v2 }
0x1090   : > { %v6295_v43 = vmul.f32 %v13656_v54, %v6278_v40 }
0x1091   : > { %v6071_v19 = vpop.xlane.xlu1 %6070 }
0x1092   : > { %v6087_v11 = vmul.f32 %v6071_v19, %v14452_v46  ;;  %v13801_v46 = vpop.f32.mrf.mxu1  ;;  %v6816_v19 = vmul.f32 %v6784_v61, %v13791_v4 }
0x1094   : > { %v13794_v53 = vadd.f32 1e-05, %v6087_v11  ;;  %v6849_v11 = vadd.f32 %v6817_v30, %v13780_v58  ;;  %v6848_v41 = vadd.f32 %v6816_v19, %v13791_v4  ;;  %v6882_v30 = vmul.f32 0.7978846, %v6850_v6  ;;  %v13860_v6 = vpop.f32.mrf.mxu0 }
0x1095   : > { %v6756_v19 = vmul.f32 0.044715, %v13847_v39 }
0x1096   : > { %9132 = vrsqrt.f32 %v13794_v53  ;;  %v6881_v61 = vmul.f32 0.7978846, %v6849_v11  ;;  %vm6260_vm3 = vweird.f32 %v13794_v53  ;;  %v6880_v28 = vmul.f32 0.7978846, %v6848_v41 }
0x1097   : > { %v6788_v1 = vmul.f32 %v6756_v19, %v13847_v39  ;;  %v6312_v41 = vadd.f32 %v13669_v42, %v6295_v43  ;;  %v6721_v43 = vmul.f32 0.5, %v13780_v58 }
0x1098   : > { %9134 = vtanh.f32 %v6881_v61 }
0x1099   : > { %9136 = vtanh.f32 %v6882_v30  ;;  %v6820_v40 = vmul.f32 %v6788_v1, %v13847_v39 }
0x109a   : > { %v13830_v33 = vpop.f32.mrf.mxu1  ;;  %9138 = vtanh.f32 %v6879_v36 }
0x109b   : > { %9140 = vtanh.f32 %v6880_v28  ;;  %v13888_v28 = vadd.f32 %v6691_v52, %v13777_v60  ;;  %v13900_v52 = vadd.f32 %v13809_v24, %v13777_v60 }
0x109c   : > { %v9133_v15 = vpop.eup %9132  ;;  %v13903_v1 = vpop.f32.mrf.mxu0 }
0x109d   : > { %v6255_v49 = vmul.f32 %v9133_v15, %v13794_v53  ;;  %vm6261_vm2 = vweird.f32 %v9133_v15  ;;  %v6790_v53 = vmul.f32 %v6758_v10, %v13834_v45  ;;  %v13878_v10 = vadd.f32 %v6642_v27, %v13774_v8 }
0x109e   : > { %vm6262_vm4 = vmor %vm6260_vm3, %vm6261_vm2  ;;  %v9135_v50 = vpop.eup %9134 }
0x109f   : > { %v6256_v20 = vmul.f32 %v9133_v15, %v6255_v49  ;;  %v6755_v49 = vmul.f32 0.044715, %v13842_v25  ;;  %v6822_v2 = vmul.f32 %v6790_v53, %v13834_v45  ;;  %v9137_v47 = vpop.eup %9136  ;;  %v6945_v27 = vadd.f32 1.0, %v9135_v50 }
0x10a0   : > { %v9139_v30 = vpop.eup %9138  ;;  %v6852_v53 = vadd.f32 %v6820_v40, %v13847_v39 }
0x10a1   : > { %v6257_v57 = vmul.f32 0.5, %v6256_v20  ;;  %v6787_v3 = vmul.f32 %v6755_v49, %v13842_v25  ;;  %v9141_v36 = vpop.eup %9140  ;;  %v13885_v49 = vperm.slane %v13769_v32, 1  ;;  %v6854_v19 = vadd.f32 %v6822_v2, %v13834_v45 }
0x10a2   : > { %v6977_v50 = vmul.f32 %v6945_v27, %v6721_v43 }
0x10a3   : > { %v6258_v62 = vsub.f32 1.5, %v6257_v57  ;;  %v13864_v57 = vpop.f32.mrf.mxu1  ;;  %v6886_v24 = vmul.f32 0.7978846, %v6854_v19  ;;  %v6582_v27 = vadd.f32 %v13801_v46, %v13885_v49 }
0x10a5   : > { %v6259_v56 = vmul.f32 %v9133_v15, %v6258_v62 }
0x10a7   : > { %v6263_v20 = vsel %vm6262_vm4, %v9133_v15, %v6259_v56 }
0x10a8   : > { %v6279_v11 = vmul.f32 %v6263_v20, %v13728_v26  ;;  %v6821_v26 = vmul.f32 %v6789_v55, %v13824_v37  ;;  %v6946_v20 = vadd.f32 1.0, %v9137_v47  ;;  %v13893_v55 = vadd.f32 %v13806_v44, %v13774_v8 }
0x10aa   : > { %v6296_v15 = vmul.f32 %v13656_v54, %v6279_v11  ;;  %v13867_v31 = vpop.f32.mrf.mxu2  ;;  %v13870_v35 = vpop.f32.mrf.mxu3  ;;  %v6819_v54 = vmul.f32 %v6787_v3, %v13842_v25  ;;  %v6853_v56 = vadd.f32 %v6821_v26, %v13824_v37  ;;  %v6943_v3 = vadd.f32 1.0, %v9139_v30 }
0x10ab   : > { %v6761_v26 = vmul.f32 0.044715, %v13878_v10  ;;  %v13908_v58 = vpop.f32.mrf.mxu1 }
0x10ac   : > { %v6313_v62 = vadd.f32 %v13669_v42, %v6296_v15  ;;  %v13882_v42 = vperm.slane %v13769_v32, 0  ;;  %v6851_v11 = vadd.f32 %v6819_v54, %v13842_v25  ;;  %v6722_v32 = vmul.f32 0.5, %v13783_v5 }
0x10ad   : > { %v6944_v15 = vadd.f32 1.0, %v9141_v36  ;;  %v6885_v44 = vmul.f32 0.7978846, %v6853_v56  ;;  %v6762_v5 = vmul.f32 0.044715, %v13888_v28  ;;  %v6793_v7 = vmul.f32 %v6761_v26, %v13878_v10  ;;  %v13927_v26 = vpop.f32.mrf.mxu0 }
0x10ae   : > { %v6353_v61 = vpack.c.bf16 %v6313_v62, %v6312_v41  ;;  %v6719_v41 = vmul.f32 0.5, %v13787_v48  ;;  %v6720_v62 = vmul.f32 0.5, %v13791_v4  ;;  %v6978_v54 = vmul.f32 %v6946_v20, %v6722_v32 }
0x10af   : > { %v6883_v40 = vmul.f32 0.7978846, %v6851_v11  ;;  %v6535_v30 = vadd.f32 %v13820_v29, %v13882_v42  ;;  %v6584_v48 = vadd.f32 %v13830_v33, %v13885_v49  ;;  %v6760_v4 = vmul.f32 0.044715, %v13900_v52 }
0x10b0   : > { %6566 = vmatmul.bf16.gmra.mxu0 %v6353_v61  ;;  %6615 = vmatmul.bf16.gmra.mxu1 %v6353_v61  ;;  %v6884_v56 = vmul.f32 0.7978846, %v6852_v53  ;;  %v6975_v36 = vmul.f32 %v6943_v3, %v6719_v41  ;;  %v6976_v59 = vmul.f32 %v6944_v15, %v6720_v62  ;;  %9142 = vtanh.f32 %v6885_v44 }
0x10b1   : > { %6664 = vmatmul.bf16.gmra.mxu2 %v6353_v61  ;;  %6713 = vmatmul.bf16.gmra.mxu3 %v6353_v61  ;;  %v6759_v61 = vmul.f32 0.044715, %v13893_v55  ;;  %v6533_v19 = vadd.f32 %v13797_v38, %v13882_v42  ;;  %v6794_v20 = vmul.f32 %v6762_v5, %v13888_v28  ;;  %9144 = vtanh.f32 %v6886_v24 }
0x10b2   : > { %v6647_v2 = vpop.f32.mrf.mxu2  ;;  %v6696_v47 = vpop.f32.mrf.mxu3  ;;  %v7009_v33 = vmul.f32 %v6977_v50, %v6535_v30  ;;  %v7010_v11 = vmul.f32 %v6978_v54, %v6584_v48  ;;  %9146 = vtanh.f32 %v6883_v40  ;;  %v6792_v43 = vmul.f32 %v6760_v4, %v13900_v52 }
0x10b3   : > { %v6791_v29 = vmul.f32 %v6759_v61, %v13893_v55  ;;  %9148 = vtanh.f32 %v6884_v56  ;;  %v6825_v32 = vmul.f32 %v6793_v7, %v13878_v10  ;;  %v7007_v53 = vmul.f32 %v6975_v36, %v6533_v19  ;;  %v13930_v5 = vpop.f32.mrf.mxu1 }
0x10b4   : > { %v7008_v3 = vmul.f32 %v6976_v59, %v6582_v27  ;;  %v6826_v38 = vmul.f32 %v6794_v20, %v13888_v28  ;;  %v6824_v24 = vmul.f32 %v6792_v43, %v13900_v52  ;;  %v13936_v7 = vadd.f32 %v6647_v2, %v13774_v8 }
0x10b5   : > { %v6823_v46 = vmul.f32 %v6791_v29, %v13893_v55  ;;  %v7071_v44 = vpack.c.bf16 %v7009_v33, %v7007_v53  ;;  %v6857_v61 = vadd.f32 %v6825_v32, %v13878_v10  ;;  %v13942_v30 = vadd.f32 %v6696_v47, %v13777_v60 }
0x10b6   : > { %v9143_v15 = vpop.eup %9142  ;;  %v7072_v41 = vpack.c.bf16 %v7010_v11, %v7008_v3  ;;  %v6858_v48 = vadd.f32 %v6826_v38, %v13888_v28  ;;  %v13947_v4 = vadd.f32 %v13867_v31, %v13774_v8  ;;  %v13952_v19 = vadd.f32 %v13870_v35, %v13777_v60 }
0x10b7   : > { %v9145_v62 = vpop.eup %9144  ;;  %v6949_v56 = vadd.f32 1.0, %v9143_v15  ;;  %v6855_v2 = vadd.f32 %v6823_v46, %v13893_v55  ;;  %v6725_v27 = vmul.f32 0.5, %v13824_v37  ;;  %v6726_v20 = vmul.f32 0.5, %v13834_v45 }
0x10b8   : > { %v9147_v54 = vpop.eup %9146  ;;  %v6950_v36 = vadd.f32 1.0, %v9145_v62  ;;  %v6856_v47 = vadd.f32 %v6824_v24, %v13900_v52  ;;  %v6765_v29 = vmul.f32 0.044715, %v13936_v7  ;;  %v6889_v31 = vmul.f32 0.7978846, %v6857_v61  ;;  %v6544_v62 = vpop.f32.mrf.mxu0 }
0x10b9   : > { %v9149_v40 = vpop.eup %9148  ;;  %v6947_v33 = vadd.f32 1.0, %v9147_v54  ;;  %v6766_v43 = vmul.f32 0.044715, %v13942_v30  ;;  %v6723_v32 = vmul.f32 0.5, %v13842_v25  ;;  %v6724_v53 = vmul.f32 0.5, %v13847_v39 }
0x10ba   : > { %v13933_v50 = vpop.f32.mrf.mxu2  ;;  %v13938_v59 = vpop.f32.mrf.mxu3  ;;  %v6948_v11 = vadd.f32 1.0, %v9149_v40  ;;  %v6890_v3 = vmul.f32 0.7978846, %v6858_v48  ;;  %v6763_v35 = vmul.f32 0.044715, %v13947_v4  ;;  %v6981_v38 = vmul.f32 %v6949_v56, %v6725_v27 }
0x10bb   : > { %v6982_v37 = vmul.f32 %v6950_v36, %v6726_v20  ;;  %v6887_v15 = vmul.f32 0.7978846, %v6855_v2  ;;  %v6540_v45 = vadd.f32 %v13903_v1, %v13882_v42  ;;  %v6589_v46 = vadd.f32 %v13908_v58, %v13885_v49  ;;  %v6593_v40 = vpop.f32.mrf.mxu1 }
0x10bc   : > { %v6797_v25 = vmul.f32 %v6765_v29, %v13936_v7  ;;  %v6979_v24 = vmul.f32 %v6947_v33, %v6723_v32  ;;  %v6980_v39 = vmul.f32 %v6948_v11, %v6724_v53  ;;  %9150 = vtanh.f32 %v6889_v31 }
0x10bd   : > { %v6538_v54 = vadd.f32 %v13860_v6, %v13882_v42  ;;  %v6587_v61 = vadd.f32 %v13864_v57, %v13885_v49  ;;  %v6798_v1 = vmul.f32 %v6766_v43, %v13942_v30  ;;  %9152 = vtanh.f32 %v6890_v3 }
0x10be   : > { %v6795_v58 = vmul.f32 %v6763_v35, %v13947_v4  ;;  %v7013_v36 = vmul.f32 %v6981_v38, %v6540_v45  ;;  %v7014_v2 = vmul.f32 %v6982_v37, %v6589_v46  ;;  %9154 = vtanh.f32 %v6887_v15 }
0x10bf   : > { %v6829_v20 = vmul.f32 %v6797_v25, %v13936_v7  ;;  %v7011_v6 = vmul.f32 %v6979_v24, %v6538_v54  ;;  %v6830_v57 = vmul.f32 %v6798_v1, %v13942_v30  ;;  %v6730_v1 = vmul.f32 0.5, %v13888_v28 }
0x10c0   : > { %7192 = vmatmul.bf16.vlgmr.msrb.gmra.mxu0 %v7071_v44  ;;  %7241 = vmatmul.bf16.vlgmr.msrb.gmra.mxu1 %v7072_v41  ;;  %v6764_v44 = vmul.f32 0.044715, %v13952_v19  ;;  %v6888_v41 = vmul.f32 0.7978846, %v6856_v47  ;;  %v7012_v47 = vmul.f32 %v6980_v39, %v6587_v61  ;;  %v6827_v33 = vmul.f32 %v6795_v58, %v13947_v4  ;;  %v13983_v37 = vpop.f32.mrf.mxu0 }
0x10c1   : > { %v7073_v11 = vpack.c.bf16 %v7013_v36, %v7011_v6  ;;  %v6861_v35 = vadd.f32 %v6829_v20, %v13936_v7  ;;  %v6862_v46 = vadd.f32 %v6830_v57, %v13942_v30  ;;  %v13998_v39 = vadd.f32 %v13938_v59, %v13777_v60 }
0x10c2   : > { %v6652_v48 = vpop.f32.mrf.mxu2  ;;  %v6701_v56 = vpop.f32.mrf.mxu3  ;;  %v6796_v27 = vmul.f32 %v6764_v44, %v13952_v19  ;;  %9156 = vtanh.f32 %v6888_v41  ;;  %v7074_v31 = vpack.c.bf16 %v7014_v2, %v7012_v47  ;;  %v13993_v44 = vadd.f32 %v13933_v50, %v13774_v8 }
0x10c3   : > { %v9151_v29 = vpop.eup %9150  ;;  %v13980_v3 = vadd.f32 %v6652_v48, %v13774_v8  ;;  %v13985_v15 = vpop.f32.mrf.mxu1  ;;  %v13988_v45 = vadd.f32 %v6701_v56, %v13777_v60  ;;  %v6859_v24 = vadd.f32 %v6827_v33, %v13947_v4  ;;  %v6729_v61 = vmul.f32 0.5, %v13878_v10 }
0x10c4   : > { %v9153_v43 = vpop.eup %9152  ;;  %v6828_v32 = vmul.f32 %v6796_v27, %v13952_v19  ;;  %v6953_v41 = vadd.f32 1.0, %v9151_v29  ;;  %v6893_v2 = vmul.f32 0.7978846, %v6861_v35  ;;  %v6727_v20 = vmul.f32 0.5, %v13893_v55 }
0x10c5   : > { %v9155_v53 = vpop.eup %9154  ;;  %v6954_v25 = vadd.f32 1.0, %v9153_v43  ;;  %v6769_v58 = vmul.f32 0.044715, %v13980_v3  ;;  %v6770_v27 = vmul.f32 0.044715, %v13988_v45  ;;  %v6728_v59 = vmul.f32 0.5, %v13900_v52 }
0x10c6   : > { %v6860_v48 = vadd.f32 %v6828_v32, %v13952_v19  ;;  %v6951_v50 = vadd.f32 1.0, %v9155_v53  ;;  %v6894_v6 = vmul.f32 0.7978846, %v6862_v46  ;;  %v6767_v47 = vmul.f32 0.044715, %v13993_v44 }
0x10c7   : > { %v6985_v10 = vmul.f32 %v6953_v41, %v6729_v61  ;;  %v6986_v57 = vmul.f32 %v6954_v25, %v6730_v1  ;;  %v6891_v28 = vmul.f32 0.7978846, %v6859_v24  ;;  %v6545_v29 = vadd.f32 %v6544_v62, %v13882_v42 }
0x10c8   : > { %v9157_v38 = vpop.eup %9156  ;;  %v6594_v33 = vadd.f32 %v6593_v40, %v13885_v49  ;;  %v6801_v43 = vmul.f32 %v6769_v58, %v13980_v3  ;;  %v6983_v32 = vmul.f32 %v6951_v50, %v6727_v20  ;;  %9158 = vtanh.f32 %v6893_v2  ;;  %v6549_v46 = vpop.f32.mrf.mxu0 }
0x10c9   : > { %v6952_v36 = vadd.f32 1.0, %v9157_v38  ;;  %v6543_v55 = vadd.f32 %v13927_v26, %v13882_v42  ;;  %v6592_v52 = vadd.f32 %v13930_v5, %v13885_v49  ;;  %v6802_v35 = vmul.f32 %v6770_v27, %v13988_v45 }
0x10ca   : > { %v6655_v54 = vpop.f32.mrf.mxu2  ;;  %v6704_v56 = vpop.f32.mrf.mxu3  ;;  %9160 = vtanh.f32 %v6894_v6  ;;  %v6799_v62 = vmul.f32 %v6767_v47, %v13993_v44  ;;  %v7017_v40 = vmul.f32 %v6985_v10, %v6545_v29  ;;  %v7018_v38 = vmul.f32 %v6986_v57, %v6594_v33 }
0x10cb   : > { %v6984_v53 = vmul.f32 %v6952_v36, %v6728_v59  ;;  %9162 = vtanh.f32 %v6891_v28  ;;  %v6598_v41 = vpop.f32.mrf.mxu1  ;;  %v6833_v24 = vmul.f32 %v6801_v43, %v13980_v3  ;;  %v7015_v61 = vmul.f32 %v6983_v32, %v6543_v55 }
0x10cc   : > { %v6834_v1 = vmul.f32 %v6802_v35, %v13988_v45  ;;  %v6831_v58 = vmul.f32 %v6799_v62, %v13993_v44  ;;  %v14032_v29 = vadd.f32 %v6655_v54, %v13774_v8  ;;  %v14036_v43 = vadd.f32 %v6704_v56, %v13777_v60 }
0x10cd   : > { %v7016_v26 = vmul.f32 %v6984_v53, %v6592_v52  ;;  %v7075_v36 = vpack.c.bf16 %v7017_v40, %v7015_v61  ;;  %v6865_v47 = vadd.f32 %v6833_v24, %v13980_v3  ;;  %v6733_v32 = vmul.f32 0.5, %v13936_v7 }
0x10ce   : > { %v6866_v28 = vadd.f32 %v6834_v1, %v13988_v45  ;;  %v6734_v53 = vmul.f32 0.5, %v13942_v30  ;;  %v6731_v56 = vmul.f32 0.5, %v13947_v4  ;;  %v6732_v24 = vmul.f32 0.5, %v13952_v19 }
0x10cf   : > { %v7076_v2 = vpack.c.bf16 %v7018_v38, %v7016_v26  ;;  %v6897_v40 = vmul.f32 0.7978846, %v6865_v47  ;;  %v6771_v30 = vmul.f32 0.044715, %v14032_v29  ;;  %v6548_v4 = vadd.f32 %v13983_v37, %v13882_v42 }
0x10d0   : > { %7197 = vmatmul.bf16.gmra.mxu0 %v7073_v11  ;;  %7246 = vmatmul.bf16.gmra.mxu1 %v7074_v31  ;;  %v6768_v11 = vmul.f32 0.044715, %v13998_v39  ;;  %v6892_v31 = vmul.f32 0.7978846, %v6860_v48  ;;  %v9159_v48 = vpop.eup %9158  ;;  %v14042_v54 = vpop.f32.mrf.mxu0  ;;  %v6898_v7 = vmul.f32 0.7978846, %v6866_v28  ;;  %v6597_v19 = vadd.f32 %v13985_v15, %v13885_v49 }
0x10d1   : > { %v9161_v27 = vpop.eup %9160  ;;  %v6957_v33 = vadd.f32 1.0, %v9159_v48  ;;  %v6599_v48 = vadd.f32 %v6598_v41, %v13885_v49 }
0x10d2   : > { %v6800_v25 = vmul.f32 %v6768_v11, %v13998_v39  ;;  %9164 = vtanh.f32 %v6892_v31  ;;  %v6657_v5 = vpop.f32.mrf.mxu2  ;;  %v6706_v50 = vpop.f32.mrf.mxu3  ;;  %v6958_v11 = vadd.f32 1.0, %v9161_v27  ;;  %v6863_v31 = vadd.f32 %v6831_v58, %v13993_v44 }
0x10d3   : > { %v9163_v59 = vpop.eup %9162  ;;  %v14024_v6 = vadd.f32 %v6657_v5, %v13774_v8  ;;  %v14028_v57 = vadd.f32 %v6706_v50, %v13777_v60  ;;  %v14044_v38 = vpop.f32.mrf.mxu1  ;;  %v6989_v61 = vmul.f32 %v6957_v33, %v6733_v32  ;;  %v6550_v5 = vadd.f32 %v6549_v46, %v13882_v42 }
0x10d4   : > { %v6832_v20 = vmul.f32 %v6800_v25, %v13998_v39  ;;  %v6955_v35 = vadd.f32 1.0, %v9163_v59  ;;  %v6990_v26 = vmul.f32 %v6958_v11, %v6734_v53  ;;  %v6895_v1 = vmul.f32 0.7978846, %v6863_v31 }
0x10d5   : > { %v6773_v52 = vmul.f32 0.044715, %v14024_v6  ;;  %v6774_v25 = vmul.f32 0.044715, %v14028_v57  ;;  %v6772_v58 = vmul.f32 0.044715, %v14036_v43  ;;  %9166 = vtanh.f32 %v6897_v40 }
0x10d6   : > { %v6864_v55 = vadd.f32 %v6832_v20, %v13998_v39  ;;  %9168 = vtanh.f32 %v6898_v7  ;;  %v6803_v46 = vmul.f32 %v6771_v30, %v14032_v29  ;;  %v7021_v41 = vmul.f32 %v6989_v61, %v6550_v5 }
0x10d7   : > { %v6806_v20 = vmul.f32 %v6774_v25, %v14028_v57  ;;  %v7022_v59 = vmul.f32 %v6990_v26, %v6599_v48  ;;  %9170 = vtanh.f32 %v6895_v1  ;;  %v6804_v47 = vmul.f32 %v6772_v58, %v14036_v43 }
0x10d8   : > { %v9165_v10 = vpop.eup %9164  ;;  %v6896_v50 = vmul.f32 0.7978846, %v6864_v55  ;;  %v6835_v15 = vmul.f32 %v6803_v46, %v14032_v29  ;;  %v6554_v55 = vpop.f32.mrf.mxu0  ;;  %v6737_v61 = vmul.f32 0.5, %v13980_v3  ;;  %v6738_v58 = vmul.f32 0.5, %v13988_v45 }
0x10d9   : > { %v6956_v62 = vadd.f32 1.0, %v9165_v10  ;;  %v6838_v37 = vmul.f32 %v6806_v20, %v14028_v57  ;;  %v6736_v3 = vmul.f32 0.5, %v13998_v39 }
0x10da   : > { %9172 = vtanh.f32 %v6896_v50  ;;  %v6867_v30 = vadd.f32 %v6835_v15, %v14032_v29 }
0x10db   : > { %v6988_v27 = vmul.f32 %v6956_v62, %v6732_v24  ;;  %v9167_v11 = vpop.eup %9166 }
0x10dc   : > { %v9169_v53 = vpop.eup %9168  ;;  %v6961_v24 = vadd.f32 1.0, %v9167_v11 }
0x10dd   : > { %v7020_v33 = vmul.f32 %v6988_v27, %v6597_v19  ;;  %v9171_v62 = vpop.eup %9170  ;;  %v6962_v7 = vadd.f32 1.0, %v9169_v53 }
0x10de   : > { %v6959_v48 = vadd.f32 1.0, %v9171_v62  ;;  %v6993_v20 = vmul.f32 %v6961_v24, %v6737_v61 }
0x10df   : > { %v7078_v32 = vpack.c.bf16 %v7022_v59, %v7020_v33  ;;  %v6994_v46 = vmul.f32 %v6962_v7, %v6738_v58  ;;  %v6555_v59 = vadd.f32 %v6554_v55, %v13882_v42 }
0x10e0   : > { %7202 = vmatmul.bf16.gmra.mxu0 %v7075_v36  ;;  %7251 = vmatmul.bf16.gmra.mxu1 %v7076_v2  ;;  %v6805_v36 = vmul.f32 %v6773_v52, %v14024_v6  ;;  %v6987_v2 = vmul.f32 %v6955_v35, %v6731_v56  ;;  %v6603_v52 = vpop.f32.mrf.mxu1  ;;  %v6836_v35 = vmul.f32 %v6804_v47, %v14036_v43  ;;  %v9173_v25 = vpop.eup %9172 }
0x10e1   : > { %v6870_v56 = vadd.f32 %v6838_v37, %v14028_v57  ;;  %v6960_v50 = vadd.f32 1.0, %v9173_v25  ;;  %v6557_v11 = vpop.f32.mrf.mxu0 }
0x10e2   : > { %v6837_v10 = vmul.f32 %v6805_v36, %v14024_v6  ;;  %v7019_v28 = vmul.f32 %v6987_v2, %v6548_v4  ;;  %v6868_v26 = vadd.f32 %v6836_v35, %v14036_v43  ;;  %v6735_v4 = vmul.f32 0.5, %v13993_v44 }
0x10e3   : > { %v6902_v19 = vmul.f32 0.7978846, %v6870_v56  ;;  %v6992_v37 = vmul.f32 %v6960_v50, %v6736_v3  ;;  %v6553_v44 = vadd.f32 %v14042_v54, %v13882_v42 }
0x10e4   : > { %v7077_v31 = vpack.c.bf16 %v7021_v41, %v7019_v28  ;;  %v6869_v40 = vadd.f32 %v6837_v10, %v14024_v6  ;;  %v6899_v41 = vmul.f32 0.7978846, %v6867_v30  ;;  %v6900_v10 = vmul.f32 0.7978846, %v6868_v26 }
0x10e5   : > { %v6604_v28 = vadd.f32 %v6603_v52, %v13885_v49  ;;  %v6991_v33 = vmul.f32 %v6959_v48, %v6735_v4 }
0x10e6   : > { %v6901_v36 = vmul.f32 0.7978846, %v6869_v40 }
0x10e7   : > { %v7026_v53 = vmul.f32 %v6994_v46, %v6604_v28  ;;  %v7023_v40 = vmul.f32 %v6991_v33, %v6553_v44 }
0x10e8   : > { %9174 = vtanh.f32 %v6901_v36  ;;  %v6606_v15 = vpop.f32.mrf.mxu1 }
0x10e9   : > { %9176 = vtanh.f32 %v6902_v19 }
0x10ea   : > { %9178 = vtanh.f32 %v6899_v41 }
0x10eb   : > { %9180 = vtanh.f32 %v6900_v10  ;;  %v6742_v10 = vmul.f32 0.5, %v14028_v57 }
0x10ee   : > { %v9175_v24 = vpop.eup %9174 }
0x10ef   : > { %v9177_v30 = vpop.eup %9176  ;;  %v6965_v4 = vadd.f32 1.0, %v9175_v24  ;;  %v6607_v24 = vadd.f32 %v6606_v15, %v13885_v49 }
0x10f0   : > { %7207 = vmatmul.bf16.gmra.mxu0 %v7077_v31  ;;  %7256 = vmatmul.bf16.gmra.mxu1 %v7078_v32  ;;  %v6602_v31 = vadd.f32 %v14044_v38, %v13885_v49  ;;  %v7025_v32 = vmul.f32 %v6993_v20, %v6555_v59  ;;  %v6966_v19 = vadd.f32 1.0, %v9177_v30  ;;  %v6559_v20 = vpop.f32.mrf.mxu0  ;;  %v6608_v3 = vpop.f32.mrf.mxu1  ;;  %v6741_v59 = vmul.f32 0.5, %v14024_v6 }
0x10f2   : > { %v7024_v54 = vmul.f32 %v6992_v37, %v6602_v31  ;;  %v7079_v7 = vpack.c.bf16 %v7025_v32, %v7023_v40  ;;  %v6997_v31 = vmul.f32 %v6965_v4, %v6741_v59  ;;  %v6740_v32 = vmul.f32 0.5, %v14036_v43 }
0x10f4   : > { %v6660_v1 = vpop.f32.mrf.mxu2  ;;  %v6709_v5 = vpop.f32.mrf.mxu3  ;;  %v7080_v38 = vpack.c.bf16 %v7026_v53, %v7024_v54  ;;  %v6998_v53 = vmul.f32 %v6966_v19, %v6742_v10  ;;  %v6558_v54 = vadd.f32 %v6557_v11, %v13882_v42 }
0x10f5   : > { %v14072_v2 = vadd.f32 %v6660_v1, %v13774_v8  ;;  %v14075_v27 = vadd.f32 %v6709_v5, %v13777_v60  ;;  %v9179_v5 = vpop.eup %9178 }
0x10f6   : > { %v9181_v58 = vpop.eup %9180 }
0x10f7   : > { %v6775_v45 = vmul.f32 0.044715, %v14072_v2  ;;  %v6776_v47 = vmul.f32 0.044715, %v14075_v27  ;;  %v6964_v28 = vadd.f32 1.0, %v9181_v58 }
0x10f8   : > { %v6562_v43 = vpop.f32.mrf.mxu0 }
0x10f9   : > { %v6807_v39 = vmul.f32 %v6775_v45, %v14072_v2  ;;  %v6808_v55 = vmul.f32 %v6776_v47, %v14075_v27  ;;  %v6963_v47 = vadd.f32 1.0, %v9179_v5  ;;  %v6996_v57 = vmul.f32 %v6964_v28, %v6740_v32 }
0x10fb   : > { %v6839_v52 = vmul.f32 %v6807_v39, %v14072_v2  ;;  %v6840_v61 = vmul.f32 %v6808_v55, %v14075_v27  ;;  %v6739_v39 = vmul.f32 0.5, %v14032_v29  ;;  %v6560_v55 = vadd.f32 %v6559_v20, %v13882_v42 }
0x10fc   : > { %v6662_v35 = vpop.f32.mrf.mxu2  ;;  %v6711_v62 = vpop.f32.mrf.mxu3 }
0x10fd   : > { %v6663_v25 = vadd.f32 %v6662_v35, %v13774_v8  ;;  %v14092_v56 = vadd.f32 %v6711_v62, %v13777_v60  ;;  %v6871_v48 = vadd.f32 %v6839_v52, %v14072_v2  ;;  %v6872_v45 = vadd.f32 %v6840_v61, %v14075_v27 }
0x10fe   : > { %v6609_v62 = vadd.f32 %v6608_v3, %v13885_v49  ;;  %v6995_v40 = vmul.f32 %v6963_v47, %v6739_v39  ;;  %v7029_v29 = vmul.f32 %v6997_v31, %v6560_v55  ;;  %v7028_v61 = vmul.f32 %v6996_v57, %v6607_v24 }
0x10ff   : > { %v6777_v26 = vmul.f32 0.044715, %v6663_v25  ;;  %v6778_v1 = vmul.f32 0.044715, %v14092_v56  ;;  %v6903_v33 = vmul.f32 0.7978846, %v6871_v48 }
0x1100   : > { %7212 = vmatmul.bf16.gmra.mxu0 %v7079_v7  ;;  %7261 = vmatmul.bf16.gmra.mxu1 %v7080_v38  ;;  %v6904_v6 = vmul.f32 0.7978846, %v6872_v45  ;;  %v7030_v7 = vmul.f32 %v6998_v53, %v6609_v62  ;;  %v6611_v38 = vpop.f32.mrf.mxu1  ;;  %v7027_v30 = vmul.f32 %v6995_v40, %v6558_v54  ;;  %v6745_v4 = vmul.f32 0.5, %v6663_v25  ;;  %v6564_v3 = vpop.f32.mrf.mxu0 }
0x1101   : > { %v6809_v50 = vmul.f32 %v6777_v26, %v6663_v25  ;;  %v6810_v36 = vmul.f32 %v6778_v1, %v14092_v56  ;;  %9182 = vtanh.f32 %v6903_v33  ;;  %v6746_v19 = vmul.f32 0.5, %v14092_v56 }
0x1102   : > { %v7081_v1 = vpack.c.bf16 %v7029_v29, %v7027_v30  ;;  %v7082_v5 = vpack.c.bf16 %v7030_v7, %v7028_v61  ;;  %v6744_v45 = vmul.f32 0.5, %v14075_v27  ;;  %v6565_v10 = vadd.f32 %v6564_v3, %v13882_v42 }
0x1103   : > { %v6841_v46 = vmul.f32 %v6809_v50, %v6663_v25  ;;  %v6842_v41 = vmul.f32 %v6810_v36, %v14092_v56 }
0x1105   : > { %v6873_v37 = vadd.f32 %v6841_v46, %v6663_v25  ;;  %v6874_v44 = vadd.f32 %v6842_v41, %v14092_v56  ;;  %v6743_v41 = vmul.f32 0.5, %v14072_v2  ;;  %v6563_v25 = vadd.f32 %v6562_v43, %v13882_v42  ;;  %v9200_v43 = vld [vmem:[#allocation5] sm:$0xff] }
0x1107   : > { %v6905_v52 = vmul.f32 0.7978846, %v6873_v37  ;;  %v6906_v35 = vmul.f32 0.7978846, %v6874_v44  ;;  %v9183_v26 = vpop.eup %9182  ;;  %v6612_v44 = vadd.f32 %v6611_v38, %v13885_v49  ;;  %v14126_v38 = vperm.slane %v9200_v43, 6 }
0x1108   : > { %v6967_v15 = vadd.f32 1.0, %v9183_v26  ;;  %v6613_v46 = vpop.f32.mrf.mxu1 }
0x1109   : > { %9184 = vtanh.f32 %v6905_v52  ;;  %v6614_v28 = vadd.f32 %v6613_v46, %v13885_v49 }
0x110a   : > { %9186 = vtanh.f32 %v6906_v35  ;;  %v6999_v33 = vmul.f32 %v6967_v15, %v6743_v41 }
0x110b   : > { %9188 = vtanh.f32 %v6904_v6 }
0x110c   : > { %v7031_v31 = vmul.f32 %v6999_v33, %v6563_v25 }
0x110f   : > { %v9185_v48 = vpop.eup %9184 }
0x1110   : > { %v9187_v58 = vpop.eup %9186  ;;  %7217 = vmatmul.bf16.gmra.mxu0 %v7081_v1  ;;  %7266 = vmatmul.bf16.gmra.mxu1 %v7082_v5  ;;  %v6969_v11 = vadd.f32 1.0, %v9185_v48 }
0x1111   : > { %v9189_v50 = vpop.eup %9188  ;;  %v6970_v36 = vadd.f32 1.0, %v9187_v58 }
0x1112   : > { %v6968_v20 = vadd.f32 1.0, %v9189_v50  ;;  %v7001_v59 = vmul.f32 %v6969_v11, %v6745_v4 }
0x1113   : > { %v7002_v47 = vmul.f32 %v6970_v36, %v6746_v19 }
0x1114   : > { %v7000_v37 = vmul.f32 %v6968_v20, %v6744_v45  ;;  %v7033_v56 = vmul.f32 %v7001_v59, %v6565_v10 }
0x1115   : > { %v7034_v39 = vmul.f32 %v7002_v47, %v6614_v28 }
0x1116   : > { %v7032_v32 = vmul.f32 %v7000_v37, %v6612_v44  ;;  %v7083_v53 = vpack.c.bf16 %v7033_v56, %v7031_v31 }
0x1118   : > { %v7084_v2 = vpack.c.bf16 %v7034_v39, %v7032_v32 }
0x1120   : > { %7222 = vmatmul.bf16.gmra.mxu0 %v7083_v53  ;;  %7271 = vmatmul.bf16.gmra.mxu1 %v7084_v2 }
0x112d   : > { %v14116_v27 = vpop.f32.mrf.mxu0  ;;  %v14118_v55 = vpop.f32.mrf.mxu1 }
0x1134   : > { %v6665_v52 = vpop.f32.mrf.mxu2  ;;  %v6714_v6 = vpop.f32.mrf.mxu3 }
0x1135   : > { %v6666_v35 = vadd.f32 %v6665_v52, %v13774_v8  ;;  %v6715_v62 = vadd.f32 %v6714_v6, %v13777_v60  ;;  %v14122_v40 = vpop.f32.mrf.mxu0  ;;  %v14124_v57 = vpop.f32.mrf.mxu1 }
0x1137   : > { %v6779_v54 = vmul.f32 0.044715, %v6666_v35  ;;  %v6780_v24 = vmul.f32 0.044715, %v6715_v62  ;;  %v6747_v6 = vmul.f32 0.5, %v6666_v35 }
0x1139   : > { %v6811_v29 = vmul.f32 %v6779_v54, %v6666_v35  ;;  %v6812_v7 = vmul.f32 %v6780_v24, %v6715_v62 }
0x113b   : > { %v6843_v30 = vmul.f32 %v6811_v29, %v6666_v35  ;;  %v6844_v61 = vmul.f32 %v6812_v7, %v6715_v62  ;;  %v6748_v29 = vmul.f32 0.5, %v6715_v62 }
0x113c   : > { %v6667_v26 = vpop.f32.mrf.mxu2  ;;  %v6716_v1 = vpop.f32.mrf.mxu3 }
0x113d   : > { %v6875_v5 = vadd.f32 %v6843_v30, %v6666_v35  ;;  %v6668_v48 = vadd.f32 %v6667_v26, %v13774_v8  ;;  %v6717_v58 = vadd.f32 %v6716_v1, %v13777_v60  ;;  %v7193_v50 = vpop.f32.mrf.mxu0  ;;  %v7242_v11 = vpop.f32.mrf.mxu1  ;;  %v6876_v36 = vadd.f32 %v6844_v61, %v6715_v62 }
0x113e   : > { %v7194_v4 = vadd.f32 %v7193_v50, %v14126_v38  ;;  %v6568_v50 = vadd.f32 %v14116_v27, %v13882_v42  ;;  %v6617_v62 = vadd.f32 %v14118_v55, %v13885_v49 }
0x113f   : > { %v6907_v15 = vmul.f32 0.7978846, %v6875_v5  ;;  %v6781_v19 = vmul.f32 0.044715, %v6668_v48  ;;  %v6782_v20 = vmul.f32 0.044715, %v6717_v58 }
0x1140   : > { %v7243_v3 = vadd.f32 %v7242_v11, %v7194_v4  ;;  %v6908_v46 = vmul.f32 0.7978846, %v6876_v36  ;;  %v6749_v30 = vmul.f32 0.5, %v6668_v48  ;;  %v6750_v1 = vmul.f32 0.5, %v6717_v58 }
0x1141   : > { %v6813_v41 = vmul.f32 %v6781_v19, %v6668_v48  ;;  %v6814_v59 = vmul.f32 %v6782_v20, %v6717_v58  ;;  %9190 = vtanh.f32 %v6907_v15  ;;  %v6570_v11 = vadd.f32 %v14122_v40, %v13882_v42 }
0x1142   : > { %v7282_v45 = vadd.f32 %v7243_v3, %v13305_v0  ;;  %9192 = vtanh.f32 %v6908_v46 }
0x1143   : > { %v6845_v8 = vmul.f32 %v6813_v41, %v6668_v48  ;;  %v6846_v47 = vmul.f32 %v6814_v59, %v6717_v58 }
0x1144   : > { %7298 = vst [vmem:[%s14135_s7] sm:$0xff] %v7282_v45 }
0x1145   : > { %v6877_v60 = vadd.f32 %v6845_v8, %v6668_v48  ;;  %v7195_v10 = vpop.f32.mrf.mxu0  ;;  %v7244_v28 = vpop.f32.mrf.mxu1  ;;  %v6878_v37 = vadd.f32 %v6846_v47, %v6717_v58  ;;  %v6619_v48 = vadd.f32 %v14124_v57, %v13885_v49 }
0x1146   : > { %v7196_v33 = vadd.f32 %v7195_v10, %v14126_v38 }
0x1147   : > { %v6909_v25 = vmul.f32 0.7978846, %v6877_v60  ;;  %v6910_v56 = vmul.f32 0.7978846, %v6878_v37  ;;  %v9191_v39 = vpop.eup %9190 }
0x1148   : > { %v7245_v44 = vadd.f32 %v7244_v28, %v7196_v33  ;;  %v9193_v0 = vpop.eup %9192  ;;  %v6971_v32 = vadd.f32 1.0, %v9191_v39 }
0x1149   : > { %9194 = vtanh.f32 %v6909_v25  ;;  %v6972_v52 = vadd.f32 1.0, %v9193_v0 }
0x114a   : > { %v7283_v31 = vadd.f32 %v7245_v44, %v13310_v13  ;;  %9196 = vtanh.f32 %v6910_v56  ;;  %v7003_v43 = vmul.f32 %v6971_v32, %v6747_v6 }
0x114b   : > { %v7004_v13 = vmul.f32 %v6972_v52, %v6748_v29 }
0x114c   : > { %7299 = vst [vmem:[%s14135_s7 + $0x8] sm:$0xff] %v7283_v31  ;;  %v7035_v58 = vmul.f32 %v7003_v43, %v6568_v50 }
0x114d   : > { %v7198_v53 = vpop.f32.mrf.mxu0  ;;  %v7247_v2 = vpop.f32.mrf.mxu1  ;;  %v7036_v27 = vmul.f32 %v7004_v13, %v6617_v62 }
0x114e   : > { %v7199_v54 = vadd.f32 %v7198_v53, %v14126_v38 }
0x114f   : > { %v9195_v24 = vpop.eup %9194 }
0x1150   : > { %v9197_v7 = vpop.eup %9196  ;;  %v6973_v61 = vadd.f32 1.0, %v9195_v24  ;;  %v7248_v26 = vadd.f32 %v7247_v2, %v7199_v54 }
0x1151   : > { %v6974_v5 = vadd.f32 1.0, %v9197_v7 }
0x1152   : > { %v7005_v35 = vmul.f32 %v6973_v61, %v6749_v30  ;;  %v7284_v36 = vadd.f32 %v7248_v26, %v13315_v16 }
0x1153   : > { %v7006_v4 = vmul.f32 %v6974_v5, %v6750_v1 }
0x1154   : > { %7300 = vst [vmem:[%s14135_s7 + $0x10] sm:$0xff] %v7284_v36  ;;  %v7037_v15 = vmul.f32 %v7005_v35, %v6570_v11 }
0x1155   : > { %v7200_v19 = vpop.f32.mrf.mxu0  ;;  %v7249_v20 = vpop.f32.mrf.mxu1  ;;  %v7038_v3 = vmul.f32 %v7006_v4, %v6619_v48 }
0x1156   : > { %v7201_v42 = vadd.f32 %v7200_v19, %v14126_v38  ;;  %v7085_v40 = vpack.c.bf16 %v7037_v15, %v7035_v58 }
0x1157   : > { %v7086_v16 = vpack.c.bf16 %v7038_v3, %v7036_v27  ;;  %v14466_v27 = vld [vmem:[#allocation28_spill] sm:$0xff] }
0x1158   : > { %v7250_v46 = vadd.f32 %v7249_v20, %v7201_v42  ;;  %7227 = vmatmul.bf16.vlgmr.msra.gmra.mxu2 %v7085_v40 }
0x1159   : > { %7276 = vmatmul.bf16.gmra.mxu1 %v7086_v16  ;;  %v14467_v16 = vld [vmem:[#allocation34_spill] sm:$0xff] }
0x115a   : > { %v7285_v49 = vadd.f32 %v7250_v46, %v13320_v9 }
0x115c   : > { %7301 = vst [vmem:[%s14135_s7 + $0x18] sm:$0xff] %v7285_v49 }
0x115d   : > { %v7203_v55 = vpop.f32.mrf.mxu0  ;;  %v7252_v57 = vpop.f32.mrf.mxu1 }
0x115e   : > { %v7204_v41 = vadd.f32 %v7203_v55, %v14126_v38 }
0x1160   : > { %v7253_v59 = vadd.f32 %v7252_v57, %v7204_v41 }
0x1162   : > { %v7286_v45 = vadd.f32 %v7253_v59, %v13325_v34 }
0x1164   : > { %7302 = vst [vmem:[%s14135_s7 + $0x20] sm:$0xff] %v7286_v45 }
0x1165   : > { %v7205_v8 = vpop.f32.mrf.mxu0  ;;  %v7254_v47 = vpop.f32.mrf.mxu1 }
0x1166   : > { %v7206_v60 = vadd.f32 %v7205_v8, %v14126_v38 }
0x1168   : > { %v7255_v10 = vadd.f32 %v7254_v47, %v7206_v60 }
0x116a   : > { %v7287_v28 = vadd.f32 %v7255_v10, %v13330_v63 }
0x116c   : > { %7303 = vst [vmem:[%s14135_s7 + $0x28] sm:$0xff] %v7287_v28 }
0x116d   : > { %v7208_v9 = vpop.f32.mrf.mxu0  ;;  %v7257_v33 = vpop.f32.mrf.mxu1 }
0x116e   : > { %v7209_v37 = vadd.f32 %v7208_v9, %v14126_v38 }
0x1170   : > { %v7258_v25 = vadd.f32 %v7257_v33, %v7209_v37 }
0x1172   : > { %v7288_v44 = vadd.f32 %v7258_v25, %v13343_v51 }
0x1174   : > { %7304 = vst [vmem:[%s14135_s7 + $0x30] sm:$0xff] %v7288_v44 }
0x1175   : > { %v7210_v34 = vpop.f32.mrf.mxu0  ;;  %v7259_v56 = vpop.f32.mrf.mxu1 }
0x1176   : > { %v7211_v39 = vadd.f32 %v7210_v34, %v14126_v38 }
0x1178   : > { %v7260_v0 = vadd.f32 %v7259_v56, %v7211_v39 }
0x117a   : > { %v7289_v31 = vadd.f32 %v7260_v0, %v13368_v17 }
0x117c   : > { %7305 = vst [vmem:[%s14135_s7 + $0x38] sm:$0xff] %v7289_v31 }
0x117d   : > { %v7213_v63 = vpop.f32.mrf.mxu0  ;;  %v7262_v32 = vpop.f32.mrf.mxu1 }
0x117e   : > { %v7214_v53 = vadd.f32 %v7213_v63, %v14126_v38 }
0x1180   : > { %v7263_v2 = vadd.f32 %v7262_v32, %v7214_v53 }
0x1182   : > { %v7290_v52 = vadd.f32 %v7263_v2, %v13379_v18 }
0x1184   : > { %7306 = vst [vmem:[%s14135_s7 + $0x40] sm:$0xff] %v7290_v52 }
0x1185   : > { %v7215_v51 = vpop.f32.mrf.mxu0  ;;  %v7264_v6 = vpop.f32.mrf.mxu1 }
0x1186   : > { %v7216_v54 = vadd.f32 %v7215_v51, %v14126_v38 }
0x1188   : > { %v7265_v24 = vadd.f32 %v7264_v6, %v7216_v54 }
0x118a   : > { %v7291_v29 = vadd.f32 %v7265_v24, %v13388_v14 }
0x118c   : > { %7307 = vst [vmem:[%s14135_s7 + $0x48] sm:$0xff] %v7291_v29 }
0x118d   : > { %v7218_v17 = vpop.f32.mrf.mxu0  ;;  %v7267_v7 = vpop.f32.mrf.mxu1 }
0x118e   : > { %v7219_v43 = vadd.f32 %v7218_v17, %v14126_v38 }
0x1190   : > { %v7268_v30 = vadd.f32 %v7267_v7, %v7219_v43 }
0x1192   : > { %v7292_v61 = vadd.f32 %v7268_v30, %v13399_v21 }
0x1194   : > { %7308 = vst [vmem:[%s14135_s7 + $0x50] sm:$0xff] %v7292_v61 }
0x1195   : > { %v7220_v18 = vpop.f32.mrf.mxu0  ;;  %v7269_v26 = vpop.f32.mrf.mxu1 }
0x1196   : > { %v7221_v1 = vadd.f32 %v7220_v18, %v14126_v38 }
0x1198   : > { %v7270_v5 = vadd.f32 %v7269_v26, %v7221_v1 }
0x119a   : > { %v7293_v13 = vadd.f32 %v7270_v5, %v13410_v12 }
0x119c   : > { %7309 = vst [vmem:[%s14135_s7 + $0x58] sm:$0xff] %v7293_v13 }
0x119d   : > { %v7223_v14 = vpop.f32.mrf.mxu0  ;;  %v7272_v50 = vpop.f32.mrf.mxu1 }
0x119e   : > { %v7224_v11 = vadd.f32 %v7223_v14, %v14126_v38 }
0x11a0   : > { %v7273_v35 = vadd.f32 %v7272_v50, %v7224_v11 }
0x11a2   : > { %v7294_v36 = vadd.f32 %v7273_v35, %v13417_v22 }
0x11a4   : > { %7310 = vst [vmem:[%s14135_s7 + $0x60] sm:$0xff] %v7294_v36 }
0x11a5   : > { %v7225_v21 = vpop.f32.mrf.mxu0  ;;  %v7274_v48 = vpop.f32.mrf.mxu1 }
0x11a6   : > { %v7226_v62 = vadd.f32 %v7225_v21, %v14126_v38 }
0x11a8   : > { %v7275_v4 = vadd.f32 %v7274_v48, %v7226_v62 }
0x11aa   : > { %v7295_v58 = vadd.f32 %v7275_v4, %v13428_v23 }
0x11ac   : > { %7311 = vst [vmem:[%s14135_s7 + $0x68] sm:$0xff] %v7295_v58 }
0x11d6   : > { %v7277_v12 = vpop.f32.mrf.mxu1 }
0x11db   : > { %v7228_v15 = vpop.f32.mrf.mxu2 }
0x11dc   : > { %v7229_v19 = vadd.f32 %v7228_v15, %v14126_v38 }
0x11de   : > { %v7278_v20 = vadd.f32 %v7277_v12, %v7229_v19  ;;  %v7279_v42 = vpop.f32.mrf.mxu1 }
0x11e0   : > { %v7296_v22 = vadd.f32 %v7278_v20, %v14466_v27 }
0x11e2   : > { %7312 = vst [vmem:[%s14135_s7 + $0x70] sm:$0xff] %v7296_v22 }
0x11e3   : > { %v7230_v3 = vpop.f32.mrf.mxu2 }
0x11e4   : > { %v7231_v23 = vadd.f32 %v7230_v3, %v14126_v38 }
0x11e6   : > { %v7280_v40 = vadd.f32 %v7279_v42, %v7231_v23 }
0x11e8   : > { %v7297_v46 = vadd.f32 %v7280_v40, %v14467_v16 }
0x11ea   : > { %7313 = vst [vmem:[%s14135_s7 + $0x78] sm:$0xff] %v7297_v46 }
0x11eb   : > { %9408 = shalt.err (!%p9405_p8)
}
0x11ec   : > { %s9474_s28 = smov 128   ;;  %s9475_s21 = smov 8  }
0x11ed   : > { %8165 = dma.vmem_to_hbm [thread:$0]  (%p9579_p5), %s7328_s15, 2048, %s7330_s29, %s7315_s25, %s9474_s28, %s9474_s28, %s9475_s21  }
0x11ee PF: > { %s14468_s14 = sld [smem:[#allocation19_spill]]  ;;  %p8202_p9 = scmp.ge.s32.totalorder %s9459_s24, 2 }
0x11f0   : > { %p8187_p10 = pnand %p8202_p9, %p9583_p6 }
0x11f2   : > { %p8188_p11 = pneg %p8187_p10 }
0x11f4   : > { %s7344_s27 = sand.u32 1, %s14468_s14  }
0x11f5   : > { %s7345_s2 = scalar_lea.sflag [#allocation4], %s7344_s27 }
0x11f6   : > { %9442 = dma.done.wait (%p8188_p11), %s7345_s2, 2048  }
0x11f7   : > { %9444 = vsyncadd (%p8188_p11), %s7345_s2, 4294965248  ;;  %s14470_s24 = sld [smem:[#allocation21_spill]]  ;;  %s14473_s21 = smov %s9451_s22 }
0x11f8   : > { %s14471_s3 = sld [smem:[#allocation20_spill]] }
0x11f9   : > { %s14472_s23 = sld [smem:[#allocation22_spill]] }
0x11fd   : > { %p26_p12 = scmp.ge.s32.totalorder %s14470_s24, 4  }
0x11fe   : > { %s14474_s22 = smov %s14471_s3 }
0x11ff   :  { %28 = sbr.rel (!%p26_p12) target bundleno = 11 (0xb), region = 131 }
0x1204   :  { %7351 = vsyncpa [#allocation3], 1 }
0x1205   :  { %7353 = vsyncpa [#allocation3 + $0x1], 1 }
0x1206   :  { %7354 = vsyncpa [#allocation6], 1 }
0x1207   :  { %7355 = vsyncpa [#allocation9], 1 }
0x1208   :  { %7356 = vsyncpa [#allocation12], 1 }
0x1209   :  { %7357 = vsyncpa [#allocation4], 1 }
0x120a   :  { %7359 = vsyncpa [#allocation4 + $0x1], 1 }

</bundles_post_ra>
